<compile_context>
chip_gen: v5e
topology: v5e:2x2
jax: 0.10.0
libtpu: 0.0.40
codegen_flags: <defaults>
</compile_context>

<pallas_src>
import functools

import jax
import jax.numpy as jnp
import numpy as np
from jax.experimental import pallas as pl
from jax.experimental.pallas import tpu as pltpu

DIM = 48                 # must be divisible by 6 (per-axis rotary) and num_heads
NUM_HEADS = 4
HEAD_DIM = DIM // NUM_HEADS
FFN_DIM = 4 * DIM
LN_EPS = 1e-5


def _round_up(x, n):
    return (x + n - 1) // n * n


# -------------------------- rotary embedding glue --------------------------- #
def point_rotary_cos_sin(xyz, dim):
    # TODO(synk): PointRotaryEmbedding source is not in the provided snippet; implemented
    # here as a standard per-axis (x, y, z) rotary embedding with dim//6 frequency bands.
    d_axis = dim // 3
    half = d_axis // 2
    freqs = 1.0 / (100.0 ** (jnp.arange(half, dtype=jnp.float32) / half))
    ang = xyz[..., :, None] * freqs                 # (..., 3, half)
    cos = jnp.repeat(jnp.cos(ang), 2, axis=-1).reshape(*xyz.shape[:-1], dim)
    sin = jnp.repeat(jnp.sin(ang), 2, axis=-1).reshape(*xyz.shape[:-1], dim)
    return cos, sin


def rotate_half_matrix(dim):
    # x @ R implements rot[2i] = -x[2i+1], rot[2i+1] = x[2i]  (pairwise rotate-half)
    R = np.zeros((dim, dim), dtype=np.float32)
    for i in range(dim // 2):
        R[2 * i + 1, 2 * i] = -1.0
        R[2 * i, 2 * i + 1] = 1.0
    return jnp.asarray(R)


def rotate_half_cols(w):
    # Exact (no matmul) equivalent of w @ rotate_half_matrix(dim):
    # out[:, 2i] = -w[:, 2i+1], out[:, 2i+1] = w[:, 2i]
    w2 = w.reshape(w.shape[0], -1, 2)
    return jnp.stack([-w2[..., 1], w2[..., 0]], axis=-1).reshape(w.shape)


def axis_freq_table(dim):
    # F[a, c] = frequency of channel c if channel c belongs to spatial axis a, else 0.
    # angle[n, c] = x*F[0,c] + y*F[1,c] + z*F[2,c] reproduces point_rotary_cos_sin exactly.
    d_axis = dim // 3
    half = d_axis // 2
    freqs = 1.0 / (100.0 ** (jnp.arange(half, dtype=jnp.float32) / half))
    per_axis = jnp.repeat(freqs, 2)                 # (d_axis,)
    F = jnp.zeros((3, dim), jnp.float32)
    for a in range(3):
        F = F.at[a, a * d_axis:(a + 1) * d_axis].set(per_axis)
    return F


def head_select_matrix(dim, heads, value):
    # (dim, heads) indicator: column h selects channels of head h (scaled by `value`).
    hd = dim // heads
    M = np.zeros((dim, heads), np.float32)
    for h in range(heads):
        M[h * hd:(h + 1) * hd, h] = value
    return jnp.asarray(M)


# -------------------------------- kernel ------------------------------------ #
def decoder_kernel(x_ref, xyz_ref, const_ref, hsq_ref,
                   wqq_ref, wkkv_ref, wo_ref, w1_ref, b1_ref, w2_ref,
                   out_ref, *, compute_dtype, approx_recip):
    N, S, C = x_ref.shape                      # (TG, seq_len, DIM)
    H = NUM_HEADS
    f32 = jnp.float32
    cd = compute_dtype

    # --- resident constants (f32): LN affines, biases, rotary freqs, head rows ---
    ln1g = const_ref[0:1, :]
    ln1b = const_ref[1:2, :]
    bo = const_ref[2:3, :]
    ln2g = const_ref[3:4, :]
    ln2b = const_ref[4:5, :]
    b2 = const_ref[5:6, :]
    fx = const_ref[6:7, :]
    fy = const_ref[7:8, :]
    fz = const_ref[8:9, :]
    hso = const_ref[9:9 + H, :].astype(cd)     # (H, C) 0/1 head indicator

    # --- rotary angle table, rebuilt in-kernel (exact; trig rides the EUP) ---
    xyzf = xyz_ref[...].astype(f32).reshape(N * S, 3)
    ang = xyzf[:, 0:1] * fx + xyzf[:, 1:2] * fy + xyzf[:, 2:3] * fz   # (N*S, C)
    cos = jnp.cos(ang)
    sin = jnp.sin(ang)

    # --- fused k / k@R / v projection over every token in the tile (one matmul) ---
    xfull = x_ref[...]
    xf = xfull.reshape(N * S, C).astype(cd)
    kkv = jnp.dot(xf, wkkv_ref[...], preferred_element_type=f32)      # (N*S, 3C)
    k = kkv[:, 0:C] * cos + kkv[:, C:2 * C] * sin                     # rotary-blended keys
    v = kkv[:, 2 * C:3 * C]

    # --- query path: only token 0 of each sequence is consumed downstream ---
    x0 = xfull[:, 0, :].astype(f32)                                   # (N, C)
    mu = jnp.mean(x0, axis=-1, keepdims=True)
    var = jnp.mean(jnp.square(x0 - mu), axis=-1, keepdims=True)
    xn0 = (x0 - mu) * jax.lax.rsqrt(var + LN_EPS) * ln1g + ln1b
    # wqq = 1/sqrt(head_dim) * [wq | wq@R]  (scale folded host-side)
    qq = jnp.dot(xn0.astype(cd), wqq_ref[...], preferred_element_type=f32)   # (N, 2C)
    cos3 = cos.reshape(N, S, C)
    sin3 = sin.reshape(N, S, C)
    q = qq[:, 0:C] * cos3[:, 0, :] + qq[:, C:2 * C] * sin3[:, 0, :]   # (N, C)

    # --- grouped-head block-diagonal attention (query = token 0) ---
    k3 = k.reshape(N, S, C)
    qk = q[:, None, :] * k3                                           # (N, S, C)
    s = jnp.dot(qk.reshape(N * S, C).astype(cd), hsq_ref[...],
                preferred_element_type=f32).reshape(N, S, H)          # per-head scores
    smax = jnp.max(s, axis=1, keepdims=True)                          # (N, 1, H)
    p = jnp.exp(s - smax)
    l = jnp.sum(p, axis=1, keepdims=True)                             # (N, 1, H), >= 1
    pn = p * pl.reciprocal(l, approx=approx_recip)                    # normalized probs
    pe = jnp.dot(pn.reshape(N * S, H).astype(cd), hso,
                 preferred_element_type=f32)                          # (N*S, C)
    o = jnp.sum((pe * v).reshape(N, S, C), axis=1)                    # (N, C)

    y = x0 + jnp.dot(o.astype(cd), wo_ref[...], preferred_element_type=f32) + bo

    # --- FFN: LayerNorm -> Linear(4C) -> ReLU -> Linear(C), residual ---
    mu2 = jnp.mean(y, axis=-1, keepdims=True)
    var2 = jnp.mean(jnp.square(y - mu2), axis=-1, keepdims=True)
    yn = (y - mu2) * jax.lax.rsqrt(var2 + LN_EPS) * ln2g + ln2b
    h1 = jnp.maximum(
        jnp.dot(yn.astype(cd), w1_ref[...], preferred_element_type=f32) + b1_ref[...], 0.0)
    y2 = jnp.dot(h1.astype(cd), w2_ref[...], preferred_element_type=f32) + b2

    out_ref[...] = (y + y2).astype(out_ref.dtype)


# ------------------------------- wrapper ------------------------------------ #
def decoder_transformer_forward(xyz_seq, x_seq, params, *, tile_g=1024,
                                input_dtype=jnp.bfloat16,
                                compute_dtype=jnp.bfloat16,
                                out_dtype=jnp.float32):
    """tile_g: sequences per grid step. input_dtype controls the streaming x DMA
    (bf16 default halves HBM bytes); compute_dtype is the MXU operand dtype
    (bf16 default; accumulation and all elementwise math stay f32). TG is
    chosen so the grid has >= 2 blocks when possible (v7x: 2 TensorCores)."""
    b, m, S, C = x_seq.shape
    assert C == DIM
    G = b * m
    TG = _round_up(min(int(tile_g), max((G + 1) // 2, 8)), 8)   # sublane-friendly, >=2 blocks
    Gp = _round_up(G, TG)

    xg = x_seq.reshape(G, S, C).astype(input_dtype)
    xyzg = xyz_seq.reshape(G, S, 3).astype(jnp.float32)
    if Gp != G:                            # pad with zero sequences (LN eps keeps them finite)
        xg = jnp.pad(xg, ((0, Gp - G), (0, 0), (0, 0)))
        xyzg = jnp.pad(xyzg, ((0, Gp - G), (0, 0), (0, 0)))

    f32 = jnp.float32
    row = lambda a: jnp.asarray(a, f32).reshape(1, -1)
    scale = 1.0 / float(np.sqrt(HEAD_DIM))

    # fused / folded weights (MXU operands in compute_dtype, f32 accumulation)
    wqq = (scale * jnp.concatenate(
        [params["wq"], rotate_half_cols(params["wq"])], axis=1)).astype(compute_dtype)
    wkkv = jnp.concatenate(
        [params["wk"], rotate_half_cols(params["wk"]), params["wv"]],
        axis=1).astype(compute_dtype)
    wo = params["wo"].astype(compute_dtype)
    w1 = params["w1"].astype(compute_dtype)
    w2 = params["w2"].astype(compute_dtype)
    b1 = row(params["b1"])
    hsq = head_select_matrix(C, NUM_HEADS, 1.0).astype(compute_dtype)   # (C, H) 0/1
    const = jnp.concatenate([
        row(params["ln1_g"]), row(params["ln1_b"]), row(params["bo"]),
        row(params["ln2_g"]), row(params["ln2_b"]), row(params["b2"]),
        axis_freq_table(C),                                             # (3, C)
        head_select_matrix(C, NUM_HEADS, 1.0).T,                        # (H, C)
    ], axis=0).astype(f32)                                              # (13, C)

    seq_spec = lambda w: pl.BlockSpec((TG, S, w), lambda g: (g, 0, 0))
    cst = lambda a: pl.BlockSpec(a.shape, lambda g: (0,) * a.ndim)      # resident (DMA'd once)

    kernel = functools.partial(
        decoder_kernel,
        compute_dtype=compute_dtype,
        approx_recip=bool(np.dtype(compute_dtype) != np.dtype(jnp.float32)))

    out = pl.pallas_call(
        kernel,
        out_shape=jax.ShapeDtypeStruct((Gp, C), out_dtype),
        grid=(Gp // TG,),
        in_specs=[
            seq_spec(C), seq_spec(3),                    # x, xyz (streaming)
            cst(const), cst(hsq),                        # packed constants, head-select (q)
            cst(wqq), cst(wkkv), cst(wo),                # fused q, fused k/kR/v, out proj
            cst(w1), cst(b1), cst(w2),                   # FFN
        ],
        out_specs=pl.BlockSpec((TG, C), lambda g: (g, 0)),
        compiler_params=pltpu.CompilerParams(
            dimension_semantics=("parallel",),
            vmem_limit_bytes=48 * 1024 * 1024),
    )(xg, xyzg, const, hsq, wqq, wkkv, wo, w1, b1, w2)
    return out[:G].reshape(b, m, C)


# --------------------------- deterministic params --------------------------- #
def init_params(key):
    ks = jax.random.split(key, 8)
    sd = 0.05
    return dict(
        ln1_g=jnp.ones((DIM,), jnp.float32),
        ln1_b=jnp.zeros((DIM,), jnp.float32),
        wq=sd * jax.random.normal(ks[0], (DIM, DIM), jnp.float32),
        wk=sd * jax.random.normal(ks[1], (DIM, DIM), jnp.float32),
        wv=sd * jax.random.normal(ks[2], (DIM, DIM), jnp.float32),
        wo=sd * jax.random.normal(ks[3], (DIM, DIM), jnp.float32),
        bo=sd * jax.random.normal(ks[4], (DIM,), jnp.float32),
        ln2_g=jnp.ones((DIM,), jnp.float32),
        ln2_b=jnp.zeros((DIM,), jnp.float32),
        w1=sd * jax.random.normal(ks[5], (DIM, FFN_DIM), jnp.float32),
        b1=sd * jax.random.normal(ks[6], (FFN_DIM,), jnp.float32),
        w2=sd * jax.random.normal(ks[7], (FFN_DIM, DIM), jnp.float32),
        b2=jnp.zeros((DIM,), jnp.float32),
        rot=rotate_half_matrix(DIM),
    )


# ---------------------------- pure-JAX reference ---------------------------- #
def reference_forward(xyz_seq, x_seq, p):
    b, m, S, C = x_seq.shape
    H, DH = NUM_HEADS, HEAD_DIM
    cos, sin = point_rotary_cos_sin(xyz_seq, C)

    def ln(x, g, bt):
        mu = x.mean(-1, keepdims=True)
        var = ((x - mu) ** 2).mean(-1, keepdims=True)
        return (x - mu) / jnp.sqrt(var + LN_EPS) * g + bt

    R = p["rot"]
    q = ln(x_seq, p["ln1_g"], p["ln1_b"]) @ p["wq"]
    k = x_seq @ p["wk"]
    v = x_seq @ p["wv"]
    q = q * cos + (q @ R) * sin
    k = k * cos + (k @ R) * sin
    qh = q.reshape(b, m, S, H, DH)
    kh = k.reshape(b, m, S, H, DH)
    vh = v.reshape(b, m, S, H, DH)
    s = jnp.einsum("bmqhd,bmkhd->bmhqk", qh, kh) / jnp.sqrt(DH)
    a = jax.nn.softmax(s, axis=-1)
    o = jnp.einsum("bmhqk,bmkhd->bmqhd", a, vh).reshape(b, m, S, C)
    out = x_seq[..., 0, :] + o[..., 0, :] @ p["wo"] + p["bo"]
    out = out + jax.nn.relu(ln(out, p["ln2_g"], p["ln2_b"]) @ p["w1"] + p["b1"]) @ p["w2"] + p["b2"]
    return out


if __name__ == "__main__":
    key = jax.random.PRNGKey(0)
    kxyz, kx, kp = jax.random.split(key, 3)
    b, m, S = 2, 12, 8                     # batch, num sequences, seq_len (= k+1)
    xyz_seq = jax.random.normal(kxyz, (b, m, S, 3), jnp.float32)
    x_seq = jax.random.normal(kx, (b, m, S, DIM), jnp.float32)
    params = init_params(kp)

    with jax.default_matmul_precision("float32"):
        ref = jax.block_until_ready(reference_forward(xyz_seq, x_seq, params))

    # Fast path (defaults): bf16 x input + bf16 MXU operands, f32 accumulation.
    # tile_g=16 so the demo exercises a multi-block grid and G-padding; leave the
    # default (1024) for real workloads.
    out_fast = jax.block_until_ready(
        decoder_transformer_forward(xyz_seq, x_seq, params, tile_g=16))
    assert out_fast.shape == (b, m, DIM)
    np.testing.assert_allclose(np.asarray(out_fast, np.float32), np.asarray(ref),
                               rtol=1e-2, atol=1e-2)

    # Exact path: f32 input, f32 MXU operands, exact reciprocal — tight tolerance.
    out_f32 = jax.block_until_ready(
        decoder_transformer_forward(xyz_seq, x_seq, params, tile_g=16,
                                    input_dtype=jnp.float32,
                                    compute_dtype=jnp.float32))
    np.testing.assert_allclose(np.asarray(out_f32), np.asarray(ref),
                               rtol=2e-3, atol=2e-3)

    print("KERNEL_OK")
</pallas_src>

<mosaic_0001>
module attributes {stable_mosaic.version = 11 : i64} {
  func.func @decoder_kernel(%arg0: i32, %arg1: memref<16x8x48xbf16, #tpu.memory_space<vmem>>, %arg2: memref<16x8x3xf32, #tpu.memory_space<vmem>>, %arg3: memref<13x48xf32, #tpu.memory_space<vmem>>, %arg4: memref<48x4xbf16, #tpu.memory_space<vmem>>, %arg5: memref<48x96xbf16, #tpu.memory_space<vmem>>, %arg6: memref<48x144xbf16, #tpu.memory_space<vmem>>, %arg7: memref<48x48xbf16, #tpu.memory_space<vmem>>, %arg8: memref<48x192xbf16, #tpu.memory_space<vmem>>, %arg9: memref<1x192xf32, #tpu.memory_space<vmem>>, %arg10: memref<192x48xbf16, #tpu.memory_space<vmem>>, %arg11: memref<16x48xf32, #tpu.memory_space<vmem>>) attributes {dimension_semantics = [#tpu.dimension_semantics<parallel>], iteration_bounds = array<i64: 2>, scalar_prefetch = 0 : i64, scratch_operands = 0 : i64, tpu.core_type = #tpu.core_type<tc>, window_params = [{transform_indices = @transform_0, window_bounds = array<i64: 16, 8, 48>}, {transform_indices = @transform_1, window_bounds = array<i64: 16, 8, 3>}, {pipeline_mode = #tpu.pipeline_mode<synchronous>, transform_indices = @transform_2, window_bounds = array<i64: 13, 48>}, {pipeline_mode = #tpu.pipeline_mode<synchronous>, transform_indices = @transform_3, window_bounds = array<i64: 48, 4>}, {pipeline_mode = #tpu.pipeline_mode<synchronous>, transform_indices = @transform_4, window_bounds = array<i64: 48, 96>}, {pipeline_mode = #tpu.pipeline_mode<synchronous>, transform_indices = @transform_5, window_bounds = array<i64: 48, 144>}, {pipeline_mode = #tpu.pipeline_mode<synchronous>, transform_indices = @transform_6, window_bounds = array<i64: 48, 48>}, {pipeline_mode = #tpu.pipeline_mode<synchronous>, transform_indices = @transform_7, window_bounds = array<i64: 48, 192>}, {pipeline_mode = #tpu.pipeline_mode<synchronous>, transform_indices = @transform_8, window_bounds = array<i64: 1, 192>}, {pipeline_mode = #tpu.pipeline_mode<synchronous>, transform_indices = @transform_9, window_bounds = array<i64: 192, 48>}, {transform_indices = @transform_10, window_bounds = array<i64: 16, 48>}]} {
    %c0 = arith.constant 0 : index
    %c0_0 = arith.constant 0 : index
    %0 = vector.load %arg3[%c0, %c0_0] : memref<13x48xf32, #tpu.memory_space<vmem>>, vector<1x48xf32>
    %c1 = arith.constant 1 : index
    %c0_1 = arith.constant 0 : index
    %1 = vector.load %arg3[%c1, %c0_1] : memref<13x48xf32, #tpu.memory_space<vmem>>, vector<1x48xf32>
    %c2 = arith.constant 2 : index
    %c0_2 = arith.constant 0 : index
    %2 = vector.load %arg3[%c2, %c0_2] : memref<13x48xf32, #tpu.memory_space<vmem>>, vector<1x48xf32>
    %c3 = arith.constant 3 : index
    %c0_3 = arith.constant 0 : index
    %3 = vector.load %arg3[%c3, %c0_3] : memref<13x48xf32, #tpu.memory_space<vmem>>, vector<1x48xf32>
    %c4 = arith.constant 4 : index
    %c0_4 = arith.constant 0 : index
    %4 = vector.load %arg3[%c4, %c0_4] : memref<13x48xf32, #tpu.memory_space<vmem>>, vector<1x48xf32>
    %c5 = arith.constant 5 : index
    %c0_5 = arith.constant 0 : index
    %5 = vector.load %arg3[%c5, %c0_5] : memref<13x48xf32, #tpu.memory_space<vmem>>, vector<1x48xf32>
    %c6 = arith.constant 6 : index
    %c0_6 = arith.constant 0 : index
    %6 = vector.load %arg3[%c6, %c0_6] : memref<13x48xf32, #tpu.memory_space<vmem>>, vector<1x48xf32>
    %c7 = arith.constant 7 : index
    %c0_7 = arith.constant 0 : index
    %7 = vector.load %arg3[%c7, %c0_7] : memref<13x48xf32, #tpu.memory_space<vmem>>, vector<1x48xf32>
    %c8 = arith.constant 8 : index
    %c0_8 = arith.constant 0 : index
    %8 = vector.load %arg3[%c8, %c0_8] : memref<13x48xf32, #tpu.memory_space<vmem>>, vector<1x48xf32>
    %c9 = arith.constant 9 : index
    %c0_9 = arith.constant 0 : index
    %9 = vector.load %arg3[%c9, %c0_9] : memref<13x48xf32, #tpu.memory_space<vmem>>, vector<4x48xf32>
    %10 = arith.truncf %9 : vector<4x48xf32> to vector<4x48xbf16>
    %c0_10 = arith.constant 0 : index
    %c0_11 = arith.constant 0 : index
    %c0_12 = arith.constant 0 : index
    %11 = vector.load %arg2[%c0_10, %c0_11, %c0_12] : memref<16x8x3xf32, #tpu.memory_space<vmem>>, vector<16x8x3xf32>
    %12 = vector.shape_cast %11 : vector<16x8x3xf32> to vector<128x3xf32>
    %13 = vector.extract_strided_slice %12 {offsets = [0, 0], sizes = [128, 1], strides = [1, 1]} : vector<128x3xf32> to vector<128x1xf32>
    %14 = vector.broadcast %13 : vector<128x1xf32> to vector<128x48xf32>
    %15 = vector.broadcast %6 : vector<1x48xf32> to vector<128x48xf32>
    %16 = arith.mulf %14, %15 : vector<128x48xf32>
    %17 = vector.extract_strided_slice %12 {offsets = [0, 1], sizes = [128, 1], strides = [1, 1]} : vector<128x3xf32> to vector<128x1xf32>
    %18 = vector.broadcast %17 : vector<128x1xf32> to vector<128x48xf32>
    %19 = vector.broadcast %7 : vector<1x48xf32> to vector<128x48xf32>
    %20 = arith.mulf %18, %19 : vector<128x48xf32>
    %21 = arith.addf %16, %20 : vector<128x48xf32>
    %22 = vector.extract_strided_slice %12 {offsets = [0, 2], sizes = [128, 1], strides = [1, 1]} : vector<128x3xf32> to vector<128x1xf32>
    %23 = vector.broadcast %22 : vector<128x1xf32> to vector<128x48xf32>
    %24 = vector.broadcast %8 : vector<1x48xf32> to vector<128x48xf32>
    %25 = arith.mulf %23, %24 : vector<128x48xf32>
    %26 = arith.addf %21, %25 : vector<128x48xf32>
    %27 = math.cos %26 : vector<128x48xf32>
    %28 = math.sin %26 : vector<128x48xf32>
    %c0_13 = arith.constant 0 : index
    %c0_14 = arith.constant 0 : index
    %c0_15 = arith.constant 0 : index
    %29 = vector.load %arg1[%c0_13, %c0_14, %c0_15] : memref<16x8x48xbf16, #tpu.memory_space<vmem>>, vector<16x8x48xbf16>
    %30 = vector.shape_cast %29 : vector<16x8x48xbf16> to vector<128x48xbf16>
    %c0_16 = arith.constant 0 : index
    %c0_17 = arith.constant 0 : index
    %31 = vector.load %arg6[%c0_16, %c0_17] : memref<48x144xbf16, #tpu.memory_space<vmem>>, vector<48x144xbf16>
    %cst = arith.constant dense<0.000000e+00> : vector<128x144xf32>
    %32 = tpu.matmul %30, %31, %cst {dimension_numbers = #tpu.dot_dimension_numbers<[1], [0], [0], [1], [0, 0, 1, 1], [], []>} : vector<128x48xbf16>, vector<48x144xbf16>, vector<128x144xf32> -> vector<128x144xf32>
    %33 = vector.extract_strided_slice %32 {offsets = [0, 0], sizes = [128, 48], strides = [1, 1]} : vector<128x144xf32> to vector<128x48xf32>
    %34 = arith.mulf %33, %27 : vector<128x48xf32>
    %35 = vector.extract_strided_slice %32 {offsets = [0, 48], sizes = [128, 48], strides = [1, 1]} : vector<128x144xf32> to vector<128x48xf32>
    %36 = arith.mulf %35, %28 : vector<128x48xf32>
    %37 = arith.addf %34, %36 : vector<128x48xf32>
    %38 = vector.extract_strided_slice %32 {offsets = [0, 96], sizes = [128, 48], strides = [1, 1]} : vector<128x144xf32> to vector<128x48xf32>
    %39 = vector.extract_strided_slice %29 {offsets = [0, 0, 0], sizes = [16, 1, 48], strides = [1, 1, 1]} : vector<16x8x48xbf16> to vector<16x1x48xbf16>
    %40 = vector.shape_cast %39 : vector<16x1x48xbf16> to vector<16x48xbf16>
    %41 = arith.extf %40 : vector<16x48xbf16> to vector<16x48xf32>
    %cst_18 = arith.constant dense<0.000000e+00> : vector<16xf32>
    %42 = vector.multi_reduction <add>, %41, %cst_18 [1] : vector<16x48xf32> to vector<16xf32>
    %43 = vector.shape_cast %42 : vector<16xf32> to vector<16x1xf32>
    %cst_19 = arith.constant 4.800000e+01 : f32
    %44 = vector.broadcast %cst_19 : f32 to vector<16x1xf32>
    %45 = arith.divf %43, %44 : vector<16x1xf32>
    %46 = vector.broadcast %45 : vector<16x1xf32> to vector<16x48xf32>
    %47 = arith.subf %41, %46 : vector<16x48xf32>
    %48 = arith.mulf %47, %47 : vector<16x48xf32>
    %cst_20 = arith.constant dense<0.000000e+00> : vector<16xf32>
    %49 = vector.multi_reduction <add>, %48, %cst_20 [1] : vector<16x48xf32> to vector<16xf32>
    %50 = vector.shape_cast %49 : vector<16xf32> to vector<16x1xf32>
    %cst_21 = arith.constant 4.800000e+01 : f32
    %51 = vector.broadcast %cst_21 : f32 to vector<16x1xf32>
    %52 = arith.divf %50, %51 : vector<16x1xf32>
    %53 = vector.broadcast %45 : vector<16x1xf32> to vector<16x48xf32>
    %54 = arith.subf %41, %53 : vector<16x48xf32>
    %cst_22 = arith.constant 9.99999974E-6 : f32
    %55 = vector.broadcast %cst_22 : f32 to vector<16x1xf32>
    %56 = arith.addf %52, %55 : vector<16x1xf32>
    %57 = math.rsqrt %56 : vector<16x1xf32>
    %58 = vector.broadcast %57 : vector<16x1xf32> to vector<16x48xf32>
    %59 = arith.mulf %54, %58 : vector<16x48xf32>
    %60 = vector.broadcast %0 : vector<1x48xf32> to vector<16x48xf32>
    %61 = arith.mulf %59, %60 : vector<16x48xf32>
    %62 = vector.broadcast %1 : vector<1x48xf32> to vector<16x48xf32>
    %63 = arith.addf %61, %62 : vector<16x48xf32>
    %64 = arith.truncf %63 : vector<16x48xf32> to vector<16x48xbf16>
    %c0_23 = arith.constant 0 : index
    %c0_24 = arith.constant 0 : index
    %65 = vector.load %arg5[%c0_23, %c0_24] : memref<48x96xbf16, #tpu.memory_space<vmem>>, vector<48x96xbf16>
    %cst_25 = arith.constant dense<0.000000e+00> : vector<16x96xf32>
    %66 = tpu.matmul %64, %65, %cst_25 {dimension_numbers = #tpu.dot_dimension_numbers<[1], [0], [0], [1], [0, 0, 1, 1], [], []>} : vector<16x48xbf16>, vector<48x96xbf16>, vector<16x96xf32> -> vector<16x96xf32>
    %67 = vector.shape_cast %27 : vector<128x48xf32> to vector<16x8x48xf32>
    %68 = vector.shape_cast %28 : vector<128x48xf32> to vector<16x8x48xf32>
    %69 = vector.extract_strided_slice %66 {offsets = [0, 0], sizes = [16, 48], strides = [1, 1]} : vector<16x96xf32> to vector<16x48xf32>
    %70 = vector.extract_strided_slice %67 {offsets = [0, 0, 0], sizes = [16, 1, 48], strides = [1, 1, 1]} : vector<16x8x48xf32> to vector<16x1x48xf32>
    %71 = vector.shape_cast %70 : vector<16x1x48xf32> to vector<16x48xf32>
    %72 = arith.mulf %69, %71 : vector<16x48xf32>
    %73 = vector.extract_strided_slice %66 {offsets = [0, 48], sizes = [16, 48], strides = [1, 1]} : vector<16x96xf32> to vector<16x48xf32>
    %74 = vector.extract_strided_slice %68 {offsets = [0, 0, 0], sizes = [16, 1, 48], strides = [1, 1, 1]} : vector<16x8x48xf32> to vector<16x1x48xf32>
    %75 = vector.shape_cast %74 : vector<16x1x48xf32> to vector<16x48xf32>
    %76 = arith.mulf %73, %75 : vector<16x48xf32>
    %77 = arith.addf %72, %76 : vector<16x48xf32>
    %78 = vector.shape_cast %37 : vector<128x48xf32> to vector<16x8x48xf32>
    %79 = vector.shape_cast %77 : vector<16x48xf32> to vector<16x1x48xf32>
    %80 = vector.broadcast %79 : vector<16x1x48xf32> to vector<16x8x48xf32>
    %81 = arith.mulf %80, %78 : vector<16x8x48xf32>
    %82 = vector.shape_cast %81 : vector<16x8x48xf32> to vector<128x48xf32>
    %83 = arith.truncf %82 : vector<128x48xf32> to vector<128x48xbf16>
    %c0_26 = arith.constant 0 : index
    %c0_27 = arith.constant 0 : index
    %84 = vector.load %arg4[%c0_26, %c0_27] : memref<48x4xbf16, #tpu.memory_space<vmem>>, vector<48x4xbf16>
    %cst_28 = arith.constant dense<0.000000e+00> : vector<128x4xf32>
    %85 = tpu.matmul %83, %84, %cst_28 {dimension_numbers = #tpu.dot_dimension_numbers<[1], [0], [0], [1], [0, 0, 1, 1], [], []>} : vector<128x48xbf16>, vector<48x4xbf16>, vector<128x4xf32> -> vector<128x4xf32>
    %86 = vector.shape_cast %85 : vector<128x4xf32> to vector<16x8x4xf32>
    %cst_29 = arith.constant dense<0xFF800000> : vector<16x4xf32>
    %87 = vector.multi_reduction <maximumf>, %86, %cst_29 [1] : vector<16x8x4xf32> to vector<16x4xf32>
    %88 = vector.shape_cast %87 : vector<16x4xf32> to vector<16x1x4xf32>
    %89 = vector.broadcast %88 : vector<16x1x4xf32> to vector<16x8x4xf32>
    %90 = arith.subf %86, %89 : vector<16x8x4xf32>
    %91 = math.exp %90 : vector<16x8x4xf32>
    %cst_30 = arith.constant dense<0.000000e+00> : vector<16x4xf32>
    %92 = vector.multi_reduction <add>, %91, %cst_30 [1] : vector<16x8x4xf32> to vector<16x4xf32>
    %93 = vector.shape_cast %92 : vector<16x4xf32> to vector<16x1x4xf32>
    %94 = tpu.reciprocal %93 {approx = true} : vector<16x1x4xf32> -> vector<16x1x4xf32>
    %95 = vector.broadcast %94 : vector<16x1x4xf32> to vector<16x8x4xf32>
    %96 = arith.mulf %91, %95 : vector<16x8x4xf32>
    %97 = vector.shape_cast %96 : vector<16x8x4xf32> to vector<128x4xf32>
    %98 = arith.truncf %97 : vector<128x4xf32> to vector<128x4xbf16>
    %cst_31 = arith.constant dense<0.000000e+00> : vector<128x48xf32>
    %99 = tpu.matmul %98, %10, %cst_31 {dimension_numbers = #tpu.dot_dimension_numbers<[1], [0], [0], [1], [0, 0, 1, 1], [], []>} : vector<128x4xbf16>, vector<4x48xbf16>, vector<128x48xf32> -> vector<128x48xf32>
    %100 = arith.mulf %99, %38 : vector<128x48xf32>
    %101 = vector.shape_cast %100 : vector<128x48xf32> to vector<16x8x48xf32>
    %cst_32 = arith.constant dense<0.000000e+00> : vector<16x48xf32>
    %102 = vector.multi_reduction <add>, %101, %cst_32 [1] : vector<16x8x48xf32> to vector<16x48xf32>
    %103 = arith.truncf %102 : vector<16x48xf32> to vector<16x48xbf16>
    %c0_33 = arith.constant 0 : index
    %c0_34 = arith.constant 0 : index
    %104 = vector.load %arg7[%c0_33, %c0_34] : memref<48x48xbf16, #tpu.memory_space<vmem>>, vector<48x48xbf16>
    %cst_35 = arith.constant dense<0.000000e+00> : vector<16x48xf32>
    %105 = tpu.matmul %103, %104, %cst_35 {dimension_numbers = #tpu.dot_dimension_numbers<[1], [0], [0], [1], [0, 0, 1, 1], [], []>} : vector<16x48xbf16>, vector<48x48xbf16>, vector<16x48xf32> -> vector<16x48xf32>
    %106 = arith.addf %41, %105 : vector<16x48xf32>
    %107 = vector.broadcast %2 : vector<1x48xf32> to vector<16x48xf32>
    %108 = arith.addf %106, %107 : vector<16x48xf32>
    %cst_36 = arith.constant dense<0.000000e+00> : vector<16xf32>
    %109 = vector.multi_reduction <add>, %108, %cst_36 [1] : vector<16x48xf32> to vector<16xf32>
    %110 = vector.shape_cast %109 : vector<16xf32> to vector<16x1xf32>
    %cst_37 = arith.constant 4.800000e+01 : f32
    %111 = vector.broadcast %cst_37 : f32 to vector<16x1xf32>
    %112 = arith.divf %110, %111 : vector<16x1xf32>
    %113 = vector.broadcast %112 : vector<16x1xf32> to vector<16x48xf32>
    %114 = arith.subf %108, %113 : vector<16x48xf32>
    %115 = arith.mulf %114, %114 : vector<16x48xf32>
    %cst_38 = arith.constant dense<0.000000e+00> : vector<16xf32>
    %116 = vector.multi_reduction <add>, %115, %cst_38 [1] : vector<16x48xf32> to vector<16xf32>
    %117 = vector.shape_cast %116 : vector<16xf32> to vector<16x1xf32>
    %cst_39 = arith.constant 4.800000e+01 : f32
    %118 = vector.broadcast %cst_39 : f32 to vector<16x1xf32>
    %119 = arith.divf %117, %118 : vector<16x1xf32>
    %120 = vector.broadcast %112 : vector<16x1xf32> to vector<16x48xf32>
    %121 = arith.subf %108, %120 : vector<16x48xf32>
    %cst_40 = arith.constant 9.99999974E-6 : f32
    %122 = vector.broadcast %cst_40 : f32 to vector<16x1xf32>
    %123 = arith.addf %119, %122 : vector<16x1xf32>
    %124 = math.rsqrt %123 : vector<16x1xf32>
    %125 = vector.broadcast %124 : vector<16x1xf32> to vector<16x48xf32>
    %126 = arith.mulf %121, %125 : vector<16x48xf32>
    %127 = vector.broadcast %3 : vector<1x48xf32> to vector<16x48xf32>
    %128 = arith.mulf %126, %127 : vector<16x48xf32>
    %129 = vector.broadcast %4 : vector<1x48xf32> to vector<16x48xf32>
    %130 = arith.addf %128, %129 : vector<16x48xf32>
    %131 = arith.truncf %130 : vector<16x48xf32> to vector<16x48xbf16>
    %c0_41 = arith.constant 0 : index
    %c0_42 = arith.constant 0 : index
    %132 = vector.load %arg8[%c0_41, %c0_42] : memref<48x192xbf16, #tpu.memory_space<vmem>>, vector<48x192xbf16>
    %cst_43 = arith.constant dense<0.000000e+00> : vector<16x192xf32>
    %133 = tpu.matmul %131, %132, %cst_43 {dimension_numbers = #tpu.dot_dimension_numbers<[1], [0], [0], [1], [0, 0, 1, 1], [], []>} : vector<16x48xbf16>, vector<48x192xbf16>, vector<16x192xf32> -> vector<16x192xf32>
    %c0_44 = arith.constant 0 : index
    %c0_45 = arith.constant 0 : index
    %134 = vector.load %arg9[%c0_44, %c0_45] : memref<1x192xf32, #tpu.memory_space<vmem>>, vector<1x192xf32>
    %135 = vector.broadcast %134 : vector<1x192xf32> to vector<16x192xf32>
    %136 = arith.addf %133, %135 : vector<16x192xf32>
    %cst_46 = arith.constant 0.000000e+00 : f32
    %137 = vector.broadcast %cst_46 : f32 to vector<16x192xf32>
    %138 = arith.maximumf %136, %137 : vector<16x192xf32>
    %139 = arith.truncf %138 : vector<16x192xf32> to vector<16x192xbf16>
    %c0_47 = arith.constant 0 : index
    %c0_48 = arith.constant 0 : index
    %140 = vector.load %arg10[%c0_47, %c0_48] : memref<192x48xbf16, #tpu.memory_space<vmem>>, vector<192x48xbf16>
    %cst_49 = arith.constant dense<0.000000e+00> : vector<16x48xf32>
    %141 = tpu.matmul %139, %140, %cst_49 {dimension_numbers = #tpu.dot_dimension_numbers<[1], [0], [0], [1], [0, 0, 1, 1], [], []>} : vector<16x192xbf16>, vector<192x48xbf16>, vector<16x48xf32> -> vector<16x48xf32>
    %142 = vector.broadcast %5 : vector<1x48xf32> to vector<16x48xf32>
    %143 = arith.addf %141, %142 : vector<16x48xf32>
    %144 = arith.addf %108, %143 : vector<16x48xf32>
    %c0_50 = arith.constant 0 : index
    %c0_51 = arith.constant 0 : index
    %145 = vector.load %arg11[%c0_50, %c0_51] : memref<16x48xf32, #tpu.memory_space<vmem>>, vector<16x48xf32>
    tpu.vector_store %arg11[%c0_50, %c0_51], %144 {strides = array<i32>} : memref<16x48xf32, #tpu.memory_space<vmem>>, vector<16x48xf32>,
    return
  }
  func.func @transform_0(%arg0: i32) -> (i32, i32, i32) {
    %c0_i32 = arith.constant 0 : i32
    %c0_i32_0 = arith.constant 0 : i32
    %c0_i32_1 = arith.constant 0 : i32
    return %arg0, %c0_i32, %c0_i32_0 : i32, i32, i32
  }
  func.func @transform_1(%arg0: i32) -> (i32, i32, i32) {
    %c0_i32 = arith.constant 0 : i32
    %c0_i32_0 = arith.constant 0 : i32
    %c0_i32_1 = arith.constant 0 : i32
    return %arg0, %c0_i32, %c0_i32_0 : i32, i32, i32
  }
  func.func @transform_2(%arg0: i32) -> (i32, i32) {
    %c0_i32 = arith.constant 0 : i32
    %c0_i32_0 = arith.constant 0 : i32
    %c0_i32_1 = arith.constant 0 : i32
    return %c0_i32, %c0_i32_0 : i32, i32
  }
  func.func @transform_3(%arg0: i32) -> (i32, i32) {
    %c0_i32 = arith.constant 0 : i32
    %c0_i32_0 = arith.constant 0 : i32
    %c0_i32_1 = arith.constant 0 : i32
    return %c0_i32, %c0_i32_0 : i32, i32
  }
  func.func @transform_4(%arg0: i32) -> (i32, i32) {
    %c0_i32 = arith.constant 0 : i32
    %c0_i32_0 = arith.constant 0 : i32
    %c0_i32_1 = arith.constant 0 : i32
    return %c0_i32, %c0_i32_0 : i32, i32
  }
  func.func @transform_5(%arg0: i32) -> (i32, i32) {
    %c0_i32 = arith.constant 0 : i32
    %c0_i32_0 = arith.constant 0 : i32
    %c0_i32_1 = arith.constant 0 : i32
    return %c0_i32, %c0_i32_0 : i32, i32
  }
  func.func @transform_6(%arg0: i32) -> (i32, i32) {
    %c0_i32 = arith.constant 0 : i32
    %c0_i32_0 = arith.constant 0 : i32
    %c0_i32_1 = arith.constant 0 : i32
    return %c0_i32, %c0_i32_0 : i32, i32
  }
  func.func @transform_7(%arg0: i32) -> (i32, i32) {
    %c0_i32 = arith.constant 0 : i32
    %c0_i32_0 = arith.constant 0 : i32
    %c0_i32_1 = arith.constant 0 : i32
    return %c0_i32, %c0_i32_0 : i32, i32
  }
  func.func @transform_8(%arg0: i32) -> (i32, i32) {
    %c0_i32 = arith.constant 0 : i32
    %c0_i32_0 = arith.constant 0 : i32
    %c0_i32_1 = arith.constant 0 : i32
    return %c0_i32, %c0_i32_0 : i32, i32
  }
  func.func @transform_9(%arg0: i32) -> (i32, i32) {
    %c0_i32 = arith.constant 0 : i32
    %c0_i32_0 = arith.constant 0 : i32
    %c0_i32_1 = arith.constant 0 : i32
    return %c0_i32, %c0_i32_0 : i32, i32
  }
  func.func @transform_10(%arg0: i32) -> (i32, i32) {
    %c0_i32 = arith.constant 0 : i32
    %c0_i32_0 = arith.constant 0 : i32
    return %arg0, %c0_i32 : i32, i32
  }
}

</mosaic_0001>

<bundles_post_ra>
// kernel: tpu_custom_call.1
= control target key start
LH: loop header
LB: loop body
LE: loop exit
PB: predicated region body
PF: predicated region fallthrough
CT: control target
= control target key end

     0   :  { %15 = vsyncpa [#allocation3], 0  ;;  %s13418_s0 = inlined_call_operand.vmem [shape: bf16[32,8,48], index: 0, kind: input, shape index: {}]   ;;  %s13419_s1 = inlined_call_operand.vmem [shape: f32[32,8,3], index: 1, kind: input, shape index: {}]   ;;  %s13420_s2 = inlined_call_operand.vmem [shape: f32[13,48], index: 2, kind: input, shape index: {}]   ;;  %s13421_s3 = inlined_call_operand.vmem [shape: bf16[48,4], index: 3, kind: input, shape index: {}]   ;;  %s13422_s4 = inlined_call_operand.vmem [shape: bf16[48,96], index: 4, kind: input, shape index: {}]   ;;  %s13423_s5 = inlined_call_operand.vmem [shape: bf16[48,144], index: 5, kind: input, shape index: {}]   ;;  %s13424_s6 = inlined_call_operand.vmem [shape: bf16[48,48], index: 6, kind: input, shape index: {}]   ;;  %s13425_s7 = inlined_call_operand.vmem [shape: bf16[48,192], index: 7, kind: input, shape index: {}]   ;;  %s13426_s8 = inlined_call_operand.vmem [shape: f32[1,192], index: 8, kind: input, shape index: {}]   ;;  %s13427_s9 = inlined_call_operand.vmem [shape: bf16[192,48], index: 9, kind: input, shape index: {}]   ;;  %s13428_s10 = inlined_call_operand.hbm [shape: f32[32,48], index: 10, kind: output, shape index: {}]  }
   0x1   :  { %17 = vsyncpa [#allocation3 + $0x1], 0  ;;  %s8964_s13 = smov 0   ;;  %s8966_s14 = smov 0  }
   0x2   :  { %s8968_s15 = smov 0   ;;  %s8970_s16 = smov 0  }
   0x3 LB: > { %s8286_s17 = sadd.s32 4294967295, %s8892_s16   ;;  %s8287_s18 = sadd.s32 4294967294, %s8892_s16   ;;  %s8892_s16 = sphi %s8970_s16, %s14171_s16   ;;  %s8888_s15 = sphi %s8968_s15, %s14170_s15   ;;  %s8884_s14 = sphi %s8966_s14, %s14169_s14   ;;  %s8880_s13 = sphi %s8964_s13, %s14168_s13  }
   0x4   : > { %s8987_s19 = sadd.s32 1, %s8892_s16   ;;  %s250_s20 = sadd.s32 1, %s8888_s15 }
   0x5   : > { %s247_s21 = ssub.s32 %s8892_s16, %s8987_s19  ;;  %p260_p0 = scmp.ne.s32.totalorder %s8888_s15, %s8884_s14 }
   0x6   : > { %p248_p1 = scmp.eq.s32.totalorder %s247_s21, 0  ;;  %p261_p2 = scmp.eq.s32.totalorder %s8286_s17, 1 }
   0x7   : > { %p266_p3 = scmp.ne.s32.totalorder %s8884_s14, %s8880_s13  ;;  %p267_p4 = scmp.eq.s32.totalorder %s8287_s18, 1 }
   0x8   : > { %s8997_s22 = scalar_select %p248_p1, %s8888_s15, %s250_s20  }
   0x9   : > { %p8999_p5 = por %p261_p2, %p260_p0  ;;  %p9003_p6 = por %p267_p4, %p266_p3 }
   0xa   : > { %p8290_p7 = scmp.ge.s32.totalorder %s8892_s16, 1  ;;  %p327_p8 = scmp.lt.s32.totalorder %s8892_s16, 3 }
   0xc   : > { %p328_p9 = pnand %p8290_p7, %p327_p8 }
   0xe   : > { %331 = sbr.rel (%p328_p9) target bundleno = 2361 (0x939), region = 60 }
  0x13   : > { %s9009_s25 = sshll.u32 %s8286_s17, 4  ;;  %v13436_v0 = vmov 1   ;;  %v13438_v1 = vmov 0   ;;  %vm13547_vm0 = vcmask 1041409   ;;  %vm13546_vm1 = vcmask 1042434   ;;  %s8904_s29 = smov 48  }
  0x14   : > { %8697 = vset.pattern.permute.xlu1 %v13436_v0  ;;  %8694 = vset.pattern.permute.xlu2 %v13438_v1  ;;  %p371_p10 = scmp.lt.s32.totalorder %s9009_s25, 31  ;;  %vm13545_vm2 = vcmask 1043459   ;;  %vm13501_vm3 = vcmask 1044484   ;;  %vm13500_vm4 = vcmask 1045509   ;;  %vm13499_vm5 = vcmask 1046534   ;;  %s8209_s12 = scalar_lea.hbm %s13428_s10, %s9009_s25 }
  0x15   : > { %8696 = vset.pattern.permute.xlu0 %v13438_v1  ;;  %vm13479_vm6 = vcmask 1047559   ;;  %v13448_v42 = vmov 2   ;;  %vm13544_vm7 = vcmask 392192   ;;  %v8442_v63 = vld [vmem:[%s13423_s5 + $0x20] sm:$0xf]  ;;  %s13379_s20 = sshll.u32 %s8209_s12, 4  ;;  %s8213_s20 = int_to_ptr.hbm [resolvable:$true] %s13379_s20 }
  0x16   : > { %s372_s26 = scalar_select %p371_p10, %s9009_s25, 31 }
  0x18   : > { %s8295_s27 = sshll.u32 %s372_s26, 3  ;;  %s8293_s28 = sshll.u32 %s372_s26, 2 }
  0x19   : > { %s9019_s11 = scalar_lea.vmem %s13419_s1, %s8295_s27  ;;  %s9024_s18 = scalar_lea.vmem %s13418_s0, %s8293_s28 }
  0x1a   : > { %v9027_v2 = vld [vmem:[%s9019_s11 + $0x10] sm:$0xff]  ;;  %v396_v3 = vld [vmem:[%s9019_s11 + $0x8] sm:$0xff]  ;;  %v5646_v4 = vld [vmem:[%s9024_s18] sm:$0xff]   ;;  %s8844_s26 = sshra.s32 %s8213_s20, 4  ;;  %s8850_s28 = scalar_lea.hbm %s13428_s10, 32  ;;  %s8845_s26 = int_to_ptr.hbm [resolvable:$true] %s8844_s26 }
  0x1b   : > { %517 = vperm.xlu1 %8697, %v9027_v2   ;;  %418 = vperm.xlu2 %8694, %v396_v3   ;;  %v5648_v5 = vld [vmem:[%s9024_s18 + $0x8] sm:$0xff]   ;;  %v5650_v6 = vld [vmem:[%s9024_s18 + $0x10] sm:$0xff]   ;;  %v5652_v7 = vld [vmem:[%s9024_s18 + $0x18] sm:$0xff]   ;;  %v9035_v8 = vunpack.c.l.bf16 %v5646_v4  ;;  %v9037_v9 = vunpack.c.h.bf16 %v5646_v4  ;;  %s8846_s27 = scalar_lea.hbm %s8845_s26, 16  ;;  %p8851_p0 = scmp.lt.s32.totalorder %s8845_s26, %s13428_s10 }
  0x1c   : > { %v9039_v10 = vunpack.c.l.bf16 %v5648_v5  ;;  %v9041_v11 = vunpack.c.h.bf16 %v5648_v5  ;;  %v9043_v12 = vunpack.c.l.bf16 %v5650_v6  ;;  %v9045_v13 = vunpack.c.h.bf16 %v5650_v6  ;;  %v5654_v14 = vld [vmem:[%s9024_s18 + $0x20] sm:$0xff]   ;;  %v5656_v18 = vld [vmem:[%s9024_s18 + $0x28] sm:$0xff]   ;;  %v5658_v19 = vld [vmem:[%s9024_s18 + $0x30] sm:$0xff]   ;;  %p8847_p11 = scmp.ne.s32.totalorder %s8845_s26, %s8846_s27  ;;  %p8852_p1 = scmp.lt.s32.totalorder %s8850_s28, %s8846_s27 }
  0x1d   : > { %13652 = vst [vmem:[#allocation5_spill] sm:$0xff] %v9035_v8  ;;  %v9048_v15 = vunpack.c.l.bf16 %v5652_v7  ;;  %v9050_v16 = vunpack.c.h.bf16 %v5652_v7  ;;  %v6069_v17 = vrot.slane %v9037_v9, 7  ;;  %v9055_v20 = vunpack.c.l.bf16 %v5654_v14  ;;  %v5660_v25 = vld [vmem:[%s9024_s18 + $0x38] sm:$0xff]   ;;  %v399_v57 = vld [vmem:[%s9019_s11 + $0x20] sm:$0xff]  ;;  %v400_v61 = vld [vmem:[%s9019_s11 + $0x28] sm:$0xff] }
  0x1e   : > { %13653 = vst [vmem:[#allocation6_spill] sm:$0xff] %v9037_v9  ;;  %v6072_v21 = vrot.slane %v9039_v10, 6  ;;  %v6075_v22 = vrot.slane %v9041_v11, 5  ;;  %v6078_v23 = vrot.slane %v9043_v12, 4  ;;  %v6081_v24 = vrot.slane %v9045_v13, 3  ;;  %v395_v58 = vld [vmem:[%s9019_s11] sm:$0xff]  ;;  %p8848_p12 = pnand %p8847_p11, %p8999_p5  ;;  %p8853_p2 = por %p8852_p1, %p8851_p0 }
  0x1f   : > { %13654 = vst [vmem:[#allocation7_spill] sm:$0xff] %v9039_v10  ;;  %v6071_v26 = vsel %vm13547_vm0, %v6069_v17, %v9035_v8  ;;  %v6084_v27 = vrot.slane %v9048_v15, 2  ;;  %v6087_v28 = vrot.slane %v9050_v16, 1  ;;  %v9066_v29 = vunpack.c.h.bf16 %v5654_v14  ;;  %v398_v62 = vld [vmem:[%s9019_s11 + $0x18] sm:$0xff]  ;;  %v401_v4 = vld [vmem:[%s9019_s11 + $0x30] sm:$0xff] }
  0x20   : > { %13655 = vst [vmem:[#allocation8_spill] sm:$0xff] %v9041_v11  ;;  %v6074_v30 = vsel %vm13546_vm1, %v6072_v21, %v6071_v26  ;;  %v9069_v31 = vunpack.c.l.bf16 %v5656_v18  ;;  %v9071_v32 = vunpack.c.h.bf16 %v5656_v18  ;;  %v9073_v33 = vunpack.c.l.bf16 %v5658_v19  ;;  %v8434_v6 = vld [vmem:[%s13423_s5 + $0x10] sm:$0xf]  ;;  %v8609_v7 = vld [vmem:[%s13423_s5 + $0x14] sm:$0xf0]  ;;  %v9155_v26 = vld [vmem:[%s9019_s11 + $0x68] sm:$0xff]  ;;  %p8849_p13 = pneg %p8848_p12 }
  0x21   : > { %13656 = vst [vmem:[#allocation9_spill] sm:$0xff] %v9043_v12  ;;  %v6077_v34 = vsel %vm13545_vm2, %v6075_v22, %v6074_v30  ;;  %v9076_v35 = vunpack.c.h.bf16 %v5658_v19  ;;  %v9078_v36 = vunpack.c.l.bf16 %v5660_v25  ;;  %v9080_v37 = vunpack.c.h.bf16 %v5660_v25  ;;  %v402_v14 = vld [vmem:[%s9019_s11 + $0x38] sm:$0xff]  ;;  %v8426_v18 = vld [vmem:[%s13423_s5] sm:$0xf]  ;;  %v8607_v19 = vld [vmem:[%s13423_s5 + $0x4] sm:$0xf0] }
  0x22   : > { %13657 = vst [vmem:[#allocation10_spill] sm:$0xff] %v9045_v13  ;;  %v6080_v38 = vsel %vm13501_vm3, %v6078_v23, %v6077_v34  ;;  %v6090_v39 = vrot.slane %v9066_v29, 7  ;;  %v6092_v40 = vrot.slane %v9069_v31, 6  ;;  %v6094_v41 = vrot.slane %v9071_v32, 5  ;;  %v8598_v22 = vld [vmem:[%s9024_s18] sm:$0xff]  ;;  %v404_v23 = vld [vmem:[%s9019_s11 + $0x48] sm:$0xff]  ;;  %p8854_p3 = pnand %p8853_p2, %p8849_p13 }
  0x23   : > { %13658 = vst [vmem:[#allocation11_spill] sm:$0xff] %v9048_v15  ;;  %8700 = vset.pattern.permute.xlu1 %v13448_v42  ;;  %8695 = vset.pattern.permute.xlu2 %v13436_v0  ;;  %v6083_v43 = vsel %vm13500_vm4, %v6081_v24, %v6080_v38  ;;  %v6096_v44 = vrot.slane %v9073_v33, 4  ;;  %v6098_v47 = vrot.slane %v9076_v35, 3  ;;  %v6100_v50 = vrot.slane %v9078_v36, 2  ;;  %v9149_v24 = vld [vmem:[%s9019_s11 + $0x50] sm:$0xff] }
  0x24   : > { %13659 = vst [vmem:[#allocation12_spill] sm:$0xff] %v9050_v16  ;;  %610 = vperm.xlu1 %8700, %v396_v3   ;;  %513 = vperm.xlu2 %8695, %v396_v3   ;;  %v6086_v45 = vsel %vm13499_vm5, %v6084_v27, %v6083_v43  ;;  %v6091_v46 = vsel %vm13547_vm0, %v6090_v39, %v9055_v20  ;;  %v6102_v53 = vrot.slane %v9080_v37, 1  ;;  %v8611_v3 = vld [vmem:[%s13423_s5 + $0x24] sm:$0xf0]  ;;  %v9160_v27 = vld [vmem:[%s13420_s2 + $0x6] ss:$0 sm:$0xff] }
  0x25   : > { %13660 = vst [vmem:[#allocation13_spill] sm:$0xff] %v9055_v20  ;;  %v6089_v48 = vsel %vm13479_vm6, %v6087_v28, %v6086_v45  ;;  %v6093_v49 = vsel %vm13546_vm1, %v6092_v40, %v6091_v46  ;;  %v8443_v5 = vor.u32 %v8611_v3, %v8442_v63  ;;  %v8435_v17 = vor.u32 %v8609_v7, %v8434_v6  ;;  %v9167_v28 = vld [vmem:[%s13420_s2 + $0x7] ss:$0 sm:$0xff]  ;;  %v8600_v38 = vld [vmem:[%s9024_s18 + $0x10] sm:$0xff] }
  0x26   : > { %13661 = vst [vmem:[#allocation14_spill] sm:$0xff] %v9066_v29  ;;  %v6106_v51 = vsel %vm13544_vm7, %v6089_v48, 0.0  ;;  %v6095_v52 = vsel %vm13545_vm2, %v6094_v41, %v6093_v49  ;;  %v8427_v21 = vor.u32 %v8607_v19, %v8426_v18  ;;  %v9174_v41 = vld [vmem:[%s9019_s11 + $0x58] sm:$0xff]  ;;  %v8897_v43 = vmov 48.0  }
  0x27   : > { %13662 = vst [vmem:[#allocation15_spill] sm:$0xff] %v9069_v31  ;;  %6107 = vadd.xlane.f32.xlu0 %v6106_v51  ;;  %v6097_v54 = vsel %vm13501_vm3, %v6096_v44, %v6095_v52  ;;  %5768 = vmatpush.bf16.msra.mxu0 %v8443_v5  ;;  %8738 = vrcp.f32 %v8897_v43  ;;  %v8601_v48 = vld [vmem:[%s9024_s18 + $0x18] sm:$0xff]  ;;  %v9192_v51 = vld [vmem:[%s13420_s2 + $0x8] ss:$0 sm:$0xff] }
  0x28   : > { %13663 = vst [vmem:[#allocation16_spill] sm:$0xff] %v9071_v32  ;;  %v6099_v55 = vsel %vm13500_vm4, %v6098_v47, %v6097_v54 }
  0x29   : > { %13664 = vst [vmem:[#allocation17_spill] sm:$0xff] %v9073_v33  ;;  %v6101_v56 = vsel %vm13499_vm5, %v6100_v50, %v6099_v55 }
  0x2a   : > { %13665 = vst [vmem:[#allocation18_spill] sm:$0xff] %v9076_v35  ;;  %v6103_v59 = vsel %vm13479_vm6, %v6102_v53, %v6101_v56 }
  0x2b   : > { %13666 = vst [vmem:[#allocation19_spill] sm:$0xff] %v9078_v36  ;;  %v6109_v60 = vsel %vm13544_vm7, %v6103_v59, 0.0  ;;  %5769 = vmatpush.bf16.msra.mxu0 %v8435_v17  ;;  %v9210_v17 = vld [vmem:[%s9019_s11 + $0x60] sm:$0xff] }
  0x2c   : > { %13667 = vst [vmem:[#allocation20_spill] sm:$0xff] %v9080_v37  ;;  %8702 = vset.pattern.permute.xlu1 %v13436_v0  ;;  %8698 = vset.pattern.permute.xlu2 %v13438_v1 }
  0x2d   : > { %525 = vperm.xlu1 %8702, %v399_v57   ;;  %413 = vperm.xlu2 %8698, %v395_v58   ;;  %v8739_v45 = vpop.eup %8738 }
  0x2e   : > { %v6113_v47 = vmul.f32 48.0, %v8739_v45  ;;  %vm6117_vm8 = vweird.f32 %v8739_v45 }
  0x2f   : > { %6110 = vadd.xlane.f32.xlu0 %v6109_v60  ;;  %5770 = vmatpush.bf16.msra.mxu0 %v8427_v21 }
  0x30   : > { %v6114_v50 = vsub.f32 1.0, %v6113_v47  ;;  %v13430_v47 = vmov 1326507024  }
  0x32   : > { %8448 = vmatmul.msk.bf16.vlgmr.msra.gmra.mxu0 %vm13544_vm7, %v8598_v22  ;;  %v6115_v52 = vmul.f32 %v8739_v45, %v6114_v50 }
  0x35   : > { %529 = vperm.xlu1 %8702, %v400_v61   ;;  %428 = vperm.xlu2 %8698, %v398_v62  }
  0x3d   : > { %8704 = vset.pattern.permute.xlu1 %v13448_v42  ;;  %8699 = vset.pattern.permute.xlu2 %v13436_v0 }
  0x3e   : > { %618 = vperm.xlu1 %8704, %v398_v62   ;;  %509 = vperm.xlu2 %8699, %v395_v58  }
  0x43   : > { %423 = vperm.xlu0 %8696, %v9027_v2  }
  0x46   : > { %622 = vperm.xlu1 %8704, %v399_v57   ;;  %521 = vperm.xlu2 %8699, %v398_v62  }
  0x4b   : > { %443 = vperm.xlu0 %8696, %v401_v4  }
  0x4e   : > { %8701 = vset.pattern.permute.xlu2 %v13438_v1  ;;  %8708 = vset.pattern.permute.xlu1 %v13436_v0 }
  0x4f   : > { %433 = vperm.xlu2 %8701, %v399_v57   ;;  %537 = vperm.xlu1 %8708, %v402_v14   ;;  %v6116_v57 = vadd.f32 %v8739_v45, %v6115_v52 }
  0x51   : > { %v9202_v60 = vsel %vm6117_vm8, %v8739_v45, %v6116_v57  ;;  %v13434_v57 = vmov 2102212464  }
  0x52   : > { %13669 = vst [vmem:[#allocation22_spill] sm:$0xff] %v9202_v60 }
  0x53   : > { %8705 = vset.pattern.permute.xlu0 %v13448_v42 }
  0x54   : > { %614 = vperm.xlu0 %8705, %v9027_v2   ;;  %v8599_v2 = vld [vmem:[%s9024_s18 + $0x8] sm:$0xff] }
  0x55   : > { %8449 = vmatmul.msk.bf16.gmra.mxu0 %vm13544_vm7, %v8599_v2 }
  0x57   : > { %438 = vperm.xlu2 %8701, %v400_v61   ;;  %8710 = vset.pattern.permute.xlu1 %v13448_v42 }
  0x58   : > { %634 = vperm.xlu1 %8710, %v402_v14  }
  0x5c   : > { %626 = vperm.xlu0 %8705, %v400_v61  }
  0x5f   : > { %8703 = vset.pattern.permute.xlu2 %v13448_v42 }
  0x60   : > { %606 = vperm.xlu2 %8703, %v395_v58   ;;  %8712 = vset.pattern.permute.xlu1 %v13436_v0 }
  0x61   : > { %545 = vperm.xlu1 %8712, %v404_v23  }
  0x64   : > { %8713 = vset.pattern.permute.xlu0 %v13438_v1 }
  0x65   : > { %463 = vperm.xlu0 %8713, %v9149_v24   ;;  %8450 = vmatmul.msk.bf16.gmra.mxu0 %vm13544_vm7, %v8600_v38 }
  0x68   : > { %8706 = vset.pattern.permute.xlu2 %v13436_v0 }
  0x69   : > { %533 = vperm.xlu2 %8706, %v401_v4   ;;  %8715 = vset.pattern.permute.xlu1 %v13438_v1 }
  0x6d   : > { %478 = vperm.xlu0 %8713, %v9155_v26  }
  0x71   : > { %8707 = vset.pattern.permute.xlu2 %v13438_v1 }
  0x72   : > { %448 = vperm.xlu2 %8707, %v402_v14  }
  0x75   : > { %v419_v25 = vpop.permute.xlu2 %418  ;;  %8722 = vset.pattern.permute.xlu0 %v13436_v0  ;;  %8451 = vmatmul.msk.bf16.gmra.mxu0 %vm13544_vm7, %v8601_v48 }
  0x76   : > { %v493_v30 = vmul.f32 %v9160_v27, %v419_v25  ;;  %553 = vperm.xlu0 %8722, %v9174_v41  }
  0x7a   : > { %8709 = vset.pattern.permute.xlu2 %v13448_v42 }
  0x7b   : > { %630 = vperm.xlu2 %8709, %v401_v4  }
  0x7e   : > { %v514_v34 = vpop.permute.xlu2 %513 }
  0x7f   : > { %v574_v39 = vmul.f32 %v9167_v28, %v514_v34 }
  0x81   : > { %v590_v40 = vadd.f32 %v574_v39, %v493_v30 }
  0x83   : > { %8711 = vset.pattern.permute.xlu2 %v13438_v1 }
  0x84   : > { %458 = vperm.xlu2 %8711, %v404_v23  }
  0x87   : > { %v9179_v44 = vpop.permute.xlu2 %413 }
  0x8c   : > { %8714 = vset.pattern.permute.xlu2 %v13436_v0 }
  0x8d   : > { %549 = vperm.xlu2 %8714, %v9149_v24   ;;  %v9183_v46 = vpop.permute.xlu1 %517 }
  0x8f   : > { %v9186_v49 = vpop.permute.xlu2 %428 }
  0x95   : > { %8716 = vset.pattern.permute.xlu2 %v13438_v1 }
  0x96   : > { %v611_v53 = vpop.permute.xlu1 %610  ;;  %468 = vperm.xlu2 %8716, %v9174_v41  }
  0x97   : > { %v671_v54 = vmul.f32 %v9192_v51, %v611_v53  ;;  %v13442_v53 = vmov 2131351028  }
  0x98   : > { %v9199_v56 = vpop.permute.xlu2 %509 }
  0x99   : > { %v9197_v55 = vadd.f32 %v671_v54, %v590_v40  ;;  %v13432_v40 = vmov 920167782  }
  0x9a   : > { %v6108_v61 = vpop.xlane.xlu0 %6107 }
  0x9b   : > { %13668 = vst [vmem:[#allocation21_spill] sm:$0xff] %v9197_v55  ;;  %v859_v58 = vand.u32 2139095040, %v9197_v55  ;;  %v6119_v63 = vmul.f32 %v9202_v60, %v6108_v61  ;;  %v13429_v5 = vand.u32 2147483647, %v9197_v55 }
  0x9d   : > { %v860_v59 = vshrl.u32 %v859_v58, 23  ;;  %v6123_v7 = vrot.slane %v6119_v63, 1  ;;  %v6124_v18 = vrot.slane %v6119_v63, 2  ;;  %v9217_v21 = vand.u32 8388607, %v13429_v5 }
  0x9e   : > { %8718 = vset.pattern.permute.xlu2 %v13448_v42  ;;  %v6126_v2 = vrot.slane %v6119_v63, 4  ;;  %v6127_v34 = vrot.slane %v6119_v63, 5  ;;  %v6128_v38 = vrot.slane %v6119_v63, 6  ;;  %v6129_v39 = vrot.slane %v6119_v63, 7 }
  0x9f   : > { %v8299_v62 = vadd.s32 4294967169, %v860_v59  ;;  %642 = vperm.xlu2 %8718, %v404_v23   ;;  %v526_v22 = vpop.permute.xlu1 %525  ;;  %v6125_v23 = vrot.slane %v6119_v63, 3  ;;  %v9221_v25 = vsub.f32 %v9037_v9, %v6123_v7  ;;  %v9230_v50 = vsub.f32 %v9039_v10, %v6124_v18 }
  0xa0   : > { %v9206_v4 = vpop.permute.xlu2 %521  ;;  %v577_v30 = vmul.f32 %v9167_v28, %v526_v22 }
  0xa1   : > { %v866_v3 = vadd.s32 1, %v8299_v62  ;;  %13670 = vst [vmem:[#allocation23_spill] sm:$0xff] %v9221_v25  ;;  %v13440_v62 = vmov 2475754826  }
  0xa2   : > { %13671 = vst [vmem:[#allocation24_spill] sm:$0xff] %v9230_v50 }
  0xa3   : > { %vm867_vm9 = vcmp.gt.s32.totalorder %v866_v3, 0 }
  0xa4   : > { %v868_v6 = vsel %vm867_vm9, %v866_v3, 0 }
  0xa5   : > { %v870_v14 = vand.u32 31, %v868_v6  ;;  %v9232_v52 = vshrl.u32 %v868_v6, 5  ;;  %v6170_v6 = vmul.f32 %v9221_v25, %v9221_v25 }
  0xa7   : > { %v9212_v19 = vsub.s32 32, %v870_v14  ;;  %8720 = vset.pattern.permute.xlu2 %v13436_v0  ;;  %v885_v45 = vshll.u32 %v13432_v40, %v870_v14  ;;  %v882_v59 = vshll.u32 %v13434_v57, %v870_v14  ;;  %v876_v22 = vshll.u32 %v13440_v62, %v870_v14 }
  0xa8   : > { %557 = vperm.xlu2 %8720, %v9210_v17   ;;  %v879_v5 = vshll.u32 %v13442_v53, %v870_v14  ;;  %vm891_vm10 = vcmp.lt.s32.totalorder %v9232_v52, 4  ;;  %vm888_vm11 = vcmp.lt.s32.totalorder %v9232_v52, 1  ;;  %vm890_vm12 = vcmp.lt.s32.totalorder %v9232_v52, 3 }
  0xa9   : > { %v883_v43 = vshrl.u32 %v13432_v40, %v9212_v19  ;;  %v886_v48 = vshrl.u32 %v13430_v47, %v9212_v19  ;;  %v877_v54 = vshrl.u32 %v13442_v53, %v9212_v19  ;;  %v880_v58 = vshrl.u32 %v13434_v57, %v9212_v19  ;;  %v434_v61 = vpop.permute.xlu2 %433 }
  0xaa   : > { %v874_v3 = vshrl.u32 %v13440_v62, %v9212_v19  ;;  %v496_v18 = vmul.f32 %v9160_v27, %v434_v61  ;;  %v9247_v40 = vsub.f32 %v9035_v8, %v6119_v63  ;;  %v13444_v57 = vmov 683565275  }
  0xab   : > { %v887_v7 = vor.u32 %v886_v48, %v885_v45  ;;  %v884_v47 = vor.u32 %v883_v43, %v882_v59  ;;  %v873_v0 = vshll.u32 %v13444_v57, %v870_v14  ;;  %v9253_v45 = vsub.f32 %v9041_v11, %v6125_v23 }
  0xac   : > { %13672 = vst [vmem:[#allocation25_spill] sm:$0xff] %v9247_v40  ;;  %v9250_v1 = vadd.f32 %v577_v30, %v496_v18  ;;  %v9256_v48 = vsub.f32 %v9043_v12, %v6126_v2  ;;  %v9258_v61 = vor.u32 %v877_v54, %v876_v22  ;;  %v9260_v62 = vor.u32 %v880_v58, %v879_v5  ;;  %v530_v18 = vpop.permute.xlu1 %529 }
  0xad   : > { %13673 = vst [vmem:[#allocation26_spill] sm:$0xff] %v9253_v45  ;;  %v6171_v63 = vmul.f32 %v9230_v50, %v9230_v50  ;;  %v864_v43 = vor.u32 8388608, %v9217_v21  ;;  %v9266_v14 = vor.u32 %v874_v3, %v873_v0  ;;  %v901_v23 = vsel %vm891_vm10, %v887_v7, 1326507024 }
  0xae   : > { %13674 = vst [vmem:[#allocation27_spill] sm:$0xff] %v9256_v48  ;;  %v6201_v30 = vrot.slane %v6170_v6, 7  ;;  %v897_v2 = vsel %vm891_vm10, %v884_v47, 920167782  ;;  %v9274_v5 = vsub.f32 %v9045_v13, %v6127_v34  ;;  %v9277_v54 = vsub.f32 %v9048_v15, %v6128_v38 }
  0xaf   : > { %v9280_v58 = vsub.f32 %v9050_v16, %v6129_v39  ;;  %v6169_v0 = vmul.f32 %v9247_v40, %v9247_v40  ;;  %v900_v21 = vsel %vm888_vm11, %v9258_v61, %v9260_v62  ;;  %v902_v34 = vsel %vm890_vm12, %v884_v47, %v901_v23 }
  0xb0   : > { %561 = vperm.xlu2 %8720, %v9155_v26   ;;  %13675 = vst [vmem:[#allocation28_spill] sm:$0xff] %v9274_v5  ;;  %v6172_v26 = vmul.f32 %v9253_v45, %v9253_v45  ;;  %v6173_v38 = vmul.f32 %v9256_v48, %v9256_v48  ;;  %v6203_v39 = vrot.slane %v6171_v63, 6  ;;  %v896_v59 = vsel %vm888_vm11, %v9266_v14, %v9258_v61  ;;  %v6111_v63 = vpop.xlane.xlu0 %6110 }
  0xb1   : > { %13676 = vst [vmem:[#allocation29_spill] sm:$0xff] %v9277_v54  ;;  %v898_v3 = vsel %vm890_vm12, %v9260_v62, %v897_v2  ;;  %v6202_v7 = vsel %vm13547_vm0, %v6201_v30, %v6169_v0  ;;  %vm889_vm13 = vcmp.lt.s32.totalorder %v9232_v52, 2  ;;  %v6174_v47 = vmul.f32 %v9274_v5, %v9274_v5 }
  0xb2   : > { %13677 = vst [vmem:[#allocation30_spill] sm:$0xff] %v9280_v58  ;;  %v9309_v6 = vsel %vm889_vm13, %v900_v21, %v902_v34  ;;  %v9311_v22 = vshll.u32 %v864_v43, 8  ;;  %v6175_v23 = vmul.f32 %v9277_v54, %v9277_v54  ;;  %v6205_v53 = vrot.slane %v6172_v26, 5 }
  0xb3   : > { %v9317_v30 = vsel %vm889_vm13, %v896_v59, %v898_v3  ;;  %v6176_v2 = vmul.f32 %v9280_v58, %v9280_v58  ;;  %v6204_v0 = vsel %vm13546_vm1, %v6203_v39, %v6202_v7  ;;  %v6207_v57 = vrot.slane %v6173_v38, 4  ;;  %v439_v7 = vpop.permute.xlu2 %438 }
  0xb4   : > { %v6206_v21 = vsel %vm13545_vm2, %v6205_v53, %v6204_v0  ;;  %v13450_v43 = vshrl.u32 %v9309_v6, 16  ;;  %v6120_v34 = vmul.f32 %v9202_v60, %v6111_v63  ;;  %v6209_v16 = vrot.slane %v6174_v47, 3 }
  0xb5   : > { %v6208_v26 = vsel %vm13501_vm3, %v6207_v57, %v6206_v21  ;;  %v930_v59 = vshrl.u32 %v9317_v30, 16  ;;  %v578_v3 = vmul.f32 %v9167_v28, %v530_v18  ;;  %v6211_v15 = vrot.slane %v6175_v23, 2 }
  0xb6   : > { %v905_v38 = vand.u32 65535, %v9311_v22  ;;  %v6210_v53 = vsel %vm13500_vm4, %v6209_v16, %v6208_v26  ;;  %v6213_v39 = vrot.slane %v6176_v2, 1  ;;  %v497_v63 = vmul.f32 %v9160_v27, %v439_v7 }
  0xb7   : > { %v6212_v0 = vsel %vm13499_vm5, %v6211_v15, %v6210_v53  ;;  %v6130_v47 = vrot.slane %v6120_v34, 1  ;;  %v6131_v16 = vrot.slane %v6120_v34, 2  ;;  %v907_v2 = vand.u32 65535, %v9309_v6  ;;  %v9345_v15 = vpop.permute.xlu1 %618 }
  0xb8   : > { %8723 = vset.pattern.permute.xlu2 %v13448_v42  ;;  %v9336_v57 = vmul.u32 %v13450_v43, %v905_v38  ;;  %v9339_v21 = vmul.u32 %v930_v59, %v905_v38  ;;  %v9342_v23 = vadd.f32 %v578_v3, %v497_v63  ;;  %v6132_v26 = vrot.slane %v6120_v34, 3 }
  0xb9   : > { %650 = vperm.xlu2 %8723, %v9174_v41   ;;  %v6214_v41 = vsel %vm13479_vm6, %v6213_v39, %v6212_v0  ;;  %v6133_v53 = vrot.slane %v6120_v34, 4  ;;  %v929_v7 = vand.u32 65535, %v9317_v30  ;;  %v6134_v42 = vrot.slane %v6120_v34, 5 }
  0xba   : > { %v6231_v18 = vsel %vm13544_vm7, %v6214_v41, 0.0  ;;  %v906_v39 = vshrl.u32 %v9311_v22, 16  ;;  %v913_v0 = vshll.u32 %v9336_v57, 16  ;;  %v6135_v43 = vrot.slane %v6120_v34, 6 }
  0xbb   : > { %6232 = vadd.xlane.f32.xlu1 %v6231_v18  ;;  %v9351_v41 = vsub.f32 %v9066_v29, %v6130_v47  ;;  %v935_v3 = vshll.u32 %v9339_v21, 16  ;;  %v6136_v63 = vrot.slane %v6120_v34, 7  ;;  %v9356_v18 = vsub.f32 %v9069_v31, %v6131_v16 }
  0xbc   : > { %v9359_v13 = vsub.f32 %v9071_v32, %v6132_v26  ;;  %v909_v30 = vmul.u32 %v907_v2, %v905_v38  ;;  %v9361_v12 = vmul.u32 %v907_v2, %v906_v39  ;;  %v9364_v11 = vsub.f32 %v9055_v20, %v6120_v34 }
  0xbd   : > { %13678 = vst [vmem:[#allocation31_spill] sm:$0xff] %v9351_v41  ;;  %v9367_v47 = vsub.f32 %v9073_v33, %v6133_v53  ;;  %v931_v29 = vmul.u32 %v929_v7, %v905_v38  ;;  %v9369_v10 = vmul.u32 %v929_v7, %v906_v39  ;;  %v9372_v9 = vsub.f32 %v9076_v35, %v6134_v42 }
  0xbe   : > { %13679 = vst [vmem:[#allocation32_spill] sm:$0xff] %v9356_v18  ;;  %v6178_v16 = vmul.f32 %v9351_v41, %v9351_v41  ;;  %vm9376_vm14 = vc.u32 %v909_v30, %v913_v0  ;;  %v9381_v2 = vsub.f32 %v9078_v36, %v6135_v43  ;;  %v6179_v34 = vmul.f32 %v9356_v18, %v9356_v18 }
  0xbf   : > { %13680 = vst [vmem:[#allocation33_spill] sm:$0xff] %v9359_v13  ;;  %v6180_v38 = vmul.f32 %v9359_v13, %v9359_v13  ;;  %v919_v53 = vadd.s32 %v913_v0, %v909_v30  ;;  %vm939_vm15 = vc.u32 %v931_v29, %v935_v3  ;;  %v941_v42 = vadd.s32 %v935_v3, %v931_v29  ;;  %v623_v8 = vpop.permute.xlu1 %622 }
  0xc0   : > { %13681 = vst [vmem:[#allocation34_spill] sm:$0xff] %v9364_v11  ;;  %v9388_v7 = vsub.f32 %v9080_v37, %v6136_v63  ;;  %v6177_v35 = vmul.f32 %v9364_v11, %v9364_v11  ;;  %v6181_v33 = vmul.f32 %v9367_v47, %v9367_v47  ;;  %v6215_v43 = vrot.slane %v6178_v16, 7 }
  0xc1   : > { %654 = vperm.xlu2 %8723, %v9210_v17   ;;  %13682 = vst [vmem:[#allocation35_spill] sm:$0xff] %v9367_v47  ;;  %v6217_v36 = vrot.slane %v6179_v34, 6  ;;  %v915_v32 = vshll.u32 %v9361_v12, 16  ;;  %v934_v31 = vmul.u32 %v930_v59, %v906_v39  ;;  %v937_v20 = vshll.u32 %v9369_v10, 16 }
  0xc2   : > { %13683 = vst [vmem:[#allocation36_spill] sm:$0xff] %v9372_v9  ;;  %v6182_v0 = vmul.f32 %v9372_v9, %v9372_v9  ;;  %v13688_v29 = vmov 0   ;;  %v6183_v63 = vmul.f32 %v9381_v2, %v9381_v2  ;;  %v6216_v30 = vsel %vm13547_vm0, %v6215_v43, %v6177_v35 }
  0xc3   : > { %13686 = vst [vmem:[#allocation37_spill] sm:$0xff] %v9381_v2  ;;  %v940_v3 = vsel %vm939_vm15, 1, %v13688_v29  ;;  %v6219_v37 = vrot.slane %v6180_v38, 5  ;;  %v13689_v47 = vmov 1   ;;  %v918_v59 = vsel %vm9376_vm14, 1, %v13688_v29 }
  0xc4   : > { %13687 = vst [vmem:[#allocation38_spill] sm:$0xff] %v9388_v7  ;;  %vm943_vm8 = vc.u32 %v941_v42, %v937_v20  ;;  %v6184_v16 = vmul.f32 %v9388_v7, %v9388_v7  ;;  %v6218_v34 = vsel %vm13546_vm1, %v6217_v36, %v6216_v30  ;;  %v13690_v9 = vshrl.u32 %v9309_v6, 16 }
  0xc5   : > { %vm921_vm9 = vc.u32 %v919_v53, %v915_v32  ;;  %v6220_v35 = vsel %vm13545_vm2, %v6219_v37, %v6218_v34  ;;  %v6221_v38 = vrot.slane %v6181_v33, 4  ;;  %v942_v43 = vadd.s32 %v940_v3, %v934_v31 }
  0xc6   : > { %v912_v13 = vmul.u32 %v13690_v9, %v906_v39  ;;  %v6223_v2 = vrot.slane %v6182_v0, 3  ;;  %v674_v58 = vmul.f32 %v9192_v51, %v623_v8  ;;  %v944_v26 = vsel %vm943_vm8, 1, %v13688_v29 }
  0xc7   : > { %v6222_v5 = vsel %vm13501_vm3, %v6221_v38, %v6220_v35  ;;  %v6225_v48 = vrot.slane %v6183_v63, 2  ;;  %v922_v7 = vsel %vm921_vm9, 1, %v13688_v29  ;;  %v6227_v6 = vrot.slane %v6184_v16, 1 }
  0xc8   : > { %v920_v54 = vadd.s32 %v918_v59, %v912_v13  ;;  %v6224_v36 = vsel %vm13500_vm4, %v6223_v2, %v6222_v5  ;;  %v946_v32 = vadd.s32 %v944_v26, %v942_v43  ;;  %v9420_v31 = vadd.f32 %v674_v58, %v9250_v1 }
  0xc9   : > { %8725 = vset.pattern.permute.xlu2 %v13689_v47  ;;  %v6226_v9 = vsel %vm13499_vm5, %v6225_v48, %v6224_v36  ;;  %v936_v13 = vshrl.u32 %v9339_v21, 16  ;;  %v914_v39 = vshrl.u32 %v9336_v57, 16  ;;  %v938_v48 = vshrl.u32 %v9369_v10, 16 }
  0xca   : > { %v6228_v33 = vsel %vm13479_vm6, %v6227_v6, %v6226_v9  ;;  %13691 = vst [vmem:[#allocation39_spill] sm:$0xff] %v9420_v31  ;;  %v924_v8 = vadd.s32 %v922_v7, %v920_v54  ;;  %v1321_v53 = vand.u32 2139095040, %v9420_v31  ;;  %v916_v3 = vshrl.u32 %v9361_v12, 16 }
  0xcb   : > { %v6234_v37 = vsel %vm13544_vm7, %v6228_v33, 0.0  ;;  %v947_v5 = vadd.s32 %v946_v32, %v936_v13  ;;  %v893_v1 = vsel %vm891_vm10, %v9260_v62, 2102212464  ;;  %v13692_v58 = vmov 683565275  }
  0xcc   : > { %6235 = vadd.xlane.f32.xlu1 %v6234_v37  ;;  %v925_v2 = vadd.s32 %v924_v8, %v914_v39  ;;  %v1322_v0 = vshrl.u32 %v1321_v53, 23  ;;  %v872_v21 = vshrl.u32 %v13692_v58, %v9212_v19  ;;  %v894_v10 = vsel %vm890_vm12, %v9258_v61, %v893_v1 }
  0xcd   : > { %v948_v54 = vadd.s32 %v947_v5, %v938_v48  ;;  %v9441_v12 = vadd.s32 %v941_v42, %v937_v20  ;;  %v13474_v34 = vand.u32 2147483647, %v9420_v31  ;;  %v13694_v43 = vmov 2131351028  }
  0xce   : > { %v8308_v63 = vadd.s32 4294967169, %v1322_v0  ;;  %v9433_v57 = vadd.s32 %v925_v2, %v916_v3  ;;  %v892_v30 = vsel %vm888_vm11, %v872_v21, %v9266_v14  ;;  %v13693_v14 = vmov 2475754826   ;;  %v9483_v21 = vpop.permute.xlu2 %606 }
  0xcf   : > { %v952_v59 = vadd.s32 1, %v948_v54  ;;  %v895_v16 = vsel %vm889_vm13, %v892_v30, %v894_v10  ;;  %v13695_v26 = vmov 2102212464   ;;  %v13696_v6 = vmov 920167782  }
  0xd0   : > { %v1328_v7 = vadd.s32 1, %v8308_v63  ;;  %vm951_vm10 = vc.u32 %v9433_v57, %v9441_v12  ;;  %v949_v13 = vmul.u32 %v9311_v22, %v895_v16  ;;  %v13697_v39 = vmov 1326507024   ;;  %v9500_v16 = vld [vmem:[%s9019_s11 + $0x40] sm:$0xff] }
  0xd1   : > { %v953_v20 = vsel %vm951_vm10, %v952_v59, %v948_v54  ;;  %v1325_v5 = vand.u32 8388607, %v13474_v34 }
  0xd2   : > { %vm1329_vm14 = vcmp.gt.s32.totalorder %v1328_v7, 0  ;;  %v954_v48 = vadd.s32 %v953_v20, %v949_v13 }
  0xd3   : > { %v1330_v62 = vsel %vm1329_vm14, %v1328_v7, 0  ;;  %v1326_v7 = vor.u32 8388608, %v1325_v5 }
  0xd4   : > { %v1332_v19 = vand.u32 31, %v1330_v62  ;;  %v9455_v32 = vshrl.u32 %v1330_v62, 5  ;;  %v955_v59 = vadd.s32 536870912, %v954_v48 }
  0xd5   : > { %v9506_v20 = vshll.u32 %v1326_v7, 8 }
  0xd6   : > { %v9448_v35 = vsub.s32 32, %v1332_v19  ;;  %v1338_v38 = vshll.u32 %v13693_v14, %v1332_v19  ;;  %v1341_v61 = vshll.u32 %v13694_v43, %v1332_v19  ;;  %v1335_v42 = vshll.u32 %v13692_v58, %v1332_v19 }
  0xd7   : > { %v1344_v36 = vshll.u32 %v13695_v26, %v1332_v19  ;;  %v1347_v9 = vshll.u32 %v13696_v6, %v1332_v19  ;;  %vm1353_vm11 = vcmp.lt.s32.totalorder %v9455_v32, 4  ;;  %vm1350_vm12 = vcmp.lt.s32.totalorder %v9455_v32, 1 }
  0xd8   : > { %v1336_v52 = vshrl.u32 %v13693_v14, %v9448_v35  ;;  %v1339_v33 = vshrl.u32 %v13694_v43, %v9448_v35  ;;  %v1342_v8 = vshrl.u32 %v13695_v26, %v9448_v35  ;;  %v1345_v37 = vshrl.u32 %v13696_v6, %v9448_v35 }
  0xd9   : > { %v1348_v53 = vshrl.u32 %v13697_v39, %v9448_v35  ;;  %vm1352_vm13 = vcmp.lt.s32.totalorder %v9455_v32, 3  ;;  %vm1351_vm15 = vcmp.lt.s32.totalorder %v9455_v32, 2 }
  0xda   : > { %v9470_v2 = vor.u32 %v1339_v33, %v1338_v38  ;;  %v9472_v0 = vor.u32 %v1342_v8, %v1341_v61  ;;  %v9474_v3 = vor.u32 %v1336_v52, %v1335_v42  ;;  %v1346_v63 = vor.u32 %v1345_v37, %v1344_v36  ;;  %v9511_v52 = vpop.permute.xlu2 %533  ;;  %v538_v33 = vpop.permute.xlu1 %537 }
  0xdb   : > { %v1349_v1 = vor.u32 %v1348_v53, %v1347_v9  ;;  %v9508_v42 = vshrl.u32 %v955_v59, 30  ;;  %v1367_v8 = vand.u32 65535, %v9506_v20 }
  0xdc   : > { %v1359_v22 = vsel %vm1353_vm11, %v1346_v63, 920167782  ;;  %v1362_v30 = vsel %vm1350_vm12, %v9470_v2, %v9472_v0  ;;  %v1358_v62 = vsel %vm1350_vm12, %v9474_v3, %v9470_v2 }
  0xdd   : > { %v1363_v54 = vsel %vm1353_vm11, %v1349_v1, 1326507024  ;;  %v1360_v19 = vsel %vm1352_vm13, %v9472_v0, %v1359_v22  ;;  %v957_v13 = vshll.u32 %v9508_v42, 30  ;;  %v1368_v22 = vshrl.u32 %v9506_v20, 16 }
  0xde   : > { %v1364_v10 = vsel %vm1352_vm13, %v1346_v63, %v1363_v54  ;;  %v1361_v61 = vsel %vm1351_vm15, %v1358_v62, %v1360_v19 }
  0xdf   : > { %v1365_v38 = vsel %vm1351_vm15, %v1362_v30, %v1364_v10  ;;  %v1392_v9 = vshrl.u32 %v1361_v61, 16  ;;  %v9515_v63 = vsub.s32 %v954_v48, %v957_v13  ;;  %v1391_v1 = vand.u32 65535, %v1361_v61 }
  0xe0   : > { %v1370_v36 = vshrl.u32 %v1365_v38, 16  ;;  %v1369_v5 = vand.u32 65535, %v1365_v38 }
  0xe1   : > { %v1394_v53 = vmul.u32 %v1392_v9, %v1367_v8  ;;  %v960_v59 = vsub.s32 0, %v9515_v63  ;;  %v1393_v62 = vmul.u32 %v1391_v1, %v1367_v8  ;;  %v1395_v19 = vmul.u32 %v1391_v1, %v1368_v22 }
  0xe2   : > { %v1372_v37 = vmul.u32 %v1370_v36, %v1367_v8  ;;  %v1371_v30 = vmul.u32 %v1369_v5, %v1367_v8  ;;  %v1373_v10 = vmul.u32 %v1369_v5, %v1368_v22  ;;  %v449_v34 = vpop.permute.xlu2 %448  ;;  %v635_v18 = vpop.permute.xlu1 %634  ;;  %vm959_vm8 = vcmp.lt.s32.totalorder %v9515_v63, 0 }
  0xe3   : > { %v1397_v7 = vshll.u32 %v1394_v53, 16  ;;  %v499_v13 = vmul.f32 %v9160_v27, %v449_v34  ;;  %v677_v45 = vmul.f32 %v9192_v51, %v635_v18  ;;  %v961_v5 = vsel %vm959_vm8, %v960_v59, %v9515_v63 }
  0xe4   : > { %v1375_v54 = vshll.u32 %v1372_v37, 16  ;;  %v1377_v61 = vshll.u32 %v1373_v10, 16  ;;  %v1399_v1 = vshll.u32 %v1395_v19, 16  ;;  %v1374_v50 = vmul.u32 %v1370_v36, %v1368_v22 }
  0xe5   : > { %453 = vperm.xlu1 %8715, %v9500_v16   ;;  %vm1401_vm14 = vc.u32 %v1393_v62, %v1397_v7  ;;  %v1403_v38 = vadd.s32 %v1397_v7, %v1393_v62  ;;  %v962_v18 = vclz %v961_v5  ;;  %v13699_v5 = vmov 2  }
  0xe6   : > { %vm1379_vm9 = vc.u32 %v1371_v30, %v1375_v54  ;;  %v1381_v48 = vadd.s32 %v1375_v54, %v1371_v30  ;;  %v1402_v41 = vsel %vm1401_vm14, 1, %v13688_v29  ;;  %v1400_v11 = vshrl.u32 %v1395_v19, 16 }
  0xe7   : > { %v1380_v8 = vsel %vm1379_vm9, 1, %v13688_v29  ;;  %vm1405_vm6 = vc.u32 %v1403_v38, %v1399_v1 }
  0xe8   : > { %vm1383_vm10 = vc.u32 %v1381_v48, %v1377_v61  ;;  %v1382_v34 = vadd.s32 %v1380_v8, %v1374_v50  ;;  %v1406_v62 = vsel %vm1405_vm6, 1, %v13688_v29  ;;  %v8602_v48 = vld [vmem:[%s9024_s18 + $0x20] sm:$0xff]  ;;  %v9536_v61 = vpop.permute.xlu0 %423 }
  0xe9   : > { %v1384_v30 = vsel %vm1383_vm10, 1, %v13688_v29  ;;  %8452 = vmatmul.msk.bf16.gmra.mxu0 %vm13544_vm7, %v8602_v48 }
  0xed   : > { %8717 = vset.pattern.permute.xlu1 %v13689_v47  ;;  %v580_v47 = vmul.f32 %v9167_v28, %v538_v33  ;;  %v1396_v33 = vmul.u32 %v1392_v9, %v1368_v22  ;;  %v8300_v9 = vadd.s32 4294967294, %v962_v18  ;;  %v1334_v18 = vshrl.u32 %v13692_v58, %v9448_v35 }
  0xee   : > { %541 = vperm.xlu1 %8717, %v9500_v16  }
  0xef   : > { %v596_v54 = vadd.f32 %v580_v47, %v499_v13  ;;  %v1404_v59 = vadd.s32 %v1402_v41, %v1396_v33  ;;  %v1386_v47 = vadd.s32 %v1384_v30, %v1382_v34  ;;  %vm8301_vm6 = vcmp.lt.s32.totalorder %v8300_v9, 0 }
  0xf0   : > { %v1378_v33 = vshrl.u32 %v1373_v10, 16  ;;  %v9541_v34 = vsel %vm8301_vm6, 0, %v8300_v9  ;;  %v1354_v35 = vsel %vm1350_vm12, %v1334_v18, %v9474_v3 }
  0xf1   : > { %v9530_v7 = vadd.f32 %v677_v45, %v596_v54  ;;  %v1408_v22 = vadd.s32 %v1406_v62, %v1404_v59  ;;  %v1398_v45 = vshrl.u32 %v1394_v53, 16  ;;  %v1355_v53 = vsel %vm1353_vm11, %v9472_v0, 2102212464 }
  0xf2   : > { %v970_v10 = vsub.s32 4294967266, %v9541_v34  ;;  %v1356_v0 = vsel %vm1352_vm13, %v9470_v2, %v1355_v53 }
  0xf3   : > { %13698 = vst [vmem:[#allocation40_spill] sm:$0xff] %v9530_v7  ;;  %v1783_v36 = vand.u32 2139095040, %v9530_v7  ;;  %v1409_v54 = vadd.s32 %v1408_v22, %v1398_v45 }
  0xf4   : > { %v971_v18 = vadd.s32 127, %v970_v10 }
  0xf5   : > { %v1784_v13 = vshrl.u32 %v1783_v36, 23  ;;  %v1410_v59 = vadd.s32 %v1409_v54, %v1400_v11  ;;  %v444_v36 = vpop.permute.xlu0 %443  ;;  %v579_v11 = vmul.f32 %v9167_v28, %v9511_v52 }
  0xf6   : > { %8719 = vset.pattern.permute.xlu1 %v13688_v29  ;;  %v498_v19 = vmul.f32 %v9160_v27, %v444_v36 }
  0xf7   : > { %473 = vperm.xlu1 %8719, %v9210_v17   ;;  %v1376_v17 = vshrl.u32 %v1372_v37, 16  ;;  %v8317_v50 = vadd.s32 4294967169, %v1784_v13 }
  0xf9   : > { %v1387_v8 = vadd.s32 %v1386_v47, %v1376_v17  ;;  %v1790_v41 = vadd.s32 1, %v8317_v50  ;;  %v631_v47 = vpop.permute.xlu2 %630 }
  0xfa   : > { %v676_v17 = vmul.f32 %v9192_v51, %v631_v47 }
  0xfb   : > { %vm1791_vm8 = vcmp.gt.s32.totalorder %v1790_v41, 0  ;;  %v9545_v30 = vadd.s32 %v1387_v8, %v1378_v33  ;;  %v595_v8 = vadd.f32 %v579_v11, %v498_v19  ;;  %v950_v11 = vadd.s32 %v9441_v12, %v9433_v57 }
  0xfc   : > { %v1792_v37 = vsel %vm1791_vm8, %v1790_v41, 0  ;;  %v1357_v41 = vsel %vm1351_vm15, %v1354_v35, %v1356_v0 }
  0xfd   : > { %v1794_v62 = vand.u32 31, %v1792_v37  ;;  %v9568_v13 = vshrl.u32 %v1792_v37, 5  ;;  %v9592_v36 = vadd.f32 %v676_v17, %v595_v8  ;;  %v1411_v0 = vmul.u32 %v9506_v20, %v1357_v41 }
  0xff   : > { %8721 = vset.pattern.permute.xlu1 %v13699_v5  ;;  %v9554_v48 = vsub.s32 32, %v1794_v62  ;;  %v1809_v9 = vshll.u32 %v13696_v6, %v1794_v62  ;;  %v1800_v3 = vshll.u32 %v13693_v14, %v1794_v62  ;;  %v1803_v22 = vshll.u32 %v13694_v43, %v1794_v62  ;;  %13700 = vst [vmem:[#allocation41_spill] sm:$0xff] %v9592_v36 }
 0x100   : > { %646 = vperm.xlu1 %8721, %v9149_v24   ;;  %v9550_v24 = vadd.s32 %v1403_v38, %v1399_v1  ;;  %v1414_v38 = vadd.s32 1, %v1410_v59  ;;  %v13481_v1 = vand.u32 2147483647, %v9530_v7  ;;  %v1806_v50 = vshll.u32 %v13695_v26, %v1794_v62 }
 0x101   : > { %v1810_v2 = vshrl.u32 %v13697_v39, %v9554_v48  ;;  %v1801_v52 = vshrl.u32 %v13694_v43, %v9554_v48  ;;  %v1807_v45 = vshrl.u32 %v13696_v6, %v9554_v48  ;;  %vm1815_vm12 = vcmp.lt.s32.totalorder %v9568_v13, 4 }
 0x102   : > { %vm1413_vm11 = vc.u32 %v9545_v30, %v9550_v24  ;;  %v1787_v54 = vand.u32 8388607, %v13481_v1  ;;  %v1797_v53 = vshll.u32 %v13692_v58, %v1794_v62  ;;  %v1798_v19 = vshrl.u32 %v13693_v14, %v9554_v48 }
 0x103   : > { %v1811_v33 = vor.u32 %v1810_v2, %v1809_v9  ;;  %v1415_v37 = vsel %vm1413_vm11, %v1414_v38, %v1410_v59  ;;  %v9596_v32 = vor.u32 %v1801_v52, %v1800_v3  ;;  %v1808_v35 = vor.u32 %v1807_v45, %v1806_v50  ;;  %v8603_v52 = vld [vmem:[%s9024_s18 + $0x28] sm:$0xff] }
 0x104   : > { %vm1812_vm13 = vcmp.lt.s32.totalorder %v9568_v13, 1  ;;  %vm1814_vm15 = vcmp.lt.s32.totalorder %v9568_v13, 3  ;;  %v966_v62 = vsub.s32 32, %v9541_v34  ;;  %v1788_v10 = vor.u32 8388608, %v1787_v54  ;;  %8453 = vmatmul.msk.bf16.gmra.mxu0 %vm13544_vm7, %v8603_v52 }
 0x105   : > { %v1825_v59 = vsel %vm1815_vm12, %v1811_v33, 1326507024  ;;  %v972_v38 = vshll.u32 %v971_v18, 23  ;;  %v1416_v9 = vadd.s32 %v1415_v37, %v1411_v0  ;;  %v1629_v20 = vand.u32 2139095040, %v9592_v36  ;;  %v409_v18 = vld [vmem:[%s9019_s11 + $0x70] sm:$0xff] }
 0x106   : > { %v9610_v3 = vor.u32 %v1798_v19, %v1797_v53  ;;  %vm1813_vm9 = vcmp.lt.s32.totalorder %v9568_v13, 2  ;;  %v1826_v2 = vsel %vm1814_vm15, %v1808_v35, %v1825_v59  ;;  %v1821_v57 = vsel %vm1815_vm12, %v1808_v35, 920167782  ;;  %565 = vperm.xlu0 %8722, %v409_v18  }
 0x107   : > { %v968_v12 = vshrl.u32 %v950_v11, %v966_v62  ;;  %v9621_v17 = vshll.u32 %v1788_v10, 8  ;;  %v973_v50 = vor.u32 4788187, %v972_v38  ;;  %v1417_v8 = vadd.s32 536870912, %v1416_v9  ;;  %v9653_v11 = vpop.permute.xlu2 %458 }
 0x108   : > { %638 = vperm.xlu1 %8721, %v9500_v16   ;;  %v1804_v16 = vshrl.u32 %v13695_v26, %v9554_v48  ;;  %v1820_v41 = vsel %vm1812_vm13, %v9610_v3, %v9596_v32  ;;  %v1630_v33 = vshrl.u32 %v1629_v20, 23  ;;  %v495_v19 = vmul.f32 %v9160_v27, %v9186_v49 }
 0x109   : > { %v1829_v37 = vand.u32 65535, %v9621_v17  ;;  %v974_v0 = vand.u32 2147483647, %v973_v50  ;;  %v673_v59 = vmul.f32 %v9192_v51, %v9345_v15  ;;  %v9651_v62 = vshrl.u32 %v1417_v8, 30 }
 0x10a   : > { %v9598_v47 = vor.u32 %v1804_v16, %v1803_v22  ;;  %v967_v16 = vshll.u32 %v9515_v63, %v9541_v34  ;;  %v576_v34 = vmul.f32 %v9167_v28, %v9206_v4  ;;  %v8314_v10 = vadd.s32 4294967169, %v1630_v33 }
 0x10b   : > { %13701 = vst [vmem:[#allocation42_spill] sm:$0xff] %v9651_v62  ;;  %v1830_v4 = vshrl.u32 %v9621_v17, 16  ;;  %v13482_v49 = vand.u32 2147483647, %v9592_v36  ;;  %v1419_v50 = vshll.u32 %v9651_v62, 30 }
 0x10c   : > { %v1824_v22 = vsel %vm1812_vm13, %v9596_v32, %v9598_v47  ;;  %v1822_v54 = vsel %vm1814_vm15, %v9598_v47, %v1821_v57  ;;  %v969_v63 = vor.u32 %v968_v12, %v967_v16  ;;  %v1636_v16 = vadd.s32 1, %v8314_v10 }
 0x10d   : > { %v9628_v45 = vsel %vm1813_vm9, %v1824_v22, %v1826_v2  ;;  %v9647_v35 = vsel %vm1813_vm9, %v1820_v41, %v1822_v54  ;;  %v592_v2 = vadd.f32 %v576_v34, %v495_v19  ;;  %v1633_v54 = vand.u32 8388607, %v13482_v49 }
 0x10e   : > { %v13483_v53 = vshrl.u32 %v9628_v45, 16  ;;  %v1831_v38 = vand.u32 65535, %v9628_v45  ;;  %v1853_v20 = vand.u32 65535, %v9647_v35  ;;  %v976_v22 = vcvt.s32.f32 %v969_v63  ;;  %8727 = vset.pattern.permute.xlu0 %v13699_v5 }
 0x10f   : > { %v1854_v15 = vshrl.u32 %v9647_v35, 16  ;;  %v9666_v52 = vadd.f32 %v673_v59, %v592_v2  ;;  %vm1637_vm14 = vcmp.gt.s32.totalorder %v1636_v16, 0  ;;  %662 = vperm.xlu0 %8727, %v409_v18   ;;  %v9681_v19 = vmul.f32 %v9160_v27, %v9179_v44 }
 0x110   : > { %8724 = vset.pattern.permute.xlu1 %v13688_v29  ;;  %v9661_v57 = vmul.u32 %v13483_v53, %v1829_v37  ;;  %v9664_v12 = vmul.f32 %v976_v22, %v974_v0  ;;  %v1833_v8 = vmul.u32 %v1831_v38, %v1829_v37  ;;  %v9669_v41 = vmul.u32 %v1853_v20, %v1830_v4 }
 0x111   : > { %483 = vperm.xlu1 %8724, %v409_v18   ;;  %13702 = vst [vmem:[#allocation43_spill] sm:$0xff] %v9666_v52  ;;  %v9674_v33 = vmul.u32 %v1831_v38, %v1830_v4  ;;  %v9677_v34 = vmul.u32 %v1854_v15, %v1829_v37  ;;  %v1638_v35 = vsel %vm1637_vm14, %v1636_v16, 0  ;;  %v9686_v59 = vmul.f32 %v9167_v28, %v9199_v56  ;;  %v9700_v28 = vpop.permute.xlu2 %549 }
 0x112   : > { %v1837_v63 = vshll.u32 %v9661_v57, 16  ;;  %v1640_v38 = vand.u32 31, %v1638_v35  ;;  %v9689_v22 = vsub.s32 %v1416_v9, %v1419_v50  ;;  %v1855_v2 = vmul.u32 %v1853_v20, %v1829_v37  ;;  %13705 = vst [vmem:[#allocation44_spill] sm:$0xff] %v9700_v28 }
 0x113   : > { %v1634_v18 = vor.u32 8388608, %v1633_v54  ;;  %v1839_v49 = vshll.u32 %v9674_v33, 16  ;;  %v1859_v44 = vshll.u32 %v9677_v34, 16  ;;  %v9702_v10 = vshrl.u32 %v1638_v35, 5 }
 0x114   : > { %vm9693_vm10 = vc.u32 %v1833_v8, %v1837_v63  ;;  %v9698_v16 = vsub.s32 32, %v1640_v38  ;;  %v1843_v56 = vadd.s32 %v1837_v63, %v1833_v8  ;;  %v1643_v9 = vshll.u32 %v13692_v58, %v1640_v38 }
 0x115   : > { %v1646_v37 = vshll.u32 %v13693_v14, %v1640_v38  ;;  %v1649_v54 = vshll.u32 %v13694_v43, %v1640_v38  ;;  %v1652_v0 = vshll.u32 %v13695_v26, %v1640_v38  ;;  %vm1421_vm6 = vcmp.lt.s32.totalorder %v9689_v22, 0 }
 0x116   : > { %v1644_v20 = vshrl.u32 %v13693_v14, %v9698_v16  ;;  %v1647_v50 = vshrl.u32 %v13694_v43, %v9698_v16  ;;  %v1650_v8 = vshrl.u32 %v13695_v26, %v9698_v16  ;;  %v1653_v63 = vshrl.u32 %v13696_v6, %v9698_v16 }
 0x117   : > { %v1655_v35 = vshll.u32 %v13696_v6, %v1640_v38  ;;  %v1656_v1 = vshrl.u32 %v13697_v39, %v9698_v16  ;;  %vm9720_vm8 = vc.u32 %v1855_v2, %v1859_v44  ;;  %v9724_v25 = vadd.s32 %v1859_v44, %v1855_v2  ;;  %v410_v38 = vld [vmem:[%s9019_s11 + $0x78] sm:$0xff] }
 0x118   : > { %v9726_v40 = vor.u32 %v1644_v20, %v1643_v9  ;;  %v9728_v28 = vor.u32 %v1647_v50, %v1646_v37  ;;  %v1422_v60 = vsub.s32 0, %v9689_v22  ;;  %v9731_v7 = vor.u32 %v1650_v8, %v1649_v54  ;;  %569 = vperm.xlu2 %8725, %v410_v38   ;;  %v9789_v50 = vld [vmem:[%s13420_s2 + $0x7] ss:$0 sm:$0xff] }
 0x119   : > { %v1654_v36 = vor.u32 %v1653_v63, %v1652_v0  ;;  %v1657_v14 = vor.u32 %v1656_v1, %v1655_v35  ;;  %v13708_v43 = vshrl.u32 %v9628_v45, 16  ;;  %v1858_v31 = vmul.u32 %v1854_v15, %v1830_v4  ;;  %488 = vperm.xlu1 %8724, %v410_v38   ;;  %13710 = vst [vmem:[#allocation45_spill] sm:$0xff] %v9789_v50  ;;  %v615_v35 = vpop.permute.xlu0 %614 }
 0x11a   : > { %vm1658_vm11 = vcmp.lt.s32.totalorder %v9702_v10, 1  ;;  %v9737_v39 = vshll.u32 %v1634_v18, 8  ;;  %v1842_v2 = vsel %vm9693_vm10, 1, %v13688_v29  ;;  %v1864_v0 = vsel %vm9720_vm8, 1, %v13688_v29 }
 0x11b   : > { %v1836_v62 = vmul.u32 %v13708_v43, %v1830_v4  ;;  %vm1661_vm14 = vcmp.lt.s32.totalorder %v9702_v10, 4  ;;  %v1666_v43 = vsel %vm1658_vm11, %v9726_v40, %v9728_v28  ;;  %vm1845_vm5 = vc.u32 %v1843_v56, %v1839_v49  ;;  %v9772_v56 = vpop.permute.xlu2 %468 }
 0x11c   : > { %v13709_v1 = vshll.u32 %v9669_v41, 16  ;;  %vm1660_vm3 = vcmp.lt.s32.totalorder %v9702_v10, 3  ;;  %v1667_v45 = vsel %vm1661_vm14, %v1654_v36, 920167782  ;;  %vm1659_vm10 = vcmp.lt.s32.totalorder %v9702_v10, 2 }
 0x11d   : > { %v1668_v53 = vsel %vm1660_vm3, %v9731_v7, %v1667_v45  ;;  %v1670_v4 = vsel %vm1658_vm11, %v9728_v28, %v9731_v7  ;;  %v1671_v49 = vsel %vm1661_vm14, %v1657_v14, 1326507024  ;;  %v1844_v15 = vadd.s32 %v1842_v2, %v1836_v62 }
 0x11e   : > { %vm1867_vm4 = vc.u32 %v9724_v25, %v13709_v1  ;;  %v1866_v18 = vadd.s32 %v1864_v0, %v1858_v31  ;;  %v9768_v27 = vsel %vm1659_vm10, %v1666_v43, %v1668_v53  ;;  %v1672_v44 = vsel %vm1660_vm3, %v1654_v36, %v1671_v49  ;;  %v8814_v53 = vld [vmem:[%s9019_s11 + $0x68] sm:$0xff]  ;;  %s8905_s11 = smov 80  }
 0x11f   : > { %v1846_v9 = vsel %vm1845_vm5, 1, %v13688_v29  ;;  %v1868_v37 = vsel %vm1867_vm4, 1, %v13688_v29  ;;  %v9778_v20 = vsel %vm1659_vm10, %v1670_v4, %v1672_v44  ;;  %v13503_v14 = vshrl.u32 %v9768_v27, 16  ;;  %v546_v44 = vpop.permute.xlu1 %545 }
 0x120   : > { %vm858_vm8 = vcmp.lt.s32.totalorder %v9197_v55, 0  ;;  %v670_v31 = vmul.f32 %v9192_v51, %v9483_v21  ;;  %v1675_v62 = vand.u32 65535, %v9737_v39  ;;  %v13502_v36 = vshrl.u32 %v9778_v20, 16  ;;  %8728 = vset.pattern.permute.xlu2 %v13699_v5 }
 0x121   : > { %v9793_v54 = vmul.f32 %v9789_v50, %v9183_v46  ;;  %v13711_v8 = vxor.u32 2147483648, %v9664_v12  ;;  %v589_v21 = vadd.f32 %v9686_v59, %v9681_v19  ;;  %v1423_v63 = vsel %vm1421_vm6, %v1422_v60, %v9689_v22  ;;  %8726 = vset.pattern.permute.xlu1 %v13699_v5  ;;  %v9821_v60 = vld [vmem:[%s13420_s2 + $0x6] ss:$0 sm:$0xff]  ;;  %666 = vperm.xlu2 %8728, %v410_v38   ;;  %v9844_v5 = vld [vmem:[%s13420_s2 + $0x8] ss:$0 sm:$0xff] }
 0x122   : > { %v1848_v2 = vadd.s32 %v1846_v9, %v1844_v15  ;;  %v1870_v0 = vadd.s32 %v1868_v37, %v1866_v18  ;;  %v9807_v46 = vmul.u32 %v13503_v14, %v1675_v62  ;;  %v13712_v43 = vand.u32 2147483647, %v9197_v55  ;;  %13716 = vst [vmem:[#allocation46_spill] sm:$0xff] %v9821_v60  ;;  %658 = vperm.xlu1 %8726, %v8814_v53  }
 0x123   : > { %v979_v51 = vsel %vm858_vm8, %v13711_v8, %v9664_v12  ;;  %v13715_v19 = vand.u32 2139095040, %v9666_v52  ;;  %v494_v1 = vmul.f32 %v9821_v60, %v9536_v61  ;;  %v9827_v45 = vmul.u32 %v13502_v36, %v1675_v62  ;;  %v643_v53 = vpop.permute.xlu2 %642 }
 0x124   : > { %vm9812_vm4 = vcmp.le.f32.partialorder %v13712_v43, 0.7853982  ;;  %v9831_v4 = vadd.f32 %v670_v31, %v589_v21  ;;  %v1838_v49 = vshrl.u32 %v9661_v57, 16  ;;  %v1860_v15 = vshrl.u32 %v9677_v34, 16 }
 0x125   : > { %v1168_v59 = vshrl.u32 %v13715_v19, 23  ;;  %v1699_v18 = vand.u32 65535, %v9768_v27  ;;  %v9839_v61 = vsel %vm9812_vm4, %v9197_v55, %v979_v51  ;;  %v1424_v9 = vclz %v1423_v63 }
 0x126   : > { %v672_v37 = vmul.f32 %v9844_v5, %v615_v35  ;;  %v1677_v57 = vand.u32 65535, %v9778_v20  ;;  %v1849_v34 = vadd.s32 %v1848_v2, %v1838_v49  ;;  %v1871_v31 = vadd.s32 %v1870_v0, %v1860_v15 }
 0x127   : > { %v1676_v8 = vshrl.u32 %v9737_v39, 16  ;;  %v1705_v38 = vshll.u32 %v9807_v46, 16  ;;  %v1796_v51 = vshrl.u32 %v13692_v58, %v9554_v48  ;;  %v1683_v21 = vshll.u32 %v9827_v45, 16 }
 0x128   : > { %v501_v63 = vmul.f32 %v9821_v60, %v9653_v11  ;;  %v582_v43 = vmul.f32 %v9789_v50, %v546_v44  ;;  %v1840_v35 = vshrl.u32 %v9674_v33, 16  ;;  %v1862_v19 = vshrl.u32 %v9669_v41, 16 }
 0x129   : > { %v1701_v2 = vmul.u32 %v1699_v18, %v1675_v62  ;;  %v9858_v0 = vmul.u32 %v1699_v18, %v1676_v8  ;;  %v9862_v49 = vmul.f32 %v9839_v61, %v9839_v61  ;;  %v1817_v48 = vsel %vm1815_vm12, %v9598_v47, 2102212464 }
 0x12a   : > { %v1679_v15 = vmul.u32 %v1677_v57, %v1675_v62  ;;  %v9867_v11 = vmul.u32 %v1677_v57, %v1676_v8  ;;  %v9869_v44 = vadd.s32 %v1849_v34, %v1840_v35  ;;  %v1872_v33 = vadd.s32 %v1871_v31, %v1862_v19 }
 0x12b   : > { %vm1709_vm5 = vc.u32 %v1701_v2, %v1705_v38  ;;  %v9871_v36 = vadd.s32 %v1705_v38, %v1701_v2  ;;  %v598_v14 = vadd.f32 %v582_v43, %v501_v63  ;;  %v679_v52 = vmul.f32 %v9844_v5, %v643_v53 }
 0x12c   : > { %vm1687_vm6 = vc.u32 %v1679_v15, %v1683_v21  ;;  %v1689_v18 = vadd.s32 %v1683_v21, %v1679_v15  ;;  %v8309_v50 = vadd.s32 4294967294, %v1424_v9  ;;  %v1816_v60 = vsel %vm1812_vm13, %v1796_v51, %v9610_v3 }
 0x12d   : > { %v1818_v47 = vsel %vm1814_vm15, %v9596_v32, %v1817_v48  ;;  %v1707_v62 = vshll.u32 %v9858_v0, 16  ;;  %v13717_v57 = vshll.u32 %v9669_v41, 16  ;;  %v1685_v31 = vshll.u32 %v9867_v11, 16 }
 0x12e   : > { %v1710_v38 = vsel %vm1709_vm5, 1, %v13688_v29  ;;  %v9888_v9 = vadd.f32 %v679_v52, %v598_v14  ;;  %v1876_v21 = vadd.s32 1, %v1872_v33  ;;  %v1688_v3 = vsel %vm1687_vm6, 1, %v13688_v29 }
 0x12f   : > { %v9884_v34 = vadd.s32 %v9724_v25, %v13717_v57  ;;  %v13719_v51 = vshrl.u32 %v9768_v27, 16  ;;  %vm1713_vm12 = vc.u32 %v9871_v36, %v1707_v62  ;;  %v591_v32 = vadd.f32 %v9793_v54, %v494_v1 }
 0x130   : > { %13718 = vst [vmem:[#allocation47_spill] sm:$0xff] %v9888_v9  ;;  %v13720_v25 = vshrl.u32 %v9778_v20, 16  ;;  %vm1691_vm15 = vc.u32 %v1689_v18, %v1685_v31  ;;  %v8305_v52 = vadd.s32 4294967169, %v1168_v59  ;;  %v705_v14 = vand.u32 2139095040, %v9831_v4  ;;  %v627_v59 = vpop.permute.xlu0 %626 }
 0x131   : > { %v1704_v63 = vmul.u32 %v13719_v51, %v1676_v8  ;;  %vm1875_vm13 = vc.u32 %v9869_v44, %v9884_v34  ;;  %v1819_v27 = vsel %vm1813_vm9, %v1816_v60, %v1818_v47  ;;  %v9904_v35 = vadd.f32 %v672_v37, %v591_v32 }
 0x132   : > { %v1682_v41 = vmul.u32 %v13720_v25, %v1676_v8  ;;  %v1714_v2 = vsel %vm1713_vm12, 1, %v13688_v29  ;;  %v992_v54 = vmul.f32 -0.00019511016, %v9862_v49  ;;  %vm8310_vm5 = vcmp.lt.s32.totalorder %v8309_v50, 0 }
 0x133   : > { %v1712_v43 = vadd.s32 %v1710_v38, %v1704_v63  ;;  %v1877_v1 = vsel %vm1875_vm13, %v1876_v21, %v1872_v33  ;;  %v1692_v20 = vsel %vm1691_vm15, 1, %v13688_v29  ;;  %v1873_v8 = vmul.u32 %v9621_v17, %v1819_v27 }
 0x134   : > { %v1690_v19 = vadd.s32 %v1688_v3, %v1682_v41  ;;  %v1174_v53 = vadd.s32 1, %v8305_v52  ;;  %v706_v48 = vshrl.u32 %v705_v14, 23  ;;  %v985_v13 = vmul.f32 -0.001358992, %v9862_v49 }
 0x135   : > { %v1716_v15 = vadd.s32 %v1714_v2, %v1712_v43  ;;  %v9911_v60 = vsel %vm8310_vm5, 0, %v8309_v50  ;;  %v1878_v37 = vadd.s32 %v1877_v1, %v1873_v8  ;;  %v993_v47 = vadd.f32 0.008332121, %v992_v54 }
 0x136   : > { %v1694_v18 = vadd.s32 %v1692_v20, %v1690_v19  ;;  %v1013_v57 = vand.u32 2139095040, %v9904_v35  ;;  %v675_v31 = vmul.f32 %v9844_v5, %v627_v59  ;;  %v1706_v33 = vshrl.u32 %v9807_v46, 16 }
 0x137   : > { %v1684_v38 = vshrl.u32 %v9827_v45, 16  ;;  %vm1175_vm9 = vcmp.gt.s32.totalorder %v1174_v53, 0  ;;  %v1432_v17 = vsub.s32 4294967266, %v9911_v60  ;;  %v8296_v21 = vadd.s32 4294967169, %v706_v48 }
 0x138   : > { %v1717_v3 = vadd.s32 %v1716_v15, %v1706_v33  ;;  %v986_v51 = vadd.f32 0.041655596, %v985_v13  ;;  %v1879_v63 = vadd.s32 536870912, %v1878_v37  ;;  %v994_v32 = vmul.f32 %v993_v47, %v9862_v49 }
 0x139   : > { %v1695_v50 = vadd.s32 %v1694_v18, %v1684_v38  ;;  %v1014_v25 = vshrl.u32 %v1013_v57, 23  ;;  %v9920_v41 = vadd.f32 %v675_v31, %v9342_v23  ;;  %v1708_v52 = vshrl.u32 %v9858_v0, 16 }
 0x13a   : > { %v980_v46 = vsub.s32 4, %v9508_v42  ;;  %v1176_v14 = vsel %vm1175_vm9, %v1174_v53, 0  ;;  %v1686_v45 = vshrl.u32 %v9867_v11, 16  ;;  %v1433_v27 = vadd.s32 127, %v1432_v17 }
 0x13b   : > { %13721 = vst [vmem:[#allocation48_spill] sm:$0xff] %v9920_v41  ;;  %v712_v43 = vadd.s32 1, %v8296_v21  ;;  %v1663_v19 = vsel %vm1661_vm14, %v9731_v7, 2102212464  ;;  %v1718_v2 = vadd.s32 %v1717_v3, %v1708_v52  ;;  %v987_v54 = vmul.f32 %v986_v51, %v9862_v49  ;;  %v9967_v3 = vpop.permute.xlu0 %463 }
 0x13c   : > { %v9929_v1 = vshrl.u32 %v1879_v63, 30  ;;  %v1642_v23 = vshrl.u32 %v13692_v58, %v9698_v16  ;;  %v9933_v20 = vadd.s32 %v1695_v50, %v1686_v45  ;;  %v995_v8 = vadd.f32 -0.16666654, %v994_v32  ;;  %13723 = vst [vmem:[#allocation50_spill] sm:$0xff] %v9967_v3 }
 0x13d   : > { %v1428_v59 = vsub.s32 32, %v9911_v60  ;;  %v8302_v11 = vadd.s32 4294967169, %v1014_v25  ;;  %v1475_v53 = vand.u32 2139095040, %v9920_v41  ;;  %v1664_v48 = vsel %vm1660_vm3, %v9728_v28, %v1663_v19 }
 0x13e   : > { %13722 = vst [vmem:[#allocation49_spill] sm:$0xff] %v9929_v1  ;;  %v1662_v7 = vsel %vm1658_vm11, %v1642_v23, %v9726_v40  ;;  %v9946_v16 = vadd.s32 %v9871_v36, %v1707_v62  ;;  %v2091_v15 = vand.u32 2139095040, %v9888_v9  ;;  %v9949_v13 = vand.u32 31, %v1176_v14 }
 0x13f   : > { %v1412_v18 = vadd.s32 %v9550_v24, %v9545_v30  ;;  %v1434_v47 = vshll.u32 %v1433_v27, 23  ;;  %v1722_v57 = vadd.s32 1, %v1718_v2  ;;  %v981_v40 = vsel %vm858_vm8, %v980_v46, %v9508_v42  ;;  %v9981_v27 = vpop.permute.xlu2 %557 }
 0x140   : > { %v1881_v28 = vshll.u32 %v9929_v1, 30  ;;  %vm1721_vm3 = vc.u32 %v9933_v20, %v9946_v16  ;;  %v988_v36 = vadd.f32 -0.4999988, %v987_v54  ;;  %v1020_v62 = vadd.s32 1, %v8302_v11  ;;  %13725 = vst [vmem:[#allocation52_spill] sm:$0xff] %v9981_v27 }
 0x141   : > { %v1430_v0 = vshrl.u32 %v1412_v18, %v1428_v59  ;;  %v1665_v31 = vsel %vm1659_vm10, %v1662_v7, %v1664_v48  ;;  %v996_v33 = vmul.f32 %v995_v8, %v9862_v49  ;;  %vm713_vm11 = vcmp.gt.s32.totalorder %v712_v43, 0 }
 0x142   : > { %v1476_v30 = vshrl.u32 %v1475_v53, 23  ;;  %v2092_v24 = vshrl.u32 %v2091_v15, 23  ;;  %v9963_v38 = vsub.s32 32, %v9949_v13  ;;  %v1429_v42 = vshll.u32 %v9689_v22, %v9911_v60 }
 0x143   : > { %v1435_v17 = vor.u32 4788187, %v1434_v47  ;;  %v1723_v21 = vsel %vm1721_vm3, %v1722_v57, %v1718_v2  ;;  %v9971_v51 = vsel %vm9812_vm4, 0, %v981_v40  ;;  %v9973_v10 = vshrl.u32 %v1176_v14, 5 }
 0x144   : > { %13724 = vst [vmem:[#allocation51_spill] sm:$0xff] %v9971_v51  ;;  %v9975_v63 = vsub.s32 %v1878_v37, %v1881_v28  ;;  %v1719_v50 = vmul.u32 %v9737_v39, %v1665_v31  ;;  %v989_v32 = vmul.f32 %v988_v36, %v9862_v49  ;;  %v1431_v25 = vor.u32 %v1430_v0, %v1429_v42  ;;  %v10012_v36 = vpop.permute.xlu0 %478  ;;  %v13733_v42 = vld [vmem:[#allocation39_spill] sm:$0xff] }
 0x145   : > { %v714_v52 = vsel %vm713_vm11, %v712_v43, 0  ;;  %vm1021_vm14 = vcmp.gt.s32.totalorder %v1020_v62, 0  ;;  %v997_v22 = vadd.f32 1.0, %v996_v33  ;;  %v8311_v60 = vadd.s32 4294967169, %v1476_v30  ;;  %13730 = vst [vmem:[#allocation56_spill] sm:$0xff] %v10012_v36  ;;  %v13748_v36 = vld [vmem:[#allocation45_spill] sm:$0xff] }
 0x146   : > { %v9979_v46 = vadd.s32 %v1723_v21, %v1719_v50  ;;  %v8323_v45 = vadd.s32 4294967169, %v2092_v24  ;;  %v1190_v12 = vshll.u32 %v13695_v26, %v9949_v13  ;;  %v1191_v37 = vshrl.u32 %v13696_v6, %v9963_v38 }
 0x147   : > { %v1193_v39 = vshll.u32 %v13696_v6, %v9949_v13  ;;  %v1436_v49 = vand.u32 2147483647, %v1435_v17  ;;  %v13726_v14 = vmov 1326507024   ;;  %v9991_v19 = vand.u32 31, %v714_v52 }
 0x148   : > { %v1194_v43 = vshrl.u32 %v13726_v14, %v9963_v38  ;;  %v1022_v2 = vsel %vm1021_vm14, %v1020_v62, 0  ;;  %v1884_v54 = vsub.s32 0, %v9975_v63  ;;  %v9994_v23 = vadd.f32 1.0, %v989_v32 }
 0x149   : > { %v1000_v8 = vand.u32 3, %v9971_v51  ;;  %v1438_v59 = vcvt.s32.f32 %v1431_v25  ;;  %vm1883_vm10 = vcmp.lt.s32.totalorder %v9975_v63, 0  ;;  %v9999_v11 = vmul.f32 %v997_v22, %v9839_v61  ;;  %v10037_v25 = vpop.permute.xlu2 %561 }
 0x14a   : > { %13727 = vst [vmem:[#allocation53_spill] sm:$0xff] %v9994_v23  ;;  %v1482_v53 = vadd.s32 1, %v8311_v60  ;;  %v1725_v7 = vadd.s32 536870912, %v9979_v46  ;;  %v2098_v48 = vadd.s32 1, %v8323_v45  ;;  %v10002_v15 = vor.u32 %v1191_v37, %v1190_v12 }
 0x14b   : > { %13728 = vst [vmem:[#allocation54_spill] sm:$0xff] %v9999_v11  ;;  %v1439_v18 = vmul.f32 %v1438_v59, %v1436_v49  ;;  %v10004_v47 = vand.u32 31, %v1022_v2  ;;  %v1195_v57 = vor.u32 %v1194_v43, %v1193_v39  ;;  %vm1199_vm8 = vcmp.lt.s32.totalorder %v9973_v10, 4 }
 0x14c   : > { %v10008_v40 = vsub.s32 32, %v9991_v19  ;;  %v1885_v28 = vsel %vm1883_vm10, %v1884_v54, %v9975_v63  ;;  %vm1001_vm4 = vcmp.lt.s32.totalorder %v1000_v8, 2  ;;  %vm1002_vm6 = vcmp.eq.s32.totalorder %v1000_v8, 0  ;;  %13738 = vst [vmem:[#allocation60_spill] sm:$0xff] %v10037_v25 }
 0x14d   : > { %13729 = vst [vmem:[#allocation55_spill] sm:$0xff] %v10004_v47  ;;  %vm1005_vm12 = vcmp.eq.s32.totalorder %v1000_v8, 2  ;;  %v13508_v61 = vxor.u32 2147483648, %v9994_v23  ;;  %v13509_v0 = vxor.u32 2147483648, %v9999_v11  ;;  %vm1483_vm13 = vcmp.gt.s32.totalorder %v1482_v53, 0  ;;  %v13742_v8 = vld [vmem:[#allocation42_spill] sm:$0xff] }
 0x14e   : > { %v10015_v62 = vshrl.u32 %v1725_v7, 30  ;;  %vm2099_vm15 = vcmp.gt.s32.totalorder %v2098_v48, 0  ;;  %vm13554_vm5 = vweird.f32 %v9197_v55  ;;  %v10021_v31 = vsel %vm1199_vm8, %v10002_v15, 920167782 }
 0x14f   : > { %v1440_v33 = vxor.u32 2147483648, %v1439_v18  ;;  %v10024_v30 = vsub.s32 32, %v10004_v47  ;;  %v1886_v24 = vclz %v1885_v28  ;;  %v13734_v17 = vand.u32 2147483647, %v13733_v42 }
 0x150   : > { %13731 = vst [vmem:[#allocation57_spill] sm:$0xff] %v10015_v62  ;;  %v13735_v21 = vmov 0  ;;  %vm1320_vm3 = vcmp.lt.s32.totalorder %v13733_v42, 0  ;;  %v729_v50 = vshrl.u32 %v13696_v6, %v10008_v40  ;;  %v732_v32 = vshrl.u32 %v13726_v14, %v10008_v40 }
 0x151   : > { %13732 = vst [vmem:[#allocation58_spill] sm:$0xff] %v10024_v30  ;;  %vm10028_vm9 = vcmp.le.f32.partialorder %v13734_v17, 0.7853982  ;;  %v10039_v22 = vshrl.u32 %v714_v52, 5  ;;  %v728_v60 = vshll.u32 %v13695_v26, %v9991_v19  ;;  %v1484_v45 = vsel %vm1483_vm13, %v1482_v53, 0  ;;  %v651_v27 = vpop.permute.xlu2 %650 }
 0x152   : > { %v13736_v21 = vsel %vm10028_vm9, 4294967295, %v13735_v21  ;;  %v2100_v12 = vsel %vm2099_vm15, %v2098_v48, 0  ;;  %v1004_v37 = vsel %vm1002_vm6, %v9994_v23, %v13509_v0  ;;  %v1007_v39 = vsel %vm1005_vm12, %v13508_v61, %v9999_v11 }
 0x153   : > { %13737 = vst [vmem:[#allocation59_spill] sm:$0xff] %v13736_v21  ;;  %v731_v49 = vshll.u32 %v13696_v6, %v9991_v19  ;;  %v1727_v52 = vshll.u32 %v10015_v62, 30  ;;  %v1441_v43 = vsel %vm1320_vm3, %v1440_v33, %v1439_v18  ;;  %v1037_v54 = vshrl.u32 %v13696_v6, %v10024_v30 }
 0x154   : > { %v1040_v59 = vshrl.u32 %v13726_v14, %v10024_v30  ;;  %v8318_v53 = vadd.s32 4294967294, %v1886_v24  ;;  %v10060_v7 = vor.u32 %v729_v50, %v728_v60  ;;  %v10062_v28 = vand.u32 31, %v1484_v45 }
 0x155   : > { %v733_v48 = vor.u32 %v732_v32, %v731_v49  ;;  %v10064_v17 = vand.u32 31, %v2100_v12  ;;  %v1008_v61 = vsel %vm1001_vm4, %v1004_v37, %v1007_v39  ;;  %v10067_v0 = vshrl.u32 %v1022_v2, 5  ;;  %v554_v39 = vpop.permute.xlu0 %553 }
 0x156   : > { %13739 = vst [vmem:[#allocation61_spill] sm:$0xff] %v10062_v28  ;;  %v1036_v18 = vshll.u32 %v13695_v26, %v10004_v47  ;;  %v1039_v33 = vshll.u32 %v13696_v6, %v10004_v47  ;;  %v10075_v24 = vsel %vm1199_vm8, %v1195_v57, 1326507024  ;;  %v10080_v50 = vsel %vm10028_vm9, %v13733_v42, %v1441_v43 }
 0x157   : > { %13740 = vst [vmem:[#allocation62_spill] sm:$0xff] %v10067_v0  ;;  %vm737_vm11 = vcmp.lt.s32.totalorder %v10039_v22, 4  ;;  %v10084_v2 = vsub.s32 %v9979_v46, %v1727_v52  ;;  %v1442_v32 = vsub.s32 4, %v13742_v8  ;;  %vm8319_vm14 = vcmp.lt.s32.totalorder %v8318_v53, 0 }
 0x158   : > { %13741 = vst [vmem:[#allocation63_spill] sm:$0xff] %v10080_v50  ;;  %v10087_v60 = vor.u32 %v1037_v54, %v1036_v18  ;;  %v1041_v37 = vor.u32 %v1040_v59, %v1039_v33  ;;  %v10091_v57 = vsel %vm13554_vm5, nan, %v1008_v61  ;;  %v10096_v49 = vsel %vm737_vm11, %v10060_v7, 920167782  ;;  %v13747_v33 = vld [vmem:[#allocation46_spill] sm:$0xff] }
 0x159   : > { %13744 = vst [vmem:[#allocation64_spill] sm:$0xff] %v10091_v57  ;;  %v10099_v43 = vsub.s32 32, %v10062_v28  ;;  %v10102_v46 = vsub.s32 32, %v10064_v17  ;;  %v10106_v52 = vmul.f32 %v10080_v50, %v10080_v50  ;;  %v10110_v54 = vsel %vm737_vm11, %v733_v48, 1326507024 }
 0x15a   : > { %13743 = vst [vmem:[#allocation42_spill] sm:$0xff] %v10087_v60  ;;  %vm1045_vm10 = vcmp.lt.s32.totalorder %v10067_v0, 4  ;;  %v10114_v59 = vsel %vm8319_vm14, 0, %v8318_v53  ;;  %v1730_v18 = vsub.s32 0, %v10084_v2  ;;  %v503_v25 = vmul.f32 %v13747_v33, %v9772_v56 }
 0x15b   : > { %13745 = vst [vmem:[#allocation65_spill] sm:$0xff] %v10099_v43  ;;  %v584_v3 = vmul.f32 %v13748_v36, %v554_v39  ;;  %v10123_v62 = vsel %vm1320_vm3, %v1442_v32, %v13742_v8  ;;  %v10128_v48 = vsel %vm1045_vm10, %v10087_v60, 920167782  ;;  %v10132_v53 = vsel %vm1045_vm10, %v1041_v37, 1326507024 }
 0x15c   : > { %13746 = vst [vmem:[#allocation66_spill] sm:$0xff] %v10106_v52  ;;  %vm1729_vm4 = vcmp.lt.s32.totalorder %v10084_v2, 0  ;;  %v10135_v56 = vshrl.u32 %v1484_v45, 5  ;;  %v1498_v36 = vshll.u32 %v13695_v26, %v10062_v28  ;;  %v1499_v8 = vshrl.u32 %v13696_v6, %v10099_v43 }
 0x15d   : > { %13749 = vst [vmem:[#allocation46_spill] sm:$0xff] %v10123_v62  ;;  %v2118_v32 = vshrl.u32 %v13726_v14, %v10102_v46  ;;  %v1454_v39 = vmul.f32 -0.00019511016, %v10106_v52  ;;  %v1894_v33 = vsub.s32 4294967266, %v10114_v59  ;;  %v1501_v37 = vshll.u32 %v13696_v6, %v10062_v28 }
 0x15e   : > { %13750 = vst [vmem:[#allocation45_spill] sm:$0xff] %v10128_v48  ;;  %v681_v61 = vmul.f32 %v9844_v5, %v651_v27  ;;  %v1731_v45 = vsel %vm1729_vm4, %v1730_v18, %v10084_v2  ;;  %v2117_v1 = vshll.u32 %v13696_v6, %v10064_v17  ;;  %v600_v50 = vadd.f32 %v584_v3, %v503_v25 }
 0x15f   : > { %13751 = vst [vmem:[#allocation67_spill] sm:$0xff] %v10132_v53  ;;  %v10152_v57 = vshrl.u32 %v2100_v12, 5  ;;  %v13753_v55 = vmov 2131351028   ;;  %v2112_v11 = vshrl.u32 %v13695_v26, %v10102_v46  ;;  %v2115_v21 = vshrl.u32 %v13696_v6, %v10102_v46 }
 0x160   : > { %13752 = vst [vmem:[#allocation68_spill] sm:$0xff] %v10135_v56  ;;  %v2109_v23 = vshrl.u32 %v13753_v55, %v10102_v46  ;;  %v10160_v5 = vor.u32 %v1499_v8, %v1498_v36  ;;  %v1502_v27 = vshrl.u32 %v13726_v14, %v10099_v43  ;;  %vm1507_vm6 = vcmp.lt.s32.totalorder %v10135_v56, 4 }
 0x161   : > { %v2119_v18 = vor.u32 %v2118_v32, %v2117_v1  ;;  %v1732_v3 = vclz %v1731_v45  ;;  %v13755_v25 = vmov 2475754826   ;;  %v2111_v42 = vshll.u32 %v13753_v55, %v10064_v17 }
 0x162   : > { %13754 = vst [vmem:[#allocation69_spill] sm:$0xff] %v10160_v5  ;;  %v2108_v12 = vshll.u32 %v13755_v25, %v10064_v17  ;;  %v2114_v62 = vshll.u32 %v13695_v26, %v10064_v17  ;;  %v1895_v51 = vadd.s32 127, %v1894_v33  ;;  %v13756_v36 = vand.u32 2147483647, %v9888_v9 }
 0x163   : > { %v2106_v28 = vshrl.u32 %v13755_v25, %v10102_v46  ;;  %v10175_v43 = vadd.f32 %v681_v61, %v600_v50  ;;  %v2113_v32 = vor.u32 %v2112_v11, %v2111_v42  ;;  %vm2123_vm12 = vcmp.lt.s32.totalorder %v10152_v57, 4 }
 0x164   : > { %v2095_v8 = vand.u32 8388607, %v13756_v36  ;;  %v10177_v1 = vor.u32 %v2109_v23, %v2108_v12  ;;  %v2116_v45 = vor.u32 %v2115_v21, %v2114_v62  ;;  %v1455_v41 = vadd.f32 0.008332121, %v1454_v39 }
 0x165   : > { %13757 = vst [vmem:[#allocation70_spill] sm:$0xff] %v10175_v43  ;;  %v1890_v48 = vsub.s32 32, %v10114_v59  ;;  %v1503_v60 = vor.u32 %v1502_v27, %v1501_v37  ;;  %v2133_v33 = vsel %vm2123_vm12, %v2119_v18, 1326507024  ;;  %v1874_v36 = vadd.s32 %v9884_v34, %v9869_v44 }
 0x166   : > { %v10188_v50 = vsel %vm1507_vm6, %v10160_v5, 920167782  ;;  %v8315_v23 = vadd.s32 4294967294, %v1732_v3  ;;  %v2105_v11 = vshll.u32 %v13692_v58, %v10064_v17  ;;  %v1896_v62 = vshll.u32 %v1895_v51, 23 }
 0x167   : > { %13758 = vst [vmem:[#allocation71_spill] sm:$0xff] %v10188_v50  ;;  %vm2120_vm13 = vcmp.lt.s32.totalorder %v10152_v57, 1  ;;  %vm2122_vm15 = vcmp.lt.s32.totalorder %v10152_v57, 3  ;;  %v2399_v42 = vand.u32 2139095040, %v10175_v43  ;;  %v2096_v21 = vor.u32 8388608, %v2095_v8 }
 0x168   : > { %v2107_v61 = vor.u32 %v2106_v28, %v2105_v11  ;;  %v2132_v44 = vsel %vm2120_vm13, %v10177_v1, %v2113_v32  ;;  %v2134_v34 = vsel %vm2122_vm15, %v2116_v45, %v2133_v33  ;;  %v10201_v39 = vmul.f32 %v1455_v41, %v10106_v52 }
 0x169   : > { %v1891_v51 = vshll.u32 %v9975_v63, %v10114_v59  ;;  %v1892_v17 = vshrl.u32 %v1874_v36, %v1890_v48  ;;  %v2129_v37 = vsel %vm2123_vm12, %v2116_v45, 920167782  ;;  %vm8316_vm3 = vcmp.lt.s32.totalorder %v8315_v23, 0 }
 0x16a   : > { %13759 = vst [vmem:[#allocation72_spill] sm:$0xff] %v10201_v39  ;;  %vm2121_vm14 = vcmp.lt.s32.totalorder %v10152_v57, 2  ;;  %v13760_v28 = vand.u32 2147483647, %v9831_v4  ;;  %v720_v18 = vshrl.u32 %v13755_v25, %v10008_v40  ;;  %v10212_v3 = vor.u32 4788187, %v1896_v62 }
 0x16b   : > { %v2135_v41 = vsel %vm2121_vm14, %v2132_v44, %v2134_v34  ;;  %v2400_v12 = vshrl.u32 %v2399_v42, 23  ;;  %v723_v63 = vshrl.u32 %v13753_v55, %v10008_v40  ;;  %v2128_v59 = vsel %vm2120_vm13, %v2107_v61, %v10177_v1 }
 0x16c   : > { %v709_v27 = vand.u32 8388607, %v13760_v28  ;;  %v2130_v48 = vsel %vm2122_vm15, %v2113_v32, %v2129_v37  ;;  %v10223_v8 = vshll.u32 %v2096_v21, 8  ;;  %v719_v45 = vshll.u32 %v13692_v58, %v9991_v19 }
 0x16d   : > { %v10229_v33 = vsel %vm1507_vm6, %v1503_v60, 1326507024  ;;  %v1735_v36 = vsel %vm8316_vm3, 0, %v8315_v23  ;;  %v722_v11 = vshll.u32 %v13755_v25, %v9991_v19  ;;  %v726_v62 = vshrl.u32 %v13695_v26, %v10008_v40 }
 0x16e   : > { %13761 = vst [vmem:[#allocation73_spill] sm:$0xff] %v10229_v33  ;;  %v10235_v42 = vor.u32 %v1892_v17, %v1891_v51  ;;  %v1720_v21 = vadd.s32 %v9946_v16, %v9933_v20  ;;  %v2140_v44 = vshrl.u32 %v2135_v41, 16  ;;  %v10239_v34 = vor.u32 %v720_v18, %v719_v45 }
 0x16f   : > { %v2131_v37 = vsel %vm2121_vm14, %v2128_v59, %v2130_v48  ;;  %v8329_v60 = vadd.s32 4294967169, %v2400_v12  ;;  %v10243_v28 = vor.u32 %v723_v63, %v722_v11  ;;  %v725_v23 = vshll.u32 %v13753_v55, %v9991_v19 }
 0x170   : > { %v1740_v52 = vsub.s32 4294967266, %v1735_v36  ;;  %v2137_v51 = vand.u32 65535, %v10223_v8  ;;  %v710_v17 = vor.u32 8388608, %v709_v27  ;;  %v2104_v20 = vshrl.u32 %v13692_v58, %v10102_v46 }
 0x171   : > { %v10253_v16 = vshrl.u32 %v13692_v58, %v10008_v40  ;;  %v10255_v18 = vor.u32 %v726_v62, %v725_v23  ;;  %vm734_vm4 = vcmp.lt.s32.totalorder %v10039_v22, 1  ;;  %v1736_v12 = vsub.s32 32, %v1735_v36 }
 0x172   : > { %v2125_v19 = vsel %vm2123_vm12, %v2113_v32, 2102212464  ;;  %v10260_v63 = vmul.u32 %v2140_v44, %v2137_v51  ;;  %v2162_v59 = vshrl.u32 %v2131_v37, 16  ;;  %v2138_v27 = vshrl.u32 %v10223_v8, 16 }
 0x173   : > { %v2139_v48 = vand.u32 65535, %v2135_v41  ;;  %v10263_v45 = vadd.s32 1, %v8329_v60  ;;  %v742_v40 = vsel %vm734_vm4, %v10239_v34, %v10243_v28  ;;  %v1741_v46 = vadd.s32 127, %v1740_v52 }
 0x174   : > { %v10271_v11 = vsel %vm2120_vm13, %v2104_v20, %v2107_v61  ;;  %vm735_vm12 = vcmp.lt.s32.totalorder %v10039_v22, 2  ;;  %vm736_vm3 = vcmp.lt.s32.totalorder %v10039_v22, 3  ;;  %v1737_v32 = vshll.u32 %v10084_v2, %v1735_v36 }
 0x175   : > { %v10279_v41 = vsel %vm2122_vm15, %v10177_v1, %v2125_v19  ;;  %v2161_v62 = vand.u32 65535, %v2131_v37  ;;  %v744_v52 = vsel %vm736_vm3, %v10255_v18, %v10096_v49  ;;  %v1738_v60 = vshrl.u32 %v1720_v21, %v1736_v12 }
 0x176   : > { %v2145_v61 = vshll.u32 %v10260_v63, 16  ;;  %v10286_v23 = vmul.u32 %v2162_v59, %v2137_v51  ;;  %v745_v20 = vsel %vm735_vm12, %v742_v40, %v744_v52  ;;  %v2141_v2 = vmul.u32 %v2139_v48, %v2137_v51 }
 0x177   : > { %v746_v1 = vsel %vm734_vm4, %v10243_v28, %v10255_v18  ;;  %v748_v36 = vsel %vm736_vm3, %v10060_v7, %v10110_v54  ;;  %v10298_v49 = vshll.u32 %v710_v17, 8  ;;  %v1742_v21 = vshll.u32 %v1741_v46, 23 }
 0x178   : > { %v10300_v37 = vmul.u32 %v2139_v48, %v2138_v27  ;;  %v749_v12 = vsel %vm735_vm12, %v746_v1, %v748_v36  ;;  %v776_v19 = vshrl.u32 %v745_v20, 16  ;;  %v1739_v50 = vor.u32 %v1738_v60, %v1737_v32 }
 0x179   : > { %v751_v40 = vand.u32 65535, %v10298_v49  ;;  %v752_v52 = vshrl.u32 %v10298_v49, 16  ;;  %v753_v9 = vand.u32 65535, %v749_v12  ;;  %v754_v39 = vshrl.u32 %v749_v12, 16 }
 0x17a   : > { %v2144_v5 = vmul.u32 %v2140_v44, %v2138_v27  ;;  %v2151_v33 = vadd.s32 %v2145_v61, %v2141_v2  ;;  %v2167_v7 = vshll.u32 %v10286_v23, 16  ;;  %vm2149_vm13 = vc.u32 %v2141_v2, %v2145_v61 }
 0x17b   : > { %v2163_v54 = vmul.u32 %v2161_v62, %v2137_v51  ;;  %v756_v17 = vmul.u32 %v754_v39, %v751_v40  ;;  %v757_v48 = vmul.u32 %v753_v9, %v752_v52  ;;  %v1743_v46 = vor.u32 4788187, %v1742_v21 }
 0x17c   : > { %v2147_v56 = vshll.u32 %v10300_v37, 16  ;;  %v775_v1 = vand.u32 65535, %v745_v20  ;;  %v778_v36 = vmul.u32 %v776_v19, %v751_v40  ;;  %v10308_v53 = vmul.u32 %v2161_v62, %v2138_v27 }
 0x17d   : > { %v2166_v0 = vmul.u32 %v2162_v59, %v2138_v27  ;;  %v755_v47 = vmul.u32 %v753_v9, %v751_v40  ;;  %v759_v30 = vshll.u32 %v756_v17, 16  ;;  %v2150_v32 = vsel %vm2149_vm13, 1, %v13688_v29 }
 0x17e   : > { %vm10311_vm15 = vc.u32 %v2151_v33, %v2147_v56  ;;  %vm10315_vm7 = vc.u32 %v2163_v54, %v2167_v7  ;;  %v10319_v60 = vadd.s32 %v2167_v7, %v2163_v54  ;;  %v758_v61 = vmul.u32 %v754_v39, %v752_v52 }
 0x17f   : > { %v761_v20 = vshll.u32 %v757_v48, 16  ;;  %vm763_vm2 = vc.u32 %v755_v47, %v759_v30  ;;  %v765_v62 = vadd.s32 %v759_v30, %v755_v47  ;;  %v1744_v2 = vand.u32 2147483647, %v1743_v46 }
 0x180   : > { %v764_v9 = vsel %vm763_vm2, 1, %v13688_v29  ;;  %v779_v59 = vmul.u32 %v775_v1, %v752_v52  ;;  %v781_v27 = vshll.u32 %v778_v36, 16  ;;  %v2169_v56 = vshll.u32 %v10308_v53, 16 }
 0x181   : > { %v766_v33 = vadd.s32 %v764_v9, %v758_v61  ;;  %vm767_vm13 = vc.u32 %v765_v62, %v761_v20  ;;  %v777_v21 = vmul.u32 %v775_v1, %v751_v40  ;;  %v2152_v12 = vadd.s32 %v2150_v32, %v2144_v5  ;;  %v13766_v20 = vld [vmem:[#allocation41_spill] sm:$0xff] }
 0x182   : > { %v2154_v7 = vsel %vm10311_vm15, 1, %v13688_v29  ;;  %v2172_v39 = vsel %vm10315_vm7, 1, %v13688_v29  ;;  %v768_v47 = vsel %vm767_vm13, 1, %v13688_v29  ;;  %vm2175_vm2 = vc.u32 %v10319_v60, %v2169_v56 }
 0x183   : > { %v770_v30 = vadd.s32 %v768_v47, %v766_v33  ;;  %v780_v54 = vmul.u32 %v776_v19, %v752_v52  ;;  %vm785_vm1 = vc.u32 %v777_v21, %v781_v27  ;;  %v760_v46 = vshrl.u32 %v756_v17, 16 }
 0x184   : > { %v783_v61 = vshll.u32 %v779_v59, 16  ;;  %v786_v40 = vsel %vm785_vm1, 1, %v13688_v29  ;;  %v787_v5 = vadd.s32 %v781_v27, %v777_v21  ;;  %v1746_v1 = vcvt.s32.f32 %v1739_v50 }
 0x185   : > { %v2174_v32 = vadd.s32 %v2172_v39, %v2166_v0  ;;  %vm2407_vm15 = vcmp.gt.s32.totalorder %v10263_v45, 0  ;;  %v788_v44 = vadd.s32 %v786_v40, %v780_v54  ;;  %vm13548_vm0 = vcmp.lt.s32.totalorder %v13766_v20, 0 }
 0x186   : > { %v10338_v51 = vsel %vm2121_vm14, %v10271_v11, %v10279_v41  ;;  %v2176_v19 = vsel %vm2175_vm2, 1, %v13688_v29  ;;  %v771_v52 = vadd.s32 %v770_v30, %v760_v46  ;;  %vm789_vm7 = vc.u32 %v787_v5, %v783_v61  ;;  %v13770_v46 = vld [vmem:[#allocation43_spill] sm:$0xff] }
 0x187   : > { %v1747_v17 = vmul.f32 %v1746_v1, %v1744_v2  ;;  %v2156_v62 = vadd.s32 %v2154_v7, %v2152_v12  ;;  %v739_v0 = vsel %vm737_vm11, %v10255_v18, 2102212464  ;;  %v790_v50 = vsel %vm789_vm7, 1, %v13688_v29 }
 0x188   : > { %v13549_v9 = vand.u32 2147483647, %v10175_v43  ;;  %v762_v27 = vshrl.u32 %v757_v48, 16  ;;  %v782_v33 = vshrl.u32 %v778_v36, 16  ;;  %v792_v21 = vadd.s32 %v790_v50, %v788_v44 }
 0x189   : > { %v2146_v57 = vshrl.u32 %v10260_v63, 16  ;;  %v2178_v11 = vadd.s32 %v2176_v19, %v2174_v32  ;;  %v2408_v41 = vsel %vm2407_vm15, %v10263_v45, 0  ;;  %v738_v2 = vsel %vm734_vm4, %v10253_v16, %v10239_v34 }
 0x18a   : > { %v13767_v18 = vand.u32 2147483647, %v13766_v20  ;;  %v740_v63 = vsel %vm736_vm3, %v10243_v28, %v739_v0  ;;  %v10363_v48 = vadd.s32 %v771_v52, %v762_v27  ;;  %v784_v36 = vshrl.u32 %v779_v59, 16 }
 0x18b   : > { %v793_v7 = vadd.s32 %v792_v21, %v782_v33  ;;  %v1900_v45 = vcvt.s32.f32 %v10235_v42  ;;  %v1748_v39 = vxor.u32 2147483648, %v1747_v17  ;;  %v2157_v47 = vadd.s32 %v2156_v62, %v2146_v57 }
 0x18c   : > { %vm10356_vm1 = vcmp.le.f32.partialorder %v13767_v18, 0.7853982  ;;  %v2168_v34 = vshrl.u32 %v10286_v23, 16  ;;  %v2410_v16 = vand.u32 31, %v2408_v41  ;;  %v10367_v30 = vadd.s32 %v787_v5, %v783_v61 }
 0x18d   : > { %v794_v54 = vadd.s32 %v793_v7, %v784_v36  ;;  %v13550_v40 = vand.u32 2147483647, %v13770_v46  ;;  %v13771_v1 = vand.u32 2147483647, %v10212_v3  ;;  %v2148_v28 = vshrl.u32 %v10300_v37, 16 }
 0x18e   : > { %v2181_v59 = vmul.u32 %v10223_v8, %v10338_v51  ;;  %v741_v42 = vsel %vm735_vm12, %v738_v2, %v740_v63  ;;  %v2170_v23 = vshrl.u32 %v10308_v53, 16  ;;  %v2179_v44 = vadd.s32 %v2178_v11, %v2168_v34 }
 0x18f   : > { %v10372_v32 = vmul.f32 %v1900_v45, %v13771_v1  ;;  %v10382_v61 = vand.u32 8388607, %v13549_v9  ;;  %vm797_vm11 = vc.u32 %v10363_v48, %v10367_v30  ;;  %v1749_v3 = vsel %vm13548_vm0, %v1748_v39, %v1747_v17 }
 0x190   : > { %v10388_v37 = vadd.s32 %v2157_v47, %v2148_v28  ;;  %v10391_v5 = vadd.s32 %v10319_v60, %v2169_v56  ;;  %v798_v22 = vadd.s32 1, %v794_v54  ;;  %v2411_v19 = vsub.s32 32, %v2410_v16 }
 0x191   : > { %v795_v53 = vmul.u32 %v10298_v49, %v741_v42  ;;  %v1171_v52 = vand.u32 8388607, %v13550_v40  ;;  %v1185_v62 = vshrl.u32 %v13753_v55, %v9963_v38  ;;  %v1184_v50 = vshll.u32 %v13755_v25, %v9949_v13 }
 0x192   : > { %13772 = vst [vmem:[#allocation43_spill] sm:$0xff] %v10388_v37  ;;  %v799_v0 = vsel %vm797_vm11, %v798_v22, %v794_v54  ;;  %v1187_v17 = vshll.u32 %v13753_v55, %v9949_v13  ;;  %v1188_v60 = vshrl.u32 %v13695_v26, %v9963_v38  ;;  %v2180_v56 = vadd.s32 %v2179_v44, %v2170_v23 }
 0x193   : > { %13773 = vst [vmem:[#allocation74_spill] sm:$0xff] %v10391_v5  ;;  %v10405_v49 = vshrl.u32 %v2408_v41, 5  ;;  %v800_v33 = vadd.s32 %v799_v0, %v795_v53  ;;  %v10410_v21 = vsel %vm10356_vm1, %v13766_v20, %v1749_v3  ;;  %v2413_v57 = vshll.u32 %v13692_v58, %v2410_v16 }
 0x194   : > { %13774 = vst [vmem:[#allocation75_spill] sm:$0xff] %v10410_v21  ;;  %v10413_v11 = vor.u32 %v1185_v62, %v1184_v50  ;;  %v10415_v2 = vor.u32 %v1188_v60, %v1187_v17  ;;  %vm2183_vm14 = vc.u32 %v10388_v37, %v10391_v5  ;;  %v2416_v18 = vshll.u32 %v13755_v25, %v2410_v16 }
 0x195   : > { %v2419_v41 = vshll.u32 %v13753_v55, %v2410_v16  ;;  %v801_v63 = vadd.s32 536870912, %v800_v33  ;;  %v2414_v36 = vshrl.u32 %v13755_v25, %v2411_v19  ;;  %v2417_v7 = vshrl.u32 %v13753_v55, %v2411_v19 }
 0x196   : > { %v1172_v45 = vor.u32 8388608, %v1171_v52  ;;  %v1182_v39 = vshrl.u32 %v13755_v25, %v9963_v38  ;;  %v2184_v47 = vadd.s32 1, %v2180_v56  ;;  %v2420_v34 = vshrl.u32 %v13695_v26, %v2411_v19 }
 0x197   : > { %vm2428_vm4 = vcmp.lt.s32.totalorder %v10405_v49, 1  ;;  %v10427_v54 = vshrl.u32 %v801_v63, 30  ;;  %vm1196_vm12 = vcmp.lt.s32.totalorder %v9973_v10, 1  ;;  %v2422_v1 = vshll.u32 %v13695_v26, %v2410_v16 }
 0x198   : > { %v2423_v28 = vshrl.u32 %v13696_v6, %v2411_v19  ;;  %v1181_v42 = vshll.u32 %v13692_v58, %v9949_v13  ;;  %v1208_v23 = vsel %vm1196_vm12, %v10413_v11, %v10415_v2  ;;  %v2412_v44 = vshrl.u32 %v13692_v58, %v2411_v19 }
 0x199   : > { %v2425_v3 = vshll.u32 %v13696_v6, %v2410_v16  ;;  %v803_v22 = vshll.u32 %v10427_v54, 30  ;;  %vm1198_vm3 = vcmp.lt.s32.totalorder %v9973_v10, 3  ;;  %vm1197_vm13 = vcmp.lt.s32.totalorder %v9973_v10, 2 }
 0x19a   : > { %v10442_v53 = vor.u32 %v1182_v39, %v1181_v42  ;;  %v1210_v13 = vsel %vm1198_vm3, %v10002_v15, %v10075_v24  ;;  %v10449_v52 = vshll.u32 %v1172_v45, 8  ;;  %v2415_v62 = vor.u32 %v2414_v36, %v2413_v57 }
 0x19b   : > { %v2418_v0 = vor.u32 %v2417_v7, %v2416_v18  ;;  %v804_v50 = vsub.s32 %v800_v33, %v803_v22  ;;  %v1211_v16 = vsel %vm1197_vm13, %v1208_v23, %v1210_v13  ;;  %v2185_v17 = vsel %vm2183_vm14, %v2184_v47, %v2180_v56 }
 0x19c   : > { %v2421_v60 = vor.u32 %v2420_v34, %v2419_v41  ;;  %v2424_v63 = vor.u32 %v2423_v28, %v2422_v1  ;;  %v2426_v39 = vshrl.u32 %v13726_v14, %v2411_v19  ;;  %vm2431_vm2 = vcmp.lt.s32.totalorder %v10405_v49, 4 }
 0x19d   : > { %vm805_vm15 = vcmp.lt.s32.totalorder %v804_v50, 0  ;;  %v806_v15 = vsub.s32 0, %v804_v50  ;;  %v1215_v24 = vand.u32 65535, %v1211_v16  ;;  %v1204_v33 = vsel %vm1196_vm12, %v10442_v53, %v10413_v11 }
 0x19e   : > { %v1206_v57 = vsel %vm1198_vm3, %v10415_v2, %v10021_v31  ;;  %v1213_v56 = vand.u32 65535, %v10449_v52  ;;  %v1216_v18 = vshrl.u32 %v1211_v16, 16  ;;  %v10470_v19 = vadd.s32 %v2185_v17, %v2181_v59 }
 0x19f   : > { %v2433_v41 = vsel %vm2431_vm2, %v2421_v60, 2102212464  ;;  %v807_v36 = vsel %vm805_vm15, %v806_v15, %v804_v50  ;;  %v1214_v7 = vshrl.u32 %v10449_v52, 16  ;;  %vm2429_vm7 = vcmp.lt.s32.totalorder %v10405_v49, 2 }
 0x1a0   : > { %vm2430_vm11 = vcmp.lt.s32.totalorder %v10405_v49, 3  ;;  %v2437_v31 = vsel %vm2431_vm2, %v2424_v63, 920167782  ;;  %v808_v45 = vclz %v807_v36  ;;  %v1218_v47 = vmul.u32 %v1216_v18, %v1213_v56 }
 0x1a1   : > { %v10481_v8 = vmul.f32 %v10410_v21, %v10410_v21  ;;  %v10485_v51 = vsel %vm2428_vm4, %v2412_v44, %v2415_v62  ;;  %v1207_v59 = vsel %vm1197_vm13, %v1204_v33, %v1206_v57  ;;  %v10489_v34 = vmul.u32 %v1215_v24, %v1214_v7 }
 0x1a2   : > { %v2427_v1 = vor.u32 %v2426_v39, %v2425_v3  ;;  %v10493_v28 = vsel %vm2430_vm11, %v2418_v0, %v2433_v41  ;;  %v2436_v42 = vsel %vm2428_vm4, %v2415_v62, %v2418_v0  ;;  %v8297_v23 = vadd.s32 4294967294, %v808_v45 }
 0x1a3   : > { %v10498_v22 = vadd.s32 536870912, %v10470_v19  ;;  %v2438_v44 = vsel %vm2430_vm11, %v2421_v60, %v2437_v31  ;;  %v1217_v13 = vmul.u32 %v1215_v24, %v1213_v56  ;;  %v1221_v16 = vshll.u32 %v1218_v47, 16 }
 0x1a4   : > { %vm8298_vm14 = vcmp.lt.s32.totalorder %v8297_v23, 0  ;;  %v1220_v17 = vmul.u32 %v1216_v18, %v1214_v7  ;;  %v1237_v15 = vand.u32 65535, %v1207_v59  ;;  %v1238_v3 = vshrl.u32 %v1207_v59, 16 }
 0x1a5   : > { %v811_v39 = vsel %vm8298_vm14, 0, %v8297_v23  ;;  %v1223_v33 = vshll.u32 %v10489_v34, 16  ;;  %vm1225_vm15 = vc.u32 %v1217_v13, %v1221_v16  ;;  %v1227_v57 = vadd.s32 %v1221_v16, %v1217_v13 }
 0x1a6   : > { %v796_v62 = vadd.s32 %v10367_v30, %v10363_v48  ;;  %v812_v41 = vsub.s32 32, %v811_v39  ;;  %v816_v36 = vsub.s32 4294967266, %v811_v39  ;;  %v1226_v45 = vsel %vm1225_vm15, 1, %v13688_v29 }
 0x1a7   : > { %v2441_v24 = vsel %vm2431_vm2, %v2427_v1, 1326507024  ;;  %v1228_v31 = vadd.s32 %v1226_v45, %v1220_v17  ;;  %vm1229_vm0 = vc.u32 %v1227_v57, %v1223_v33  ;;  %v1240_v18 = vmul.u32 %v1238_v3, %v1213_v56 }
 0x1a8   : > { %v813_v9 = vshll.u32 %v804_v50, %v811_v39  ;;  %v814_v59 = vshrl.u32 %v796_v62, %v812_v41  ;;  %v817_v23 = vadd.s32 127, %v816_v36  ;;  %v1230_v40 = vsel %vm1229_vm0, 1, %v13688_v29 }
 0x1a9   : > { %v2440_v13 = vsel %vm2428_vm4, %v2418_v0, %v2421_v60  ;;  %v1239_v16 = vmul.u32 %v1237_v15, %v1213_v56  ;;  %v1241_v48 = vmul.u32 %v1237_v15, %v1214_v7  ;;  %v1243_v30 = vshll.u32 %v1240_v18, 16 }
 0x1aa   : > { %v2442_v27 = vsel %vm2430_vm11, %v2424_v63, %v2441_v24  ;;  %v815_v43 = vor.u32 %v814_v59, %v813_v9  ;;  %v818_v14 = vshll.u32 %v817_v23, 23  ;;  %v1232_v1 = vadd.s32 %v1230_v40, %v1228_v31  ;;  %v13783_v9 = vld [vmem:[#allocation42_spill] sm:$0xff] }
 0x1ab   : > { %v10515_v17 = vsel %vm2429_vm7, %v2436_v42, %v2438_v44  ;;  %v13775_v50 = vor.u32 8388608, %v10382_v61  ;;  %vm704_vm0 = vcmp.lt.s32.totalorder %v9831_v4, 0  ;;  %v1242_v0 = vmul.u32 %v1238_v3, %v1214_v7 }
 0x1ac   : > { %vm1247_vm4 = vc.u32 %v1239_v16, %v1243_v30  ;;  %v2469_v60 = vand.u32 65535, %v10515_v17  ;;  %v13776_v56 = vand.u32 2147483647, %v9831_v4  ;;  %v819_v40 = vor.u32 4788187, %v818_v14 }
 0x1ad   : > { %v10519_v39 = vshll.u32 %v13775_v50, 8  ;;  %v1222_v63 = vshrl.u32 %v1218_v47, 16  ;;  %v1248_v42 = vsel %vm1247_vm4, 1, %v13688_v29  ;;  %v10532_v61 = vsel %vm2429_vm7, %v2440_v13, %v2442_v27  ;;  %v13779_v50 = vld [vmem:[#allocation58_spill] sm:$0xff] }
 0x1ae   : > { %vm10525_vm2 = vcmp.le.f32.partialorder %v13776_v56, 0.7853982  ;;  %v1245_v44 = vshll.u32 %v1241_v48, 16  ;;  %v1249_v15 = vadd.s32 %v1243_v30, %v1239_v16  ;;  %v1250_v7 = vadd.s32 %v1248_v42, %v1242_v0 }
 0x1af   : > { %v820_v3 = vand.u32 2147483647, %v819_v40  ;;  %v822_v33 = vcvt.s32.f32 %v815_v43  ;;  %v1201_v57 = vsel %vm1199_vm8, %v10415_v2, 2102212464  ;;  %v1233_v62 = vadd.s32 %v1232_v1, %v1222_v63  ;;  %v13780_v63 = vld [vmem:[#allocation55_spill] sm:$0xff] }
 0x1b0   : > { %v10538_v41 = vand.u32 65535, %v10519_v39  ;;  %v10541_v14 = vshrl.u32 %v10519_v39, 16  ;;  %v1180_v27 = vshrl.u32 %v13692_v58, %v9963_v38  ;;  %vm1251_vm11 = vc.u32 %v1249_v15, %v1245_v44 }
 0x1b1   : > { %v2470_v47 = vshrl.u32 %v10515_v17, 16  ;;  %v823_v36 = vmul.f32 %v822_v33, %v820_v3  ;;  %v1224_v43 = vshrl.u32 %v10489_v34, 16  ;;  %v1252_v45 = vsel %vm1251_vm11, 1, %v13688_v29 }
 0x1b2   : > { %v1200_v2 = vsel %vm1196_vm12, %v1180_v27, %v10442_v53  ;;  %v1202_v24 = vsel %vm1198_vm3, %v10413_v11, %v1201_v57  ;;  %v1244_v31 = vshrl.u32 %v1240_v18, 16  ;;  %v1254_v59 = vadd.s32 %v1252_v45, %v1250_v7 }
 0x1b3   : > { %v2447_v38 = vand.u32 65535, %v10532_v61  ;;  %v824_v23 = vxor.u32 2147483648, %v823_v36  ;;  %v826_v13 = vsub.s32 4, %v10427_v54  ;;  %v10556_v16 = vadd.s32 %v1233_v62, %v1224_v43 }
 0x1b4   : > { %v1246_v34 = vshrl.u32 %v1241_v48, 16  ;;  %v1255_v30 = vadd.s32 %v1254_v59, %v1244_v31  ;;  %v13555_v1 = vand.u32 2147483647, %v9904_v35  ;;  %v1031_v53 = vshrl.u32 %v13753_v55, %v13779_v50 }
 0x1b5   : > { %v825_v0 = vsel %vm704_vm0, %v824_v23, %v823_v36  ;;  %v1203_v11 = vsel %vm1197_vm13, %v1200_v2, %v1202_v24  ;;  %v10565_v18 = vadd.s32 %v1249_v15, %v1245_v44  ;;  %v1034_v56 = vshrl.u32 %v13695_v26, %v13779_v50  ;;  %v13781_v24 = vld [vmem:[#allocation62_spill] sm:$0xff] }
 0x1b6   : > { %v828_v48 = vsel %vm10525_vm2, %v9831_v4, %v825_v0  ;;  %v1256_v40 = vadd.s32 %v1255_v30, %v1246_v34  ;;  %v1030_v42 = vshll.u32 %v13755_v25, %v13780_v63  ;;  %v1033_v7 = vshll.u32 %v13753_v55, %v13780_v63  ;;  %v13782_v30 = vld [vmem:[#allocation67_spill] sm:$0xff] }
 0x1b7   : > { %v2448_v3 = vshrl.u32 %v10532_v61, 16  ;;  %v827_v10 = vsel %vm704_vm0, %v826_v13, %v10427_v54  ;;  %v830_v44 = vmul.f32 %v828_v48, %v828_v48  ;;  %vm1259_vm8 = vc.u32 %v10556_v16, %v10565_v18 }
 0x1b8   : > { %v1260_v15 = vadd.s32 1, %v1256_v40  ;;  %v1017_v33 = vand.u32 8388607, %v13555_v1  ;;  %v10584_v57 = vor.u32 %v1031_v53, %v1030_v42  ;;  %v10586_v62 = vor.u32 %v1034_v56, %v1033_v7 }
 0x1b9   : > { %v10589_v27 = vmul.u32 %v2469_v60, %v10538_v41  ;;  %v831_v61 = vmul.f32 -0.001358992, %v830_v44  ;;  %v838_v36 = vmul.f32 -0.00019511016, %v830_v44  ;;  %v1257_v43 = vmul.u32 %v10449_v52, %v1203_v11 }
 0x1ba   : > { %v10595_v54 = vmul.u32 %v2470_v47, %v10538_v41  ;;  %v829_v45 = vsel %vm10525_vm2, 0, %v827_v10  ;;  %v1261_v2 = vsel %vm1259_vm8, %v1260_v15, %v1256_v40  ;;  %vm1042_vm12 = vcmp.lt.s32.totalorder %v13781_v24, 1 }
 0x1bb   : > { %v832_v31 = vadd.f32 0.041655596, %v831_v61  ;;  %v839_v59 = vadd.f32 0.008332121, %v838_v36  ;;  %v1262_v23 = vadd.s32 %v1261_v2, %v1257_v43  ;;  %vm1044_vm3 = vcmp.lt.s32.totalorder %v13781_v24, 3 }
 0x1bc   : > { %v10602_v13 = vmul.u32 %v2469_v60, %v10541_v14  ;;  %v1018_v52 = vor.u32 8388608, %v1017_v33  ;;  %v1054_v34 = vsel %vm1042_vm12, %v10584_v57, %v10586_v62  ;;  %v1056_v53 = vsel %vm1044_vm3, %v13783_v9, %v13782_v30 }
 0x1bd   : > { %v833_v0 = vmul.f32 %v832_v31, %v830_v44  ;;  %v840_v11 = vmul.f32 %v839_v59, %v830_v44  ;;  %v1263_v56 = vadd.s32 536870912, %v1262_v23  ;;  %v1028_v40 = vshrl.u32 %v13755_v25, %v13779_v50 }
 0x1be   : > { %v846_v42 = vand.u32 3, %v829_v45  ;;  %v3310_v60 = vadd.s32 3, %v829_v45  ;;  %v1027_v7 = vshll.u32 %v13692_v58, %v13780_v63  ;;  %vm1043_vm13 = vcmp.lt.s32.totalorder %v13781_v24, 2 }
 0x1bf   : > { %v834_v10 = vadd.f32 -0.4999988, %v833_v0  ;;  %v841_v15 = vadd.f32 -0.16666654, %v840_v11  ;;  %v10617_v33 = vshrl.u32 %v1263_v56, 30  ;;  %v1057_v61 = vsel %vm1043_vm13, %v1054_v34, %v1056_v53 }
 0x1c0   : > { %v10622_v36 = vmul.u32 %v2447_v38, %v10538_v41  ;;  %v10625_v43 = vmul.u32 %v2448_v3, %v10538_v41  ;;  %v10628_v45 = vmul.u32 %v2447_v38, %v10541_v14  ;;  %v10630_v2 = vshll.u32 %v1018_v52, 8 }
 0x1c1   : > { %v835_v63 = vmul.f32 %v834_v10, %v830_v44  ;;  %v842_v31 = vmul.f32 %v841_v15, %v830_v44  ;;  %v1265_v59 = vshll.u32 %v10617_v33, 30  ;;  %v10633_v30 = vor.u32 %v1028_v40, %v1027_v7 }
 0x1c2   : > { %v10636_v9 = vmul.u32 %v2448_v3, %v10541_v14  ;;  %v10641_v34 = vmul.u32 %v2470_v47, %v10541_v14  ;;  %vm847_vm14 = vcmp.lt.s32.totalorder %v846_v42, 2  ;;  %v1062_v41 = vshrl.u32 %v1057_v61, 16  ;;  %v13784_v14 = vld [vmem:[#allocation45_spill] sm:$0xff] }
 0x1c3   : > { %v836_v38 = vadd.f32 1.0, %v835_v63  ;;  %v843_v53 = vadd.f32 1.0, %v842_v31  ;;  %vm848_vm15 = vcmp.eq.s32.totalorder %v846_v42, 0  ;;  %v3311_v52 = vand.u32 3, %v3310_v60 }
 0x1c4   : > { %vm851_vm0 = vcmp.eq.s32.totalorder %v846_v42, 2  ;;  %v1266_v44 = vsub.s32 %v1262_v23, %v1265_v59  ;;  %v1059_v0 = vand.u32 65535, %v10630_v2  ;;  %v1061_v11 = vand.u32 65535, %v1057_v61 }
 0x1c5   : > { %v844_v56 = vmul.f32 %v843_v53, %v828_v48  ;;  %v852_v40 = vxor.u32 2147483648, %v836_v38  ;;  %v1050_v17 = vsel %vm1042_vm12, %v10633_v30, %v10584_v57  ;;  %v1052_v47 = vsel %vm1044_vm3, %v10586_v62, %v13784_v14 }
 0x1c6   : > { %vm1267_vm4 = vcmp.lt.s32.totalorder %v1266_v44, 0  ;;  %v1268_v3 = vsub.s32 0, %v1266_v44  ;;  %v1060_v60 = vshrl.u32 %v10630_v2, 16  ;;  %v1064_v23 = vmul.u32 %v1062_v41, %v1059_v0 }
 0x1c7   : > { %v849_v7 = vxor.u32 2147483648, %v844_v56  ;;  %vm3312_vm2 = vcmp.lt.s32.totalorder %v3311_v52, 2  ;;  %vm3313_vm11 = vcmp.eq.s32.totalorder %v3311_v52, 0  ;;  %v853_v48 = vsel %vm851_vm0, %v852_v40, %v844_v56 }
 0x1c8   : > { %vm3316_vm8 = vcmp.eq.s32.totalorder %v3311_v52, 2  ;;  %v1269_v10 = vsel %vm1267_vm4, %v1268_v3, %v1266_v44  ;;  %v1053_v15 = vsel %vm1043_vm13, %v1050_v17, %v1052_v47  ;;  %v10655_v61 = vmul.u32 %v1061_v11, %v1060_v60 }
 0x1c9   : > { %v3315_v63 = vsel %vm3313_vm11, %v836_v38, %v849_v7  ;;  %v3318_v31 = vsel %vm3316_vm8, %v852_v40, %v844_v56  ;;  %v850_v59 = vsel %vm848_vm15, %v836_v38, %v849_v7  ;;  %v1270_v53 = vclz %v1269_v10 }
 0x1ca   : > { %vm845_vm5 = vweird.f32 %v9831_v4  ;;  %v3319_v14 = vsel %vm3312_vm2, %v3315_v63, %v3318_v31  ;;  %v854_v1 = vsel %vm847_vm14, %v850_v59, %v853_v48  ;;  %v1067_v6 = vshll.u32 %v1064_v23, 16 }
 0x1cb   : > { %v10660_v5 = vsel %vm845_vm5, nan, %v3319_v14  ;;  %v10662_v52 = vsel %vm845_vm5, nan, %v854_v1  ;;  %v8306_v3 = vadd.s32 4294967294, %v1270_v53  ;;  %v1063_v37 = vmul.u32 %v1061_v11, %v1059_v0 }
 0x1cc   : > { %13785 = vst [vmem:[#allocation58_spill] sm:$0xff] %v10662_v52  ;;  %v2453_v17 = vshll.u32 %v10625_v43, 16  ;;  %5893 = vrot.lane.b32.xlu2 %v10660_v5, %s8904_s29  ;;  %v1083_v4 = vand.u32 65535, %v1053_v15  ;;  %v1066_v42 = vmul.u32 %v1062_v41, %v1060_v60  ;;  %v1069_v38 = vshll.u32 %v10655_v61, 16 }
 0x1cd   : > { %vm8307_vm15 = vcmp.lt.s32.totalorder %v8306_v3, 0  ;;  %vm1071_vm14 = vc.u32 %v1063_v37, %v1067_v6  ;;  %v1073_v11 = vadd.s32 %v1067_v6, %v1063_v37  ;;  %v1084_v7 = vshrl.u32 %v1053_v15, 16 }
 0x1ce   : > { %v1273_v1 = vsel %vm8307_vm15, 0, %v8306_v3  ;;  %v1072_v40 = vsel %vm1071_vm14, 1, %v13688_v29  ;;  %v1258_v48 = vadd.s32 %v10565_v18, %v10556_v16  ;;  %v2475_v59 = vshll.u32 %v10595_v54, 16 }
 0x1cf   : > { %v1274_v10 = vsub.s32 32, %v1273_v1  ;;  %v1278_v63 = vsub.s32 4294967266, %v1273_v1  ;;  %v1074_v31 = vadd.s32 %v1072_v40, %v1066_v42  ;;  %vm1075_vm5 = vc.u32 %v1073_v11, %v1069_v38 }
 0x1d0   : > { %v1086_v53 = vmul.u32 %v1084_v7, %v1059_v0  ;;  %v1087_v14 = vmul.u32 %v1083_v4, %v1060_v60  ;;  %v1275_v41 = vshll.u32 %v1266_v44, %v1273_v1  ;;  %v1076_v3 = vsel %vm1075_vm5, 1, %v13688_v29 }
 0x1d1   : > { %v1276_v47 = vshrl.u32 %v1258_v48, %v1274_v10  ;;  %v1279_v56 = vadd.s32 127, %v1278_v63  ;;  %v1026_v6 = vshrl.u32 %v13692_v58, %v13779_v50  ;;  %v1078_v37 = vadd.s32 %v1076_v3, %v1074_v31  ;;  %v13788_v3 = vld [vmem:[#allocation48_spill] sm:$0xff] }
 0x1d2   : > { %v1085_v15 = vmul.u32 %v1083_v4, %v1059_v0  ;;  %v1089_v21 = vshll.u32 %v1086_v53, 16  ;;  %v1047_v42 = vsel %vm1045_vm10, %v10586_v62, 2102212464  ;;  %v1068_v38 = vshrl.u32 %v1064_v23, 16 }
 0x1d3   : > { %v1277_v16 = vor.u32 %v1276_v47, %v1275_v41  ;;  %v1280_v18 = vshll.u32 %v1279_v56, 23  ;;  %v1088_v40 = vmul.u32 %v1084_v7, %v1060_v60  ;;  %v1091_v11 = vshll.u32 %v1087_v14, 16 }
 0x1d4   : > { %vm1093_vm0 = vc.u32 %v1085_v15, %v1089_v21  ;;  %v1095_v44 = vadd.s32 %v1089_v21, %v1085_v15  ;;  %vm10681_vm4 = vc.u32 %v10622_v36, %v2453_v17  ;;  %v1079_v48 = vadd.s32 %v1078_v37, %v1068_v38  ;;  %v13790_v38 = vld [vmem:[#allocation61_spill] sm:$0xff] }
 0x1d5   : > { %v1281_v50 = vor.u32 4788187, %v1280_v18  ;;  %v1094_v0 = vsel %vm1093_vm0, 1, %v13688_v29  ;;  %v1046_v47 = vsel %vm1042_vm12, %v1026_v6, %v10633_v30  ;;  %v1048_v62 = vsel %vm1044_vm3, %v10584_v57, %v1047_v42 }
 0x1d6   : > { %v1096_v60 = vadd.s32 %v1094_v0, %v1088_v40  ;;  %vm1097_vm10 = vc.u32 %v1095_v44, %v1091_v11  ;;  %v1284_v23 = vcvt.s32.f32 %v1277_v16  ;;  %v1070_v56 = vshrl.u32 %v10655_v61, 16  ;;  %v13789_v16 = vld [vmem:[#allocation65_spill] sm:$0xff] }
 0x1d7   : > { %v1282_v21 = vand.u32 2147483647, %v1281_v50  ;;  %v1098_v4 = vsel %vm1097_vm10, 1, %v13688_v29  ;;  %v2459_v7 = vadd.s32 %v2453_v17, %v10622_v36  ;;  %v13561_v10 = vshll.u32 %v10602_v13, 16 }
 0x1d8   : > { %v1090_v63 = vshrl.u32 %v1086_v53, 16  ;;  %v1100_v31 = vadd.s32 %v1098_v4, %v1096_v60  ;;  %v2458_v30 = vsel %vm10681_vm4, 1, %v13688_v29  ;;  %v10699_v57 = vadd.s32 %v1079_v48, %v1070_v56 }
 0x1d9   : > { %v1285_v41 = vmul.f32 %v1284_v23, %v1282_v21  ;;  %v13560_v6 = vand.u32 2147483647, %v13788_v3  ;;  %vm1166_vm12 = vcmp.lt.s32.totalorder %v13770_v46, 0  ;;  %v1049_v61 = vsel %vm1043_vm13, %v1046_v47, %v1048_v62 }
 0x1da   : > { %v1092_v37 = vshrl.u32 %v1087_v14, 16  ;;  %v1101_v36 = vadd.s32 %v1100_v31, %v1090_v63  ;;  %v1288_v53 = vsub.s32 4, %v10617_v33  ;;  %v10706_v15 = vadd.s32 %v1095_v44, %v1091_v11 }
 0x1db   : > { %v1286_v17 = vxor.u32 2147483648, %v1285_v41  ;;  %v1493_v18 = vshrl.u32 %v13753_v55, %v13789_v16  ;;  %v1492_v40 = vshll.u32 %v13755_v25, %v13790_v38  ;;  %v1495_v1 = vshll.u32 %v13753_v55, %v13790_v38 }
 0x1dc   : > { %v1102_v42 = vadd.s32 %v1101_v36, %v1092_v37  ;;  %v1496_v24 = vshrl.u32 %v13695_v26, %v13789_v16  ;;  %v13791_v14 = vand.u32 2147483647, %v13770_v46  ;;  %vm1105_vm13 = vc.u32 %v10699_v57, %v10706_v15  ;;  %v13795_v36 = vld [vmem:[#allocation68_spill] sm:$0xff] }
 0x1dd   : > { %v1287_v11 = vsel %vm1166_vm12, %v1286_v17, %v1285_v41  ;;  %v1479_v44 = vand.u32 8388607, %v13560_v6  ;;  %v10731_v47 = vor.u32 %v1493_v18, %v1492_v40  ;;  %v13794_v60 = vshll.u32 %v10628_v45, 16  ;;  %v13796_v18 = vld [vmem:[#allocation73_spill] sm:$0xff] }
 0x1de   : > { %vm10718_vm3 = vcmp.le.f32.partialorder %v13791_v14, 0.7853982  ;;  %v1106_v0 = vadd.s32 1, %v1102_v42  ;;  %v10733_v62 = vor.u32 %v1496_v24, %v1495_v1  ;;  %v1289_v21 = vsel %vm1166_vm12, %v1288_v53, %v10617_v33 }
 0x1df   : > { %v1290_v48 = vsel %vm10718_vm3, %v13770_v46, %v1287_v11  ;;  %vm2461_vm2 = vc.u32 %v2459_v7, %v13794_v60  ;;  %v1103_v56 = vmul.u32 %v10630_v2, %v1049_v61  ;;  %v2460_v4 = vadd.s32 %v2458_v30, %v10636_v9 }
 0x1e0   : > { %v1292_v23 = vmul.f32 %v1290_v48, %v1290_v48  ;;  %vm2479_vm11 = vc.u32 %v10589_v27, %v2475_v59  ;;  %v10748_v63 = vadd.s32 %v2475_v59, %v10589_v27  ;;  %v1107_v31 = vsel %vm1105_vm13, %v1106_v0, %v1102_v42  ;;  %v13797_v42 = vld [vmem:[#allocation69_spill] sm:$0xff] }
 0x1e1   : > { %v1108_v37 = vadd.s32 %v1107_v31, %v1103_v56  ;;  %vm1504_vm8 = vcmp.lt.s32.totalorder %v13795_v36, 1  ;;  %v2462_v33 = vsel %vm2461_vm2, 1, %v13688_v29  ;;  %v1291_v2 = vsel %vm10718_vm3, 0, %v1289_v21 }
 0x1e2   : > { %v1293_v7 = vmul.f32 -0.001358992, %v1292_v23  ;;  %v1300_v41 = vmul.f32 -0.00019511016, %v1292_v23  ;;  %v1480_v9 = vor.u32 8388608, %v1479_v44  ;;  %v1516_v30 = vsel %vm1504_vm8, %v10731_v47, %v10733_v62 }
 0x1e3   : > { %v1109_v59 = vadd.s32 536870912, %v1108_v37  ;;  %vm1506_vm15 = vcmp.lt.s32.totalorder %v13795_v36, 3  ;;  %v2480_v17 = vsel %vm2479_vm11, 1, %v13688_v29  ;;  %v1490_v53 = vshrl.u32 %v13755_v25, %v13789_v16 }
 0x1e4   : > { %v1294_v61 = vadd.f32 0.041655596, %v1293_v7  ;;  %v1301_v27 = vadd.f32 0.008332121, %v1300_v41  ;;  %vm1505_vm14 = vcmp.lt.s32.totalorder %v13795_v36, 2  ;;  %v1518_v40 = vsel %vm1506_vm15, %v13797_v42, %v13796_v18 }
 0x1e5   : > { %v10767_v14 = vshrl.u32 %v1109_v59, 30  ;;  %v10771_v50 = vsel %vm1505_vm14, %v1516_v30, %v1518_v40  ;;  %v2464_v11 = vadd.s32 %v2462_v33, %v2460_v4  ;;  %v1308_v44 = vand.u32 3, %v1291_v2 }
 0x1e6   : > { %v1295_v1 = vmul.f32 %v1294_v61, %v1292_v23  ;;  %v1302_v24 = vmul.f32 %v1301_v27, %v1292_v23  ;;  %v3775_v0 = vadd.s32 3, %v1291_v2  ;;  %v10773_v60 = vshll.u32 %v1480_v9, 8 }
 0x1e7   : > { %v1111_v31 = vshll.u32 %v10767_v14, 30  ;;  %v1489_v7 = vshll.u32 %v13692_v58, %v13790_v38  ;;  %v2476_v61 = vshrl.u32 %v10595_v54, 16  ;;  %vm2483_vm5 = vc.u32 %v10748_v63, %v13561_v10 }
 0x1e8   : > { %v1296_v21 = vadd.f32 -0.4999988, %v1295_v1  ;;  %v1303_v56 = vadd.f32 -0.16666654, %v1302_v24  ;;  %v1524_v4 = vshrl.u32 %v10771_v50, 16  ;;  %v13798_v27 = vshrl.u32 %v10625_v43, 16 }
 0x1e9   : > { %v10784_v9 = vsub.s32 %v1108_v37, %v1111_v31  ;;  %v10786_v30 = vor.u32 %v1490_v53, %v1489_v7  ;;  %v2482_v38 = vadd.s32 %v2480_v17, %v10641_v34  ;;  %v3776_v18 = vand.u32 3, %v3775_v0  ;;  %v13799_v17 = vld [vmem:[#allocation71_spill] sm:$0xff] }
 0x1ea   : > { %v1297_v33 = vmul.f32 %v1296_v21, %v1292_v23  ;;  %v1304_v2 = vmul.f32 %v1303_v56, %v1292_v23  ;;  %v10790_v59 = vadd.s32 %v2464_v11, %v13798_v27  ;;  %v10794_v42 = vand.u32 65535, %v10773_v60 }
 0x1eb   : > { %v2484_v40 = vsel %vm2483_vm5, 1, %v13688_v29  ;;  %vm1309_vm0 = vcmp.lt.s32.totalorder %v1308_v44, 2  ;;  %vm1310_vm4 = vcmp.eq.s32.totalorder %v1308_v44, 0  ;;  %vm1113_vm10 = vcmp.lt.s32.totalorder %v10784_v9, 0 }
 0x1ec   : > { %v1298_v1 = vadd.f32 1.0, %v1297_v33  ;;  %v1305_v24 = vadd.f32 1.0, %v1304_v2  ;;  %v1114_v23 = vsub.s32 0, %v10784_v9  ;;  %v10800_v43 = vmul.u32 %v1524_v4, %v10794_v42 }
 0x1ed   : > { %v1512_v34 = vsel %vm1504_vm8, %v10786_v30, %v10731_v47  ;;  %v1514_v11 = vsel %vm1506_vm15, %v10733_v62, %v13799_v17  ;;  %vm1313_vm12 = vcmp.eq.s32.totalorder %v1308_v44, 2  ;;  %vm3777_vm3 = vcmp.lt.s32.totalorder %v3776_v18, 2 }
 0x1ee   : > { %v1306_v37 = vmul.f32 %v1305_v24, %v1290_v48  ;;  %v1314_v53 = vxor.u32 2147483648, %v1298_v1  ;;  %v1115_v0 = vsel %vm1113_vm10, %v1114_v23, %v10784_v9  ;;  %v1523_v21 = vand.u32 65535, %v10771_v50 }
 0x1ef   : > { %vm3778_vm13 = vcmp.eq.s32.totalorder %v3776_v18, 0  ;;  %v1116_v48 = vclz %v1115_v0  ;;  %vm3781_vm2 = vcmp.eq.s32.totalorder %v3776_v18, 2  ;;  %v1515_v7 = vsel %vm1505_vm14, %v1512_v34, %v1514_v11 }
 0x1f0   : > { %v1311_v56 = vxor.u32 2147483648, %v1306_v37  ;;  %v1315_v31 = vsel %vm1313_vm12, %v1314_v53, %v1306_v37  ;;  %v1522_v33 = vshrl.u32 %v10773_v60, 16  ;;  %v1529_v2 = vshll.u32 %v10800_v43, 16 }
 0x1f1   : > { %v3783_v17 = vsel %vm3781_vm2, %v1314_v53, %v1306_v37  ;;  %v8303_v6 = vadd.s32 4294967294, %v1116_v48  ;;  %vm1307_vm11 = vweird.f32 %v13770_v46  ;;  %v1525_v34 = vmul.u32 %v1523_v21, %v10794_v42 }
 0x1f2   : > { %v1312_v27 = vsel %vm1310_vm4, %v1298_v1, %v1311_v56  ;;  %v3780_v24 = vsel %vm3778_vm13, %v1298_v1, %v1311_v56  ;;  %v1527_v0 = vmul.u32 %v1523_v21, %v1522_v33  ;;  %v2486_v11 = vadd.s32 %v2484_v40, %v2482_v38 }
 0x1f3   : > { %v1316_v50 = vsel %vm1309_vm0, %v1312_v27, %v1315_v31  ;;  %v3784_v23 = vsel %vm3777_vm3, %v3780_v24, %v3783_v17  ;;  %vm8304_vm5 = vcmp.lt.s32.totalorder %v8303_v6, 0  ;;  %v1104_v1 = vadd.s32 %v10706_v15, %v10699_v57 }
 0x1f4   : > { %v10820_v10 = vsel %vm1307_vm11, nan, %v1316_v50  ;;  %v10822_v41 = vsel %vm1307_vm11, nan, %v3784_v23  ;;  %v1119_v46 = vsel %vm8304_vm5, 0, %v8303_v6  ;;  %v1545_v44 = vand.u32 65535, %v1515_v7 }
 0x1f5   : > { %13800 = vst [vmem:[#allocation55_spill] sm:$0xff] %v10820_v10  ;;  %5899 = vrot.lane.b32.xlu2 %v10822_v41, %s8904_s29  ;;  %v1120_v37 = vsub.s32 32, %v1119_v46  ;;  %v1124_v18 = vsub.s32 4294967266, %v1119_v46  ;;  %v1528_v53 = vmul.u32 %v1524_v4, %v1522_v33  ;;  %vm1533_vm0 = vc.u32 %v1525_v34, %v1529_v2 }
 0x1f6   : > { %v1531_v56 = vshll.u32 %v1527_v0, 16  ;;  %v1534_v31 = vsel %vm1533_vm0, 1, %v13688_v29  ;;  %v1535_v48 = vadd.s32 %v1529_v2, %v1525_v34  ;;  %v1546_v27 = vshrl.u32 %v1515_v7, 16 }
 0x1f7   : > { %v1121_v21 = vshll.u32 %v10784_v9, %v1119_v46  ;;  %v1122_v38 = vshrl.u32 %v1104_v1, %v1120_v37  ;;  %v1125_v40 = vadd.s32 127, %v1124_v18  ;;  %v1536_v24 = vadd.s32 %v1534_v31, %v1528_v53 }
 0x1f8   : > { %v10835_v57 = vsel %vm2429_vm7, %v10485_v51, %v10493_v28  ;;  %vm1537_vm4 = vc.u32 %v1535_v48, %v1531_v56  ;;  %v1548_v6 = vmul.u32 %v1546_v27, %v10794_v42  ;;  %v1549_v15 = vmul.u32 %v1545_v44, %v1522_v33  ;;  %v13804_v48 = vld [vmem:[#allocation51_spill] sm:$0xff] }
 0x1f9   : > { %v2478_v4 = vshrl.u32 %v10602_v13, 16  ;;  %v1123_v17 = vor.u32 %v1122_v38, %v1121_v21  ;;  %v1126_v2 = vshll.u32 %v1125_v40, 23  ;;  %v1538_v7 = vsel %vm1537_vm4, 1, %v13688_v29 }
 0x1fa   : > { %v2487_v9 = vadd.s32 %v2486_v11, %v2476_v61  ;;  %v1540_v50 = vadd.s32 %v1538_v7, %v1536_v24  ;;  %v1547_v23 = vmul.u32 %v1545_v44, %v10794_v42  ;;  %v1551_v34 = vshll.u32 %v1548_v6, 16 }
 0x1fb   : > { %v13801_v49 = vshrl.u32 %v10628_v45, 16  ;;  %v13802_v28 = vshll.u32 %v10602_v13, 16  ;;  %v1127_v46 = vor.u32 4788187, %v1126_v2  ;;  %v1530_v37 = vshrl.u32 %v10800_v43, 16 }
 0x1fc   : > { %v1550_v18 = vmul.u32 %v1546_v27, %v1522_v33  ;;  %v1553_v54 = vshll.u32 %v1549_v15, 16  ;;  %vm1555_vm7 = vc.u32 %v1547_v23, %v1551_v34  ;;  %v1557_v61 = vadd.s32 %v1551_v34, %v1547_v23  ;;  %v13809_v23 = vld [vmem:[#allocation46_spill] sm:$0xff] }
 0x1fd   : > { %v10846_v51 = vadd.s32 %v10790_v59, %v13801_v49  ;;  %v10851_v1 = vadd.s32 %v10748_v63, %v13802_v28  ;;  %v1128_v11 = vand.u32 2147483647, %v1127_v46  ;;  %v1130_v42 = vcvt.s32.f32 %v1123_v17 }
 0x1fe   : > { %v1541_v44 = vadd.s32 %v1540_v50, %v1530_v37  ;;  %v1556_v45 = vsel %vm1555_vm7, 1, %v13688_v29  ;;  %v2488_v53 = vadd.s32 %v2487_v9, %v2478_v4  ;;  %v1509_v13 = vsel %vm1507_vm6, %v10733_v62, 2102212464  ;;  %v13812_v37 = vld [vmem:[#allocation72_spill] sm:$0xff] }
 0x1ff   : > { %v1558_v59 = vadd.s32 %v1556_v45, %v1550_v18  ;;  %vm1559_vm10 = vc.u32 %v1557_v61, %v1553_v54  ;;  %v1131_v63 = vmul.f32 %v1130_v42, %v1128_v11  ;;  %v1488_v43 = vshrl.u32 %v13692_v58, %v13789_v16 }
 0x200   : > { %v1532_v33 = vshrl.u32 %v1527_v0, 16  ;;  %v1560_v56 = vsel %vm1559_vm10, 1, %v13688_v29  ;;  %v10862_v31 = vshrl.u32 %v10498_v22, 30  ;;  %v3465_v27 = vadd.s32 3, %v13804_v48 }
 0x201   : > { %v1552_v21 = vshrl.u32 %v1548_v6, 16  ;;  %v1562_v38 = vadd.s32 %v1560_v56, %v1558_v59  ;;  %v1132_v40 = vxor.u32 2147483648, %v1131_v63  ;;  %v1508_v62 = vsel %vm1504_vm8, %v1488_v43, %v10786_v30  ;;  %v13805_v6 = vld [vmem:[#allocation40_spill] sm:$0xff] }
 0x202   : > { %13803 = vst [vmem:[#allocation62_spill] sm:$0xff] %v10862_v31  ;;  %v1510_v24 = vsel %vm1506_vm15, %v10731_v47, %v1509_v13  ;;  %v10871_v16 = vadd.s32 %v1541_v44, %v1532_v33  ;;  %vm2491_vm6 = vc.u32 %v10846_v51, %v10851_v1  ;;  %vm1012_vm12 = vcmp.lt.s32.totalorder %v9904_v35, 0 }
 0x203   : > { %v1554_v22 = vshrl.u32 %v1549_v15, 16  ;;  %v1563_v0 = vadd.s32 %v1562_v38, %v1552_v21  ;;  %vm1782_vm3 = vcmp.lt.s32.totalorder %v13805_v6, 0  ;;  %v2492_v4 = vadd.s32 1, %v2488_v53 }
 0x204   : > { %v13806_v17 = vand.u32 2147483647, %v9904_v35  ;;  %v1133_v47 = vsel %vm1012_vm12, %v1132_v40, %v1131_v63  ;;  %v10885_v2 = vadd.s32 %v1557_v61, %v1553_v54  ;;  %v1134_v7 = vsub.s32 4, %v10767_v14 }
 0x205   : > { %v1511_v9 = vsel %vm1505_vm14, %v1508_v62, %v1510_v24  ;;  %v1564_v50 = vadd.s32 %v1563_v0, %v1554_v22  ;;  %v10896_v49 = vsel %vm10028_vm9, 0, %v13809_v23  ;;  %v3466_v28 = vand.u32 3, %v3465_v27  ;;  %v13816_v27 = vld [vmem:[#allocation66_spill] sm:$0xff]  ;;  %v13819_v62 = vld [vmem:[#allocation53_spill] sm:$0xff] }
 0x206   : > { %vm10879_vm13 = vcmp.le.f32.partialorder %v13806_v17, 0.7853982  ;;  %13811 = vst [vmem:[#allocation67_spill] sm:$0xff] %v10896_v49  ;;  %vm1567_vm8 = vc.u32 %v10871_v16, %v10885_v2  ;;  %v1457_v18 = vadd.f32 -0.16666654, %v13812_v37  ;;  %v2189_v54 = vshll.u32 %v10862_v31, 30 }
 0x207   : > { %v1136_v15 = vsel %vm10879_vm13, %v9904_v35, %v1133_v47  ;;  %v2489_v61 = vmul.u32 %v10519_v39, %v10835_v57  ;;  %v1568_v36 = vadd.s32 1, %v1564_v50  ;;  %v13813_v11 = vand.u32 2147483647, %v13805_v6 }
 0x208   : > { %v1138_v46 = vmul.f32 %v1136_v15, %v1136_v15  ;;  %v2493_v44 = vsel %vm2491_vm6, %v2492_v4, %v2488_v53  ;;  %v1565_v59 = vmul.u32 %v10773_v60, %v1511_v9  ;;  %v1902_v63 = vxor.u32 2147483648, %v10372_v32  ;;  %v13817_v60 = vld [vmem:[#allocation54_spill] sm:$0xff] }
 0x209   : > { %vm10906_vm15 = vcmp.le.f32.partialorder %v13813_v11, 0.7853982  ;;  %v1762_v43 = vmul.f32 -0.00019511016, %v10481_v8  ;;  %v1135_v39 = vsel %vm1012_vm12, %v1134_v7, %v10767_v14  ;;  %v1569_v57 = vsel %vm1567_vm8, %v1568_v36, %v1564_v50 }
 0x20a   : > { %v1139_v45 = vmul.f32 -0.001358992, %v1138_v46  ;;  %v1146_v13 = vmul.f32 -0.00019511016, %v1138_v46  ;;  %vm3468_vm9 = vcmp.eq.s32.totalorder %v3466_v28, 0  ;;  %v1570_v48 = vadd.s32 %v1569_v57, %v1565_v59 }
 0x20b   : > { %v1458_v21 = vmul.f32 %v1457_v18, %v13816_v27  ;;  %v10921_v53 = vsub.s32 %v10470_v19, %v2189_v54  ;;  %v10923_v38 = vadd.s32 %v2493_v44, %v2489_v61  ;;  %v13818_v40 = vxor.u32 2147483648, %v13817_v60 }
 0x20c   : > { %v1140_v33 = vadd.f32 0.041655596, %v1139_v45  ;;  %v1147_v56 = vadd.f32 0.008332121, %v1146_v13  ;;  %v1137_v22 = vsel %vm10879_vm13, 0, %v1135_v39  ;;  %v1571_v4 = vadd.s32 536870912, %v1570_v48 }
 0x20d   : > { %v3470_v24 = vsel %vm3468_vm9, %v13819_v62, %v13818_v40  ;;  %v1903_v17 = vsel %vm1782_vm3, %v1902_v63, %v10372_v32  ;;  %v1763_v47 = vadd.f32 0.008332121, %v1762_v43  ;;  %vm3467_vm14 = vcmp.lt.s32.totalorder %v3466_v28, 2  ;;  %v13821_v45 = vld [vmem:[#allocation21_spill] sm:$0xff]  ;;  %v13824_v40 = vld [vmem:[#allocation64_spill] sm:$0xff] }
 0x20e   : > { %v1141_v14 = vmul.f32 %v1140_v33, %v1138_v46  ;;  %v1148_v0 = vmul.f32 %v1147_v56, %v1138_v46  ;;  %vm3471_vm2 = vcmp.eq.s32.totalorder %v3466_v28, 2  ;;  %v13820_v19 = vxor.u32 2147483648, %v13819_v62 }
 0x20f   : > { %v10936_v23 = vshrl.u32 %v1571_v4, 30  ;;  %v2192_v30 = vsub.s32 0, %v10921_v53  ;;  %v2495_v34 = vadd.s32 536870912, %v10923_v38  ;;  %v3620_v18 = vadd.s32 3, %v1137_v22 }
 0x210   : > { %v3473_v7 = vsel %vm3471_vm2, %v13820_v19, %v13817_v60  ;;  %v1142_v9 = vadd.f32 -0.4999988, %v1141_v14  ;;  %v1149_v50 = vadd.f32 -0.16666654, %v1148_v0  ;;  %vm2191_vm11 = vcmp.lt.s32.totalorder %v10921_v53, 0 }
 0x211   : > { %v3474_v37 = vsel %vm3467_vm14, %v3470_v24, %v3473_v7  ;;  %v1573_v28 = vshll.u32 %v10936_v23, 30  ;;  %v1459_v61 = vadd.f32 1.0, %v1458_v21  ;;  %v10943_v36 = vadd.s32 3, %v10896_v49 }
 0x212   : > { %v1143_v32 = vmul.f32 %v1142_v9, %v1138_v46  ;;  %v1150_v54 = vmul.f32 %v1149_v50, %v1138_v46  ;;  %v10948_v11 = vsel %vm10906_vm15, %v13805_v6, %v1903_v17  ;;  %v1154_v44 = vand.u32 3, %v1137_v22 }
 0x213   : > { %vm13822_vm5 = vweird.f32 %v13821_v45  ;;  %v10954_v43 = vsub.s32 %v1570_v48, %v1573_v28  ;;  %v1764_v46 = vmul.f32 %v1763_v47, %v10481_v8  ;;  %v10958_v39 = vsel %vm2191_vm11, %v2192_v30, %v10921_v53  ;;  %v6233_v48 = vpop.xlane.xlu1 %6232 }
 0x214   : > { %v10952_v13 = vsel %vm13822_vm5, nan, %v3474_v37  ;;  %v1144_v59 = vadd.f32 1.0, %v1143_v32  ;;  %v1151_v63 = vadd.f32 1.0, %v1150_v54  ;;  %v10960_v57 = vshrl.u32 %v2495_v34, 30  ;;  %v13826_v34 = vld [vmem:[#allocation22_spill] sm:$0xff] }
 0x215   : > { %v3621_v33 = vand.u32 3, %v3620_v18  ;;  %vm1575_vm0 = vcmp.lt.s32.totalorder %v10954_v43, 0  ;;  %v1576_v60 = vsub.s32 0, %v10954_v43  ;;  %v6477_v62 = vrot.slane %v13824_v40, 7  ;;  %v13866_v40 = vld [vmem:[#allocation43_spill] sm:$0xff] }
 0x216   : > { %13823 = vst [vmem:[#allocation42_spill] sm:$0xff] %v10960_v57  ;;  %v1152_v56 = vmul.f32 %v1151_v63, %v1136_v15  ;;  %v1160_v21 = vxor.u32 2147483648, %v1144_v59  ;;  %v6509_v24 = vrot.slane %v10952_v13, 7  ;;  %vm1153_vm4 = vweird.f32 %v9904_v35 }
 0x217   : > { %vm1159_vm7 = vcmp.eq.s32.totalorder %v1154_v44, 2  ;;  %vm1155_vm10 = vcmp.lt.s32.totalorder %v1154_v44, 2  ;;  %v1577_v0 = vsel %vm1575_vm0, %v1576_v60, %v10954_v43  ;;  %vm1156_vm6 = vcmp.eq.s32.totalorder %v1154_v44, 0 }
 0x218   : > { %v1157_v22 = vxor.u32 2147483648, %v1152_v56  ;;  %v1161_v14 = vsel %vm1159_vm7, %v1160_v21, %v1152_v56  ;;  %vm3623_vm12 = vcmp.eq.s32.totalorder %v3621_v33, 0  ;;  %vm3626_vm13 = vcmp.eq.s32.totalorder %v3621_v33, 2 }
 0x219   : > { %v1578_v15 = vclz %v1577_v0  ;;  %vm3622_vm8 = vcmp.lt.s32.totalorder %v3621_v33, 2  ;;  %v3628_v17 = vsel %vm3626_vm13, %v1160_v21, %v1152_v56  ;;  %v1447_v50 = vmul.f32 -0.001358992, %v13816_v27  ;;  %v13836_v0 = vld [vmem:[#allocation49_spill] sm:$0xff] }
 0x21a   : > { %v3625_v4 = vsel %vm3623_vm12, %v1144_v59, %v1157_v22  ;;  %v1158_v47 = vsel %vm1156_vm6, %v1144_v59, %v1157_v22  ;;  %vm13825_vm9 = vcmask 1041409   ;;  %v6237_v37 = vmul.f32 %v6233_v48, %v13826_v34 }
 0x21b   : > { %v3629_v19 = vsel %vm3622_vm8, %v3625_v4, %v3628_v17  ;;  %v1162_v7 = vsel %vm1155_vm10, %v1158_v47, %v1161_v14  ;;  %v8312_v9 = vadd.s32 4294967294, %v1578_v15  ;;  %v6478_v30 = vsel %vm13825_vm9, %v6477_v62, %v10662_v52  ;;  %vm13828_vm14 = vmmov %vm13825_vm9  ;;  %v6236_v17 = vpop.xlane.xlu1 %6235 }
 0x21c   : > { %v3630_v18 = vsel %vm1153_vm4, nan, %v3629_v19  ;;  %v10976_v32 = vsel %vm1153_vm4, nan, %v1162_v7  ;;  %v6510_v54 = vsel %vm13828_vm14, %v6509_v24, %v10660_v5  ;;  %v6481_v45 = vrot.slane %v10820_v10, 5  ;;  %v13837_v7 = vld [vmem:[#allocation57_spill] sm:$0xff] }
 0x21d   : > { %13827 = vst [vmem:[#allocation45_spill] sm:$0xff] %v10976_v32  ;;  %5897 = vrot.lane.b32.xlu0 %v3630_v18, %s8904_s29  ;;  %v6479_v28 = vrot.slane %v10976_v32, 6  ;;  %v6511_v44 = vrot.slane %v3630_v18, 6  ;;  %vm8313_vm2 = vcmp.lt.s32.totalorder %v8312_v9, 0  ;;  %v6513_v59 = vrot.slane %v10822_v41, 5  ;;  %v13834_v41 = vld [vmem:[#allocation63_spill] sm:$0xff] }
 0x21e   : > { %v1566_v63 = vadd.s32 %v10885_v2, %v10871_v16  ;;  %v1581_v33 = vsel %vm8313_vm2, 0, %v8312_v9  ;;  %vm13829_vm11 = vcmask 1042434   ;;  %v1448_v5 = vadd.f32 0.041655596, %v1447_v50 }
 0x21f   : > { %v6480_v35 = vsel %vm13829_vm11, %v6479_v28, %v6478_v30  ;;  %vm13830_vm5 = vmmov %vm13829_vm11  ;;  %v1582_v21 = vsub.s32 32, %v1581_v33  ;;  %v10988_v60 = vadd.f32 1e-05, %v6237_v37  ;;  %vm13831_vm0 = vcmask 1043459   ;;  %v8604_v28 = vld [vmem:[%s9024_s18 + $0x30] sm:$0xff] }
 0x220   : > { %v6512_v56 = vsel %vm13830_vm5, %v6511_v44, %v6510_v54  ;;  %v10991_v62 = vsel %vm13831_vm0, %v6481_v45, %v6480_v35  ;;  %vm13833_vm4 = vmmov %vm13831_vm0  ;;  %v1586_v48 = vsub.s32 4294967266, %v1581_v33  ;;  %v10997_v22 = vmul.f32 %v1459_v61, %v13834_v41 }
 0x221   : > { %13832 = vst [vmem:[#allocation48_spill] sm:$0xff] %v10991_v62  ;;  %v10994_v24 = vsel %vm13833_vm4, %v6513_v59, %v6512_v56  ;;  %v1765_v16 = vadd.f32 -0.16666654, %v1764_v46  ;;  %v2497_v2 = vshll.u32 %v10960_v57, 30  ;;  %v1584_v14 = vshrl.u32 %v1566_v63, %v1582_v21  ;;  %v13884_v57 = vld [vmem:[#allocation37_spill] sm:$0xff] }
 0x222   : > { %13835 = vst [vmem:[#allocation65_spill] sm:$0xff] %v10997_v22  ;;  %v1904_v15 = vsub.s32 4, %v13836_v0  ;;  %v11003_v4 = vmul.f32 %v10948_v11, %v10948_v11  ;;  %v1583_v47 = vshll.u32 %v10954_v43, %v1581_v33  ;;  %v1587_v19 = vadd.s32 127, %v1586_v48 }
 0x223   : > { %v1750_v9 = vsub.s32 4, %v13837_v7  ;;  %v2194_v61 = vclz %v10958_v39  ;;  %v1449_v46 = vmul.f32 %v1448_v5, %v13816_v27  ;;  %v11010_v50 = vand.u32 3, %v10943_v36 }
 0x224   : > { %8740 = vrsqrt.f32 %v10988_v60  ;;  %v1585_v30 = vor.u32 %v1584_v14, %v1583_v47  ;;  %v1588_v37 = vshll.u32 %v1587_v19, 23  ;;  %v13562_v18 = vxor.u32 2147483648, %v10997_v22 }
 0x225   : > { %v1766_v54 = vmul.f32 %v1765_v16, %v10481_v8  ;;  %v11016_v43 = vsub.s32 %v10923_v38, %v2497_v2  ;;  %v1755_v44 = vmul.f32 -0.001358992, %v10481_v8  ;;  %v1905_v39 = vsel %vm1782_vm3, %v1904_v15, %v13836_v0 }
 0x226   : > { %v1589_v36 = vor.u32 4788187, %v1588_v37  ;;  %v1909_v45 = vmul.f32 -0.001358992, %v11003_v4  ;;  %v1916_v59 = vmul.f32 -0.00019511016, %v11003_v4  ;;  %v1592_v21 = vcvt.s32.f32 %v1585_v30 }
 0x227   : > { %vm13838_vm7 = vcmp.lt.s32.totalorder %v13766_v20, 0  ;;  %v8324_v33 = vadd.s32 4294967294, %v2194_v61  ;;  %vm13839_vm10 = vcmask 392192   ;;  %v1450_v38 = vadd.f32 -0.4999988, %v1449_v46 }
 0x228   : > { %v1751_v63 = vsel %vm13838_vm7, %v1750_v9, %v13837_v7  ;;  %8454 = vmatmul.msk.bf16.gmra.mxu0 %vm13839_vm10, %v8604_v28  ;;  %v1756_v35 = vadd.f32 0.041655596, %v1755_v44  ;;  %v1590_v56 = vand.u32 2147483647, %v1589_v36  ;;  %v1910_v5 = vadd.f32 0.041655596, %v1909_v45  ;;  %v11037_v7 = vpop.permute.xlu1 %453 }
 0x229   : > { %v1917_v48 = vadd.f32 0.008332121, %v1916_v59  ;;  %v1767_v41 = vadd.f32 1.0, %v1766_v54  ;;  %v2500_v16 = vsub.s32 0, %v11016_v43  ;;  %v1596_v2 = vsub.s32 4, %v10936_v23 }
 0x22a   : > { %v1757_v14 = vmul.f32 %v1756_v35, %v10481_v8  ;;  %v11032_v0 = vpop.eup %8740  ;;  %vm2499_vm3 = vcmp.lt.s32.totalorder %v11016_v43, 0  ;;  %v6238_v15 = vmul.f32 %v6236_v17, %v13826_v34  ;;  %v1593_v47 = vmul.f32 %v1592_v21, %v1590_v56  ;;  %v13841_v17 = vld [vmem:[#allocation75_spill] sm:$0xff]  ;;  %v11065_v35 = vld [vmem:[%s13420_s2 + $0x7] ss:$0 sm:$0xff]  ;;  %v13844_v56 = vld [vmem:[#allocation52_spill] sm:$0xff] }
 0x22b   : > { %v1918_v19 = vmul.f32 %v1917_v48, %v11003_v4  ;;  %v11041_v9 = vsel %vm10356_vm1, 0, %v1751_v63  ;;  %vm8325_vm6 = vcmp.lt.s32.totalorder %v8324_v33, 0  ;;  %vm1474_vm12 = vcmp.lt.s32.totalorder %v13788_v3, 0 }
 0x22c   : > { %13840 = vst [vmem:[#allocation61_spill] sm:$0xff] %v11041_v9  ;;  %v1451_v61 = vmul.f32 %v1450_v38, %v13816_v27  ;;  %v1594_v46 = vxor.u32 2147483648, %v1593_v47  ;;  %v1758_v30 = vadd.f32 -0.4999988, %v1757_v14  ;;  %v1911_v37 = vmul.f32 %v1910_v5, %v11003_v4 }
 0x22d   : > { %v1919_v54 = vadd.f32 -0.16666654, %v1918_v19  ;;  %v11047_v28 = vmul.f32 %v1767_v41, %v13841_v17  ;;  %v11050_v44 = vsel %vm2499_vm3, %v2500_v16, %v11016_v43  ;;  %v6242_v12 = vmul.f32 %v11032_v0, %v10988_v60 }
 0x22e   : > { %v1597_v36 = vsel %vm1474_vm12, %v1596_v2, %v10936_v23  ;;  %v11055_v45 = vadd.f32 1e-05, %v6238_v15  ;;  %v13843_v27 = vand.u32 2147483647, %v13788_v3  ;;  %v1595_v59 = vsel %vm1474_vm12, %v1594_v46, %v1593_v47 }
 0x22f   : > { %13842 = vst [vmem:[#allocation68_spill] sm:$0xff] %v11047_v28  ;;  %v1920_v63 = vmul.f32 %v1919_v54, %v11003_v4  ;;  %v11060_v38 = vsel %vm8325_vm6, 0, %v8324_v33  ;;  %v11069_v21 = vmul.f32 %v11065_v35, %v13844_v56  ;;  %v11074_v5 = vadd.f32 1.0, %v1451_v61 }
 0x230   : > { %vm1473_vm1 = vcmp.le.f32.partialorder %v13843_v27, 0.7853982  ;;  %v1759_v33 = vmul.f32 %v1758_v30, %v10481_v8  ;;  %v1912_v16 = vadd.f32 -0.4999988, %v1911_v37  ;;  %v11081_v14 = vmul.f32 %v11032_v0, %v6242_v12  ;;  %v11089_v54 = vpop.permute.xlu1 %541  ;;  %v8614_v8 = vld [vmem:[%s13422_s4 + $0x10] sm:$0xff] }
 0x231   : > { %v11072_v23 = vsel %vm1473_vm1, %v13788_v3, %v1595_v59  ;;  %13845 = vst [vmem:[#allocation73_spill] sm:$0xff] %v11074_v5  ;;  %v1599_v48 = vsel %vm1473_vm1, 0, %v1597_v36  ;;  %v11085_v15 = vsel %vm10906_vm15, 0, %v1905_v39  ;;  %v4240_v47 = vadd.s32 3, %v11041_v9  ;;  %6452 = vmatpush.bf16.msra.mxu2 %v8614_v8 }
 0x232   : > { %v1600_v41 = vmul.f32 %v11072_v23, %v11072_v23  ;;  %13846 = vst [vmem:[#allocation69_spill] sm:$0xff] %v11085_v15  ;;  %8742 = vrsqrt.f32 %v11055_v45  ;;  %v1921_v46 = vadd.f32 1.0, %v1920_v63  ;;  %v11094_v30 = vand.u32 3, %v1599_v48 }
 0x233   : > { %vm3933_vm15 = vcmp.eq.s32.totalorder %v11010_v50, 0  ;;  %vm3936_vm13 = vcmp.eq.s32.totalorder %v11010_v50, 2  ;;  %v11099_v17 = vadd.f32 1.0, %v1759_v33  ;;  %v1913_v12 = vmul.f32 %v1912_v16, %v11003_v4  ;;  %v13849_v33 = vld [vmem:[#allocation39_spill] sm:$0xff] }
 0x234   : > { %v1601_v19 = vmul.f32 -0.001358992, %v1600_v41  ;;  %v1608_v61 = vmul.f32 -0.00019511016, %v1600_v41  ;;  %v4085_v36 = vadd.s32 3, %v1599_v48  ;;  %v4241_v59 = vand.u32 3, %v4240_v47 }
 0x235   : > { %13847 = vst [vmem:[#allocation71_spill] sm:$0xff] %v11099_v17  ;;  %v4395_v63 = vadd.s32 3, %v11085_v15  ;;  %v11105_v37 = vmul.f32 %v1921_v46, %v10948_v11  ;;  %vm1461_vm8 = vweird.f32 %v13849_v33  ;;  %vm1769_vm9 = vweird.f32 %v13766_v20 }
 0x236   : > { %v1602_v42 = vadd.f32 0.041655596, %v1601_v19  ;;  %v1609_v39 = vadd.f32 0.008332121, %v1608_v61  ;;  %v3935_v19 = vsel %vm3933_vm15, %v11074_v5, %v13562_v18  ;;  %vm3932_vm14 = vcmp.lt.s32.totalorder %v11010_v50, 2  ;;  %v655_v61 = vpop.permute.xlu2 %654 }
 0x237   : > { %13848 = vst [vmem:[#allocation51_spill] sm:$0xff] %v11105_v37  ;;  %v13850_v4 = vxor.u32 2147483648, %v11074_v5  ;;  %v11121_v46 = vadd.f32 1.0, %v1913_v12  ;;  %vm1618_vm2 = vcmp.eq.s32.totalorder %v11094_v30, 0  ;;  %v4086_v8 = vand.u32 3, %v4085_v36  ;;  %v8613_v12 = vld [vmem:[%s13422_s4 + $0x8] sm:$0xff] }
 0x238   : > { %v1603_v56 = vmul.f32 %v1602_v42, %v1600_v41  ;;  %v1610_v2 = vmul.f32 %v1609_v39, %v1600_v41  ;;  %v11118_v16 = vpop.eup %8742  ;;  %vm4243_vm11 = vcmp.eq.s32.totalorder %v4241_v59, 0  ;;  %v4396_v39 = vand.u32 3, %v4395_v63  ;;  %v11143_v63 = vld [vmem:[%s13420_s2 + $0x8] ss:$0 sm:$0xff]  ;;  %6453 = vmatpush.bf16.msra.mxu2 %v8613_v12 }
 0x239   : > { %v3938_v48 = vsel %vm3936_vm13, %v13850_v4, %v10997_v22  ;;  %13851 = vst [vmem:[#allocation46_spill] sm:$0xff] %v11121_v46  ;;  %vm1617_vm5 = vcmp.lt.s32.totalorder %v11094_v30, 2  ;;  %v13852_v4 = vxor.u32 2147483648, %v11047_v28  ;;  %vm1615_vm0 = vweird.f32 %v13788_v3 }
 0x23a   : > { %v1604_v11 = vadd.f32 -0.4999988, %v1603_v56  ;;  %v1611_v47 = vadd.f32 -0.16666654, %v1610_v2  ;;  %v3939_v42 = vsel %vm3932_vm14, %v3935_v19, %v3938_v48  ;;  %v474_v56 = vpop.permute.xlu1 %473  ;;  %vm1923_vm4 = vweird.f32 %v13805_v6 }
 0x23b   : > { %v4245_v2 = vsel %vm4243_vm11, %v11099_v17, %v13852_v4  ;;  %vm4242_vm7 = vcmp.lt.s32.totalorder %v4241_v59, 2  ;;  %vm4246_vm10 = vcmp.eq.s32.totalorder %v4241_v59, 2  ;;  %v682_v19 = vmul.f32 %v11143_v63, %v655_v61 }
 0x23c   : > { %v1605_v18 = vmul.f32 %v1604_v11, %v1600_v41  ;;  %v1612_v27 = vmul.f32 %v1611_v47, %v1600_v41  ;;  %v11137_v41 = vld [vmem:[%s13420_s2 + $0x6] ss:$0 sm:$0xff]  ;;  %v13853_v59 = vxor.u32 2147483648, %v11099_v17  ;;  %vm1621_vm3 = vcmp.eq.s32.totalorder %v11094_v30, 2 }
 0x23d   : > { %v504_v36 = vmul.f32 %v11137_v41, %v474_v56  ;;  %v8612_v56 = vld [vmem:[%s13422_s4] sm:$0xff]  ;;  %vm4398_vm6 = vcmp.eq.s32.totalorder %v4396_v39, 0  ;;  %vm4087_vm12 = vcmp.lt.s32.totalorder %v4086_v8, 2  ;;  %v13854_v61 = vxor.u32 2147483648, %v11105_v37 }
 0x23e   : > { %v1606_v48 = vadd.f32 1.0, %v1605_v18  ;;  %v1613_v11 = vadd.f32 1.0, %v1612_v27  ;;  %v4248_v4 = vsel %vm4246_vm10, %v13853_v59, %v11047_v28  ;;  %v11161_v12 = vsel %vm1461_vm8, nan, %v3939_v42  ;;  %6454 = vmatpush.bf16.msra.mxu2 %v8612_v56 }
 0x23f   : > { %v4249_v50 = vsel %vm4242_vm7, %v4245_v2, %v4248_v4  ;;  %v601_v34 = vadd.f32 %v11069_v21, %v504_v36  ;;  %v4400_v47 = vsel %vm4398_vm6, %v11121_v46, %v13854_v61  ;;  %vm4397_vm1 = vcmp.lt.s32.totalorder %v4396_v39, 2 }
 0x240   : > { %v1614_v18 = vmul.f32 %v1613_v11, %v11072_v23  ;;  %v1622_v27 = vxor.u32 2147483648, %v1606_v48  ;;  %vm4401_vm15 = vcmp.eq.s32.totalorder %v4396_v39, 2  ;;  %v11167_v21 = vsel %vm1769_vm9, nan, %v4249_v50 }
 0x241   : > { %v11163_v59 = vadd.f32 %v682_v19, %v601_v34  ;;  %13856 = vst [vmem:[#allocation72_spill] sm:$0xff] %v11167_v21  ;;  %v13857_v23 = vxor.u32 2147483648, %v11121_v46  ;;  %vm4088_vm13 = vcmp.eq.s32.totalorder %v4086_v8, 0  ;;  %vm4091_vm14 = vcmp.eq.s32.totalorder %v4086_v8, 2 }
 0x242   : > { %v1619_v2 = vxor.u32 2147483648, %v1614_v18  ;;  %v1623_v4 = vsel %vm1621_vm3, %v1622_v27, %v1614_v18  ;;  %v4093_v39 = vsel %vm4091_vm14, %v1622_v27, %v1614_v18  ;;  %v6515_v19 = vrot.slane %v11161_v12, 4  ;;  %v13859_v18 = vld [vmem:[#allocation44_spill] sm:$0xff] }
 0x243   : > { %13855 = vst [vmem:[#allocation59_spill] sm:$0xff] %v11163_v59  ;;  %v4403_v36 = vsel %vm4401_vm15, %v13857_v23, %v11105_v37  ;;  %v2553_v42 = vand.u32 2139095040, %v11163_v59  ;;  %v6519_v23 = vrot.slane %v11167_v21, 2  ;;  %v13566_v8 = vand.u32 2147483647, %v11163_v59  ;;  %v13870_v37 = vld [vmem:[#allocation25_spill] sm:$0xff] }
 0x244   : > { %v4404_v11 = vsel %vm4397_vm1, %v4400_v47, %v4403_v36  ;;  %v4090_v61 = vsel %vm4088_vm13, %v1606_v48, %v1619_v2  ;;  %v1620_v34 = vsel %vm1618_vm2, %v1606_v48, %v1619_v2  ;;  %v583_v30 = vmul.f32 %v11065_v35, %v13859_v18 }
 0x245   : > { %v4094_v50 = vsel %vm4087_vm12, %v4090_v61, %v4093_v39  ;;  %v1624_v32 = vsel %vm1617_vm5, %v1620_v34, %v1623_v4  ;;  %v2554_v56 = vshrl.u32 %v2553_v42, 23  ;;  %v11188_v48 = vsel %vm1923_vm4, nan, %v4404_v11  ;;  %v13860_v42 = vld [vmem:[#allocation50_spill] sm:$0xff] }
 0x246   : > { %v4095_v47 = vsel %vm1615_vm0, nan, %v4094_v50  ;;  %v11184_v36 = vsel %vm1615_vm0, nan, %v1624_v32  ;;  %v2202_v4 = vsub.s32 4294967266, %v11060_v38  ;;  %v502_v3 = vmul.f32 %v11137_v41, %v13860_v42 }
 0x247   : > { %13858 = vst [vmem:[#allocation66_spill] sm:$0xff] %v11184_v36  ;;  %5903 = vrot.lane.b32.xlu0 %v4095_v47, %s8904_s29  ;;  %v6517_v27 = vrot.slane %v4095_v47, 3  ;;  %v8332_v2 = vadd.s32 4294967169, %v2554_v56  ;;  %v6252_v32 = vmul.f32 %v11118_v16, %v11055_v45  ;;  %vm13861_vm2 = vcmask 1044484   ;;  %v13883_v36 = vld [vmem:[#allocation36_spill] sm:$0xff] }
 0x248   : > { %v6516_v11 = vsel %vm13861_vm2, %v6515_v19, %v10994_v24  ;;  %v6244_v61 = vmul.f32 0.5, %v11081_v14  ;;  %vm13862_vm11 = vcmask 1045509   ;;  %v6521_v34 = vrot.slane %v11188_v48, 1  ;;  %v13867_v24 = vld [vmem:[#allocation74_spill] sm:$0xff] }
 0x249   : > { %v6518_v39 = vsel %vm13862_vm11, %v6517_v27, %v6516_v11  ;;  %v2560_v50 = vadd.s32 1, %v8332_v2  ;;  %v13863_v56 = vclz %v11050_v44  ;;  %vm13864_vm5 = vcmask 1046534  }
 0x24a   : > { %v6520_v18 = vsel %vm13864_vm5, %v6519_v23, %v6518_v39  ;;  %v2557_v42 = vand.u32 8388607, %v13566_v8  ;;  %vm13865_vm0 = vcmask 1047559   ;;  %v11212_v19 = vadd.s32 %v13867_v24, %v13866_v40 }
 0x24b   : > { %v8330_v47 = vadd.s32 4294967294, %v13863_v56  ;;  %v6522_v10 = vsel %vm13865_vm0, %v6521_v34, %v6520_v18  ;;  %vm2561_vm7 = vcmp.gt.s32.totalorder %v2560_v50, 0  ;;  %v6253_v27 = vmul.f32 %v11118_v16, %v6252_v32 }
 0x24c   : > { %6537 = vrot.lane.b32.xlu1 %v6522_v10, %s8904_s29  ;;  %v2562_v44 = vsel %vm2561_vm7, %v2560_v50, 0  ;;  %v11217_v2 = vadd.s32 127, %v2202_v4  ;;  %v11219_v23 = vadd.f32 %v583_v30, %v502_v3  ;;  %v6245_v11 = vsub.f32 1.5, %v6244_v61 }
 0x24d   : > { %v2564_v39 = vand.u32 31, %v2562_v44  ;;  %vm8331_vm10 = vcmp.lt.s32.totalorder %v8330_v47, 0  ;;  %vm6247_vm3 = vweird.f32 %v10988_v60  ;;  %v2558_v34 = vor.u32 8388608, %v2557_v42 }
 0x24e   : > { %v11222_v56 = vshrl.u32 %v2562_v44, 5  ;;  %vm6248_vm6 = vweird.f32 %v11032_v0  ;;  %v6254_v4 = vmul.f32 0.5, %v6253_v27  ;;  %v13868_v3 = vmov 920167782  }
 0x24f   : > { %v2565_v40 = vsub.s32 32, %v2564_v39  ;;  %v2567_v18 = vshll.u32 %v13692_v58, %v2564_v39  ;;  %v2570_v32 = vshll.u32 %v13755_v25, %v2564_v39  ;;  %v2573_v10 = vshll.u32 %v13753_v55, %v2564_v39  ;;  %vm6249_vm13 = vmor %vm6247_vm3, %vm6248_vm6 }
 0x250   : > { %v2576_v30 = vshll.u32 %v13695_v26, %v2564_v39  ;;  %v2579_v61 = vshll.u32 %v13868_v3, %v2564_v39  ;;  %v6246_v50 = vmul.f32 %v11032_v0, %v6245_v11  ;;  %v13869_v14 = vmov 1326507024  }
 0x251   : > { %v2568_v42 = vshrl.u32 %v13755_v25, %v2565_v40  ;;  %v2571_v24 = vshrl.u32 %v13753_v55, %v2565_v40  ;;  %v2574_v44 = vshrl.u32 %v13695_v26, %v2565_v40  ;;  %v2577_v8 = vshrl.u32 %v13868_v3, %v2565_v40 }
 0x252   : > { %v2580_v52 = vshrl.u32 %v13869_v14, %v2565_v40  ;;  %vm2582_vm12 = vcmp.lt.s32.totalorder %v11222_v56, 1  ;;  %v11237_v21 = vshll.u32 %v2558_v34, 8  ;;  %vm2585_vm1 = vcmp.lt.s32.totalorder %v11222_v56, 4 }
 0x253   : > { %v2569_v27 = vor.u32 %v2568_v42, %v2567_v18  ;;  %v2572_v6 = vor.u32 %v2571_v24, %v2570_v32  ;;  %v2575_v20 = vor.u32 %v2574_v44, %v2573_v10  ;;  %v6255_v11 = vsub.f32 1.5, %v6254_v4 }
 0x254   : > { %5895 = vrot.lane.b32.xlu1 %v10952_v13, %s8904_s29  ;;  %v2578_v39 = vor.u32 %v2577_v8, %v2576_v30  ;;  %v2581_v17 = vor.u32 %v2580_v52, %v2579_v61  ;;  %vm2584_vm15 = vcmp.lt.s32.totalorder %v11222_v56, 3  ;;  %v11245_v28 = vadd.s32 %v10851_v1, %v10846_v51 }
 0x255   : > { %vm2583_vm14 = vcmp.lt.s32.totalorder %v11222_v56, 2  ;;  %v2590_v34 = vsel %vm2582_vm12, %v2569_v27, %v2572_v6  ;;  %v2594_v13 = vsel %vm2582_vm12, %v2572_v6, %v2575_v20  ;;  %v11257_v52 = vsel %vm8331_vm10, 0, %v8330_v47 }
 0x256   : > { %v11260_v8 = vsel %vm6249_vm13, %v11032_v0, %v6246_v50  ;;  %v2591_v51 = vsel %vm2585_vm1, %v2578_v39, 920167782  ;;  %v2595_v1 = vsel %vm2585_vm1, %v2581_v17, 1326507024  ;;  %v2599_v32 = vand.u32 65535, %v11237_v21 }
 0x257   : > { %v2592_v60 = vsel %vm2584_vm15, %v2575_v20, %v2591_v51  ;;  %v2596_v18 = vsel %vm2584_vm15, %v2578_v39, %v2595_v1  ;;  %v2600_v47 = vshrl.u32 %v11237_v21, 16  ;;  %v6256_v10 = vmul.f32 %v11118_v16, %v6255_v11 }
 0x258   : > { %vm6258_vm2 = vweird.f32 %v11118_v16  ;;  %v2593_v0 = vsel %vm2583_vm14, %v2590_v34, %v2592_v60  ;;  %v2597_v17 = vsel %vm2583_vm14, %v2594_v13, %v2596_v18  ;;  %v6263_v42 = vrot.slane %v11260_v8, 1 }
 0x259   : > { %v2601_v4 = vand.u32 65535, %v2597_v17  ;;  %v2602_v30 = vshrl.u32 %v2597_v17, 16  ;;  %v2623_v61 = vand.u32 65535, %v2593_v0  ;;  %v2624_v50 = vshrl.u32 %v2593_v0, 16 }
 0x25a   : > { %v6264_v24 = vrot.slane %v11260_v8, 2  ;;  %v6265_v44 = vrot.slane %v11260_v8, 3  ;;  %vm6257_vm11 = vweird.f32 %v11055_v45  ;;  %v2566_v11 = vshrl.u32 %v13692_v58, %v2565_v40 }
 0x25b   : > { %vm6259_vm5 = vmor %vm6257_vm11, %vm6258_vm2  ;;  %v2603_v39 = vmul.u32 %v2601_v4, %v2599_v32  ;;  %v2604_v34 = vmul.u32 %v2602_v30, %v2599_v32  ;;  %v2605_v51 = vmul.u32 %v2601_v4, %v2600_v47  ;;  %v2625_v1 = vmul.u32 %v2623_v61, %v2599_v32 }
 0x25c   : > { %v11284_v13 = vsel %vm6259_vm5, %v11118_v16, %v6256_v10  ;;  %5901 = vrot.lane.b32.xlu1 %v11161_v12, %s8904_s29  ;;  %v2626_v60 = vmul.u32 %v2624_v50, %v2599_v32  ;;  %v2627_v18 = vmul.u32 %v2623_v61, %v2600_v47  ;;  %v2587_v0 = vsel %vm2585_vm1, %v2575_v20, 2102212464 }
 0x25d   : > { %v2606_v17 = vmul.u32 %v2602_v30, %v2600_v47  ;;  %v2607_v45 = vshll.u32 %v2604_v34, 16  ;;  %v2609_v46 = vshll.u32 %v2605_v51, 16  ;;  %v11292_v40 = vmul.f32 %v11260_v8, %v13870_v37 }
 0x25e   : > { %v2628_v4 = vmul.u32 %v2624_v50, %v2600_v47  ;;  %v2629_v9 = vshll.u32 %v2626_v60, 16  ;;  %v2631_v16 = vshll.u32 %v2627_v18, 16  ;;  %v6270_v10 = vrot.slane %v11284_v13, 1 }
 0x25f   : > { %v2586_v12 = vsel %vm2582_vm12, %v2566_v11, %v2569_v27  ;;  %vm2611_vm0 = vc.u32 %v2603_v39, %v2607_v45  ;;  %v2613_v32 = vadd.s32 %v2607_v45, %v2603_v39  ;;  %v2588_v20 = vsel %vm2584_vm15, %v2572_v6, %v2587_v0  ;;  %v13871_v27 = vld [vmem:[#allocation23_spill] sm:$0xff] }
 0x260   : > { %v2612_v30 = vsel %vm2611_vm0, 1, %v13688_v29  ;;  %vm2633_vm7 = vc.u32 %v2625_v1, %v2629_v9  ;;  %v2635_v61 = vadd.s32 %v2629_v9, %v2625_v1  ;;  %v2608_v15 = vshrl.u32 %v2604_v34, 16 }
 0x261   : > { %v2614_v37 = vadd.s32 %v2612_v30, %v2606_v17  ;;  %vm2615_vm10 = vc.u32 %v2613_v32, %v2609_v46  ;;  %v2634_v47 = vsel %vm2633_vm7, 1, %v13688_v29  ;;  %v2630_v62 = vshrl.u32 %v2626_v60, 16  ;;  %v13872_v46 = vld [vmem:[#allocation34_spill] sm:$0xff] }
 0x262   : > { %v2616_v50 = vsel %vm2615_vm10, 1, %v13688_v29  ;;  %v2636_v33 = vadd.s32 %v2634_v47, %v2628_v4  ;;  %vm2637_vm3 = vc.u32 %v2635_v61, %v2631_v16  ;;  %v6294_v11 = vmul.f32 %v6263_v42, %v13871_v27  ;;  %v13873_v42 = vld [vmem:[#allocation31_spill] sm:$0xff]  ;;  %v13874_v27 = vld [vmem:[#allocation24_spill] sm:$0xff] }
 0x263   : > { %v2610_v39 = vshrl.u32 %v2605_v51, 16  ;;  %v2618_v45 = vadd.s32 %v2616_v50, %v2614_v37  ;;  %v2638_v6 = vsel %vm2637_vm3, 1, %v13688_v29  ;;  %v6271_v0 = vrot.slane %v11284_v13, 2 }
 0x264   : > { %v6272_v9 = vrot.slane %v11284_v13, 3  ;;  %v2632_v34 = vshrl.u32 %v2627_v18, 16  ;;  %v2640_v1 = vadd.s32 %v2638_v6, %v2636_v33  ;;  %v6301_v17 = vmul.f32 %v11284_v13, %v13872_v46 }
 0x265   : > { %v2589_v60 = vsel %vm2583_vm14, %v2586_v12, %v2588_v20  ;;  %v2619_v4 = vadd.s32 %v2618_v45, %v2608_v15  ;;  %v11310_v32 = vadd.s32 %v2635_v61, %v2631_v16  ;;  %v6302_v51 = vmul.f32 %v6270_v10, %v13873_v42  ;;  %v13875_v12 = vld [vmem:[#allocation26_spill] sm:$0xff]  ;;  %v13876_v61 = vld [vmem:[#allocation32_spill] sm:$0xff]  ;;  %v13877_v45 = vld [vmem:[#allocation27_spill] sm:$0xff] }
 0x266   : > { %v2641_v30 = vadd.s32 %v2640_v1, %v2630_v62  ;;  %v6266_v37 = vrot.slane %v11260_v8, 4  ;;  %v6267_v47 = vrot.slane %v11260_v8, 5  ;;  %v6268_v33 = vrot.slane %v11260_v8, 6  ;;  %v13878_v1 = vld [vmem:[#allocation28_spill] sm:$0xff]  ;;  %v13880_v42 = vld [vmem:[#allocation30_spill] sm:$0xff] }
 0x267   : > { %v11315_v50 = vadd.s32 %v2619_v4, %v2610_v39  ;;  %v6269_v18 = vrot.slane %v11260_v8, 7  ;;  %v6295_v6 = vmul.f32 %v6264_v24, %v13874_v27  ;;  %v2643_v15 = vmul.u32 %v11237_v21, %v2589_v60  ;;  %v8732_v8 = vld [vmem:[%s13420_s2] ss:$0 sm:$0xff] }
 0x268   : > { %v2642_v56 = vadd.s32 %v2641_v30, %v2632_v34  ;;  %v6273_v16 = vrot.slane %v11284_v13, 4  ;;  %v6274_v10 = vrot.slane %v11284_v13, 5  ;;  %v6275_v62 = vrot.slane %v11284_v13, 6  ;;  %v13879_v60 = vld [vmem:[#allocation29_spill] sm:$0xff] }
 0x269   : > { %vm2645_vm6 = vc.u32 %v11315_v50, %v11310_v32  ;;  %v6296_v20 = vmul.f32 %v6265_v44, %v13875_v12  ;;  %v6303_v39 = vmul.f32 %v6271_v0, %v13876_v61  ;;  %v6276_v21 = vrot.slane %v11284_v13, 7  ;;  %v13881_v12 = vld [vmem:[#allocation33_spill] sm:$0xff]  ;;  %v13882_v61 = vld [vmem:[#allocation35_spill] sm:$0xff] }
 0x26a   : > { %v2646_v24 = vadd.s32 1, %v2642_v56  ;;  %v6297_v34 = vmul.f32 %v6266_v37, %v13877_v45  ;;  %v6298_v46 = vmul.f32 %v6267_v47, %v13878_v1  ;;  %v6299_v4 = vmul.f32 %v6268_v33, %v13879_v60  ;;  %v8733_v47 = vld [vmem:[%s13420_s2 + $0x1] ss:$0 sm:$0xff]  ;;  %v8605_v60 = vld [vmem:[%s9024_s18 + $0x38] sm:$0xff] }
 0x26b   : > { %v6300_v30 = vmul.f32 %v6269_v18, %v13880_v42  ;;  %v6311_v27 = vmul.f32 %v8732_v8, %v6294_v11  ;;  %v6312_v5 = vmul.f32 %v8732_v8, %v6295_v6  ;;  %v6304_v0 = vmul.f32 %v6272_v9, %v13881_v12  ;;  %v13885_v11 = vld [vmem:[#allocation38_spill] sm:$0xff] }
 0x26c   : > { %v2647_v44 = vsel %vm2645_vm6, %v2646_v24, %v2642_v56  ;;  %v6305_v22 = vmul.f32 %v6273_v16, %v13882_v61  ;;  %v6306_v49 = vmul.f32 %v6274_v10, %v13883_v36  ;;  %v6307_v31 = vmul.f32 %v6275_v62, %v13884_v57 }
 0x26d   : > { %v6313_v13 = vmul.f32 %v8732_v8, %v6296_v20  ;;  %v6319_v59 = vmul.f32 %v8732_v8, %v6302_v51  ;;  %v6320_v37 = vmul.f32 %v8732_v8, %v6303_v39  ;;  %v11343_v33 = vadd.s32 %v2647_v44, %v2643_v15 }
 0x26e   : > { %v6308_v18 = vmul.f32 %v6276_v21, %v13885_v11  ;;  %v6310_v9 = vmul.f32 %v8732_v8, %v11292_v40  ;;  %v6314_v6 = vmul.f32 %v8732_v8, %v6297_v34  ;;  %v6315_v56 = vmul.f32 %v8732_v8, %v6298_v46 }
 0x26f   : > { %v6316_v16 = vmul.f32 %v8732_v8, %v6299_v4  ;;  %v6328_v36 = vadd.f32 %v8733_v47, %v6311_v27  ;;  %v6329_v10 = vadd.f32 %v8733_v47, %v6312_v5  ;;  %v6317_v57 = vmul.f32 %v8732_v8, %v6300_v30 }
 0x270   : > { %v6318_v62 = vmul.f32 %v8732_v8, %v6301_v17  ;;  %v6321_v51 = vmul.f32 %v8732_v8, %v6304_v0  ;;  %v6322_v20 = vmul.f32 %v8732_v8, %v6305_v22  ;;  %v6323_v39 = vmul.f32 %v8732_v8, %v6306_v49 }
 0x271   : > { %v6330_v24 = vadd.f32 %v8733_v47, %v6313_v13  ;;  %v6336_v45 = vadd.f32 %v8733_v47, %v6319_v59  ;;  %v6337_v1 = vadd.f32 %v8733_v47, %v6320_v37  ;;  %v2649_v15 = vadd.s32 536870912, %v11343_v33 }
 0x272   : > { %v6324_v21 = vmul.f32 %v8732_v8, %v6307_v31  ;;  %v6325_v42 = vmul.f32 %v8732_v8, %v6308_v18  ;;  %v6327_v44 = vadd.f32 %v8733_v47, %v6310_v9  ;;  %v6331_v40 = vadd.f32 %v8733_v47, %v6314_v6 }
 0x273   : > { %v6332_v34 = vadd.f32 %v8733_v47, %v6315_v56  ;;  %v6344_v46 = vpack.c.bf16 %v6328_v36, %v6328_v36  ;;  %v6345_v4 = vpack.c.bf16 %v6329_v10, %v6329_v10  ;;  %vm13886_vm12 = vcmask 392192  }
 0x274   : > { %8455 = vmatmul.msk.bf16.gmra.mxu0 %vm13886_vm12, %v8605_v60  ;;  %v6333_v5 = vadd.f32 %v8733_v47, %v6316_v16  ;;  %v6334_v17 = vadd.f32 %v8733_v47, %v6317_v57  ;;  %v6335_v30 = vadd.f32 %v8733_v47, %v6318_v62  ;;  %v6338_v22 = vadd.f32 %v8733_v47, %v6321_v51 }
 0x275   : > { %v6339_v49 = vadd.f32 %v8733_v47, %v6322_v20  ;;  %v6346_v27 = vpack.c.bf16 %v6330_v24, %v6330_v24  ;;  %v6352_v59 = vpack.c.bf16 %v6336_v45, %v6336_v45  ;;  %v6353_v12 = vpack.c.bf16 %v6337_v1, %v6337_v1 }
 0x276   : > { %v11350_v0 = vshrl.u32 %v2649_v15, 30  ;;  %v6340_v61 = vadd.f32 %v8733_v47, %v6323_v39  ;;  %v6341_v31 = vadd.f32 %v8733_v47, %v6324_v21  ;;  %v6342_v8 = vadd.f32 %v8733_v47, %v6325_v42  ;;  %v647_v39 = vpop.permute.xlu1 %646 }
 0x277   : > { %v6343_v13 = vpack.c.bf16 %v6327_v44, %v6327_v44  ;;  %v6347_v37 = vpack.c.bf16 %v6331_v40, %v6331_v40  ;;  %v6382_v11 = vunpack.c.l.b16 %v6344_v46  ;;  %v6383_v18 = vunpack.c.l.b16 %v6345_v4 }
 0x278   : > { %v6348_v9 = vpack.c.bf16 %v6332_v34, %v6332_v34  ;;  %v6349_v6 = vpack.c.bf16 %v6333_v5, %v6333_v5  ;;  %v6351_v56 = vpack.c.bf16 %v6335_v30, %v6335_v30  ;;  %v6354_v16 = vpack.c.bf16 %v6338_v22, %v6338_v22 }
 0x279   : > { %v6350_v36 = vpack.c.bf16 %v6334_v17, %v6334_v17  ;;  %v6384_v10 = vunpack.c.l.b16 %v6346_v27  ;;  %v6390_v57 = vunpack.c.l.b16 %v6352_v59  ;;  %v6391_v62 = vunpack.c.l.b16 %v6353_v12 }
 0x27a   : > { %v2651_v51 = vshll.u32 %v11350_v0, 30  ;;  %v6355_v20 = vpack.c.bf16 %v6339_v49, %v6339_v49  ;;  %v6356_v24 = vpack.c.bf16 %v6340_v61, %v6340_v61  ;;  %v6357_v45 = vpack.c.bf16 %v6341_v31, %v6341_v31 }
 0x27b   : > { %v6381_v1 = vunpack.c.l.b16 %v6343_v13  ;;  %v6385_v47 = vunpack.c.l.b16 %v6347_v37  ;;  %v6397_v15 = vrot.slane %v6382_v11, 7  ;;  %v6399_v60 = vrot.slane %v6383_v18, 6 }
 0x27c   : > { %v6358_v21 = vpack.c.bf16 %v6342_v8, %v6342_v8  ;;  %v6386_v42 = vunpack.c.l.b16 %v6348_v9  ;;  %v6389_v44 = vunpack.c.l.b16 %v6351_v56  ;;  %v6392_v40 = vunpack.c.l.b16 %v6354_v16 }
 0x27d   : > { %vm13887_vm1 = vcmask 1041409   ;;  %v6401_v46 = vrot.slane %v6384_v10, 5  ;;  %v6411_v4 = vrot.slane %v6390_v57, 7  ;;  %v6413_v5 = vrot.slane %v6391_v62, 6 }
 0x27e   : > { %v6398_v34 = vsel %vm13887_vm1, %v6397_v15, %v6381_v1  ;;  %v2510_v17 = vsub.s32 4294967266, %v11257_v52  ;;  %v6387_v30 = vunpack.c.l.b16 %v6349_v6  ;;  %v6393_v22 = vunpack.c.l.b16 %v6355_v20  ;;  %vm13890_vm14 = vmmov %vm13887_vm1  ;;  %v11365_v62 = vpop.permute.xlu1 %638 }
 0x27f   : > { %vm13888_vm15 = vcmask 1042434   ;;  %v6394_v27 = vunpack.c.l.b16 %v6356_v24  ;;  %vm13889_vm13 = vcmask 1043459   ;;  %v6403_v12 = vrot.slane %v6385_v47, 4 }
 0x280   : > { %v6400_v49 = vsel %vm13888_vm15, %v6399_v60, %v6398_v34  ;;  %v6412_v61 = vsel %vm13890_vm14, %v6411_v4, %v6389_v44  ;;  %v11359_v31 = vsub.s32 %v11343_v33, %v2651_v51  ;;  %v6388_v8 = vunpack.c.l.b16 %v6350_v36  ;;  %vm13892_vm11 = vmmov %vm13888_vm15  ;;  %v566_v44 = vpop.permute.xlu0 %565 }
 0x281   : > { %v6402_v59 = vsel %vm13889_vm13, %v6401_v46, %v6400_v49  ;;  %v6395_v13 = vunpack.c.l.b16 %v6357_v45  ;;  %v6405_v37 = vrot.slane %v6386_v42, 3  ;;  %v6396_v11 = vunpack.c.l.b16 %v6358_v21  ;;  %vm13894_vm0 = vmmov %vm13889_vm13 }
 0x282   : > { %vm13891_vm2 = vcmask 1044484   ;;  %v6414_v9 = vsel %vm13892_vm11, %v6413_v5, %v6412_v61  ;;  %v6415_v6 = vrot.slane %v6392_v40, 5  ;;  %v2506_v56 = vsub.s32 32, %v11257_v52 }
 0x283   : > { %v6404_v18 = vsel %vm13891_vm2, %v6403_v12, %v6402_v59  ;;  %vm13893_vm5 = vcmask 1045509   ;;  %v6407_v10 = vrot.slane %v6387_v30, 2  ;;  %v6417_v57 = vrot.slane %v6393_v22, 4  ;;  %vm13896_vm10 = vmmov %vm13891_vm2 }
 0x284   : > { %v6406_v16 = vsel %vm13893_vm5, %v6405_v37, %v6404_v18  ;;  %v2511_v20 = vadd.s32 127, %v2510_v17  ;;  %v6416_v33 = vsel %vm13894_vm0, %v6415_v6, %v6414_v9  ;;  %v6419_v36 = vrot.slane %v6394_v27, 3  ;;  %vm13897_vm3 = vmmov %vm13893_vm5 }
 0x285   : > { %v680_v51 = vmul.f32 %v11143_v63, %v647_v39  ;;  %v2654_v24 = vsub.s32 0, %v11359_v31  ;;  %vm13895_vm7 = vcmask 1046534   ;;  %v6418_v1 = vsel %vm13896_vm10, %v6417_v57, %v6416_v33 }
 0x286   : > { %v6408_v45 = vsel %vm13895_vm7, %v6407_v10, %v6406_v16  ;;  %v6421_v47 = vrot.slane %v6395_v13, 2  ;;  %v6409_v15 = vrot.slane %v6388_v8, 1  ;;  %v6420_v60 = vsel %vm13897_vm3, %v6419_v36, %v6418_v1  ;;  %vm13899_vm12 = vmmov %vm13895_vm7  ;;  %v484_v8 = vpop.permute.xlu1 %483 }
 0x287   : > { %v6423_v21 = vrot.slane %v6396_v11, 1  ;;  %v11374_v42 = vadd.f32 %v680_v51, %v11219_v23  ;;  %v2204_v40 = vshll.u32 %v11217_v2, 23  ;;  %vm2653_vm6 = vcmp.lt.s32.totalorder %v11359_v31, 0 }
 0x288   : > { %v6422_v39 = vsel %vm13899_vm12, %v6421_v47, %v6420_v60  ;;  %v13900_v34 = vsub.s32 32, %v11060_v38  ;;  %vm13901_vm1 = vcmask 1047559   ;;  %v2199_v23 = vshll.u32 %v10921_v53, %v11060_v38  ;;  %v663_v11 = vpop.permute.xlu0 %662 }
 0x289   : > { %13898 = vst [vmem:[#allocation54_spill] sm:$0xff] %v11374_v42  ;;  %v6410_v4 = vsel %vm13901_vm1, %v6409_v15, %v6408_v45  ;;  %vm13902_vm15 = vmmov %vm13901_vm1  ;;  %v2245_v17 = vand.u32 2139095040, %v11374_v42  ;;  %v2507_v2 = vshll.u32 %v11016_v43, %v11257_v52  ;;  %v2508_v22 = vshrl.u32 %v11245_v28, %v2506_v56 }
 0x28a   : > { %v2200_v46 = vshrl.u32 %v11212_v19, %v13900_v34  ;;  %v6424_v5 = vsel %vm13902_vm15, %v6423_v21, %v6422_v39  ;;  %v2512_v49 = vshll.u32 %v2511_v20, 23  ;;  %v2655_v27 = vsel %vm2653_vm6, %v2654_v24, %v11359_v31  ;;  %v11407_v39 = vpop.permute.xlu2 %569 }
 0x28b   : > { %v6425_v30 = vpack.c.b16 %v6424_v5, %v6410_v4  ;;  %v2246_v59 = vshrl.u32 %v2245_v17, 23  ;;  %v2205_v19 = vor.u32 4788187, %v2204_v40  ;;  %vm13903_vm13 = vcmask 392192   ;;  %v13904_v17 = vld [vmem:[#allocation70_spill] sm:$0xff] }
 0x28c   : > { %v2201_v12 = vor.u32 %v2200_v46, %v2199_v23  ;;  %v2656_v13 = vclz %v2655_v27  ;;  %v13595_v37 = vand.u32 2147483647, %v11374_v42  ;;  %v587_v53 = vmul.f32 %v11065_v35, %v566_v44 }
 0x28d   : > { %8476 = vmatmul.msk.bf16.vlgmr.msra.gmra.mxu2 %vm13903_vm13, %v6425_v30  ;;  %v8326_v61 = vadd.s32 4294967169, %v2246_v59  ;;  %v506_v43 = vmul.f32 %v11137_v41, %v484_v8  ;;  %v2509_v38 = vor.u32 %v2508_v22, %v2507_v2  ;;  %v2513_v52 = vor.u32 4788187, %v2512_v49 }
 0x28e   : > { %v2206_v18 = vand.u32 2147483647, %v2205_v19  ;;  %v684_v6 = vmul.f32 %v11143_v63, %v663_v11  ;;  %v2208_v56 = vcvt.s32.f32 %v2201_v12  ;;  %v8333_v16 = vadd.s32 4294967294, %v2656_v13 }
 0x28f   : > { %v2252_v28 = vadd.s32 1, %v8326_v61  ;;  %v603_v9 = vadd.f32 %v587_v53, %v506_v43  ;;  %v2249_v10 = vand.u32 8388607, %v13595_v37  ;;  %v2514_v33 = vand.u32 2147483647, %v2513_v52 }
 0x290   : > { %v2516_v36 = vcvt.s32.f32 %v2509_v38  ;;  %v2209_v24 = vmul.f32 %v2208_v56, %v2206_v18  ;;  %vm8334_vm2 = vcmp.lt.s32.totalorder %v8333_v16, 0  ;;  %vm2398_vm11 = vcmp.lt.s32.totalorder %v13904_v17, 0 }
 0x291   : > { %vm2253_vm14 = vcmp.gt.s32.totalorder %v2252_v28, 0  ;;  %v11398_v20 = vadd.f32 %v684_v6, %v603_v9  ;;  %v2250_v21 = vor.u32 8388608, %v2249_v10  ;;  %v11416_v30 = vsel %vm8334_vm2, 0, %v8333_v16 }
 0x292   : > { %v2254_v57 = vsel %vm2253_vm14, %v2252_v28, 0  ;;  %v2517_v34 = vmul.f32 %v2516_v36, %v2514_v33  ;;  %v2210_v61 = vxor.u32 2147483648, %v2209_v24  ;;  %v2660_v43 = vsub.s32 32, %v11416_v30 }
 0x293   : > { %v2256_v51 = vand.u32 31, %v2254_v57  ;;  %v11400_v45 = vshrl.u32 %v2254_v57, 5  ;;  %v11423_v12 = vshll.u32 %v2250_v21, 8  ;;  %v2664_v28 = vsub.s32 4294967266, %v11416_v30 }
 0x294   : > { %v2518_v8 = vxor.u32 2147483648, %v2517_v34 }
 0x295   : > { %v2257_v1 = vsub.s32 32, %v2256_v51  ;;  %v2259_v47 = vshll.u32 %v13692_v58, %v2256_v51  ;;  %v2262_v15 = vshll.u32 %v13755_v25, %v2256_v51  ;;  %v2265_v60 = vshll.u32 %v13753_v55, %v2256_v51 }
 0x296   : > { %v2268_v44 = vshll.u32 %v13695_v26, %v2256_v51  ;;  %v2271_v40 = vshll.u32 %v13868_v3, %v2256_v51  ;;  %vm2274_vm5 = vcmp.lt.s32.totalorder %v11400_v45, 1  ;;  %vm2277_vm0 = vcmp.lt.s32.totalorder %v11400_v45, 4  ;;  %v13905_v51 = vld [vmem:[#allocation47_spill] sm:$0xff] }
 0x297   : > { %v2260_v46 = vshrl.u32 %v13755_v25, %v2257_v1  ;;  %v2263_v4 = vshrl.u32 %v13753_v55, %v2257_v1  ;;  %v2266_v5 = vshrl.u32 %v13695_v26, %v2257_v1  ;;  %v2269_v23 = vshrl.u32 %v13868_v3, %v2257_v1 }
 0x298   : > { %v2272_v2 = vshrl.u32 %v13869_v14, %v2257_v1  ;;  %vm2276_vm7 = vcmp.lt.s32.totalorder %v11400_v45, 3  ;;  %vm2275_vm10 = vcmp.lt.s32.totalorder %v11400_v45, 2  ;;  %v2291_v56 = vand.u32 65535, %v11423_v12 }
 0x299   : > { %v11418_v22 = vor.u32 %v2260_v46, %v2259_v47  ;;  %v11420_v49 = vor.u32 %v2263_v4, %v2262_v15  ;;  %v2267_v27 = vor.u32 %v2266_v5, %v2265_v60  ;;  %v2270_v59 = vor.u32 %v2269_v23, %v2268_v44  ;;  %v667_v47 = vpop.permute.xlu2 %666 }
 0x29a   : > { %v2273_v19 = vor.u32 %v2272_v2, %v2271_v40  ;;  %v2292_v16 = vshrl.u32 %v11423_v12, 16  ;;  %vm2090_vm3 = vcmp.lt.s32.totalorder %v13905_v51, 0  ;;  %v2644_v60 = vadd.s32 %v11310_v32, %v11315_v50 }
 0x29b   : > { %v2282_v13 = vsel %vm2274_vm5, %v11418_v22, %v11420_v49  ;;  %v2286_v53 = vsel %vm2274_vm5, %v11420_v49, %v2267_v27  ;;  %v2283_v38 = vsel %vm2277_vm0, %v2270_v59, 920167782  ;;  %v11453_v15 = vsel %vm2090_vm3, %v2210_v61, %v2209_v24 }
 0x29c   : > { %v2287_v52 = vsel %vm2277_vm0, %v2273_v19, 1326507024  ;;  %v2284_v11 = vsel %vm2276_vm7, %v2267_v27, %v2283_v38  ;;  %v11459_v40 = vsel %vm2398_vm11, %v2518_v8, %v2517_v34  ;;  %v11463_v46 = vmul.f32 %v11137_v41, %v11037_v7 }
 0x29d   : > { %v2288_v18 = vsel %vm2276_vm7, %v2270_v59, %v2287_v52  ;;  %v2285_v9 = vsel %vm2275_vm10, %v2282_v13, %v2284_v11  ;;  %v2662_v23 = vshrl.u32 %v2644_v60, %v2660_v43  ;;  %v2665_v2 = vadd.s32 127, %v2664_v28 }
 0x29e   : > { %v2289_v6 = vsel %vm2275_vm10, %v2286_v53, %v2288_v18  ;;  %v2315_v33 = vand.u32 65535, %v2285_v9  ;;  %v2316_v36 = vshrl.u32 %v2285_v9, 16  ;;  %v2258_v19 = vshrl.u32 %v13692_v58, %v2257_v1 }
 0x29f   : > { %v2293_v10 = vand.u32 65535, %v2289_v6  ;;  %v2294_v57 = vshrl.u32 %v2289_v6, 16  ;;  %v2861_v28 = vand.u32 2139095040, %v11398_v20  ;;  %v13906_v1 = vand.u32 2147483647, %v13904_v17 }
 0x2a0   : > { %v2318_v4 = vmul.u32 %v2316_v36, %v2291_v56  ;;  %v2319_v5 = vmul.u32 %v2315_v33, %v2292_v16  ;;  %v2317_v32 = vmul.u32 %v2315_v33, %v2291_v56  ;;  %v2320_v34 = vmul.u32 %v2316_v36, %v2292_v16  ;;  %v489_v33 = vpop.permute.xlu1 %488 }
 0x2a1   : > { %v2296_v21 = vmul.u32 %v2294_v57, %v2291_v56  ;;  %v2297_v44 = vmul.u32 %v2293_v10, %v2292_v16  ;;  %v2295_v59 = vmul.u32 %v2293_v10, %v2291_v56  ;;  %v2298_v61 = vmul.u32 %v2294_v57, %v2292_v16 }
 0x2a2   : > { %v2321_v50 = vshll.u32 %v2318_v4, 16  ;;  %v2323_v38 = vshll.u32 %v2319_v5, 16  ;;  %vm11471_vm15 = vcmp.le.f32.partialorder %v13906_v1, 0.7853982  ;;  %v2279_v18 = vsel %vm2277_vm0, %v2267_v27, 2102212464  ;;  %v5894_v27 = vpop.permute.xlu2 %5893 }
 0x2a3   : > { %v2299_v24 = vshll.u32 %v2296_v21, 16  ;;  %v2301_v13 = vshll.u32 %v2297_v44, 16  ;;  %v2666_v56 = vshll.u32 %v2665_v2, 23  ;;  %v2300_v16 = vshrl.u32 %v2296_v21, 16 }
 0x2a4   : > { %vm2325_vm12 = vc.u32 %v2317_v32, %v2321_v50  ;;  %v2327_v7 = vadd.s32 %v2321_v50, %v2317_v32  ;;  %v2278_v36 = vsel %vm2274_vm5, %v2258_v19, %v11418_v22  ;;  %v2322_v60 = vshrl.u32 %v2318_v4, 16  ;;  %v11487_v50 = vpop.f32.mrf.mxu0 }
 0x2a5   : > { %vm2303_vm6 = vc.u32 %v2295_v59, %v2299_v24  ;;  %v2305_v53 = vadd.s32 %v2299_v24, %v2295_v59  ;;  %v2326_v43 = vsel %vm2325_vm12, 1, %v13688_v29  ;;  %v588_v24 = vmul.f32 %v11065_v35, %v11407_v39  ;;  %13909 = vst [vmem:[#allocation53_spill] sm:$0xff] %v11487_v50 }
 0x2a6   : > { %v2304_v8 = vsel %vm2303_vm6, 1, %v13688_v29  ;;  %v2328_v6 = vadd.s32 %v2326_v43, %v2320_v34  ;;  %vm2329_vm13 = vc.u32 %v2327_v7, %v2323_v38  ;;  %v2302_v2 = vshrl.u32 %v2297_v44, 16 }
 0x2a7   : > { %v2306_v52 = vadd.s32 %v2304_v8, %v2298_v61  ;;  %vm2307_vm1 = vc.u32 %v2305_v53, %v2301_v13  ;;  %v2330_v57 = vsel %vm2329_vm13, 1, %v13688_v29  ;;  %v2280_v61 = vsel %vm2276_vm7, %v11420_v49, %v2279_v18 }
 0x2a8   : > { %v2308_v9 = vsel %vm2307_vm1, 1, %v13688_v29  ;;  %v2332_v59 = vadd.s32 %v2330_v57, %v2328_v6  ;;  %v2862_v32 = vshrl.u32 %v2861_v28, 23  ;;  %v2324_v13 = vshrl.u32 %v2319_v5, 16 }
 0x2a9   : > { %v2310_v10 = vadd.s32 %v2308_v9, %v2306_v52  ;;  %v685_v34 = vmul.f32 %v11143_v63, %v667_v47  ;;  %v507_v22 = vmul.f32 %v11137_v41, %v489_v33  ;;  %v11493_v19 = vadd.s32 %v2327_v7, %v2323_v38 }
 0x2aa   : > { %v2333_v53 = vadd.s32 %v2332_v59, %v2322_v60  ;;  %v8338_v39 = vadd.s32 4294967169, %v2862_v32  ;;  %v5941_v8 = vmul.f32 %v5894_v27, %v11487_v50  ;;  %v2661_v49 = vshll.u32 %v11359_v31, %v11416_v30 }
 0x2ab   : > { %v2311_v21 = vadd.s32 %v2310_v10, %v2300_v16  ;;  %v2281_v44 = vsel %vm2275_vm10, %v2278_v36, %v2280_v61  ;;  %v604_v5 = vadd.f32 %v588_v24, %v507_v22  ;;  %v581_v47 = vmul.f32 %v11065_v35, %v11089_v54 }
 0x2ac   : > { %v2334_v52 = vadd.s32 %v2333_v53, %v2324_v13  ;;  %v13594_v41 = vand.u32 2147483647, %v11398_v20  ;;  %v2868_v38 = vadd.s32 1, %v8338_v39  ;;  %5973 = vrot.lane.b32.xlu1 %v5941_v8, %s8905_s11  ;;  %v2663_v7 = vor.u32 %v2662_v23, %v2661_v49 }
 0x2ad   : > { %v11491_v4 = vadd.s32 %v2311_v21, %v2302_v2  ;;  %v2667_v43 = vor.u32 4788187, %v2666_v56  ;;  %v11506_v30 = vadd.f32 %v685_v34, %v604_v5  ;;  %v13911_v45 = vand.u32 2147483647, %v13905_v51 }
 0x2ae   : > { %v2338_v31 = vadd.s32 1, %v2334_v52  ;;  %v2335_v35 = vmul.u32 %v11423_v12, %v2281_v44  ;;  %vm2869_vm5 = vcmp.gt.s32.totalorder %v2868_v38, 0  ;;  %v11525_v18 = vsel %vm11471_vm15, %v13904_v17, %v11459_v40 }
 0x2af   : > { %vm2337_vm14 = vc.u32 %v11491_v4, %v11493_v19  ;;  %13910 = vst [vmem:[#allocation21_spill] sm:$0xff] %v11506_v30  ;;  %vm11510_vm2 = vcmp.le.f32.partialorder %v13911_v45, 0.7853982  ;;  %v2870_v1 = vsel %vm2869_vm5, %v2868_v38, 0  ;;  %v2865_v6 = vand.u32 8388607, %v13594_v41 }
 0x2b0   : > { %v11519_v54 = vsel %vm11510_vm2, %v13905_v51, %v11453_v15  ;;  %v2339_v23 = vsel %vm2337_vm14, %v2338_v31, %v2334_v52  ;;  %v2872_v12 = vand.u32 31, %v2870_v1  ;;  %v597_v56 = vadd.f32 %v581_v47, %v11463_v46  ;;  %v13916_v38 = vld [vmem:[#allocation59_spill] sm:$0xff] }
 0x2b1   : > { %v2340_v9 = vadd.s32 %v2339_v23, %v2335_v35  ;;  %v2668_v16 = vand.u32 2147483647, %v2667_v43  ;;  %v2670_v10 = vcvt.s32.f32 %v2663_v7  ;;  %v678_v15 = vmul.f32 %v11143_v63, %v11365_v62 }
 0x2b2   : > { %v11532_v33 = vshrl.u32 %v2870_v1, 5  ;;  %v11534_v36 = vsub.s32 32, %v2872_v12  ;;  %v2875_v40 = vshll.u32 %v13692_v58, %v2872_v12  ;;  %v2878_v60 = vshll.u32 %v13755_v25, %v2872_v12 }
 0x2b3   : > { %v2341_v57 = vadd.s32 536870912, %v2340_v9  ;;  %v2881_v59 = vshll.u32 %v13753_v55, %v2872_v12  ;;  %v2884_v24 = vshll.u32 %v13695_v26, %v2872_v12  ;;  %v2887_v46 = vshll.u32 %v13868_v3, %v2872_v12 }
 0x2b4   : > { %v2866_v61 = vor.u32 8388608, %v2865_v6  ;;  %v2876_v63 = vshrl.u32 %v13755_v25, %v11534_v36  ;;  %v2879_v62 = vshrl.u32 %v13753_v55, %v11534_v36  ;;  %5907 = vrot.lane.b32.xlu1 %v11188_v48, %s8904_s29  ;;  %v2671_v2 = vmul.f32 %v2670_v10, %v2668_v16 }
 0x2b5   : > { %v11541_v27 = vshrl.u32 %v2341_v57, 30  ;;  %v2882_v21 = vshrl.u32 %v13695_v26, %v11534_v36  ;;  %v2885_v32 = vshrl.u32 %v13868_v3, %v11534_v36  ;;  %v2888_v13 = vshrl.u32 %v13869_v14, %v11534_v36 }
 0x2b6   : > { %v11556_v34 = vadd.f32 %v678_v15, %v597_v56  ;;  %v11558_v22 = vor.u32 %v2876_v63, %v2875_v40  ;;  %vm2890_vm0 = vcmp.lt.s32.totalorder %v11532_v33, 1  ;;  %v11561_v39 = vor.u32 %v2879_v62, %v2878_v60 }
 0x2b7   : > { %v2343_v53 = vshll.u32 %v11541_v27, 30  ;;  %v11563_v48 = vor.u32 %v2882_v21, %v2881_v59  ;;  %v2886_v8 = vor.u32 %v2885_v32, %v2884_v24  ;;  %v2889_v49 = vor.u32 %v2888_v13, %v2887_v46 }
 0x2b8   : > { %13914 = vst [vmem:[#allocation63_spill] sm:$0xff] %v11556_v34  ;;  %v11567_v44 = vmul.f32 %v11519_v54, %v11519_v54  ;;  %v11571_v52 = vmul.f32 %v11525_v18, %v11525_v18  ;;  %v11575_v47 = vshll.u32 %v2866_v61, 8  ;;  %vm2552_vm7 = vcmp.lt.s32.totalorder %v13916_v38, 0 }
 0x2b9   : > { %v11573_v5 = vsub.s32 %v2340_v9, %v2343_v53  ;;  %v2672_v7 = vxor.u32 2147483648, %v2671_v2  ;;  %vm2892_vm10 = vcmp.lt.s32.totalorder %v11532_v33, 3  ;;  %vm2893_vm6 = vcmp.lt.s32.totalorder %v11532_v33, 4 }
 0x2ba   : > { %13915 = vst [vmem:[#allocation49_spill] sm:$0xff] %v11571_v52  ;;  %vm2891_vm1 = vcmp.lt.s32.totalorder %v11532_v33, 2  ;;  %v2898_v31 = vsel %vm2890_vm0, %v11558_v22, %v11561_v39  ;;  %v1937_v45 = vand.u32 2139095040, %v11556_v34  ;;  %v2899_v35 = vsel %vm2893_vm6, %v2886_v8, 920167782 }
 0x2bb   : > { %vm2345_vm12 = vcmp.lt.s32.totalorder %v11573_v5, 0  ;;  %v2346_v43 = vsub.s32 0, %v11573_v5  ;;  %v2902_v23 = vsel %vm2890_vm0, %v11561_v39, %v11563_v48  ;;  %v2903_v1 = vsel %vm2893_vm6, %v2889_v49, 1326507024 }
 0x2bc   : > { %v2900_v9 = vsel %vm2892_vm10, %v11563_v48, %v2899_v35  ;;  %v2904_v6 = vsel %vm2892_vm10, %v2886_v8, %v2903_v1  ;;  %v2907_v12 = vand.u32 65535, %v11575_v47  ;;  %v2908_v56 = vshrl.u32 %v11575_v47, 16  ;;  %v8819_v1 = vld [vmem:[%s13420_s2 + $0x6] ss:$0 sm:$0xff] }
 0x2bd   : > { %v2673_v16 = vsel %vm2552_vm7, %v2672_v7, %v2671_v2  ;;  %v2347_v10 = vsel %vm2345_vm12, %v2346_v43, %v11573_v5  ;;  %v2901_v15 = vsel %vm2891_vm1, %v2898_v31, %v2900_v9  ;;  %v2905_v57 = vsel %vm2891_vm1, %v2902_v23, %v2904_v6  ;;  %v13920_v9 = vld [vmem:[#allocation56_spill] sm:$0xff] }
 0x2be   : > { %v2909_v40 = vand.u32 65535, %v2905_v57  ;;  %v2910_v60 = vshrl.u32 %v2905_v57, 16  ;;  %v2931_v59 = vand.u32 65535, %v2901_v15  ;;  %v2932_v24 = vshrl.u32 %v2901_v15, 16 }
 0x2bf   : > { %v2224_v46 = vmul.f32 -0.00019511016, %v11567_v44  ;;  %v2532_v61 = vmul.f32 -0.00019511016, %v11571_v52  ;;  %v13917_v63 = vand.u32 2147483647, %v13916_v38  ;;  %v2348_v53 = vclz %v2347_v10 }
 0x2c0   : > { %v2911_v21 = vmul.u32 %v2909_v40, %v2907_v12  ;;  %v2912_v32 = vmul.u32 %v2910_v60, %v2907_v12  ;;  %v2913_v13 = vmul.u32 %v2909_v40, %v2908_v56  ;;  %v1938_v8 = vshrl.u32 %v1937_v45, 23 }
 0x2c1   : > { %vm11614_vm13 = vcmp.le.f32.partialorder %v13917_v63, 0.7853982  ;;  %v2934_v49 = vmul.u32 %v2932_v24, %v2907_v12  ;;  %v2914_v7 = vmul.u32 %v2910_v60, %v2908_v56  ;;  %v2935_v35 = vmul.u32 %v2931_v59, %v2908_v56 }
 0x2c2   : > { %v11621_v2 = vsel %vm11614_vm13, %v13916_v38, %v2673_v16  ;;  %v2915_v43 = vshll.u32 %v2912_v32, 16  ;;  %v2917_v31 = vshll.u32 %v2913_v13, 16  ;;  %v2225_v23 = vadd.f32 0.008332121, %v2224_v46 }
 0x2c3   : > { %v505_v6 = vmul.f32 %v8819_v1, %v13920_v9  ;;  %v11629_v16 = vmul.f32 %v11621_v2, %v11621_v2  ;;  %v2933_v15 = vmul.u32 %v2931_v59, %v2907_v12  ;;  %v2533_v57 = vadd.f32 0.008332121, %v2532_v61 }
 0x2c4   : > { %vm2919_vm14 = vc.u32 %v2911_v21, %v2915_v43  ;;  %v2921_v45 = vadd.s32 %v2915_v43, %v2911_v21  ;;  %v2937_v10 = vshll.u32 %v2934_v49, 16  ;;  %v8327_v40 = vadd.s32 4294967294, %v2348_v53 }
 0x2c5   : > { %13921 = vst [vmem:[#allocation57_spill] sm:$0xff] %v11629_v16  ;;  %v8320_v60 = vadd.s32 4294967169, %v1938_v8  ;;  %v2920_v63 = vsel %vm2919_vm14, 1, %v13688_v29  ;;  %v2936_v46 = vmul.u32 %v2932_v24, %v2908_v56  ;;  %v2916_v41 = vshrl.u32 %v2912_v32, 16  ;;  %v8820_v24 = vld [vmem:[%s13420_s2 + $0x7] ss:$0 sm:$0xff] }
 0x2c6   : > { %v2922_v37 = vadd.s32 %v2920_v63, %v2914_v7  ;;  %vm2923_vm5 = vc.u32 %v2921_v45, %v2917_v31  ;;  %v2939_v50 = vshll.u32 %v2935_v35, 16  ;;  %v2686_v1 = vmul.f32 -0.00019511016, %v11629_v16  ;;  %v13922_v32 = vld [vmem:[#allocation60_spill] sm:$0xff] }
 0x2c7   : > { %v2874_v9 = vshrl.u32 %v13692_v58, %v11534_v36  ;;  %v2924_v12 = vsel %vm2923_vm5, 1, %v13688_v29  ;;  %vm2941_vm12 = vc.u32 %v2933_v15, %v2937_v10  ;;  %v2895_v59 = vsel %vm2893_vm6, %v11563_v48, 2102212464 }
 0x2c8   : > { %v2926_v61 = vadd.s32 %v2924_v12, %v2922_v37  ;;  %v2942_v21 = vsel %vm2941_vm12, 1, %v13688_v29  ;;  %v2943_v56 = vadd.s32 %v2937_v10, %v2933_v15  ;;  %v586_v53 = vmul.f32 %v8820_v24, %v13922_v32  ;;  %v659_v10 = vpop.permute.xlu1 %658 }
 0x2c9   : > { %v2534_v8 = vmul.f32 %v2533_v57, %v11571_v52  ;;  %v2918_v36 = vshrl.u32 %v2913_v13, 16  ;;  %v2944_v7 = vadd.s32 %v2942_v21, %v2936_v46  ;;  %vm8328_vm14 = vcmp.lt.s32.totalorder %v8327_v40, 0 }
 0x2ca   : > { %v2927_v43 = vadd.s32 %v2926_v61, %v2916_v41  ;;  %v2938_v31 = vshrl.u32 %v2934_v49, 16  ;;  %vm2945_vm5 = vc.u32 %v2943_v56, %v2939_v50  ;;  %v2226_v48 = vmul.f32 %v2225_v23, %v11567_v44  ;;  %v13923_v61 = vld [vmem:[#allocation62_spill] sm:$0xff] }
 0x2cb   : > { %v2894_v37 = vsel %vm2890_vm0, %v2874_v9, %v11558_v22  ;;  %v2896_v15 = vsel %vm2892_vm10, %v11561_v39, %v2895_v59  ;;  %v2946_v45 = vsel %vm2945_vm5, 1, %v13688_v29  ;;  %v2687_v57 = vadd.f32 0.008332121, %v2686_v1  ;;  %v8821_v39 = vld [vmem:[%s13420_s2 + $0x8] ss:$0 sm:$0xff] }
 0x2cc   : > { %v1944_v13 = vadd.s32 1, %v8320_v60  ;;  %v2940_v63 = vshrl.u32 %v2935_v35, 16  ;;  %v2948_v46 = vadd.s32 %v2946_v45, %v2944_v7  ;;  %v2535_v41 = vadd.f32 -0.16666654, %v2534_v8 }
 0x2cd   : > { %v2351_v49 = vsel %vm8328_vm14, 0, %v8327_v40  ;;  %v11653_v12 = vadd.s32 %v2927_v43, %v2918_v36  ;;  %v11655_v23 = vadd.s32 %v2943_v56, %v2939_v50  ;;  %v2897_v22 = vsel %vm2891_vm1, %v2894_v37, %v2896_v15  ;;  %v13925_v36 = vld [vmem:[#allocation42_spill] sm:$0xff] }
 0x2ce   : > { %v2949_v9 = vadd.s32 %v2948_v46, %v2938_v31  ;;  %v683_v59 = vmul.f32 %v8821_v39, %v659_v10  ;;  %v2212_v1 = vsub.s32 4, %v13923_v61  ;;  %v602_v60 = vadd.f32 %v586_v53, %v505_v6 }
 0x2cf   : > { %v2688_v35 = vmul.f32 %v2687_v57, %v11629_v16  ;;  %v2356_v21 = vsub.s32 4294967266, %v2351_v49  ;;  %vm1945_vm0 = vcmp.gt.s32.totalorder %v1944_v13, 0  ;;  %v2227_v24 = vadd.f32 -0.16666654, %v2226_v48 }
 0x2d0   : > { %v2950_v40 = vadd.s32 %v2949_v9, %v2940_v63  ;;  %v2536_v50 = vmul.f32 %v2535_v41, %v11571_v52  ;;  %v2951_v33 = vmul.u32 %v11575_v47, %v2897_v22  ;;  %vm2953_vm10 = vc.u32 %v11653_v12, %v11655_v23 }
 0x2d1   : > { %v11668_v32 = vadd.f32 %v683_v59, %v602_v60  ;;  %v2213_v6 = vsel %vm2090_vm3, %v2212_v1, %v13923_v61  ;;  %v1946_v53 = vsel %vm1945_vm0, %v1944_v13, 0  ;;  %v3015_v8 = vand.u32 2139095040, %v11506_v30  ;;  %v13927_v61 = vld [vmem:[#allocation67_spill] sm:$0xff] }
 0x2d2   : > { %v2954_v56 = vadd.s32 1, %v2950_v40  ;;  %v2520_v7 = vsub.s32 4, %v13925_v36  ;;  %v2689_v43 = vadd.f32 -0.16666654, %v2688_v35  ;;  %v2357_v31 = vadd.s32 127, %v2356_v21 }
 0x2d3   : > { %13924 = vst [vmem:[#allocation75_spill] sm:$0xff] %v11668_v32  ;;  %v2228_v47 = vmul.f32 %v2227_v24, %v11567_v44  ;;  %v2537_v37 = vadd.f32 1.0, %v2536_v50  ;;  %v2352_v45 = vsub.s32 32, %v2351_v49  ;;  %v11676_v10 = vand.u32 31, %v1946_v53 }
 0x2d4   : > { %v2955_v48 = vsel %vm2953_vm10, %v2954_v56, %v2950_v40  ;;  %v2707_v57 = vand.u32 2139095040, %v11668_v32  ;;  %v11681_v63 = vsel %vm11510_vm2, 0, %v2213_v6  ;;  %v2674_v13 = vsub.s32 4, %v11350_v0 }
 0x2d5   : > { %v2956_v15 = vadd.s32 %v2955_v48, %v2951_v33  ;;  %13926 = vst [vmem:[#allocation52_spill] sm:$0xff] %v11681_v63  ;;  %v3016_v41 = vshrl.u32 %v3015_v8, 23  ;;  %v2521_v22 = vsel %vm2398_vm11, %v2520_v7, %v13925_v36  ;;  %v2690_v9 = vmul.f32 %v2689_v43, %v11629_v16 }
 0x2d6   : > { %v2336_v39 = vadd.s32 %v11493_v19, %v11491_v4  ;;  %v2358_v59 = vshll.u32 %v2357_v31, 23  ;;  %v11691_v1 = vand.u32 3, %v13927_v61  ;;  %v2229_v28 = vadd.f32 1.0, %v2228_v47 }
 0x2d7   : > { %v2957_v46 = vadd.s32 536870912, %v2956_v15  ;;  %v11694_v60 = vmul.f32 %v2537_v37, %v11525_v18  ;;  %v11699_v21 = vand.u32 3, %v11681_v63  ;;  %v11702_v24 = vsub.s32 32, %v11676_v10 }
 0x2d8   : > { %13928 = vst [vmem:[#allocation44_spill] sm:$0xff] %v11691_v1  ;;  %v2354_v40 = vshrl.u32 %v2336_v39, %v2352_v45  ;;  %v2708_v50 = vshrl.u32 %v2707_v57, 23  ;;  %v11706_v4 = vsel %vm11471_vm15, 0, %v2521_v22  ;;  %v2675_v19 = vsel %vm2552_vm7, %v2674_v13, %v11350_v0 }
 0x2d9   : > { %13929 = vst [vmem:[#allocation50_spill] sm:$0xff] %v11694_v60  ;;  %v11696_v35 = vshrl.u32 %v2957_v46, 30  ;;  %v8341_v33 = vadd.s32 4294967169, %v3016_v41  ;;  %v11713_v56 = vand.u32 3, %v11706_v4  ;;  %v2691_v6 = vadd.f32 1.0, %v2690_v9 }
 0x2da   : > { %13931 = vst [vmem:[#allocation74_spill] sm:$0xff] %v11699_v21  ;;  %v2353_v8 = vshll.u32 %v11573_v5, %v2351_v49  ;;  %v2359_v36 = vor.u32 4788187, %v2358_v59  ;;  %v11717_v7 = vmul.f32 %v2229_v28, %v11519_v54  ;;  %v11725_v0 = vsel %vm11614_vm13, 0, %v2675_v19 }
 0x2db   : > { %13930 = vst [vmem:[#allocation43_spill] sm:$0xff] %v11696_v35  ;;  %v2959_v18 = vshll.u32 %v11696_v35, 30  ;;  %v1961_v37 = vshrl.u32 %v13868_v3, %v11702_v24  ;;  %v8335_v45 = vadd.s32 4294967169, %v2708_v50  ;;  %v1964_v5 = vshrl.u32 %v13869_v14, %v11702_v24 }
 0x2dc   : > { %13932 = vst [vmem:[#allocation25_spill] sm:$0xff] %v11706_v4  ;;  %v2355_v47 = vor.u32 %v2354_v40, %v2353_v8  ;;  %v3022_v49 = vadd.s32 1, %v8341_v33  ;;  %v2360_v57 = vand.u32 2147483647, %v2359_v36  ;;  %v1960_v62 = vshll.u32 %v13695_v26, %v11676_v10 }
 0x2dd   : > { %13933 = vst [vmem:[#allocation23_spill] sm:$0xff] %v11713_v56  ;;  %v11721_v48 = vsub.s32 %v2956_v15, %v2959_v18  ;;  %v11734_v15 = vmul.f32 %v2691_v6, %v11621_v2  ;;  %v13598_v13 = vand.u32 2147483647, %v11506_v30  ;;  %v11739_v46 = vshrl.u32 %v1946_v53, 5 }
 0x2de   : > { %13934 = vst [vmem:[#allocation34_spill] sm:$0xff] %v11717_v7  ;;  %v1963_v41 = vshll.u32 %v13868_v3, %v11676_v10  ;;  %v13600_v9 = vand.u32 2147483647, %v11668_v32  ;;  %v2362_v39 = vcvt.s32.f32 %v2355_v47  ;;  %v11745_v59 = vor.u32 %v1961_v37, %v1960_v62 }
 0x2df   : > { %13936 = vst [vmem:[#allocation31_spill] sm:$0xff] %v11725_v0  ;;  %vm2961_vm11 = vcmp.lt.s32.totalorder %v11721_v48, 0  ;;  %v2962_v54 = vsub.s32 0, %v11721_v48  ;;  %v2714_v61 = vadd.s32 1, %v8335_v45  ;;  %v2366_v28 = vsub.s32 4, %v11541_v27 }
 0x2e0   : > { %13937 = vst [vmem:[#allocation24_spill] sm:$0xff] %v11734_v15  ;;  %v1965_v40 = vor.u32 %v1964_v5, %v1963_v41  ;;  %vm3023_vm3 = vcmp.gt.s32.totalorder %v3022_v49, 0  ;;  %v13599_v50 = vand.u32 2147483647, %v11556_v34  ;;  %v11750_v53 = vand.u32 3, %v11725_v0 }
 0x2e1   : > { %v2963_v22 = vsel %vm2961_vm11, %v2962_v54, %v11721_v48  ;;  %v2363_v19 = vmul.f32 %v2362_v39, %v2360_v57  ;;  %v11754_v18 = vand.u32 8388607, %v13598_v13  ;;  %vm2715_vm15 = vcmp.gt.s32.totalorder %v2714_v61, 0 }
 0x2e2   : > { %v2964_v2 = vclz %v2963_v22  ;;  %13938 = vst [vmem:[#allocation26_spill] sm:$0xff] %v11750_v53  ;;  %vm2244_vm2 = vcmp.lt.s32.totalorder %v11374_v42, 0  ;;  %v2711_v6 = vand.u32 8388607, %v13600_v9  ;;  %v2716_v8 = vsel %vm2715_vm15, %v2714_v61, 0 }
 0x2e3   : > { %13939 = vst [vmem:[#allocation32_spill] sm:$0xff] %v11754_v18  ;;  %vm1969_vm7 = vcmp.lt.s32.totalorder %v11739_v46, 4  ;;  %v3024_v47 = vsel %vm3023_vm3, %v3022_v49, 0  ;;  %v2718_v37 = vand.u32 31, %v2716_v8  ;;  %v11764_v45 = vsel %vm2244_vm2, %v2366_v28, %v11541_v27 }
 0x2e4   : > { %v8339_v33 = vadd.s32 4294967294, %v2964_v2  ;;  %v11769_v5 = vsel %vm1969_vm7, %v11745_v59, 920167782  ;;  %v11773_v54 = vsel %vm1969_vm7, %v1965_v40, 1326507024  ;;  %v2364_v49 = vxor.u32 2147483648, %v2363_v19 }
 0x2e5   : > { %v11777_v57 = vand.u32 8388607, %v13599_v50  ;;  %v11781_v62 = vadd.s32 %v11655_v23, %v11653_v12  ;;  %v2719_v41 = vsub.s32 32, %v2718_v37  ;;  %v13940_v22 = vand.u32 2147483647, %v11374_v42  ;;  %v11802_v50 = vpop.f32.mrf.mxu0 }
 0x2e6   : > { %vm8340_vm1 = vcmp.lt.s32.totalorder %v8339_v33, 0  ;;  %v11790_v2 = vand.u32 31, %v3024_v47  ;;  %v2712_v61 = vor.u32 8388608, %v2711_v6  ;;  %v11792_v28 = vshrl.u32 %v2716_v8, 5  ;;  %13943 = vst [vmem:[#allocation27_spill] sm:$0xff] %v11802_v50 }
 0x2e7   : > { %vm11786_vm6 = vcmp.le.f32.partialorder %v13940_v22, 0.7853982  ;;  %v2721_v40 = vshll.u32 %v13692_v58, %v2718_v37  ;;  %v2722_v12 = vshrl.u32 %v13755_v25, %v2719_v41  ;;  %v2724_v23 = vshll.u32 %v13755_v25, %v2718_v37 }
 0x2e8   : > { %v2727_v13 = vshll.u32 %v13753_v55, %v2718_v37  ;;  %v2725_v36 = vshrl.u32 %v13753_v55, %v2719_v41  ;;  %v2728_v22 = vshrl.u32 %v13695_v26, %v2719_v41  ;;  %v2730_v31 = vshll.u32 %v13695_v26, %v2718_v37 }
 0x2e9   : > { %v2731_v11 = vshrl.u32 %v13868_v3, %v2719_v41  ;;  %v11804_v6 = vsel %vm8340_vm1, 0, %v8339_v33  ;;  %v2723_v8 = vor.u32 %v2722_v12, %v2721_v40  ;;  %v2733_v9 = vshll.u32 %v13868_v3, %v2718_v37 }
 0x2ea   : > { %v2734_v27 = vshrl.u32 %v13869_v14, %v2719_v41  ;;  %v11808_v30 = vshrl.u32 %v3024_v47, 5  ;;  %v11810_v0 = vor.u32 %v2725_v36, %v2724_v23  ;;  %v2729_v4 = vor.u32 %v2728_v22, %v2727_v13  ;;  %v5898_v23 = vpop.permute.xlu0 %5897 }
 0x2eb   : > { %v2732_v15 = vor.u32 %v2731_v11, %v2730_v31  ;;  %v2365_v53 = vsel %vm2244_vm2, %v2364_v49, %v2363_v19  ;;  %vm2736_vm13 = vcmp.lt.s32.totalorder %v11792_v28, 1  ;;  %v11815_v43 = vshll.u32 %v2712_v61, 8  ;;  %v11844_v49 = vpop.permute.xlu1 %6537 }
 0x2ec   : > { %v2735_v38 = vor.u32 %v2734_v27, %v2733_v9  ;;  %v2972_v33 = vsub.s32 4294967266, %v11804_v6  ;;  %v11819_v37 = vsub.s32 32, %v11790_v2  ;;  %vm2739_vm12 = vcmp.lt.s32.totalorder %v11792_v28, 4  ;;  %13944 = vst [vmem:[#allocation28_spill] sm:$0xff] %v11844_v49 }
 0x2ed   : > { %v2744_v13 = vsel %vm2736_vm13, %v2723_v8, %v11810_v0  ;;  %v11827_v11 = vshll.u32 %v13692_v58, %v11790_v2  ;;  %vm2738_vm14 = vcmp.lt.s32.totalorder %v11792_v28, 3  ;;  %v2745_v31 = vsel %vm2739_vm12, %v2732_v15, 920167782  ;;  %v11860_v49 = vpop.f32.mrf.mxu0 }
 0x2ee   : > { %v2748_v9 = vsel %vm2736_vm13, %v11810_v0, %v2729_v4  ;;  %v11837_v19 = vshll.u32 %v13755_v25, %v11790_v2  ;;  %vm2737_vm5 = vcmp.lt.s32.totalorder %v11792_v28, 2  ;;  %v2746_v36 = vsel %vm2738_vm14, %v2729_v4, %v2745_v31  ;;  %13945 = vst [vmem:[#allocation29_spill] sm:$0xff] %v11860_v49 }
 0x2ef   : > { %v2749_v47 = vsel %vm2739_vm12, %v2735_v38, 1326507024  ;;  %v11849_v27 = vsel %vm11786_vm6, %v11374_v42, %v2365_v53  ;;  %v2747_v61 = vsel %vm2737_vm5, %v2744_v13, %v2746_v36  ;;  %v2753_v12 = vand.u32 65535, %v11815_v43 }
 0x2f0   : > { %v2750_v40 = vsel %vm2738_vm14, %v2732_v15, %v2749_v47  ;;  %v11856_v22 = vadd.s32 127, %v2972_v33  ;;  %v2777_v31 = vand.u32 65535, %v2747_v61  ;;  %v2778_v16 = vshrl.u32 %v2747_v61, 16 }
 0x2f1   : > { %v2751_v38 = vsel %vm2737_vm5, %v2748_v9, %v2750_v40  ;;  %v11864_v53 = vshll.u32 %v13753_v55, %v11790_v2  ;;  %v2754_v13 = vshrl.u32 %v11815_v43, 16  ;;  %v11868_v17 = vmul.f32 %v5898_v23, %v11860_v49 }
 0x2f2   : > { %v2755_v36 = vand.u32 65535, %v2751_v38  ;;  %v2756_v15 = vshrl.u32 %v2751_v38, 16  ;;  %v2780_v47 = vmul.u32 %v2778_v16, %v2753_v12  ;;  %v1951_v9 = vshll.u32 %v13692_v58, %v11676_v10 }
 0x2f3   : > { %v2720_v61 = vshrl.u32 %v13692_v58, %v2719_v41  ;;  %v2781_v42 = vmul.u32 %v2777_v31, %v2754_v13  ;;  %v2968_v56 = vsub.s32 32, %v11804_v6  ;;  %v2779_v63 = vmul.u32 %v2777_v31, %v2753_v12  ;;  %v5896_v34 = vpop.permute.xlu1 %5895 }
 0x2f4   : > { %v2758_v40 = vmul.u32 %v2756_v15, %v2753_v12  ;;  %v2759_v60 = vmul.u32 %v2755_v36, %v2754_v13  ;;  %v2783_v38 = vshll.u32 %v2780_v47, 16  ;;  %v2757_v49 = vmul.u32 %v2755_v36, %v2753_v12 }
 0x2f5   : > { %v2740_v23 = vsel %vm2736_vm13, %v2720_v61, %v2723_v8  ;;  %v1952_v33 = vshrl.u32 %v13755_v25, %v11702_v24  ;;  %v2760_v7 = vmul.u32 %v2756_v15, %v2754_v13  ;;  %v2782_v41 = vmul.u32 %v2778_v16, %v2754_v13 }
 0x2f6   : > { %v2761_v21 = vshll.u32 %v2758_v40, 16  ;;  %v2763_v51 = vshll.u32 %v2759_v60, 16  ;;  %vm2787_vm0 = vc.u32 %v2779_v63, %v2783_v38  ;;  %v2785_v35 = vshll.u32 %v2781_v42, 16 }
 0x2f7   : > { %v2788_v52 = vsel %vm2787_vm0, 1, %v13688_v29  ;;  %v2789_v32 = vadd.s32 %v2783_v38, %v2779_v63  ;;  %v5942_v8 = vmul.f32 %v5896_v34, %v11802_v50  ;;  %v2741_v12 = vsel %vm2739_vm12, %v2729_v4, 2102212464 }
 0x2f8   : > { %vm2765_vm10 = vc.u32 %v2757_v49, %v2761_v21  ;;  %v2767_v1 = vadd.s32 %v2761_v21, %v2757_v49  ;;  %v2790_v18 = vadd.s32 %v2788_v52, %v2782_v41  ;;  %v11885_v15 = vor.u32 %v1952_v33, %v1951_v9 }
 0x2f9   : > { %v2766_v31 = vsel %vm2765_vm10, 1, %v13688_v29  ;;  %vm2791_vm3 = vc.u32 %v2789_v32, %v2785_v35  ;;  %5975 = vrot.lane.b32.xlu0 %v5942_v8, %s8905_s11  ;;  %v1954_v21 = vshll.u32 %v13755_v25, %v11676_v10  ;;  %v1955_v52 = vshrl.u32 %v13753_v55, %v11702_v24 }
 0x2fa   : > { %v2768_v36 = vadd.s32 %v2766_v31, %v2760_v7  ;;  %vm2769_vm11 = vc.u32 %v2767_v1, %v2763_v51  ;;  %v2762_v63 = vshrl.u32 %v2758_v40, 16  ;;  %v2784_v49 = vshrl.u32 %v2780_v47, 16 }
 0x2fb   : > { %v2770_v16 = vsel %vm2769_vm11, 1, %v13688_v29  ;;  %v2792_v4 = vsel %vm2791_vm3, 1, %v13688_v29  ;;  %v11894_v51 = vor.u32 %v1955_v52, %v1954_v21  ;;  %v1957_v1 = vshll.u32 %v13753_v55, %v11676_v10 }
 0x2fc   : > { %v2772_v34 = vadd.s32 %v2770_v16, %v2768_v36  ;;  %v2794_v7 = vadd.s32 %v2792_v4, %v2790_v18  ;;  %v1958_v13 = vshrl.u32 %v13695_v26, %v11702_v24  ;;  %v2742_v33 = vsel %vm2738_vm14, %v11810_v0, %v2741_v12 }
 0x2fd   : > { %v2764_v9 = vshrl.u32 %v2759_v60, 16  ;;  %v2786_v40 = vshrl.u32 %v2781_v42, 16  ;;  %vm1966_vm15 = vcmp.lt.s32.totalorder %v11739_v46, 1  ;;  %vm1968_vm2 = vcmp.lt.s32.totalorder %v11739_v46, 3 }
 0x2fe   : > { %v2773_v61 = vadd.s32 %v2772_v34, %v2762_v63  ;;  %v2795_v38 = vadd.s32 %v2794_v7, %v2784_v49  ;;  %v11903_v47 = vor.u32 %v1958_v13, %v1957_v1  ;;  %v11909_v10 = vadd.s32 %v2789_v32, %v2785_v35 }
 0x2ff   : > { %v1974_v41 = vsel %vm1966_vm15, %v11885_v15, %v11894_v51  ;;  %v1980_v42 = vsel %vm1968_vm2, %v11745_v59, %v11773_v54  ;;  %v2743_v60 = vsel %vm2737_vm5, %v2740_v23, %v2742_v33  ;;  %v2970_v31 = vshrl.u32 %v11781_v62, %v2968_v56 }
 0x300   : > { %v11907_v18 = vadd.s32 %v2773_v61, %v2764_v9  ;;  %v2796_v0 = vadd.s32 %v2795_v38, %v2786_v40  ;;  %v1976_v32 = vsel %vm1968_vm2, %v11903_v47, %v11769_v5  ;;  %v1978_v35 = vsel %vm1966_vm15, %v11894_v51, %v11903_v47 }
 0x301   : > { %v11932_v8 = vshll.u32 %v13695_v26, %v11790_v2  ;;  %vm1967_vm13 = vcmp.lt.s32.totalorder %v11739_v46, 2  ;;  %v2969_v59 = vshll.u32 %v11721_v48, %v11804_v6  ;;  %5977 = vrot.lane.b32.xlu0 %v11868_v17, %s8905_s11  ;;  %v2797_v62 = vmul.u32 %v11815_v43, %v2743_v60 }
 0x302   : > { %vm2799_vm1 = vc.u32 %v11907_v18, %v11909_v10  ;;  %v2800_v5 = vadd.s32 1, %v2796_v0  ;;  %v1977_v54 = vsel %vm1967_vm13, %v1974_v41, %v1976_v32  ;;  %v1981_v56 = vsel %vm1967_vm13, %v1978_v35, %v1980_v42 }
 0x303   : > { %v13946_v28 = vor.u32 8388608, %v11777_v57  ;;  %v1985_v12 = vand.u32 65535, %v1981_v56  ;;  %v1986_v36 = vshrl.u32 %v1981_v56, 16  ;;  %v11952_v48 = vmul.f32 %v11849_v27, %v11849_v27 }
 0x304   : > { %v13947_v17 = vshll.u32 %v11856_v22, 23  ;;  %v2801_v16 = vsel %vm2799_vm1, %v2800_v5, %v2796_v0  ;;  %v2008_v21 = vshrl.u32 %v1977_v54, 16  ;;  %v2971_v52 = vor.u32 %v2970_v31, %v2969_v59 }
 0x305   : > { %v11948_v23 = vshll.u32 %v13946_v28, 8  ;;  %v2802_v63 = vadd.s32 %v2801_v16, %v2797_v62  ;;  %v3030_v57 = vshrl.u32 %v13755_v25, %v11819_v37  ;;  %v11962_v49 = vshrl.u32 %v13753_v55, %v11819_v37 }
 0x306   : > { %v2975_v6 = vor.u32 4788187, %v13947_v17  ;;  %v11966_v4 = vshrl.u32 %v13695_v26, %v11819_v37  ;;  %v2007_v22 = vand.u32 65535, %v1977_v54  ;;  %v11970_v7 = vshrl.u32 %v13868_v3, %v11819_v37 }
 0x307   : > { %v1983_v34 = vand.u32 65535, %v11948_v23  ;;  %v1984_v43 = vshrl.u32 %v11948_v23, 16  ;;  %v2803_v1 = vadd.s32 536870912, %v2802_v63  ;;  %v3041_v25 = vshll.u32 %v13868_v3, %v11790_v2 }
 0x308   : > { %v2976_v9 = vand.u32 2147483647, %v2975_v6  ;;  %v3042_v55 = vshrl.u32 %v13869_v14, %v11819_v37  ;;  %v2978_v40 = vcvt.s32.f32 %v2971_v52  ;;  %vm3047_vm12 = vcmp.lt.s32.totalorder %v11808_v30, 4 }
 0x309   : > { %v1988_v13 = vmul.u32 %v1986_v36, %v1983_v34  ;;  %v1989_v33 = vmul.u32 %v1985_v12, %v1984_v43  ;;  %v2010_v61 = vmul.u32 %v2008_v21, %v1983_v34  ;;  %v11976_v38 = vshrl.u32 %v2803_v1, 30 }
 0x30a   : > { %v1987_v26 = vmul.u32 %v1985_v12, %v1983_v34  ;;  %v1990_v42 = vmul.u32 %v1986_v36, %v1984_v43  ;;  %v2009_v60 = vmul.u32 %v2007_v22, %v1983_v34  ;;  %v2011_v0 = vmul.u32 %v2007_v22, %v1984_v43 }
 0x30b   : > { %v1991_v41 = vshll.u32 %v1988_v13, 16  ;;  %v2013_v32 = vshll.u32 %v2010_v61, 16  ;;  %v2805_v35 = vshll.u32 %v11976_v38, 30  ;;  %v1993_v31 = vshll.u32 %v1989_v33, 16 }
 0x30c   : > { %v2979_v2 = vmul.f32 %v2978_v40, %v2976_v9  ;;  %v3043_v59 = vor.u32 %v3042_v55, %v3041_v25  ;;  %vm2860_vm0 = vcmp.lt.s32.totalorder %v11398_v20, 0  ;;  %v2012_v56 = vmul.u32 %v2008_v21, %v1984_v43 }
 0x30d   : > { %vm1995_vm14 = vc.u32 %v1987_v26, %v1991_v41  ;;  %v1997_v3 = vadd.s32 %v1991_v41, %v1987_v26  ;;  %vm2017_vm5 = vc.u32 %v2009_v60, %v2013_v32  ;;  %v11982_v5 = vsub.s32 %v2802_v63, %v2805_v35 }
 0x30e   : > { %v1996_v14 = vsel %vm1995_vm14, 1, %v13688_v29  ;;  %vm3044_vm11 = vcmp.lt.s32.totalorder %v11808_v30, 1  ;;  %vm3046_vm3 = vcmp.lt.s32.totalorder %v11808_v30, 3  ;;  %v2015_v28 = vshll.u32 %v2011_v0, 16 }
 0x30f   : > { %v1998_v54 = vadd.s32 %v1996_v14, %v1990_v42  ;;  %vm1999_vm10 = vc.u32 %v1997_v3, %v1993_v31  ;;  %v2018_v12 = vsel %vm2017_vm5, 1, %v13688_v29  ;;  %v2019_v36 = vadd.s32 %v2013_v32, %v2009_v60 }
 0x310   : > { %v2000_v62 = vsel %vm1999_vm10, 1, %v13688_v29  ;;  %vm2807_vm1 = vcmp.lt.s32.totalorder %v11982_v5, 0  ;;  %v2808_v17 = vsub.s32 0, %v11982_v5  ;;  %v1950_v6 = vshrl.u32 %v13692_v58, %v11702_v24  ;;  %v6456_v50 = vpop.f32.mrf.mxu2 }
 0x311   : > { %v1971_v16 = vsel %vm1969_vm7, %v11903_v47, 2102212464  ;;  %v13948_v21 = vand.u32 2147483647, %v11398_v20  ;;  %v1992_v63 = vshrl.u32 %v1988_v13, 16  ;;  %v2002_v34 = vadd.s32 %v2000_v62, %v1998_v54 }
 0x312   : > { %v2020_v43 = vadd.s32 %v2018_v12, %v2012_v56  ;;  %vm2021_vm5 = vc.u32 %v2019_v36, %v2015_v28  ;;  %v2980_v22 = vxor.u32 2147483648, %v2979_v2  ;;  %v2809_v1 = vsel %vm2807_vm1, %v2808_v17, %v11982_v5 }
 0x313   : > { %vm11997_vm14 = vcmp.le.f32.partialorder %v13948_v21, 0.7853982  ;;  %v1994_v9 = vshrl.u32 %v1989_v33, 16  ;;  %v2022_v24 = vsel %vm2021_vm5, 1, %v13688_v29  ;;  %vm13634_vm10 = vcmp.lt.s32.totalorder %v11808_v30, 2 }
 0x314   : > { %v2810_v25 = vclz %v2809_v1  ;;  %v2003_v47 = vadd.s32 %v2002_v34, %v1992_v63  ;;  %v2014_v55 = vshrl.u32 %v2010_v61, 16  ;;  %v2024_v40 = vadd.s32 %v2022_v24, %v2020_v43  ;;  %v13953_v34 = vld [vmem:[#allocation75_spill] sm:$0xff] }
 0x315   : > { %v2378_v26 = vmul.f32 -0.00019511016, %v11952_v48  ;;  %v3031_v41 = vor.u32 %v3030_v57, %v11827_v11  ;;  %v1970_v13 = vsel %vm1966_vm15, %v1950_v6, %v11885_v15  ;;  %v1972_v33 = vsel %vm1968_vm2, %v11894_v51, %v1971_v16  ;;  %v13951_v6 = vld [vmem:[#allocation32_spill] sm:$0xff] }
 0x316   : > { %v8336_v42 = vadd.s32 4294967294, %v2810_v25  ;;  %v12012_v60 = vadd.s32 %v2003_v47, %v1994_v9  ;;  %v2016_v32 = vshrl.u32 %v2011_v0, 16  ;;  %v2025_v35 = vadd.s32 %v2024_v40, %v2014_v55 }
 0x317   : > { %v12016_v61 = vor.u32 %v11962_v49, %v11837_v19  ;;  %v3037_v11 = vor.u32 %v11966_v4, %v11864_v53  ;;  %v3057_v57 = vsel %vm3047_vm12, %v3043_v59, 1326507024  ;;  %v12022_v15 = vadd.s32 %v2019_v36, %v2015_v28 }
 0x318   : > { %v2981_v51 = vsel %vm2860_vm0, %v2980_v22, %v2979_v2  ;;  %vm8337_vm7 = vcmp.lt.s32.totalorder %v8336_v42, 0  ;;  %v1973_v0 = vsel %vm1967_vm13, %v1970_v13, %v1972_v33  ;;  %v2026_v31 = vadd.s32 %v2025_v35, %v2016_v32 }
 0x319   : > { %v2379_v3 = vadd.f32 0.008332121, %v2378_v26  ;;  %v3040_v19 = vor.u32 %v11970_v7, %v11932_v8  ;;  %v2813_v49 = vsel %vm8337_vm7, 0, %v8336_v42  ;;  %vm2029_vm15 = vc.u32 %v12012_v60, %v12022_v15 }
 0x31a   : > { %v2798_v53 = vadd.s32 %v11909_v10, %v11907_v18  ;;  %v2814_v4 = vsub.s32 32, %v2813_v49  ;;  %v2818_v59 = vsub.s32 4294967266, %v2813_v49  ;;  %v2030_v14 = vadd.s32 1, %v2026_v31 }
 0x31b   : > { %v12037_v46 = vsel %vm11997_vm14, %v11398_v20, %v2981_v51  ;;  %v3056_v2 = vsel %vm3044_vm11, %v12016_v61, %v3037_v11  ;;  %v3058_v8 = vsel %vm3046_vm3, %v3040_v19, %v3057_v57  ;;  %v2027_v7 = vmul.u32 %v11948_v23, %v1973_v0  ;;  %v13957_v0 = vld [vmem:[#allocation43_spill] sm:$0xff] }
 0x31c   : > { %v2815_v54 = vshll.u32 %v11982_v5, %v2813_v49  ;;  %v2816_v18 = vshrl.u32 %v2798_v53, %v2814_v4  ;;  %v2819_v10 = vadd.s32 127, %v2818_v59  ;;  %v2031_v56 = vsel %vm2029_vm15, %v2030_v14, %v2026_v31  ;;  %v12102_v14 = vpop.f32.mrf.mxu0 }
 0x31d   : > { %v2369_v62 = vsel %vm11786_vm6, 0, %v11764_v45  ;;  %v2380_v28 = vmul.f32 %v2379_v3, %v11952_v48  ;;  %v2032_v12 = vadd.s32 %v2031_v56, %v2027_v7  ;;  %v2217_v36 = vmul.f32 -0.001358992, %v11567_v44  ;;  %13958 = vst [vmem:[#allocation30_spill] sm:$0xff] %v12102_v14 }
 0x31e   : > { %v3053_v17 = vsel %vm3047_vm12, %v3040_v19, 920167782  ;;  %v13952_v16 = vor.u32 8388608, %v13951_v6  ;;  %v2817_v5 = vor.u32 %v2816_v18, %v2815_v54  ;;  %v2820_v21 = vshll.u32 %v2819_v10, 23  ;;  %v13959_v54 = vld [vmem:[#allocation44_spill] sm:$0xff]  ;;  %v13960_v10 = vld [vmem:[#allocation65_spill] sm:$0xff] }
 0x31f   : > { %v12059_v63 = vmul.f32 %v12037_v46, %v12037_v46  ;;  %v3028_v45 = vshrl.u32 %v13692_v58, %v11819_v37  ;;  %v3059_v39 = vsel %vm13634_vm10, %v3056_v2, %v3058_v8  ;;  %vm2706_vm6 = vcmp.lt.s32.totalorder %v13953_v34, 0 }
 0x320   : > { %v12055_v23 = vshll.u32 %v13952_v16, 8  ;;  %v2033_v43 = vadd.s32 536870912, %v2032_v12  ;;  %v12066_v22 = vand.u32 3, %v2369_v62  ;;  %v12068_v1 = vadd.s32 3, %v2369_v62  ;;  %v13962_v62 = vld [vmem:[#allocation73_spill] sm:$0xff] }
 0x321   : > { %v3052_v9 = vsel %vm3044_vm11, %v3031_v41, %v12016_v61  ;;  %v2821_v24 = vor.u32 4788187, %v2820_v21  ;;  %v2381_v25 = vadd.f32 -0.16666654, %v2380_v28  ;;  %v3054_v47 = vsel %vm3046_vm3, %v3037_v11, %v3053_v17 }
 0x322   : > { %v13954_v58 = vand.u32 2147483647, %v13953_v34  ;;  %v12081_v55 = vshrl.u32 %v2033_v43, 30  ;;  %v2218_v40 = vadd.f32 0.041655596, %v2217_v36  ;;  %v3061_v26 = vand.u32 65535, %v12055_v23 }
 0x323   : > { %v3064_v13 = vshrl.u32 %v3059_v39, 16  ;;  %v2822_v33 = vand.u32 2147483647, %v2821_v24  ;;  %v2824_v42 = vcvt.s32.f32 %v2817_v5  ;;  %v2994_v32 = vmul.f32 -0.00019511016, %v12059_v63 }
 0x324   : > { %vm12077_vm2 = vcmp.le.f32.partialorder %v13954_v58, 0.7853982  ;;  %v12087_v35 = vsel %vm3044_vm11, %v3028_v45, %v3031_v41  ;;  %v3062_v57 = vshrl.u32 %v12055_v23, 16  ;;  %v2035_v51 = vshll.u32 %v12081_v55, 30 }
 0x325   : > { %v2982_v31 = vsub.s32 4, %v13957_v0  ;;  %v12094_v3 = vsel %vm3047_vm12, %v3037_v11, 2102212464  ;;  %v3055_v19 = vsel %vm13634_vm10, %v3052_v9, %v3054_v47  ;;  %v2825_v49 = vmul.f32 %v2824_v42, %v2822_v33 }
 0x326   : > { %v2382_v53 = vmul.f32 %v2381_v25, %v11952_v48  ;;  %v3085_v4 = vand.u32 65535, %v3055_v19  ;;  %v12099_v59 = vsub.s32 %v2032_v12, %v2035_v51  ;;  %v2219_v41 = vmul.f32 %v2218_v40, %v11567_v44 }
 0x327   : > { %v3063_v2 = vand.u32 65535, %v3059_v39  ;;  %v12104_v8 = vmul.u32 %v3064_v13, %v3061_v26  ;;  %v2826_v7 = vxor.u32 2147483648, %v2825_v49  ;;  %vm1464_vm13 = vcmp.eq.s32.totalorder %v13959_v54, 0 }
 0x328   : > { %v2995_v11 = vadd.f32 0.008332121, %v2994_v32  ;;  %vm2037_vm12 = vcmp.lt.s32.totalorder %v12099_v59, 0  ;;  %v2038_v18 = vsub.s32 0, %v12099_v59  ;;  %v13961_v56 = vxor.u32 2147483648, %v13960_v10 }
 0x329   : > { %v2983_v12 = vsel %vm2860_vm0, %v2982_v31, %v13957_v0  ;;  %v3086_v36 = vshrl.u32 %v3055_v19, 16  ;;  %v2827_v17 = vsel %vm2706_vm6, %v2826_v7, %v2825_v49  ;;  %vm1467_vm11 = vcmp.eq.s32.totalorder %v13959_v54, 2 }
 0x32a   : > { %v1466_v28 = vsel %vm1464_vm13, %v13962_v62, %v13961_v56  ;;  %v2039_v6 = vsel %vm2037_vm12, %v2038_v18, %v12099_v59  ;;  %v2220_v16 = vadd.f32 -0.4999988, %v2219_v41  ;;  %vm1463_vm1 = vcmp.lt.s32.totalorder %v13959_v54, 2 }
 0x32b   : > { %v13963_v5 = vxor.u32 2147483648, %v13962_v62  ;;  %v2383_v45 = vadd.f32 1.0, %v2382_v53  ;;  %v12126_v39 = vsel %vm12077_vm2, %v13953_v34, %v2827_v17  ;;  %v2040_v43 = vclz %v2039_v6  ;;  %v13970_v6 = vld [vmem:[#allocation48_spill] sm:$0xff] }
 0x32c   : > { %v2996_v24 = vmul.f32 %v2995_v11, %v12059_v63  ;;  %v3065_v25 = vmul.u32 %v3063_v2, %v3061_v26  ;;  %v12129_v47 = vmul.u32 %v3063_v2, %v3062_v57  ;;  %v3069_v58 = vshll.u32 %v12104_v8, 16  ;;  %v12162_v11 = vpop.f32.mrf.mxu0  ;;  %v13981_v2 = vld [vmem:[#allocation69_spill] sm:$0xff] }
 0x32d   : > { %v1469_v21 = vsel %vm1467_vm11, %v13963_v5, %v13960_v10  ;;  %v12134_v40 = vsel %vm11997_vm14, 0, %v2983_v12  ;;  %v12136_v33 = vmul.u32 %v3085_v4, %v3061_v26  ;;  %v12138_v42 = vmul.u32 %v3086_v36, %v3061_v26  ;;  %v5900_v26 = vpop.permute.xlu2 %5899  ;;  %13969 = vst [vmem:[#allocation35_spill] sm:$0xff] %v12162_v11 }
 0x32e   : > { %v1470_v9 = vsel %vm1463_vm1, %v1466_v28, %v1469_v21  ;;  %v8321_v32 = vadd.s32 4294967294, %v2040_v43  ;;  %v3068_v51 = vmul.u32 %v3064_v13, %v3062_v57  ;;  %v12142_v0 = vmul.f32 %v12126_v39, %v12126_v39 }
 0x32f   : > { %v2221_v31 = vmul.f32 %v2220_v16, %v11567_v44  ;;  %v12147_v49 = vsel %vm1461_vm8, nan, %v1470_v9  ;;  %v12150_v52 = vmul.f32 %v2383_v45, %v11849_v27  ;;  %v12152_v53 = vmul.u32 %v3085_v4, %v3062_v57  ;;  %v13968_v44 = vld [vmem:[#allocation63_spill] sm:$0xff] }
 0x330   : > { %13965 = vst [vmem:[#allocation33_spill] sm:$0xff] %v12147_v49  ;;  %v12154_v41 = vmul.u32 %v3086_v36, %v3062_v57  ;;  %vm8322_vm0 = vcmp.lt.s32.totalorder %v8321_v32, 0  ;;  %v2997_v13 = vadd.f32 -0.16666654, %v2996_v24  ;;  %vm12157_vm14 = vc.u32 %v3065_v25, %v3069_v58 }
 0x331   : > { %vm1936_vm5 = vcmp.lt.s32.totalorder %v13968_v44, 0  ;;  %v2043_v54 = vsel %vm8322_vm0, 0, %v8321_v32  ;;  %v2028_v27 = vadd.s32 %v12022_v15, %v12012_v60  ;;  %v6483_v18 = vrot.slane %v12147_v49, 4  ;;  %v13976_v32 = vld [vmem:[#allocation34_spill] sm:$0xff] }
 0x332   : > { %v2044_v4 = vsub.s32 32, %v2043_v54  ;;  %v2048_v57 = vsub.s32 4294967266, %v2043_v54  ;;  %v2828_v10 = vsub.s32 4, %v11976_v38  ;;  %v2840_v56 = vmul.f32 -0.00019511016, %v12142_v0 }
 0x333   : > { %v12170_v62 = vmul.f32 %v5900_v26, %v12102_v14  ;;  %v12172_v28 = vadd.f32 1.0, %v2221_v31  ;;  %v2045_v12 = vshll.u32 %v12099_v59, %v2043_v54  ;;  %vm13971_vm8 = vcmask 1044484   ;;  %v13975_v59 = vld [vmem:[#allocation47_spill] sm:$0xff]  ;;  %v13977_v26 = vld [vmem:[#allocation74_spill] sm:$0xff] }
 0x334   : > { %v2046_v36 = vshrl.u32 %v2028_v27, %v2044_v4  ;;  %v2049_v17 = vadd.s32 127, %v2048_v57  ;;  %v12177_v60 = vsel %vm13971_vm8, %v6483_v18, %v13970_v6  ;;  %v2998_v15 = vmul.f32 %v2997_v13, %v12059_v63  ;;  %v13978_v57 = vld [vmem:[#allocation52_spill] sm:$0xff]  ;;  %v13991_v14 = vld [vmem:[#allocation70_spill] sm:$0xff] }
 0x335   : > { %v3074_v16 = vsel %vm12157_vm14, 1, %v13688_v29  ;;  %v12183_v5 = vadd.s32 %v3069_v58, %v3065_v25  ;;  %v13972_v21 = vand.u32 2147483647, %v13968_v44  ;;  %vm13635_vm15 = vweird.f32 %v13975_v59 }
 0x336   : > { %v2047_v43 = vor.u32 %v2046_v36, %v2045_v12  ;;  %v2050_v9 = vshll.u32 %v2049_v17, 23  ;;  %v2058_v24 = vsub.s32 4, %v12081_v55  ;;  %v13637_v31 = vxor.u32 2147483648, %v13976_v32 }
 0x337   : > { %vm12187_vm7 = vcmp.le.f32.partialorder %v13972_v21, 0.7853982  ;;  %v2841_v19 = vadd.f32 0.008332121, %v2840_v56  ;;  %vm2234_vm13 = vcmp.eq.s32.totalorder %v13977_v26, 0  ;;  %v13633_v25 = vxor.u32 2147483648, %v12172_v28  ;;  %v5904_v56 = vpop.permute.xlu0 %5903 }
 0x338   : > { %v2371_v58 = vmul.f32 -0.001358992, %v11952_v48  ;;  %v2829_v13 = vsel %vm2706_vm6, %v2828_v10, %v11976_v38  ;;  %v2051_v7 = vor.u32 4788187, %v2050_v9  ;;  %v2236_v54 = vsel %vm2234_vm13, %v12172_v28, %v13637_v31  ;;  %v13979_v9 = vld [vmem:[#allocation49_spill] sm:$0xff] }
 0x339   : > { %vm2237_vm12 = vcmp.eq.s32.totalorder %v13977_v26, 2  ;;  %vm2233_vm11 = vcmp.lt.s32.totalorder %v13977_v26, 2  ;;  %v4705_v18 = vadd.s32 3, %v13978_v57  ;;  %v2054_v36 = vcvt.s32.f32 %v2047_v43 }
 0x33a   : > { %v2239_v27 = vsel %vm2237_vm12, %v13633_v25, %v13976_v32  ;;  %v2372_v4 = vadd.f32 0.041655596, %v2371_v58  ;;  %v2052_v12 = vand.u32 2147483647, %v2051_v7  ;;  %v2059_v38 = vsel %vm1936_vm5, %v2058_v24, %v12081_v55  ;;  %v12219_v58 = vpop.f32.mrf.mxu0 }
 0x33b   : > { %v2240_v10 = vsel %vm2233_vm11, %v2236_v54, %v2239_v27  ;;  %v2842_v17 = vmul.f32 %v2841_v19, %v12142_v0  ;;  %v2525_v26 = vmul.f32 -0.001358992, %v13979_v9  ;;  %13980 = vst [vmem:[#allocation36_spill] sm:$0xff] %v12219_v58  ;;  %v2999_v57 = vadd.f32 1.0, %v2998_v15 }
 0x33c   : > { %v12215_v6 = vsel %vm13635_vm15, nan, %v2240_v10  ;;  %v2373_v21 = vmul.f32 %v2372_v4, %v11952_v48  ;;  %v12221_v7 = vadd.s32 %v3074_v16, %v3068_v51  ;;  %v2055_v43 = vmul.f32 %v2054_v36, %v2052_v12  ;;  %v13982_v51 = vld [vmem:[#allocation61_spill] sm:$0xff] }
 0x33d   : > { %v12224_v25 = vand.u32 3, %v13981_v2  ;;  %v12228_v55 = vsel %vm12077_vm2, 0, %v2829_v13  ;;  %v12231_v24 = vmul.f32 %v5904_v56, %v12219_v58  ;;  %v2526_v54 = vadd.f32 0.041655596, %v2525_v26 }
 0x33e   : > { %v2374_v19 = vadd.f32 -0.4999988, %v2373_v21  ;;  %v2056_v27 = vxor.u32 2147483648, %v2055_v43  ;;  %v2061_v4 = vsel %vm12187_vm7, 0, %v2059_v38  ;;  %v12235_v15 = vand.u32 3, %v4705_v18 }
 0x33f   : > { %v12238_v16 = vand.u32 3, %v13982_v51  ;;  %v2843_v2 = vadd.f32 -0.16666654, %v2842_v17  ;;  %v13636_v37 = vxor.u32 2147483648, %v12150_v52  ;;  %v2527_v13 = vmul.f32 %v2526_v54, %v13979_v9  ;;  %v13983_v54 = vld [vmem:[#allocation23_spill] sm:$0xff] }
 0x340   : > { %v2375_v12 = vmul.f32 %v2374_v19, %v11952_v48  ;;  %v12244_v56 = vmul.f32 %v2999_v57, %v12037_v46  ;;  %v12247_v36 = vand.u32 3, %v12228_v55  ;;  %v2057_v18 = vsel %vm1936_vm5, %v2056_v27, %v2055_v43  ;;  %v13984_v27 = vld [vmem:[#allocation54_spill] sm:$0xff] }
 0x341   : > { %vm1926_vm6 = vcmp.eq.s32.totalorder %v12224_v25, 0  ;;  %v12255_v38 = vsel %vm12187_vm7, %v13968_v44, %v2057_v18  ;;  %v2528_v10 = vadd.f32 -0.4999988, %v2527_v13  ;;  %vm1929_vm2 = vcmp.eq.s32.totalorder %v12224_v25, 2 }
 0x342   : > { %v12257_v48 = vadd.f32 1.0, %v2375_v12  ;;  %v2062_v46 = vmul.f32 %v12255_v38, %v12255_v38  ;;  %v12262_v17 = vand.u32 3, %v2061_v4  ;;  %vm2388_vm1 = vcmp.eq.s32.totalorder %v12066_v22, 0 }
 0x343   : > { %vm4708_vm0 = vcmp.eq.s32.totalorder %v12235_v15, 0  ;;  %vm1772_vm14 = vcmp.eq.s32.totalorder %v12238_v16, 0  ;;  %v2844_v45 = vmul.f32 %v2843_v2, %v12142_v0  ;;  %v2529_v57 = vmul.f32 %v2528_v10, %v13979_v9 }
 0x344   : > { %v2390_v21 = vsel %vm2388_vm1, %v12257_v48, %v13636_v37  ;;  %v13638_v26 = vxor.u32 2147483648, %v12257_v48  ;;  %vm1775_vm5 = vcmp.eq.s32.totalorder %v12238_v16, 2  ;;  %v2063_v43 = vmul.f32 -0.001358992, %v2062_v46  ;;  %v13985_v37 = vld [vmem:[#allocation50_spill] sm:$0xff] }
 0x345   : > { %v2070_v19 = vmul.f32 -0.00019511016, %v2062_v46  ;;  %vm2391_vm8 = vcmp.eq.s32.totalorder %v12066_v22, 2  ;;  %vm2542_vm7 = vcmp.eq.s32.totalorder %v13983_v54, 0  ;;  %vm1771_vm13 = vcmp.lt.s32.totalorder %v12238_v16, 2 }
 0x346   : > { %vm1925_vm12 = vcmp.lt.s32.totalorder %v12224_v25, 2  ;;  %vm13640_vm11 = vweird.f32 %v13984_v27  ;;  %vm2387_vm1 = vcmp.lt.s32.totalorder %v12066_v22, 2  ;;  %v2393_v9 = vsel %vm2391_vm8, %v13638_v26, %v12150_v52 }
 0x347   : > { %v12283_v51 = vadd.f32 1.0, %v2529_v57  ;;  %v2064_v2 = vadd.f32 0.041655596, %v2063_v43  ;;  %v2071_v12 = vadd.f32 0.008332121, %v2070_v19  ;;  %v2394_v13 = vsel %vm2387_vm1, %v2390_v21, %v2393_v9  ;;  %v13987_v21 = vld [vmem:[#allocation51_spill] sm:$0xff] }
 0x348   : > { %vm2545_vm10 = vcmp.eq.s32.totalorder %v13983_v54, 2  ;;  %vm4707_vm15 = vcmp.lt.s32.totalorder %v12235_v15, 2  ;;  %v2845_v18 = vadd.f32 1.0, %v2844_v45  ;;  %v12289_v10 = vsel %vm13640_vm11, nan, %v2394_v13  ;;  %v13988_v43 = vld [vmem:[#allocation46_spill] sm:$0xff] }
 0x349   : > { %v13986_v22 = vxor.u32 2147483648, %v13985_v37  ;;  %v13648_v26 = vxor.u32 2147483648, %v12283_v51  ;;  %v2065_v57 = vmul.f32 %v2064_v2, %v2062_v46  ;;  %v2072_v49 = vmul.f32 %v2071_v12, %v2062_v46 }
 0x34a   : > { %vm4711_vm8 = vcmp.eq.s32.totalorder %v12235_v15, 2  ;;  %v13989_v19 = vxor.u32 2147483648, %v13988_v43  ;;  %vm2083_vm1 = vcmp.eq.s32.totalorder %v12262_v17, 2  ;;  %vm2541_vm11 = vcmp.lt.s32.totalorder %v13983_v54, 2 }
 0x34b   : > { %v2544_v31 = vsel %vm2542_vm7, %v12283_v51, %v13986_v22  ;;  %v2547_v9 = vsel %vm2545_vm10, %v13648_v26, %v13985_v37  ;;  %v4550_v13 = vadd.s32 3, %v2061_v4  ;;  %v13990_v2 = vxor.u32 2147483648, %v13987_v21 }
 0x34c   : > { %v1931_v45 = vsel %vm1929_vm2, %v13989_v19, %v13987_v21  ;;  %v2066_v22 = vadd.f32 -0.4999988, %v2065_v57  ;;  %v2073_v58 = vadd.f32 -0.16666654, %v2072_v49  ;;  %vm2539_vm7 = vweird.f32 %v13991_v14  ;;  %v13993_v49 = vld [vmem:[#allocation68_spill] sm:$0xff] }
 0x34d   : > { %v1928_v12 = vsel %vm1926_vm6, %v13988_v43, %v13990_v2  ;;  %v2548_v19 = vsel %vm2541_vm11, %v2544_v31, %v2547_v9  ;;  %v12313_v11 = vmul.f32 %v2845_v18, %v12126_v39  ;;  %vm2080_vm2 = vcmp.eq.s32.totalorder %v12262_v17, 0  ;;  %v13995_v43 = vld [vmem:[#allocation71_spill] sm:$0xff] }
 0x34e   : > { %v12318_v4 = vsel %vm2539_vm7, nan, %v2548_v19  ;;  %v13992_v54 = vxor.u32 2147483648, %v13976_v32  ;;  %v13994_v21 = vxor.u32 2147483648, %v13993_v49  ;;  %v2067_v39 = vmul.f32 %v2066_v22, %v2062_v46  ;;  %v13998_v22 = vld [vmem:[#allocation28_spill] sm:$0xff] }
 0x34f   : > { %v2074_v18 = vmul.f32 %v2073_v58, %v2062_v46  ;;  %vm2079_vm10 = vcmp.lt.s32.totalorder %v12262_v17, 2  ;;  %v13996_v9 = vxor.u32 2147483648, %v12172_v28  ;;  %v13997_v19 = vxor.u32 2147483648, %v13995_v43 }
 0x350   : > { %v4710_v57 = vsel %vm4708_vm0, %v12172_v28, %v13992_v54  ;;  %v1774_v31 = vsel %vm1772_vm14, %v13995_v43, %v13994_v21  ;;  %vm2077_vm6 = vweird.f32 %v13968_v44  ;;  %v4551_v26 = vand.u32 3, %v4550_v13 }
 0x351   : > { %v4713_v2 = vsel %vm4711_vm8, %v13996_v9, %v13976_v32  ;;  %v1777_v54 = vsel %vm1775_vm5, %v13997_v19, %v13993_v49  ;;  %v1932_v46 = vsel %vm1925_vm12, %v1928_v12, %v1931_v45  ;;  %v6543_v28 = vmul.f32 %v13998_v22, %v6456_v50  ;;  %v14001_v45 = vld [vmem:[#allocation57_spill] sm:$0xff] }
 0x352   : > { %v1778_v58 = vsel %vm1771_vm13, %v1774_v31, %v1777_v54  ;;  %v2068_v21 = vadd.f32 1.0, %v2067_v39  ;;  %v2075_v14 = vadd.f32 1.0, %v2074_v18  ;;  %v12353_v49 = vsel %vm1923_vm4, nan, %v1932_v46  ;;  %v14002_v18 = vld [vmem:[#allocation66_spill] sm:$0xff] }
 0x353   : > { %v12349_v9 = vsel %vm1769_vm9, nan, %v1778_v58  ;;  %v12357_v13 = vsel %vm4707_vm15, %v4710_v57, %v4713_v2  ;;  %v12360_v16 = vand.u32 3, %v12068_v1  ;;  %6547 = vrot.lane.b32.xlu2 %v6543_v28, %s8905_s11  ;;  %v2679_v12 = vmul.f32 -0.001358992, %v14001_v45 }
 0x354   : > { %v6487_v25 = vrot.slane %v12349_v9, 2  ;;  %v2076_v31 = vmul.f32 %v2075_v14, %v12255_v38  ;;  %v2084_v39 = vxor.u32 2147483648, %v2068_v21  ;;  %v14003_v19 = vrot.slane %v14002_v18, 3 }
 0x355   : > { %vm14004_vm9 = vcmask 1045509   ;;  %v6489_v15 = vrot.slane %v12353_v49, 1  ;;  %vm4552_vm4 = vcmp.lt.s32.totalorder %v4551_v26, 2  ;;  %vm14005_vm15 = vcmask 1046534  }
 0x356   : > { %v6486_v54 = vsel %vm14004_vm9, %v14003_v19, %v12177_v60  ;;  %v2680_v57 = vadd.f32 0.041655596, %v2679_v12  ;;  %v2833_v2 = vmul.f32 -0.001358992, %v12142_v0  ;;  %v2081_v58 = vxor.u32 2147483648, %v2076_v31 }
 0x357   : > { %v6488_v1 = vsel %vm14005_vm15, %v6487_v25, %v6486_v54  ;;  %v2085_v46 = vsel %vm2083_vm1, %v2084_v39, %v2076_v31  ;;  %vm4553_vm0 = vcmp.eq.s32.totalorder %v4551_v26, 0  ;;  %vm14006_vm14 = vcmask 1047559  }
 0x358   : > { %v6490_v14 = vsel %vm14006_vm14, %v6489_v15, %v6488_v1  ;;  %vm4556_vm5 = vcmp.eq.s32.totalorder %v4551_v26, 2  ;;  %v2681_v60 = vmul.f32 %v2680_v57, %v14001_v45  ;;  %v2834_v22 = vadd.f32 0.041655596, %v2833_v2 }
 0x359   : > { %v12376_v38 = vmul.f32 %v6490_v14, %v6456_v50  ;;  %v2082_v28 = vsel %vm2080_vm2, %v2068_v21, %v2081_v58  ;;  %v4555_v32 = vsel %vm4553_vm0, %v2068_v21, %v2081_v58  ;;  %v4558_v43 = vsel %vm4556_vm5, %v2084_v39, %v2076_v31  ;;  %v14007_v50 = vld [vmem:[#allocation59_spill] sm:$0xff]  ;;  %v14009_v58 = vld [vmem:[#allocation72_spill] sm:$0xff] }
 0x35a   : > { %v6491_v25 = vrot.slane %v12215_v6, 7  ;;  %v2086_v12 = vsel %vm2079_vm10, %v2082_v28, %v2085_v46  ;;  %v4559_v19 = vsel %vm4552_vm4, %v4555_v32, %v4558_v43  ;;  %v2682_v54 = vadd.f32 -0.4999988, %v2681_v60  ;;  %v14011_v46 = vld [vmem:[#allocation26_spill] sm:$0xff]  ;;  %v14013_v43 = vld [vmem:[#allocation24_spill] sm:$0xff] }
 0x35b   : > { %v2835_v15 = vmul.f32 %v2834_v22, %v12142_v0  ;;  %vm2693_vm13 = vweird.f32 %v14007_v50  ;;  %v12389_v1 = vsel %vm2077_vm6, nan, %v2086_v12  ;;  %v12393_v21 = vsel %vm2077_vm6, nan, %v4559_v19  ;;  %5905 = vrot.lane.b32.xlu2 %v14009_v58, %s8904_s29 }
 0x35c   : > { %v6493_v31 = vrot.slane %v12289_v10, 6  ;;  %v2987_v17 = vmul.f32 -0.001358992, %v12059_v63  ;;  %vm14008_vm12 = vcmask 1041409   ;;  %v6495_v39 = vrot.slane %v12318_v4, 5  ;;  %5909 = vrot.lane.b32.xlu0 %v12393_v21, %s8904_s29 }
 0x35d   : > { %v6492_v26 = vsel %vm14008_vm12, %v6491_v25, %v12389_v1  ;;  %v2683_v57 = vmul.f32 %v2682_v54, %v14001_v45  ;;  %v2836_v2 = vadd.f32 -0.4999988, %v2835_v15  ;;  %vm14010_vm11 = vcmask 1042434  }
 0x35e   : > { %v6494_v44 = vsel %vm14010_vm11, %v6493_v31, %v6492_v26  ;;  %vm2695_vm8 = vcmp.lt.s32.totalorder %v14011_v46, 2  ;;  %vm2696_vm1 = vcmp.eq.s32.totalorder %v14011_v46, 0  ;;  %v2988_v14 = vadd.f32 0.041655596, %v2987_v17 }
 0x35f   : > { %vm14012_vm2 = vcmask 1043459   ;;  %v12411_v22 = vadd.f32 1.0, %v2683_v57  ;;  %v2837_v28 = vmul.f32 %v2836_v2, %v12142_v0  ;;  %v2851_v45 = vxor.u32 2147483648, %v12313_v11 }
 0x360   : > { %v12409_v60 = vsel %vm14012_vm2, %v6495_v39, %v6494_v44  ;;  %vm2699_vm10 = vcmp.eq.s32.totalorder %v14011_v46, 2  ;;  %vm2847_vm6 = vweird.f32 %v13953_v34  ;;  %vm2849_vm9 = vcmp.lt.s32.totalorder %v12247_v36, 2 }
 0x361   : > { %v2989_v32 = vmul.f32 %v2988_v14, %v12059_v63  ;;  %v14014_v25 = vxor.u32 2147483648, %v14013_v43  ;;  %v2700_v19 = vxor.u32 2147483648, %v12411_v22  ;;  %v12423_v54 = vadd.f32 1.0, %v2837_v28 }
 0x362   : > { %v3002_v0 = vand.u32 3, %v12134_v40  ;;  %vm2850_vm4 = vcmp.eq.s32.totalorder %v12247_v36, 0  ;;  %vm2853_vm15 = vcmp.eq.s32.totalorder %v12247_v36, 2  ;;  %v3005_v31 = vxor.u32 2147483648, %v12244_v56 }
 0x363   : > { %v2698_v12 = vsel %vm2696_vm1, %v12411_v22, %v14014_v25  ;;  %v2990_v15 = vadd.f32 -0.4999988, %v2989_v32  ;;  %v2701_v17 = vsel %vm2699_vm10, %v2700_v19, %v14013_v43  ;;  %v2852_v26 = vsel %vm2850_vm4, %v12423_v54, %v2851_v45  ;;  %5979 = vrot.lane.b32.xlu2 %v12170_v62, %s8905_s11 }
 0x364   : > { %v2854_v39 = vxor.u32 2147483648, %v12423_v54  ;;  %v3070_v57 = vshrl.u32 %v12104_v8, 16  ;;  %v2702_v2 = vsel %vm2695_vm8, %v2698_v12, %v2701_v17  ;;  %v14015_v44 = vshll.u32 %v12129_v47, 16  ;;  %5983 = vrot.lane.b32.xlu0 %v12231_v24, %s8905_s11 }
 0x365   : > { %v2991_v58 = vmul.f32 %v2990_v15, %v12059_v63  ;;  %v3091_v14 = vshll.u32 %v12138_v42, 16  ;;  %v12448_v28 = vsel %vm2693_vm13, nan, %v2702_v2  ;;  %vm3004_vm14 = vcmp.eq.s32.totalorder %v3002_v0, 0 }
 0x366   : > { %vm3077_vm0 = vc.u32 %v12183_v5, %v14015_v44  ;;  %v2855_v8 = vsel %vm2853_vm15, %v2854_v39, %v12313_v11  ;;  %v3093_v32 = vshll.u32 %v12152_v53, 16  ;;  %v3072_v12 = vshrl.u32 %v12129_v47, 16 }
 0x367   : > { %v3078_v63 = vsel %vm3077_vm0, 1, %v13688_v29  ;;  %v2856_v5 = vsel %vm2849_vm9, %v2852_v26, %v2855_v8  ;;  %v12458_v46 = vadd.f32 1.0, %v2991_v58  ;;  %vm3095_vm5 = vc.u32 %v12136_v33, %v3091_v14 }
 0x368   : > { %v3080_v24 = vadd.s32 %v3078_v63, %v12221_v7  ;;  %v12464_v25 = vsel %vm2847_vm6, nan, %v2856_v5  ;;  %v3097_v15 = vadd.s32 %v3091_v14, %v12136_v33  ;;  %v3096_v7 = vsel %vm3095_vm5, 1, %v13688_v29 }
 0x369   : > { %v3006_v62 = vsel %vm3004_vm14, %v12458_v46, %v3005_v31  ;;  %v3008_v36 = vxor.u32 2147483648, %v12458_v46  ;;  %vm3007_vm12 = vcmp.eq.s32.totalorder %v3002_v0, 2  ;;  %v3092_v26 = vshrl.u32 %v12138_v42, 16 }
 0x36a   : > { %v3081_v17 = vadd.s32 %v3080_v24, %v3070_v57  ;;  %v3098_v2 = vadd.s32 %v3096_v7, %v12154_v41  ;;  %vm3099_vm11 = vc.u32 %v3097_v15, %v3093_v32  ;;  %v3050_v47 = vsel %vm3046_vm3, %v12016_v61, %v12094_v3 }
 0x36b   : > { %vm3003_vm8 = vcmp.lt.s32.totalorder %v3002_v0, 2  ;;  %v3009_v33 = vsel %vm3007_vm12, %v3008_v36, %v12244_v56  ;;  %v3100_v57 = vsel %vm3099_vm11, 1, %v13688_v29  ;;  %vm3001_vm1 = vweird.f32 %v11398_v20 }
 0x36c   : > { %v3010_v58 = vsel %vm3003_vm8, %v3006_v62, %v3009_v33  ;;  %v3094_v42 = vshrl.u32 %v12152_v53, 16  ;;  %v3102_v44 = vadd.s32 %v3100_v57, %v3098_v2  ;;  %vm14016_vm2 = vweird.f32 %v13975_v59  ;;  %v12516_v2 = vpop.permute.xlu1 %5901 }
 0x36d   : > { %v12489_v41 = vsel %vm14016_vm2, nan, %v12357_v13  ;;  %v12493_v61 = vsel %vm3001_vm1, nan, %v3010_v58  ;;  %v3082_v3 = vadd.s32 %v3081_v17, %v3072_v12  ;;  %v3101_v0 = vadd.s32 %v3097_v15, %v3093_v32 }
 0x36e   : > { %vm14017_vm3 = vcmp.lt.s32.totalorder %v11808_v30, 2  ;;  %vm4863_vm10 = vcmp.eq.s32.totalorder %v12360_v16, 0  ;;  %v3103_v14 = vadd.s32 %v3102_v44, %v3092_v26  ;;  %5911 = vrot.lane.b32.xlu2 %v12489_v41, %s8904_s29  ;;  %v14018_v53 = vxor.u32 2147483648, %v12150_v52  ;;  %v14021_v44 = vld [vmem:[#allocation25_spill] sm:$0xff] }
 0x36f   : > { %v3051_v29 = vsel %vm14017_vm3, %v12087_v35, %v3050_v47  ;;  %vm4866_vm9 = vcmp.eq.s32.totalorder %v12360_v16, 2  ;;  %vm4862_vm4 = vcmp.lt.s32.totalorder %v12360_v16, 2  ;;  %v14019_v30 = vxor.u32 2147483648, %v12257_v48 }
 0x370   : > { %v4865_v59 = vsel %vm4863_vm10, %v12257_v48, %v14018_v53  ;;  %v3104_v13 = vadd.s32 %v3103_v14, %v3094_v42  ;;  %v3105_v8 = vmul.u32 %v12055_v23, %v3051_v29  ;;  %vm3107_vm15 = vc.u32 %v3082_v3, %v3101_v0 }
 0x371   : > { %v4868_v35 = vsel %vm4866_vm9, %v14019_v30, %v12150_v52  ;;  %vm14020_vm0 = vweird.f32 %v13984_v27  ;;  %v3106_v27 = vadd.s32 %v3101_v0, %v3082_v3  ;;  %v5015_v29 = vadd.s32 3, %v14021_v44  ;;  %v14022_v3 = vld [vmem:[#allocation31_spill] sm:$0xff] }
 0x372   : > { %v4869_v63 = vsel %vm4862_vm4, %v4865_v59, %v4868_v35  ;;  %v3108_v5 = vadd.s32 1, %v3104_v13  ;;  %v5170_v0 = vadd.s32 3, %v14022_v3  ;;  %v5480_v44 = vadd.s32 3, %v12134_v40 }
 0x373   : > { %v12512_v32 = vsel %vm14020_vm0, nan, %v4869_v63 }
 0x374   : > { %v3109_v24 = vsel %vm3107_vm15, %v3108_v5, %v3104_v13  ;;  %v5016_v13 = vand.u32 3, %v5015_v29  ;;  %v12521_v63 = vpop.permute.xlu1 %5973  ;;  %v5481_v3 = vand.u32 3, %v5480_v44 }
 0x375   : > { %v3110_v12 = vadd.s32 %v3109_v24, %v3105_v8  ;;  %v12519_v8 = vpop.f32.mrf.mxu0  ;;  %v5325_v24 = vadd.s32 3, %v12228_v55 }
 0x376   : > { %5913 = vrot.lane.b32.xlu2 %v12512_v32, %s8904_s29  ;;  %vm5018_vm12 = vcmp.eq.s32.totalorder %v5016_v13, 0  ;;  %vm5021_vm11 = vcmp.eq.s32.totalorder %v5016_v13, 2  ;;  %vm5017_vm8 = vcmp.lt.s32.totalorder %v5016_v13, 2 }
 0x377   : > { %v3111_v15 = vadd.s32 536870912, %v3110_v12 }
 0x379   : > { %v3112_v23 = vshrl.u32 %v3111_v15, 30 }
 0x37b   : > { %v3113_v62 = vshll.u32 %v3112_v23, 30 }
 0x37d   : > { %v3114_v16 = vsub.s32 %v3110_v12, %v3113_v62  ;;  %v14023_v12 = vxor.u32 2147483648, %v13985_v37  ;;  %v12543_v29 = vpop.f32.mrf.mxu0 }
 0x37f   : > { %vm3115_vm14 = vcmp.lt.s32.totalorder %v3114_v16, 0  ;;  %v3116_v17 = vsub.s32 0, %v3114_v16  ;;  %v5020_v15 = vsel %vm5018_vm12, %v12283_v51, %v14023_v12  ;;  %vm14032_vm12 = vcmask 1042434  }
 0x381   : > { %v3117_v48 = vsel %vm3115_vm14, %v3116_v17, %v3114_v16  ;;  %v14024_v17 = vld [vmem:[#allocation21_spill] sm:$0xff] }
 0x382   : > { %v3118_v52 = vclz %v3117_v48  ;;  %vm3014_vm2 = vcmp.lt.s32.totalorder %v14024_v17, 0  ;;  %v14025_v48 = vxor.u32 2147483648, %v12283_v51  ;;  %v5908_v51 = vpop.permute.xlu1 %5907 }
 0x383   : > { %v5948_v40 = vmul.f32 %v5908_v51, %v12543_v29 }
 0x384   : > { %v8342_v7 = vadd.s32 4294967294, %v3118_v52  ;;  %v5023_v52 = vsel %vm5021_vm11, %v14025_v48, %v13985_v37  ;;  %v6523_v37 = vrot.slane %v12489_v41, 7  ;;  %vm5486_vm11 = vcmp.eq.s32.totalorder %v5481_v3, 2 }
 0x385   : > { %5987 = vrot.lane.b32.xlu2 %v5948_v40, %s8905_s11 }
 0x386   : > { %vm8343_vm5 = vcmp.lt.s32.totalorder %v8342_v7, 0 }
 0x387   : > { %v3121_v26 = vsel %vm8343_vm5, 0, %v8342_v7  ;;  %v14026_v7 = vand.u32 2147483647, %v14024_v17  ;;  %vm5483_vm5 = vcmp.eq.s32.totalorder %v5481_v3, 0 }
 0x388   : > { %v3122_v47 = vsub.s32 32, %v3121_v26  ;;  %v3126_v33 = vsub.s32 4294967266, %v3121_v26  ;;  %v3123_v57 = vshll.u32 %v3114_v16, %v3121_v26  ;;  %v3136_v16 = vsub.s32 4, %v3112_v23 }
 0x389   : > { %vm12534_vm3 = vcmp.le.f32.partialorder %v14026_v7, 0.7853982 }
 0x38a   : > { %v3124_v58 = vshrl.u32 %v3106_v27, %v3122_v47  ;;  %v3127_v42 = vadd.s32 127, %v3126_v33  ;;  %v5171_v27 = vand.u32 3, %v5170_v0  ;;  %v5024_v47 = vsel %vm5017_vm8, %v5020_v15, %v5023_v52 }
 0x38b   : > { %vm5482_vm8 = vcmp.lt.s32.totalorder %v5481_v3, 2 }
 0x38c   : > { %v3125_v14 = vor.u32 %v3124_v58, %v3123_v57  ;;  %v3128_v53 = vshll.u32 %v3127_v42, 23  ;;  %v5326_v57 = vand.u32 3, %v5325_v24  ;;  %v3137_v58 = vsel %vm3014_vm2, %v3136_v16, %v3112_v23 }
 0x38d   : > { %vm5173_vm10 = vcmp.eq.s32.totalorder %v5171_v27, 0  ;;  %vm5176_vm4 = vcmp.eq.s32.totalorder %v5171_v27, 2  ;;  %vm5172_vm14 = vcmp.lt.s32.totalorder %v5171_v27, 2  ;;  %v5488_v27 = vsel %vm5486_vm11, %v3008_v36, %v12244_v56 }
 0x38e   : > { %v3129_v59 = vor.u32 4788187, %v3128_v53  ;;  %v3132_v35 = vcvt.s32.f32 %v3125_v14  ;;  %v12547_v53 = vsel %vm2539_vm7, nan, %v5024_v47  ;;  %vm5328_vm9 = vcmp.eq.s32.totalorder %v5326_v57, 0  ;;  %v8610_v14 = vld [vmem:[%s13423_s5 + $0x24] sm:$0xf] }
 0x38f   : > { %v5330_v41 = vsel %vm5328_vm9, %v12423_v54, %v2851_v45  ;;  %vm14030_vm7 = vcmask 1041409   ;;  %vm5331_vm15 = vcmp.eq.s32.totalorder %v5326_v57, 2  ;;  %vm5327_vm0 = vcmp.lt.s32.totalorder %v5326_v57, 2 }
 0x390   : > { %v3130_v30 = vand.u32 2147483647, %v3129_v59  ;;  %v6525_v59 = vrot.slane %v12512_v32, 6  ;;  %v6524_v0 = vsel %vm14030_vm7, %v6523_v37, %v12393_v21  ;;  %v14031_v32 = vxor.u32 2147483648, %v14013_v43 }
 0x391   : > { %v5178_v21 = vsel %vm5176_vm4, %v2700_v19, %v14013_v43  ;;  %v5485_v54 = vsel %vm5483_vm5, %v12458_v46, %v3005_v31  ;;  %vm14034_vm9 = vcmask 1044484   ;;  %vm14039_vm5 = vcmask 392192  }
 0x392   : > { %v3133_v5 = vmul.f32 %v3132_v35, %v3130_v30  ;;  %v3139_v35 = vsel %vm12534_vm3, 0, %v3137_v58  ;;  %v5175_v24 = vsel %vm5173_vm10, %v12411_v22, %v14031_v32  ;;  %v6526_v26 = vsel %vm14032_vm12, %v6525_v59, %v6524_v0  ;;  %vm14042_vm12 = vmmov %vm14039_vm5 }
 0x393   : > { %v5635_v16 = vadd.s32 3, %v3139_v35  ;;  %v5179_v7 = vsel %vm5172_vm14, %v5175_v24, %v5178_v21  ;;  %v3156_v43 = vand.u32 3, %v3139_v35  ;;  %v5489_v31 = vsel %vm5482_vm8, %v5485_v54, %v5488_v27  ;;  %v5976_v54 = vpop.permute.xlu0 %5975  ;;  %v12644_v27 = vpop.f32.mrf.mxu0  ;;  %vm14045_vm11 = vmmov %vm14039_vm5 }
 0x394   : > { %v3134_v62 = vxor.u32 2147483648, %v3133_v5  ;;  %v12579_v19 = vsel %vm2693_vm13, nan, %v5179_v7  ;;  %v12589_v50 = vsel %vm3001_vm1, nan, %v5489_v31  ;;  %vm3155_vm1 = vweird.f32 %v14024_v17  ;;  %v8617_v7 = vld [vmem:[%s13421_s3 + $0x10] sm:$0xff]  ;;  %vm14048_vm8 = vmmov %vm14039_vm5 }
 0x395   : > { %v5636_v58 = vand.u32 3, %v5635_v16  ;;  %v6529_v37 = vrot.slane %v12579_v19, 4  ;;  %vm3158_vm13 = vcmp.eq.s32.totalorder %v3156_v43, 0  ;;  %vm14037_vm14 = vcmask 1047559   ;;  %v14038_v16 = vld [vmem:[#allocation35_spill] sm:$0xff]  ;;  %6680 = vmatpush.bf16.msra.mxu3 %v8617_v7 }
 0x396   : > { %v3135_v55 = vsel %vm3014_vm2, %v3134_v62, %v3133_v5  ;;  %v5333_v62 = vsel %vm5331_vm15, %v2854_v39, %v12313_v11  ;;  %vm14033_vm2 = vcmask 1043459   ;;  %vm14035_vm15 = vcmask 1045509  }
 0x397   : > { %v3138_v33 = vsel %vm12534_vm3, %v14024_v17, %v3135_v55  ;;  %v5334_v45 = vsel %vm5327_vm0, %v5330_v41, %v5333_v62  ;;  %v6527_v55 = vrot.slane %v12547_v53, 5  ;;  %vm3161_vm3 = vcmp.eq.s32.totalorder %v3156_v43, 2  ;;  %v8428_v17 = vld [vmem:[%s13423_s5 + $0x8] sm:$0xf0] }
 0x398   : > { %v3140_v42 = vmul.f32 %v3138_v33, %v3138_v33  ;;  %v12575_v22 = vsel %vm2847_vm6, nan, %v5334_v45  ;;  %vm3157_vm6 = vcmp.lt.s32.totalorder %v3156_v43, 2  ;;  %vm5637_vm10 = vcmp.lt.s32.totalorder %v5636_v58, 2 }
 0x399   : > { %v6531_v34 = vrot.slane %v12575_v22, 3  ;;  %vm5638_vm7 = vcmp.eq.s32.totalorder %v5636_v58, 0  ;;  %vm5641_vm4 = vcmp.eq.s32.totalorder %v5636_v58, 2  ;;  %vm14036_vm0 = vcmask 1046534   ;;  %v8823_v58 = vld [vmem:[%s9024_s18 + $0x8] sm:$0xff] }
 0x39a   : > { %v3141_v13 = vmul.f32 -0.001358992, %v3140_v42  ;;  %v3148_v30 = vmul.f32 -0.00019511016, %v3140_v42 }
 0x39c   : > { %v3142_v23 = vadd.f32 0.041655596, %v3141_v13  ;;  %v3149_v5 = vadd.f32 0.008332121, %v3148_v30  ;;  %v8608_v13 = vld [vmem:[%s13423_s5 + $0x14] sm:$0xf] }
 0x39d   : > { %v8436_v30 = vld [vmem:[%s13423_s5 + $0x18] sm:$0xf0] }
 0x39e   : > { %v3143_v12 = vmul.f32 %v3142_v23, %v3140_v42  ;;  %v3150_v15 = vmul.f32 %v3149_v5, %v3140_v42  ;;  %v6533_v5 = vrot.slane %v12589_v50, 2  ;;  %v8439_v0 = vor.u32 %v8608_v13, %v8436_v30 }
 0x3a0   : > { %v3144_v48 = vadd.f32 -0.4999988, %v3143_v12  ;;  %v3151_v52 = vadd.f32 -0.16666654, %v3150_v15  ;;  %v8606_v15 = vld [vmem:[%s13423_s5 + $0x4] sm:$0xf] }
 0x3a1   : > { %v8431_v45 = vor.u32 %v8606_v15, %v8428_v17 }
 0x3a2   : > { %v3145_v11 = vmul.f32 %v3144_v48, %v3140_v42  ;;  %v3152_v39 = vmul.f32 %v3151_v52, %v3140_v42  ;;  %v6528_v42 = vsel %vm14033_vm2, %v6527_v55, %v6526_v26  ;;  %v5945_v48 = vmul.f32 %v12516_v2, %v14038_v16  ;;  %v8822_v52 = vld [vmem:[%s9024_s18] sm:$0xff]  ;;  %v8616_v55 = vld [vmem:[%s13421_s3 + $0x8] sm:$0xff]  ;;  %vm14051_vm2 = vmmov %vm14039_vm5 }
 0x3a3   : > { %v6530_v36 = vsel %vm14034_vm9, %v6529_v37, %v6528_v42  ;;  %6681 = vmatpush.bf16.msra.mxu3 %v8616_v55  ;;  %v8615_v2 = vld [vmem:[%s13421_s3] sm:$0xff]  ;;  %v14043_v42 = vld [vmem:[#allocation64_spill] sm:$0xff]  ;;  %vm14056_vm9 = vmmov %vm14051_vm2 }
 0x3a4   : > { %v3146_v47 = vadd.f32 1.0, %v3145_v11  ;;  %v3153_v57 = vadd.f32 1.0, %v3152_v39  ;;  %v6532_v59 = vsel %vm14035_vm15, %v6531_v34, %v6530_v36  ;;  %v14044_v34 = vld [vmem:[#allocation27_spill] sm:$0xff]  ;;  %vm6724_vm15 = vcmask 31744  }
 0x3a5   : > { %v6534_v12 = vsel %vm14036_vm0, %v6533_v5, %v6532_v59  ;;  %vm14062_vm0 = vcmask 1045509  }
 0x3a6   : > { %v3154_v44 = vmul.f32 %v3153_v57, %v3138_v33  ;;  %v3162_v51 = vxor.u32 2147483648, %v3146_v47  ;;  %v8444_v33 = vld [vmem:[%s13423_s5 + $0x28] sm:$0xf0]  ;;  %v14041_v57 = vld [vmem:[#allocation53_spill] sm:$0xff] }
 0x3a7   : > { %v8447_v20 = vor.u32 %v8610_v14, %v8444_v33  ;;  %6682 = vmatpush.bf16.msra.mxu3 %v8615_v2  ;;  %v8826_v2 = vld [vmem:[%s9024_s18 + $0x20] sm:$0xff] }
 0x3a8   : > { %v3159_v56 = vxor.u32 2147483648, %v3154_v44  ;;  %v3163_v46 = vsel %vm3161_vm3, %v3162_v51, %v3154_v44  ;;  %v5643_v23 = vsel %vm5641_vm4, %v3162_v51, %v3154_v44  ;;  %v5862_v44 = vmul.f32 %v14044_v34, %v14043_v42  ;;  %v5978_v51 = vpop.permute.xlu0 %5977  ;;  %vm14054_vm3 = vmmov %vm14051_vm2  ;;  %v8829_v42 = vld [vmem:[%s9024_s18 + $0x38] sm:$0xff] }
 0x3a9   : > { %5817 = vmatpush.bf16.msra.mxu1 %v8447_v20  ;;  %v12659_v20 = vpop.f32.mrf.mxu0  ;;  %vm14060_vm4 = vmmov %vm14051_vm2 }
 0x3aa   : > { %v3160_v35 = vsel %vm3158_vm13, %v3146_v47, %v3159_v56  ;;  %v5640_v40 = vsel %vm5638_vm7, %v3146_v47, %v3159_v56  ;;  %v14040_v47 = vld [vmem:[#allocation58_spill] sm:$0xff]  ;;  %vm14053_vm13 = vmmov %vm14051_vm2 }
 0x3ab   : > { %v3164_v41 = vsel %vm3157_vm6, %v3160_v35, %v3163_v46  ;;  %v5644_v3 = vsel %vm5637_vm10, %v5640_v40, %v5643_v23  ;;  %v5861_v31 = vmul.f32 %v14041_v57, %v14040_v47  ;;  %v6022_v46 = vadd.f32 %v5976_v54, %v5862_v44  ;;  %v14047_v40 = vld [vmem:[#allocation30_spill] sm:$0xff]  ;;  %v8825_v54 = vld [vmem:[%s9024_s18 + $0x18] sm:$0xff]  ;;  %vm14052_vm6 = vmmov %vm14051_vm2  ;;  %v12689_v47 = vpop.f32.mrf.mxu2 }
 0x3ac   : > { %v12609_v32 = vsel %vm3155_vm1, nan, %v3164_v41  ;;  %v12611_v24 = vsel %vm3155_vm1, nan, %v5644_v3  ;;  %v8824_v3 = vld [vmem:[%s9024_s18 + $0x10] sm:$0xff]  ;;  %vm14055_vm10 = vmmov %vm14051_vm2  ;;  %v14057_v44 = vld [vmem:[#allocation36_spill] sm:$0xff]  ;;  %vm14061_vm1 = vcmask 1044484  }
 0x3ad   : > { %v6535_v62 = vrot.slane %v12611_v24, 1  ;;  %5818 = vmatpush.bf16.msra.mxu1 %v8439_v0  ;;  %v6548_v26 = vpop.permute.xlu2 %6547  ;;  %v14049_v0 = vld [vmem:[#allocation45_spill] sm:$0xff]  ;;  %vm14059_vm7 = vmmov %vm14051_vm2 }
 0x3ae   : > { %v12642_v43 = vadd.f32 %v6548_v26, %v12376_v38  ;;  %v6021_v38 = vadd.f32 %v12521_v63, %v5861_v31 }
 0x3af   : > { %v6536_v21 = vsel %vm14037_vm14, %v6535_v62, %v6534_v12  ;;  %v14050_v12 = vld [vmem:[#allocation29_spill] sm:$0xff]  ;;  %vm14063_vm14 = vcmask 1046534  }
 0x3b0   : > { %6539 = vrot.lane.b32.xlu1 %v6536_v21, %s8904_s29  ;;  %v6571_v37 = vperm.slane %v12642_v43, 0  ;;  %v5863_v15 = vmul.f32 %v14050_v12, %v14049_v0  ;;  %v6558_v62 = vrot.slane %v12642_v43, 2 }
 0x3b1   : > { %5819 = vmatpush.bf16.msra.mxu1 %v8431_v45  ;;  %v12669_v41 = vpop.f32.mrf.mxu0 }
 0x3b2   : > { %v6603_v14 = vmul.f32 %v6571_v37, %v6021_v38  ;;  %v6573_v7 = vperm.slane %v6558_v62, 0  ;;  %v6560_v37 = vrot.slane %v12642_v43, 4  ;;  %v14058_v38 = vld [vmem:[#allocation33_spill] sm:$0xff] }
 0x3b4   : > { %8456 = vmatmul.msk.bf16.vlgmr.msra.gmra.mxu1 %vm14039_vm5, %v8822_v52  ;;  %vm14064_vm5 = vcmask 1047559  }
 0x3b5   : > { %v5906_v11 = vpop.permute.xlu2 %5905 }
 0x3b6   : > { %v5947_v39 = vmul.f32 %v5906_v11, %v12519_v8  ;;  %v8827_v11 = vld [vmem:[%s9024_s18 + $0x28] sm:$0xff] }
 0x3b8   : > { %5981 = vrot.lane.b32.xlu1 %v5945_v48, %s8905_s11  ;;  %5985 = vrot.lane.b32.xlu0 %v5947_v39, %s8905_s11  ;;  %v6023_v48 = vadd.f32 %v5978_v51, %v5863_v15  ;;  %v8828_v39 = vld [vmem:[%s9024_s18 + $0x30] sm:$0xff]  ;;  %v5866_v51 = vmul.f32 %v14057_v44, %v14002_v18  ;;  %s8906_s18 = smov 32  }
 0x3b9   : > { %v12704_v18 = vpop.f32.mrf.mxu0 }
 0x3ba   : > { %v6605_v26 = vmul.f32 %v6573_v7, %v6023_v48  ;;  %v6562_v7 = vrot.slane %v12642_v43, 6 }
 0x3bd   : > { %v5980_v56 = vpop.permute.xlu2 %5979 }
 0x3c0   : > { %5915 = vrot.lane.b32.xlu1 %v12547_v53, %s8904_s29  ;;  %v6557_v53 = vrot.slane %v12642_v43, 1  ;;  %5919 = vrot.lane.b32.xlu0 %v12575_v22, %s8904_s29  ;;  %v6559_v22 = vrot.slane %v12642_v43, 3 }
 0x3c2   : > { %v6572_v36 = vperm.slane %v6557_v53, 0  ;;  %v6574_v17 = vperm.slane %v6559_v22, 0  ;;  %v6561_v53 = vrot.slane %v12642_v43, 5  ;;  %v12710_v22 = vpop.f32.mrf.mxu0 }
 0x3c4   : > { %8457 = vmatmul.msk.bf16.gmra.mxu1 %vm14042_vm12, %v8823_v58  ;;  %v6604_v33 = vmul.f32 %v6572_v36, %v6022_v46  ;;  %v5865_v46 = vmul.f32 %v14038_v16, %v14058_v38  ;;  %vm14065_vm12 = vmmov %vm14051_vm2 }
 0x3c6   : > { %v6619_v59 = vpack.c.bf16 %v6604_v33, %v6603_v14  ;;  %v6576_v14 = vperm.slane %v6561_v53, 0  ;;  %v6575_v33 = vperm.slane %v6560_v37, 0 }
 0x3c8   : > { %5917 = vrot.lane.b32.xlu1 %v12579_v19, %s8904_s29  ;;  %8489 = vmatmul.msk.bf16.vlgmr.msra.gmra.mxu3 %vm14045_vm11, %v6619_v59  ;;  %v5912_v13 = vpop.permute.xlu2 %5911  ;;  %v14046_v19 = vld [vmem:[#allocation55_spill] sm:$0xff]  ;;  %vm14066_vm11 = vmmov %vm14051_vm2 }
 0x3c9   : > { %v5950_v30 = vmul.f32 %v5912_v13, %v12659_v20  ;;  %v5864_v23 = vmul.f32 %v14047_v40, %v14046_v19 }
 0x3ca   : > { %v12716_v15 = vpop.f32.mrf.mxu0 }
 0x3cb   : > { %5991 = vrot.lane.b32.xlu0 %v5950_v30, %s8905_s11  ;;  %v6024_v5 = vadd.f32 %v5980_v56, %v5864_v23 }
 0x3cd   : > { %v6606_v52 = vmul.f32 %v6574_v17, %v6024_v5 }
 0x3ce   : > { %v5910_v63 = vpop.permute.xlu0 %5909 }
 0x3cf   : > { %v5949_v35 = vmul.f32 %v5910_v63, %v12644_v27  ;;  %v6620_v55 = vpack.c.bf16 %v6606_v52, %v6605_v26  ;;  %v5867_v52 = vmul.f32 %v12519_v8, %v12349_v9 }
 0x3d0   : > { %v5914_v21 = vpop.permute.xlu2 %5913 }
 0x3d1   : > { %5989 = vrot.lane.b32.xlu1 %v5949_v35, %s8905_s11  ;;  %v5951_v45 = vmul.f32 %v5914_v21, %v12669_v41 }
 0x3d2   : > { %v12722_v21 = vpop.f32.mrf.mxu0 }
 0x3d3   : > { %5993 = vrot.lane.b32.xlu0 %v5951_v45, %s8905_s11 }
 0x3d4   : > { %8458 = vmatmul.msk.bf16.gmra.mxu1 %vm14048_vm8, %v8824_v3  ;;  %vm7061_vm8 = vcmask 1041408  }
 0x3d6   : > { %v5984_v58 = vpop.permute.xlu0 %5983 }
 0x3d7   : > { %v6026_v56 = vadd.f32 %v5984_v58, %v5866_v51 }
 0x3d8   : > { %8490 = vmatmul.msk.bf16.gmra.mxu3 %vm14051_vm2, %v6620_v55  ;;  %v5868_v55 = vmul.f32 %v12543_v29, %v12353_v49 }
 0x3d9   : > { %5923 = vrot.lane.b32.xlu1 %v12611_v24, %s8904_s29  ;;  %v6608_v13 = vmul.f32 %v6576_v14, %v6026_v56  ;;  %v6499_v14 = vrot.slane %v12464_v25, 3 }
 0x3da   : > { %v12734_v51 = vpop.f32.mrf.mxu0 }
 0x3df   : > { %v5988_v26 = vpop.permute.xlu2 %5987 }
 0x3e4   : > { %8459 = vmatmul.msk.bf16.gmra.mxu1 %vm14052_vm6, %v8825_v54  ;;  %v6563_v54 = vrot.slane %v12642_v43, 7  ;;  %vm14067_vm6 = vmmov %vm14051_vm2 }
 0x3f4   : > { %8460 = vmatmul.msk.bf16.gmra.mxu1 %vm14053_vm13, %v8826_v2  ;;  %vm7210_vm13 = vcmask 261120  }
 0x404   : > { %8461 = vmatmul.msk.bf16.gmra.mxu1 %vm14054_vm3, %v8827_v11  ;;  %v6028_v11 = vadd.f32 %v5988_v26, %v5868_v55  ;;  %vm14068_vm3 = vmmov %vm14051_vm2 }
 0x414   : > { %8462 = vmatmul.msk.bf16.gmra.mxu1 %vm14055_vm10, %v8828_v39  ;;  %v6577_v39 = vperm.slane %v6562_v7, 0  ;;  %vm14069_vm10 = vmmov %vm14051_vm2 }
 0x422   : > { %v6540_v31 = vpop.permute.xlu1 %6539 }
 0x423   : > { %v6544_v24 = vmul.f32 %v6540_v31, %v12689_v47 }
 0x424   : > { %8463 = vmatmul.msk.bf16.gmra.mxu1 %vm14056_vm9, %v8829_v42  ;;  %vm14070_vm9 = vmmov %vm14051_vm2 }
 0x425   : > { %6549 = vrot.lane.b32.xlu2 %v6544_v24, %s8905_s11  ;;  %v6578_v24 = vperm.slane %v6563_v54, 0 }
 0x427   : > { %v6610_v42 = vmul.f32 %v6578_v24, %v6028_v11 }
 0x42a   : > { %v5982_v36 = vpop.permute.xlu1 %5981  ;;  %v5986_v45 = vpop.permute.xlu0 %5985 }
 0x42b   : > { %v6025_v59 = vadd.f32 %v5982_v36, %v5865_v46  ;;  %v6027_v2 = vadd.f32 %v5986_v45, %v5867_v52  ;;  %v6503_v52 = vrot.slane %v12609_v32, 1 }
 0x42d   : > { %v6607_v30 = vmul.f32 %v6575_v33, %v6025_v59  ;;  %5921 = vrot.lane.b32.xlu2 %v12589_v50, %s8904_s29  ;;  %v6609_v58 = vmul.f32 %v6577_v39, %v6027_v2  ;;  %v6497_v59 = vrot.slane %v12448_v28, 4  ;;  %s367_s29 = sand.u32 1, %s8884_s14  }
 0x42e   : > { %s8198_s21 = scalar_lea.sflag [#allocation3], %s367_s29 }
 0x42f   : > { %v6621_v63 = vpack.c.bf16 %v6608_v13, %v6607_v30  ;;  %v6622_v9 = vpack.c.bf16 %v6610_v42, %v6609_v58 }
 0x431   : > { %8491 = vmatmul.msk.bf16.gmra.mxu3 %vm14059_vm7, %v6621_v63  ;;  %v12707_v23 = vpop.f32.mrf.mxu1  ;;  %vm14071_vm7 = vmmov %vm14051_vm2 }
 0x432   : > { %v5916_v35 = vpop.permute.xlu1 %5915  ;;  %v5920_v37 = vpop.permute.xlu0 %5919 }
 0x433   : > { %v5952_v19 = vmul.f32 %v5916_v35, %v12704_v18  ;;  %v5954_v38 = vmul.f32 %v5920_v37, %v12716_v15 }
 0x435   : > { %5995 = vrot.lane.b32.xlu2 %v5952_v19, %s8905_s11  ;;  %5999 = vrot.lane.b32.xlu0 %v5954_v38, %s8905_s11 }
 0x439   : > { %v5823_v0 = vpop.f32.mrf.mxu1 }
 0x43a   : > { %v5918_v5 = vpop.permute.xlu1 %5917 }
 0x43b   : > { %v5953_v3 = vmul.f32 %v5918_v5, %v12710_v22  ;;  %v6501_v5 = vrot.slane %v12493_v61, 2 }
 0x43d   : > { %5997 = vrot.lane.b32.xlu1 %v5953_v3, %s8905_s11  ;;  %7146 = vrot.lane.b32.xlu0 %v14041_v57, %s8906_s18  ;;  %v5992_v58 = vpop.permute.xlu0 %5991 }
 0x441   : > { %v12714_v50 = vpop.f32.mrf.mxu1  ;;  %8492 = vmatmul.msk.bf16.gmra.mxu3 %vm14060_vm4, %v6622_v9  ;;  %v5869_v9 = vmul.f32 %v12644_v27, %v12389_v1  ;;  %vm14072_vm4 = vcmask 1041409  }
 0x443   : > { %v12724_v48 = vpop.permute.xlu1 %5989 }
 0x445   : > { %7152 = vrot.lane.b32.xlu0 %v5823_v0, %s8906_s18 }
 0x449   : > { %v12718_v17 = vpop.f32.mrf.mxu1 }
 0x44b   : > { %v5924_v53 = vpop.permute.xlu1 %5923  ;;  %v12743_v43 = vpop.f32.mrf.mxu3 }
 0x44c   : > { %v5956_v56 = vmul.f32 %v5924_v53, %v12734_v51  ;;  %v6725_v36 = vsel %vm6724_vm15, %v12743_v43, -inf  ;;  %v5870_v53 = vmul.f32 %v12659_v20, %v12215_v6  ;;  %v6029_v6 = vadd.f32 %v12724_v48, %v5869_v9 }
 0x44d   : > { %v6726_v33 = vrot.slane %v6725_v36, 4  ;;  %7182 = vrot.lane.b32.xlu0 %v12659_v20, %s8906_s18  ;;  %v5871_v48 = vmul.f32 %v12669_v41, %v12289_v10 }
 0x44e   : > { %6003 = vrot.lane.b32.xlu1 %v5956_v56, %s8905_s11  ;;  %v6030_v38 = vadd.f32 %v5992_v58, %v5870_v53  ;;  %v5872_v58 = vmul.f32 %v12704_v18, %v12318_v4 }
 0x44f   : > { %v6727_v19 = vmax.f32 %v6725_v36, %v6726_v33 }
 0x451   : > { %v12720_v62 = vpop.f32.mrf.mxu1  ;;  %v6728_v7 = vrot.slane %v6727_v19, 2 }
 0x453   : > { %v12755_v13 = vpop.f32.mrf.mxu3  ;;  %v6729_v54 = vmax.f32 %v6727_v19, %v6728_v7  ;;  %v5994_v7 = vpop.permute.xlu0 %5993 }
 0x454   : > { %v6732_v63 = vsel %vm6724_vm15, %v12755_v13, -inf }
 0x455   : > { %v6733_v57 = vrot.slane %v6732_v63, 4  ;;  %v6730_v37 = vrot.slane %v6729_v54, 1  ;;  %7156 = vrot.lane.b32.xlu0 %v12714_v50, %s8906_s18 }
 0x456   : > { %7150 = vrot.lane.b32.xlu1 %v14044_v34, %s8906_s18  ;;  %v6498_v34 = vsel %vm14061_vm1, %v6497_v59, %v12409_v60  ;;  %vm14073_vm1 = vcmask 1042434  }
 0x457   : > { %v6500_v35 = vsel %vm14062_vm0, %v6499_v14, %v6498_v34  ;;  %v6734_v3 = vmax.f32 %v6732_v63, %v6733_v57  ;;  %v6731_v1 = vmax.f32 %v6729_v54, %v6730_v37  ;;  %vm14074_vm0 = vmmov %vm14051_vm2 }
 0x458   : > { %v6502_v45 = vsel %vm14063_vm14, %v6501_v5, %v6500_v35  ;;  %vm14075_vm14 = vcmask 1043459  }
 0x459   : > { %v12732_v31 = vpop.f32.mrf.mxu1  ;;  %v6735_v26 = vrot.slane %v6734_v3, 2  ;;  %v6504_v0 = vsel %vm14064_vm5, %v6503_v52, %v6502_v45  ;;  %v6837_v52 = vsub.f32 %v12743_v43, %v6731_v1  ;;  %v6031_v43 = vadd.f32 %v5994_v7, %v5871_v48 }
 0x45a   : > { %v6508_v2 = vmul.f32 %v6504_v0, %v12689_v47  ;;  %vm14076_vm5 = vcmask 1044484  }
 0x45b   : > { %v12767_v55 = vpop.f32.mrf.mxu3  ;;  %v6736_v11 = vmax.f32 %v6734_v3, %v6735_v26 }
 0x45c   : > { %v6739_v39 = vsel %vm6724_vm15, %v12767_v55, -inf }
 0x45d   : > { %v6740_v56 = vrot.slane %v6739_v39, 4  ;;  %v6737_v36 = vrot.slane %v6736_v11, 1  ;;  %7158 = vrot.lane.b32.xlu0 %v14047_v40, %s8906_s18 }
 0x45f   : > { %v6738_v35 = vmax.f32 %v6736_v11, %v6737_v36 }
 0x461   : > { %v12739_v49 = vpop.f32.mrf.mxu1  ;;  %v6838_v54 = vsub.f32 %v12755_v13, %v6738_v35 }
 0x463   : > { %v6691_v14 = vpop.f32.mrf.mxu3  ;;  %v6855_v53 = vmul.f32 1.442695, %v6838_v54 }
 0x464   : > { %v6746_v59 = vsel %vm6724_vm15, %v6691_v14, -inf }
 0x465   : > { %v6747_v63 = vrot.slane %v6746_v59, 4 }
 0x467   : > { %v6748_v5 = vmax.f32 %v6746_v59, %v6747_v63 }
 0x469   : > { %v12745_v46 = vpop.f32.mrf.mxu1  ;;  %v6749_v26 = vrot.slane %v6748_v5, 2 }
 0x46b   : > { %v6750_v11 = vmax.f32 %v6748_v5, %v6749_v26 }
 0x471   : > { %v5841_v30 = vpop.f32.mrf.mxu1 }
 0x472   : > { %7180 = vrot.lane.b32.xlu1 %v5841_v30, %s8906_s18  ;;  %v6741_v30 = vmax.f32 %v6739_v39, %v6740_v56  ;;  %v6853_v39 = vmul.f32 1.442695, %v6837_v52 }
 0x474   : > { %v6742_v50 = vrot.slane %v6741_v30, 2  ;;  %8744 = vpow2.f32 %v6853_v39 }
 0x475   : > { %8746 = vpow2.f32 %v6855_v53 }
 0x479   : > { %v12770_v60 = vpop.f32.mrf.mxu1 }
 0x47a   : > { %7154 = vrot.lane.b32.xlu1 %v14050_v12, %s8906_s18 }
 0x47f   : > { %v6550_v24 = vpop.permute.xlu2 %6549 }
 0x480   : > { %v12779_v42 = vadd.f32 %v6550_v24, %v6508_v2  ;;  %v6743_v24 = vmax.f32 %v6741_v30, %v6742_v50 }
 0x481   : > { %v5846_v33 = vpop.f32.mrf.mxu1 }
 0x482   : > { %v6564_v12 = vrot.slane %v12779_v42, 1  ;;  %v6579_v47 = vperm.slane %v12779_v42, 0  ;;  %7188 = vrot.lane.b32.xlu1 %v5846_v33, %s8906_s18  ;;  %v6565_v0 = vrot.slane %v12779_v42, 2  ;;  %v6566_v2 = vrot.slane %v12779_v42, 3 }
 0x483   : > { %v6744_v40 = vrot.slane %v6743_v24, 1 }
 0x484   : > { %v6580_v20 = vperm.slane %v6564_v12, 0  ;;  %v6611_v57 = vmul.f32 %v6579_v47, %v6029_v6  ;;  %v6581_v10 = vperm.slane %v6565_v0, 0  ;;  %v6582_v13 = vperm.slane %v6566_v2, 0 }
 0x485   : > { %v6751_v12 = vrot.slane %v6750_v11, 1  ;;  %v6745_v4 = vmax.f32 %v6743_v24, %v6744_v40 }
 0x486   : > { %v6612_v34 = vmul.f32 %v6580_v20, %v6030_v38  ;;  %v6613_v56 = vmul.f32 %v6581_v10, %v6031_v43 }
 0x487   : > { %v5922_v19 = vpop.permute.xlu2 %5921  ;;  %v6752_v36 = vmax.f32 %v6750_v11, %v6751_v12  ;;  %v6839_v6 = vsub.f32 %v12767_v55, %v6745_v4  ;;  %v393_v4 = vld [vmem:[%s13420_s2 + $0x9] sm:$0xf] }
 0x488   : > { %v5955_v3 = vmul.f32 %v5922_v19, %v12722_v21  ;;  %v6623_v45 = vpack.c.bf16 %v6612_v34, %v6611_v57 }
 0x489   : > { %v6840_v59 = vsub.f32 %v6691_v14, %v6752_v36  ;;  %v6857_v30 = vmul.f32 1.442695, %v6839_v6 }
 0x48a   : > { %6001 = vrot.lane.b32.xlu2 %v5955_v3, %s8905_s11  ;;  %8493 = vmatmul.msk.bf16.gmra.mxu3 %vm14065_vm12, %v6623_v45  ;;  %vm14077_vm12 = vmmov %vm14074_vm0  ;;  %s8291_s11 = sshll.u32 %s367_s29, 4 }
 0x48b   : > { %7190 = vrot.lane.b32.xlu1 %v12704_v18, %s8906_s18  ;;  %v12811_v18 = vpop.eup %8744  ;;  %s369_s17 = scalar_lea.vmem [#allocation2], %s8291_s11 }
 0x48c   : > { %v12813_v33 = vpop.eup %8746  ;;  %v6885_v20 = vsel %vm6724_vm15, %v12811_v18, 0.0  ;;  %s8210_s25 = sshll.u32 %s369_s17, 4  ;;  %s8211_s25 = int_to_ptr.vmem [resolvable:$true] %s8210_s25 }
 0x48d   : > { %v6886_v1 = vrot.slane %v6885_v20, 4 }
 0x48f   : > { %v5996_v9 = vpop.permute.xlu2 %5995  ;;  %v6887_v55 = vadd.f32 %v6886_v1, %v6885_v20 }
 0x490   : > { %v6032_v37 = vadd.f32 %v5996_v9, %v5872_v58 }
 0x492   : > { %v6614_v38 = vmul.f32 %v6582_v13, %v6032_v37  ;;  %7148 = vrot.lane.b32.xlu2 %v12707_v23, %s8906_s18  ;;  %v6892_v23 = vsel %vm6724_vm15, %v12813_v33, 0.0 }
 0x493   : > { %7164 = vrot.lane.b32.xlu1 %v12720_v62, %s8906_s18  ;;  %v6859_v62 = vmul.f32 1.442695, %v6840_v59  ;;  %v6893_v14 = vrot.slane %v6892_v23, 4 }
 0x494   : > { %v6624_v47 = vpack.c.bf16 %v6614_v38, %v6613_v56 }
 0x495   : > { %8748 = vpow2.f32 %v6859_v62  ;;  %v6894_v63 = vadd.f32 %v6893_v14, %v6892_v23 }
 0x496   : > { %8750 = vpow2.f32 %v6857_v30 }
 0x497   : > { %v6895_v57 = vrot.slane %v6894_v63, 2 }
 0x499   : > { %v6896_v5 = vadd.f32 %v6895_v57, %v6894_v63 }
 0x49a   : > { %7178 = vrot.lane.b32.xlu2 %v12644_v27, %s8906_s18  ;;  %8494 = vmatmul.msk.bf16.gmra.mxu3 %vm14066_vm11, %v6624_v47  ;;  %v6888_v27 = vrot.slane %v6887_v55, 2  ;;  %vm14078_vm11 = vcmask 1045509  }
 0x49b   : > { %7166 = vrot.lane.b32.xlu1 %v14057_v44, %s8906_s18  ;;  %v12827_v34 = vpop.eup %8748  ;;  %v6897_v7 = vrot.slane %v6896_v5, 1 }
 0x49c   : > { %v12829_v35 = vpop.eup %8750  ;;  %v6889_v19 = vadd.f32 %v6888_v27, %v6887_v55  ;;  %v6906_v44 = vsel %vm6724_vm15, %v12827_v34, 0.0 }
 0x49d   : > { %v6899_v3 = vsel %vm6724_vm15, %v12829_v35, 0.0  ;;  %v6907_v45 = vrot.slane %v6906_v44, 4  ;;  %v6898_v0 = vadd.f32 %v6897_v7, %v6896_v5 }
 0x49e   : > { %v6890_v52 = vrot.slane %v6889_v19, 1 }
 0x49f   : > { %v6908_v50 = vadd.f32 %v6907_v45, %v6906_v44 }
 0x4a0   : > { %v6891_v26 = vadd.f32 %v6890_v52, %v6889_v19 }
 0x4a1   : > { %v6909_v54 = vrot.slane %v6908_v50, 2 }
 0x4a2   : > { %7184 = vrot.lane.b32.xlu2 %v12770_v60, %s8906_s18  ;;  %v6900_v60 = vrot.slane %v6899_v3, 4  ;;  %8752 = vrcp.f32 %v6891_v26 }
 0x4a3   : > { %8754 = vrcp.f32 %v6898_v0  ;;  %v6910_v24 = vadd.f32 %v6909_v54, %v6908_v50  ;;  %v6568_v54 = vrot.slane %v12779_v42, 5 }
 0x4a4   : > { %v6901_v48 = vadd.f32 %v6900_v60, %v6899_v3 }
 0x4a5   : > { %v6911_v37 = vrot.slane %v6910_v24, 1 }
 0x4a6   : > { %v6902_v43 = vrot.slane %v6901_v48, 2 }
 0x4a7   : > { %v6912_v62 = vadd.f32 %v6911_v37, %v6910_v24  ;;  %v6000_v24 = vpop.permute.xlu0 %5999 }
 0x4a8   : > { %v6903_v10 = vadd.f32 %v6902_v43, %v6901_v48  ;;  %v8753_v9 = vpop.eup %8752  ;;  %v5873_v43 = vmul.f32 %v12710_v22, %v12448_v28 }
 0x4a9   : > { %v7013_v59 = vmul.f32 %v8753_v9, %v12811_v18  ;;  %8756 = vrcp.f32 %v6912_v62 }
 0x4aa   : > { %7186 = vrot.lane.b32.xlu2 %v12669_v41, %s8906_s18  ;;  %v5848_v41 = vpop.f32.mrf.mxu1  ;;  %v6904_v12 = vrot.slane %v6903_v10, 1 }
 0x4ab   : > { %7192 = vrot.lane.b32.xlu0 %v5848_v41, %s8906_s18 }
 0x4ac   : > { %v6905_v14 = vadd.f32 %v6904_v12, %v6903_v10  ;;  %v6584_v10 = vperm.slane %v6568_v54, 0 }
 0x4ae   : > { %8758 = vrcp.f32 %v6905_v14 }
 0x4b2   : > { %7160 = vrot.lane.b32.xlu2 %v12718_v17, %s8906_s18  ;;  %v8755_v17 = vpop.eup %8754  ;;  %v5851_v36 = vpop.f32.mrf.mxu1 }
 0x4b3   : > { %7194 = vrot.lane.b32.xlu0 %v12710_v22, %s8906_s18  ;;  %v7014_v6 = vmul.f32 %v8755_v17, %v12813_v33  ;;  %v8757_v44 = vpop.eup %8756 }
 0x4b4   : > { %v6694_v2 = vpop.f32.mrf.mxu3  ;;  %v8759_v3 = vpop.eup %8758  ;;  %v7016_v7 = vmul.f32 %v8757_v44, %v12827_v34 }
 0x4b5   : > { %v6753_v11 = vsel %vm6724_vm15, %v6694_v2, -inf  ;;  %v7029_v30 = vpack.c.bf16 %v7014_v6, %v7013_v59  ;;  %v5875_v6 = vmul.f32 %v12722_v21, %v12493_v61 }
 0x4b6   : > { %v6754_v39 = vrot.slane %v6753_v11, 4 }
 0x4b8   : > { %v6755_v58 = vmax.f32 %v6753_v11, %v6754_v39  ;;  %v6567_v11 = vrot.slane %v12779_v42, 4 }
 0x4ba   : > { %v6756_v53 = vrot.slane %v6755_v58, 2  ;;  %7162 = vrot.lane.b32.xlu2 %v14038_v16, %s8906_s18  ;;  %v394_v16 = vpack.c.bf16 %v393_v4, %v393_v4  ;;  %v5853_v33 = vpop.f32.mrf.mxu1  ;;  %v6583_v28 = vperm.slane %v6567_v11, 0 }
 0x4bb   : > { %7200 = vrot.lane.b32.xlu1 %v5853_v33, %s8906_s18  ;;  %7168 = vrot.lane.b32.xlu0 %v12732_v31, %s8906_s18  ;;  %v7015_v31 = vmul.f32 %v8759_v3, %v12829_v35 }
 0x4bc   : > { %v6757_v13 = vmax.f32 %v6755_v58, %v6756_v53  ;;  %v6696_v56 = vpop.f32.mrf.mxu3  ;;  %v7063_v1 = vsel %vm7061_vm8, %v394_v16, 0  ;;  %vm14080_vm8 = vmmov %vm14074_vm0 }
 0x4bd   : > { %v6760_v40 = vsel %vm6724_vm15, %v6696_v56, -inf  ;;  %7072 = vmatpush.bf16.msrb.mxu2 %v7063_v1  ;;  %v7030_v48 = vpack.c.bf16 %v7016_v7, %v7015_v31 }
 0x4be   : > { %v6758_v38 = vrot.slane %v6757_v13, 1  ;;  %v6761_v47 = vrot.slane %v6760_v40, 4 }
 0x4c0   : > { %v6759_v20 = vmax.f32 %v6757_v13, %v6758_v38  ;;  %v6762_v23 = vmax.f32 %v6760_v40, %v6761_v47  ;;  %8497 = vmatmul.msk.bf16.vlgmr.msrb.gmra.mxu2 %vm6724_vm15, %v7029_v30  ;;  %v5876_v47 = vmul.f32 %v12734_v51, %v12609_v32 }
 0x4c2   : > { %v6841_v55 = vsub.f32 %v6694_v2, %v6759_v20  ;;  %v6763_v63 = vrot.slane %v6762_v23, 2  ;;  %7196 = vrot.lane.b32.xlu2 %v5851_v36, %s8906_s18  ;;  %v5998_v2 = vpop.permute.xlu1 %5997  ;;  %v5856_v41 = vpop.f32.mrf.mxu1  ;;  %v6569_v20 = vrot.slane %v12779_v42, 6 }
 0x4c3   : > { %7202 = vrot.lane.b32.xlu1 %v12722_v21, %s8906_s18  ;;  %7170 = vrot.lane.b32.xlu0 %v12519_v8, %s8906_s18  ;;  %v5874_v8 = vmul.f32 %v12716_v15, %v12464_v25 }
 0x4c4   : > { %v6861_v27 = vmul.f32 1.442695, %v6841_v55  ;;  %v6764_v57 = vmax.f32 %v6762_v23, %v6763_v63  ;;  %v6699_v36 = vpop.f32.mrf.mxu3  ;;  %v6585_v32 = vperm.slane %v6569_v20, 0 }
 0x4c5   : > { %v6034_v53 = vadd.f32 %v6000_v24, %v5874_v8  ;;  %v6767_v59 = vsel %vm6724_vm15, %v6699_v36, -inf }
 0x4c6   : > { %8760 = vpow2.f32 %v6861_v27  ;;  %v6765_v18 = vrot.slane %v6764_v57, 1  ;;  %v6768_v62 = vrot.slane %v6767_v59, 4 }
 0x4c7   : > { %v6616_v17 = vmul.f32 %v6584_v10, %v6034_v53 }
 0x4c8   : > { %v6766_v19 = vmax.f32 %v6764_v57, %v6765_v18  ;;  %v6769_v57 = vmax.f32 %v6767_v59, %v6768_v62 }
 0x4ca   : > { %v6842_v5 = vsub.f32 %v6696_v56, %v6766_v19  ;;  %7198 = vrot.lane.b32.xlu2 %v12716_v15, %s8906_s18  ;;  %v6004_v38 = vpop.permute.xlu1 %6003  ;;  %v6770_v61 = vrot.slane %v6769_v57, 2 }
 0x4cb   : > { %7176 = vrot.lane.b32.xlu1 %v12745_v46, %s8906_s18  ;;  %7204 = vrot.lane.b32.xlu0 %v5856_v41, %s8906_s18  ;;  %v5858_v46 = vpop.f32.mrf.mxu1  ;;  %v6036_v23 = vadd.f32 %v6004_v38, %v5876_v47 }
 0x4cc   : > { %v8761_v45 = vpop.eup %8760  ;;  %v6863_v52 = vmul.f32 1.442695, %v6842_v5  ;;  %v6701_v33 = vpop.f32.mrf.mxu3  ;;  %v6771_v5 = vmax.f32 %v6769_v57, %v6770_v61 }
 0x4cd   : > { %v6913_v60 = vsel %vm6724_vm15, %v8761_v45, 0.0  ;;  %v6774_v19 = vsel %vm6724_vm15, %v6701_v33, -inf }
 0x4ce   : > { %v6914_v50 = vrot.slane %v6913_v60, 4  ;;  %8762 = vpow2.f32 %v6863_v52  ;;  %v6775_v21 = vrot.slane %v6774_v19, 4  ;;  %v6772_v52 = vrot.slane %v6771_v5, 1 }
 0x4d0   : > { %v6915_v26 = vadd.f32 %v6914_v50, %v6913_v60  ;;  %8498 = vmatmul.msk.bf16.gmra.mxu2 %vm6724_vm15, %v7030_v48  ;;  %v6776_v44 = vmax.f32 %v6774_v19, %v6775_v21  ;;  %v6773_v7 = vmax.f32 %v6771_v5, %v6772_v52 }
 0x4d2   : > { %v6916_v0 = vrot.slane %v6915_v26, 2  ;;  %7172 = vrot.lane.b32.xlu2 %v12739_v49, %s8906_s18  ;;  %v6033_v49 = vadd.f32 %v5998_v2, %v5873_v43  ;;  %v6777_v3 = vrot.slane %v6776_v44, 2  ;;  %v6843_v31 = vsub.f32 %v6699_v36, %v6773_v7 }
 0x4d3   : > { %7206 = vrot.lane.b32.xlu0 %v12734_v51, %s8906_s18 }
 0x4d4   : > { %v8763_v34 = vpop.eup %8762  ;;  %v6917_v39 = vadd.f32 %v6916_v0, %v6915_v26  ;;  %v6615_v37 = vmul.f32 %v6583_v28, %v6033_v49  ;;  %v6865_v48 = vmul.f32 1.442695, %v6843_v31 }
 0x4d5   : > { %v6920_v35 = vsel %vm6724_vm15, %v8763_v34, 0.0 }
 0x4d6   : > { %v6921_v58 = vrot.slane %v6920_v35, 4  ;;  %v6918_v22 = vrot.slane %v6917_v39, 1  ;;  %v6625_v56 = vpack.c.bf16 %v6616_v17, %v6615_v37 }
 0x4d8   : > { %v6922_v9 = vadd.f32 %v6921_v58, %v6920_v35  ;;  %v6919_v13 = vadd.f32 %v6918_v22, %v6917_v39  ;;  %8495 = vmatmul.msk.bf16.gmra.mxu3 %vm14051_vm2, %v6625_v56  ;;  %vm14081_vm2 = vcmask 1046534  }
 0x4da   : > { %v6923_v25 = vrot.slane %v6922_v9, 2  ;;  %7174 = vrot.lane.b32.xlu2 %v12543_v29, %s8906_s18  ;;  %8764 = vrcp.f32 %v6919_v13  ;;  %v6570_v29 = vrot.slane %v12779_v42, 7 }
 0x4dc   : > { %v6924_v15 = vadd.f32 %v6923_v25, %v6922_v9  ;;  %v6586_v63 = vperm.slane %v6570_v29, 0 }
 0x4de   : > { %v6925_v12 = vrot.slane %v6924_v15, 1  ;;  %v6618_v27 = vmul.f32 %v6586_v63, %v6036_v23 }
 0x4e0   : > { %v6926_v40 = vadd.f32 %v6925_v12, %v6924_v15  ;;  %v8765_v4 = vpop.eup %8764 }
 0x4e1   : > { %v7017_v14 = vmul.f32 %v8765_v4, %v8761_v45  ;;  %v6778_v45 = vmax.f32 %v6776_v44, %v6777_v3 }
 0x4e2   : > { %8766 = vrcp.f32 %v6926_v40  ;;  %7208 = vrot.lane.b32.xlu2 %v5858_v46, %s8906_s18 }
 0x4e3   : > { %v6779_v60 = vrot.slane %v6778_v45, 1  ;;  %8768 = vpow2.f32 %v6865_v48 }
 0x4e4   : > { %v6002_v16 = vpop.permute.xlu2 %6001 }
 0x4e5   : > { %v6035_v30 = vadd.f32 %v6002_v16, %v5875_v6  ;;  %v6780_v50 = vmax.f32 %v6778_v45, %v6779_v60  ;;  %v7147_v45 = vpop.permute.xlu0 %7146 }
 0x4e7   : > { %v6617_v18 = vmul.f32 %v6585_v32, %v6035_v30  ;;  %v6844_v26 = vsub.f32 %v6701_v33, %v6780_v50 }
 0x4e8   : > { %v8767_v1 = vpop.eup %8766 }
 0x4e9   : > { %v7018_v55 = vmul.f32 %v8767_v1, %v8763_v34  ;;  %v6626_v42 = vpack.c.bf16 %v6618_v27, %v6617_v18  ;;  %v6867_v0 = vmul.f32 1.442695, %v6844_v26  ;;  %v12894_v54 = vpop.eup %8768 }
 0x4ea   : > { %v6927_v39 = vsel %vm6724_vm15, %v12894_v54, 0.0 }
 0x4eb   : > { %v7031_v51 = vpack.c.bf16 %v7018_v55, %v7017_v14  ;;  %8496 = vmatmul.msk.bf16.gmra.mxu3 %vm14067_vm6, %v6626_v42  ;;  %8770 = vpow2.f32 %v6867_v0  ;;  %v6928_v24 = vrot.slane %v6927_v39, 4  ;;  %vm14082_vm6 = vcmask 1047559  }
 0x4ed   : > { %8499 = vmatmul.msk.bf16.gmra.mxu2 %vm6724_vm15, %v7031_v51  ;;  %v6929_v9 = vadd.f32 %v6928_v24, %v6927_v39 }
 0x4ef   : > { %v6930_v56 = vrot.slane %v6929_v9, 2 }
 0x4f1   : > { %v12896_v34 = vpop.eup %8770  ;;  %v6931_v4 = vadd.f32 %v6930_v56, %v6929_v9  ;;  %v7153_v9 = vpop.permute.xlu0 %7152 }
 0x4f2   : > { %v6934_v41 = vsel %vm6724_vm15, %v12896_v34, 0.0 }
 0x4f3   : > { %v6935_v49 = vrot.slane %v6934_v41, 4  ;;  %v6932_v62 = vrot.slane %v6931_v4, 1 }
 0x4f5   : > { %v6936_v17 = vadd.f32 %v6935_v49, %v6934_v41  ;;  %v6933_v33 = vadd.f32 %v6932_v62, %v6931_v4 }
 0x4f7   : > { %v6937_v12 = vrot.slane %v6936_v17, 2 }
 0x4f9   : > { %v6938_v16 = vadd.f32 %v6937_v12, %v6936_v17 }
 0x4fb   : > { %v6939_v1 = vrot.slane %v6938_v16, 1 }
 0x4fd   : > { %v6940_v19 = vadd.f32 %v6939_v1, %v6938_v16 }
 0x50d   : > { %v6704_v2 = vpop.f32.mrf.mxu3 }
 0x50e   : > { %v6781_v43 = vsel %vm6724_vm15, %v6704_v2, -inf }
 0x50f   : > { %v6782_v11 = vrot.slane %v6781_v43, 4 }
 0x511   : > { %v6783_v8 = vmax.f32 %v6781_v43, %v6782_v11 }
 0x513   : > { %v6784_v35 = vrot.slane %v6783_v8, 2 }
 0x515   : > { %v6785_v58 = vmax.f32 %v6783_v8, %v6784_v35  ;;  %v6706_v10 = vpop.f32.mrf.mxu3 }
 0x516   : > { %v6788_v53 = vsel %vm6724_vm15, %v6706_v10, -inf }
 0x517   : > { %v6786_v28 = vrot.slane %v6785_v58, 1  ;;  %v6789_v22 = vrot.slane %v6788_v53, 4 }
 0x519   : > { %v6787_v37 = vmax.f32 %v6785_v58, %v6786_v28  ;;  %v6790_v25 = vmax.f32 %v6788_v53, %v6789_v22  ;;  %v7149_v22 = vpop.permute.xlu2 %7148 }
 0x51b   : > { %v6845_v15 = vsub.f32 %v6704_v2, %v6787_v37  ;;  %v6791_v13 = vrot.slane %v6790_v25, 2 }
 0x51d   : > { %v6869_v46 = vmul.f32 1.442695, %v6845_v15  ;;  %v6792_v40 = vmax.f32 %v6790_v25, %v6791_v13  ;;  %v6709_v38 = vpop.f32.mrf.mxu3  ;;  %v7151_v25 = vpop.permute.xlu1 %7150 }
 0x51e   : > { %v6795_v47 = vsel %vm6724_vm15, %v6709_v38, -inf  ;;  %v7212_v15 = vsel %vm7210_vm13, %v7151_v25, %v7153_v9 }
 0x51f   : > { %8772 = vpow2.f32 %v6869_v46  ;;  %v6793_v29 = vrot.slane %v6792_v40, 1  ;;  %v6796_v36 = vrot.slane %v6795_v47, 4 }
 0x521   : > { %v6794_v59 = vmax.f32 %v6792_v40, %v6793_v29  ;;  %v6797_v6 = vmax.f32 %v6795_v47, %v6796_v36 }
 0x523   : > { %v6846_v20 = vsub.f32 %v6706_v10, %v6794_v59  ;;  %v6798_v23 = vrot.slane %v6797_v6, 2 }
 0x525   : > { %v12905_v30 = vpop.eup %8772  ;;  %v6871_v14 = vmul.f32 1.442695, %v6846_v20  ;;  %v6799_v55 = vmax.f32 %v6797_v6, %v6798_v23  ;;  %v6711_v63 = vpop.f32.mrf.mxu3 }
 0x526   : > { %v6941_v32 = vsel %vm6724_vm15, %v12905_v30, 0.0  ;;  %v6802_v51 = vsel %vm6724_vm15, %v6711_v63, -inf  ;;  %v12920_v20 = vpop.permute.xlu1 %7180 }
 0x527   : > { %v6942_v27 = vrot.slane %v6941_v32, 4  ;;  %8774 = vpow2.f32 %v6871_v14  ;;  %v6800_v57 = vrot.slane %v6799_v55, 1  ;;  %v6803_v18 = vrot.slane %v6802_v51, 4 }
 0x528   : > { %8776 = vrcp.f32 %v6933_v33 }
 0x529   : > { %v6801_v61 = vmax.f32 %v6799_v55, %v6800_v57  ;;  %v6804_v21 = vmax.f32 %v6802_v51, %v6803_v18  ;;  %v6943_v42 = vadd.f32 %v6942_v27, %v6941_v32  ;;  %8778 = vrcp.f32 %v6940_v19  ;;  %v12924_v32 = vpop.permute.xlu0 %7182 }
 0x52b   : > { %v6847_v44 = vsub.f32 %v6709_v38, %v6801_v61  ;;  %v6805_v5 = vrot.slane %v6804_v21, 2  ;;  %v6944_v7 = vrot.slane %v6943_v42, 2  ;;  %v12917_v38 = vpop.permute.xlu2 %7178 }
 0x52d   : > { %v8775_v3 = vpop.eup %8774  ;;  %v6873_v52 = vmul.f32 1.442695, %v6847_v44  ;;  %v6806_v60 = vmax.f32 %v6804_v21, %v6805_v5  ;;  %v6945_v11 = vadd.f32 %v6944_v7, %v6943_v42 }
 0x52e   : > { %v6948_v50 = vsel %vm6724_vm15, %v8775_v3, 0.0  ;;  %v8777_v48 = vpop.eup %8776  ;;  %v7155_v61 = vpop.permute.xlu1 %7154 }
 0x52f   : > { %v6949_v31 = vrot.slane %v6948_v50, 4  ;;  %8780 = vpow2.f32 %v6873_v52  ;;  %v6807_v26 = vrot.slane %v6806_v60, 1  ;;  %v8779_v0 = vpop.eup %8778  ;;  %v7019_v39 = vmul.f32 %v8777_v48, %v12894_v54 }
 0x530   : > { %v7020_v41 = vmul.f32 %v8779_v0, %v12896_v34  ;;  %v6946_v53 = vrot.slane %v6945_v11, 1 }
 0x531   : > { %v6950_v2 = vadd.f32 %v6949_v31, %v6948_v50  ;;  %v6808_v43 = vmax.f32 %v6806_v60, %v6807_v26 }
 0x532   : > { %v7032_v24 = vpack.c.bf16 %v7020_v41, %v7019_v39  ;;  %v6947_v54 = vadd.f32 %v6946_v53, %v6945_v11 }
 0x533   : > { %v6951_v8 = vrot.slane %v6950_v2, 2  ;;  %v6848_v35 = vsub.f32 %v6711_v63, %v6808_v43  ;;  %v7211_v63 = vsel %vm7210_vm13, %v7147_v45, %v7149_v22  ;;  %v12926_v27 = vpop.permute.xlu2 %7184 }
 0x534   : > { %8500 = vmatmul.msk.bf16.gmra.mxu2 %vm6724_vm15, %v7032_v24 }
 0x535   : > { %v8781_v49 = vpop.eup %8780  ;;  %v6952_v58 = vadd.f32 %v6951_v8, %v6950_v2  ;;  %v6875_v10 = vmul.f32 1.442695, %v6848_v35 }
 0x536   : > { %v6955_v28 = vsel %vm6724_vm15, %v8781_v49, 0.0  ;;  %v12933_v41 = vpop.permute.xlu1 %7188 }
 0x537   : > { %v6953_v17 = vrot.slane %v6952_v58, 1  ;;  %8782 = vpow2.f32 %v6875_v10  ;;  %v6956_v37 = vrot.slane %v6955_v28, 4 }
 0x538   : > { %8784 = vrcp.f32 %v6947_v54 }
 0x539   : > { %v6954_v34 = vadd.f32 %v6953_v17, %v6952_v58  ;;  %v6957_v13 = vadd.f32 %v6956_v37, %v6955_v28 }
 0x53b   : > { %8786 = vrcp.f32 %v6954_v34  ;;  %v6958_v40 = vrot.slane %v6957_v13, 2  ;;  %v12930_v50 = vpop.permute.xlu2 %7186 }
 0x53d   : > { %v8783_v56 = vpop.eup %8782  ;;  %v6959_v16 = vadd.f32 %v6958_v40, %v6957_v13 }
 0x53e   : > { %v6962_v12 = vsel %vm6724_vm15, %v8783_v56, 0.0  ;;  %v8785_v29 = vpop.eup %8784 }
 0x53f   : > { %v6963_v46 = vrot.slane %v6962_v12, 4  ;;  %v7021_v59 = vmul.f32 %v8785_v29, %v12905_v30  ;;  %v6960_v1 = vrot.slane %v6959_v16, 1 }
 0x541   : > { %v6964_v47 = vadd.f32 %v6963_v46, %v6962_v12  ;;  %v8787_v36 = vpop.eup %8786  ;;  %v6961_v18 = vadd.f32 %v6960_v1, %v6959_v16  ;;  %v12938_v46 = vpop.permute.xlu1 %7190 }
 0x542   : > { %v7022_v6 = vmul.f32 %v8787_v36, %v8775_v3  ;;  %v7157_v3 = vpop.permute.xlu0 %7156 }
 0x543   : > { %v6965_v4 = vrot.slane %v6964_v47, 2  ;;  %v7074_v55 = vpop.f32.mrf.mxu2  ;;  %8788 = vrcp.f32 %v6961_v18  ;;  %v7213_v11 = vsel %vm7210_vm13, %v7155_v61, %v7157_v3  ;;  %v7161_v17 = vpop.permute.xlu2 %7160 }
 0x544   : > { %v7033_v62 = vpack.c.bf16 %v7022_v6, %v7021_v59  ;;  %v7243_v51 = vmul.f32 %v7211_v63, %v7074_v55 }
 0x545   : > { %v6966_v23 = vadd.f32 %v6965_v4, %v6964_v47 }
 0x546   : > { %8501 = vmatmul.msk.bf16.gmra.mxu2 %vm6724_vm15, %v7033_v62  ;;  %v7259_v57 = vsel %vm14068_vm3, %v7243_v51, 0.0  ;;  %vm14083_vm3 = vmmov %vm14074_vm0 }
 0x547   : > { %v6967_v14 = vrot.slane %v6966_v23, 1  ;;  %v7260_v30 = vrot.slane %v7259_v57, 4 }
 0x549   : > { %v6968_v33 = vadd.f32 %v6967_v14, %v6966_v23  ;;  %v7261_v19 = vadd.f32 %v7260_v30, %v7259_v57  ;;  %v8789_v52 = vpop.eup %8788  ;;  %v7165_v57 = vpop.permute.xlu1 %7164 }
 0x54a   : > { %v7023_v48 = vmul.f32 %v8789_v52, %v8781_v49  ;;  %v7159_v28 = vpop.permute.xlu0 %7158 }
 0x54b   : > { %8790 = vrcp.f32 %v6968_v33  ;;  %v7262_v21 = vrot.slane %v7261_v19, 2  ;;  %v7076_v42 = vpop.f32.mrf.mxu2  ;;  %v7214_v34 = vsel %vm7210_vm13, %v7159_v28, %v7161_v17  ;;  %v7163_v33 = vpop.permute.xlu2 %7162 }
 0x54c   : > { %v7244_v44 = vmul.f32 %v7212_v15, %v7076_v42 }
 0x54d   : > { %v7263_v5 = vadd.f32 %v7262_v21, %v7261_v19  ;;  %v7215_v21 = vsel %vm7210_vm13, %v7163_v33, %v7165_v57 }
 0x54e   : > { %v7266_v45 = vsel %vm14069_vm10, %v7244_v44, 0.0  ;;  %vm14084_vm10 = vmmov %vm14074_vm0 }
 0x54f   : > { %v7267_v60 = vrot.slane %v7266_v45, 4  ;;  %v7264_v31 = vrot.slane %v7263_v5, 1 }
 0x551   : > { %v8791_v7 = vpop.eup %8790  ;;  %v7268_v26 = vadd.f32 %v7267_v60, %v7266_v45  ;;  %v7265_v35 = vadd.f32 %v7264_v31, %v7263_v5 }
 0x552   : > { %v7024_v0 = vmul.f32 %v8791_v7, %v8783_v56 }
 0x553   : > { %v7269_v2 = vrot.slane %v7268_v26, 2  ;;  %v7079_v43 = vpop.f32.mrf.mxu2  ;;  %v7371_v22 = vpack.c.bf16 %v7265_v35, %v7265_v35 }
 0x554   : > { %v7034_v39 = vpack.c.bf16 %v7024_v0, %v7023_v48  ;;  %v7245_v8 = vmul.f32 %v7213_v11, %v7079_v43 }
 0x555   : > { %v7270_v24 = vadd.f32 %v7269_v2, %v7268_v26  ;;  %v7409_v13 = vunpack.c.l.b16 %v7371_v22 }
 0x556   : > { %8502 = vmatmul.msk.bf16.gmra.mxu2 %vm6724_vm15, %v7034_v39  ;;  %v7273_v58 = vsel %vm14070_vm9, %v7245_v8, 0.0  ;;  %vm14085_vm9 = vmmov %vm14074_vm0 }
 0x557   : > { %v7271_v10 = vrot.slane %v7270_v24, 1  ;;  %v7274_v53 = vrot.slane %v7273_v58, 4 }
 0x559   : > { %v7272_v49 = vadd.f32 %v7271_v10, %v7270_v24  ;;  %v7275_v9 = vadd.f32 %v7274_v53, %v7273_v58 }
 0x55b   : > { %v7372_v37 = vpack.c.bf16 %v7272_v49, %v7272_v49  ;;  %v7276_v25 = vrot.slane %v7275_v9, 2  ;;  %v7081_v54 = vpop.f32.mrf.mxu2  ;;  %v6714_v1 = vpop.f32.mrf.mxu3 }
 0x55c   : > { %v7246_v15 = vmul.f32 %v7214_v34, %v7081_v54  ;;  %v6809_v14 = vsel %vm6724_vm15, %v6714_v1, -inf }
 0x55d   : > { %v7410_v56 = vunpack.c.l.b16 %v7372_v37  ;;  %v7277_v12 = vadd.f32 %v7276_v25, %v7275_v9  ;;  %v6810_v51 = vrot.slane %v6809_v14, 4 }
 0x55e   : > { %v7280_v40 = vsel %vm14071_vm7, %v7246_v15, 0.0  ;;  %vm14086_vm7 = vmmov %vm14074_vm0 }
 0x55f   : > { %v7425_v47 = vsel %vm14072_vm4, %v7410_v56, %v7409_v13  ;;  %v7278_v29 = vrot.slane %v7277_v12, 1  ;;  %v7281_v36 = vrot.slane %v7280_v40, 4  ;;  %v6811_v18 = vmax.f32 %v6809_v14, %v6810_v51  ;;  %vm14087_vm4 = vmmov %vm14074_vm0 }
 0x561   : > { %v7279_v4 = vadd.f32 %v7278_v29, %v7277_v12  ;;  %v7282_v16 = vadd.f32 %v7281_v36, %v7280_v40  ;;  %v6812_v42 = vrot.slane %v6811_v18, 2 }
 0x563   : > { %v7373_v59 = vpack.c.bf16 %v7279_v4, %v7279_v4  ;;  %v7283_v6 = vrot.slane %v7282_v16, 2  ;;  %v6813_v3 = vmax.f32 %v6811_v18, %v6812_v42  ;;  %v6716_v45 = vpop.f32.mrf.mxu3 }
 0x564   : > { %v6816_v60 = vsel %vm6724_vm15, %v6716_v45, -inf }
 0x565   : > { %v7411_v23 = vunpack.c.l.b16 %v7373_v59  ;;  %v7284_v62 = vadd.f32 %v7283_v6, %v7282_v16  ;;  %v6814_v26 = vrot.slane %v6813_v3, 1  ;;  %v6817_v48 = vrot.slane %v6816_v60, 4 }
 0x567   : > { %v7426_v55 = vsel %vm14073_vm1, %v7411_v23, %v7425_v47  ;;  %v7285_v63 = vrot.slane %v7284_v62, 1  ;;  %v6815_v2 = vmax.f32 %v6813_v3, %v6814_v26  ;;  %v6818_v43 = vmax.f32 %v6816_v60, %v6817_v48  ;;  %vm14088_vm1 = vmmov %vm14074_vm0 }
 0x569   : > { %v7286_v30 = vadd.f32 %v7285_v63, %v7284_v62  ;;  %v6849_v39 = vsub.f32 %v6714_v1, %v6815_v2  ;;  %v6819_v8 = vrot.slane %v6818_v43, 2 }
 0x56b   : > { %v7374_v19 = vpack.c.bf16 %v7286_v30, %v7286_v30  ;;  %v6877_v24 = vmul.f32 1.442695, %v6849_v39  ;;  %v6820_v58 = vmax.f32 %v6818_v43, %v6819_v8 }
 0x56d   : > { %v7412_v5 = vunpack.c.l.b16 %v7374_v19  ;;  %8792 = vpow2.f32 %v6877_v24  ;;  %v6821_v22 = vrot.slane %v6820_v58, 1 }
 0x56e   : > { %v6719_v10 = vpop.f32.mrf.mxu3 }
 0x56f   : > { %v7427_v7 = vsel %vm14075_vm14, %v7412_v5, %v7426_v55  ;;  %v6823_v53 = vsel %vm6724_vm15, %v6719_v10, -inf  ;;  %v6822_v17 = vmax.f32 %v6820_v58, %v6821_v22  ;;  %vm14089_vm14 = vmmov %vm14074_vm0 }
 0x570   : > { %v7084_v61 = vpop.f32.mrf.mxu2  ;;  %v6824_v49 = vrot.slane %v6823_v53, 4 }
 0x571   : > { %v7247_v44 = vmul.f32 %v7215_v21, %v7084_v61  ;;  %v6850_v54 = vsub.f32 %v6716_v45, %v6822_v17 }
 0x572   : > { %v6825_v37 = vmax.f32 %v6823_v53, %v6824_v49 }
 0x573   : > { %v7287_v52 = vsel %vm14074_vm0, %v7247_v44, 0.0  ;;  %v8793_v15 = vpop.eup %8792  ;;  %v6879_v56 = vmul.f32 1.442695, %v6850_v54 }
 0x574   : > { %v7288_v31 = vrot.slane %v7287_v52, 4  ;;  %v6826_v34 = vrot.slane %v6825_v37, 2  ;;  %v6969_v40 = vsel %vm6724_vm15, %v8793_v15, 0.0 }
 0x575   : > { %v6970_v4 = vrot.slane %v6969_v40, 4  ;;  %8794 = vpow2.f32 %v6879_v56 }
 0x576   : > { %v7289_v0 = vadd.f32 %v7288_v31, %v7287_v52  ;;  %v6721_v12 = vpop.f32.mrf.mxu3  ;;  %v6827_v47 = vmax.f32 %v6825_v37, %v6826_v34 }
 0x577   : > { %v6830_v29 = vsel %vm6724_vm15, %v6721_v12, -inf  ;;  %v6971_v6 = vadd.f32 %v6970_v4, %v6969_v40 }
 0x578   : > { %v7290_v11 = vrot.slane %v7289_v0, 2  ;;  %v6828_v16 = vrot.slane %v6827_v47, 1  ;;  %v6831_v59 = vrot.slane %v6830_v29, 4  ;;  %v7086_v34 = vpop.f32.mrf.mxu2 }
 0x579   : > { %v6972_v1 = vrot.slane %v6971_v6, 2 }
 0x57a   : > { %v7291_v35 = vadd.f32 %v7290_v11, %v7289_v0  ;;  %v6829_v23 = vmax.f32 %v6827_v47, %v6828_v16  ;;  %v6832_v62 = vmax.f32 %v6830_v29, %v6831_v59  ;;  %v12955_v0 = vpop.permute.xlu0 %7192 }
 0x57b   : > { %v8795_v55 = vpop.eup %8794  ;;  %v6973_v63 = vadd.f32 %v6972_v1, %v6971_v6 }
 0x57c   : > { %v7292_v28 = vrot.slane %v7291_v35, 1  ;;  %v6833_v14 = vrot.slane %v6832_v62, 2  ;;  %v6976_v51 = vsel %vm6724_vm15, %v8795_v55, 0.0  ;;  %v6851_v57 = vsub.f32 %v6719_v10, %v6829_v23 }
 0x57d   : > { %v6977_v18 = vrot.slane %v6976_v51, 4  ;;  %v6974_v19 = vrot.slane %v6973_v63, 1 }
 0x57e   : > { %v7293_v9 = vadd.f32 %v7292_v28, %v7291_v35  ;;  %v6834_v30 = vmax.f32 %v6832_v62, %v6833_v14  ;;  %v6881_v21 = vmul.f32 1.442695, %v6851_v57 }
 0x57f   : > { %v6978_v61 = vadd.f32 %v6977_v18, %v6976_v51  ;;  %v6975_v45 = vadd.f32 %v6974_v19, %v6973_v63  ;;  %v8619_v18 = vld [vmem:[%s13424_s6 + $0x8] sm:$0xff]  ;;  %v7197_v19 = vpop.permute.xlu2 %7196 }
 0x580   : > { %v7375_v25 = vpack.c.bf16 %v7293_v9, %v7293_v9  ;;  %v6835_v33 = vrot.slane %v6834_v30, 1  ;;  %8796 = vpow2.f32 %v6881_v21 }
 0x581   : > { %v6979_v44 = vrot.slane %v6978_v61, 2 }
 0x582   : > { %v7413_v13 = vunpack.c.l.b16 %v7375_v25  ;;  %v6836_v42 = vmax.f32 %v6834_v30, %v6835_v33  ;;  %v12960_v28 = vpop.permute.xlu0 %7194  ;;  %v8620_v30 = vld [vmem:[%s13424_s6 + $0x10] sm:$0xff] }
 0x583   : > { %v6980_v3 = vadd.f32 %v6979_v44, %v6978_v61  ;;  %7466 = vmatpush.bf16.msrb.mxu0 %v8620_v30 }
 0x584   : > { %v12952_v36 = vsel %vm14076_vm5, %v7413_v13, %v7427_v7  ;;  %v6852_v5 = vsub.f32 %v6721_v12, %v6836_v42  ;;  %v7167_v13 = vpop.permute.xlu1 %7166  ;;  %vm14091_vm5 = vcmask 1042434  }
 0x585   : > { %v6981_v60 = vrot.slane %v6980_v3, 1 }
 0x586   : > { %v6883_v52 = vmul.f32 1.442695, %v6852_v5  ;;  %v8797_v31 = vpop.eup %8796 }
 0x587   : > { %v6982_v7 = vadd.f32 %v6981_v60, %v6980_v3  ;;  %v6983_v2 = vsel %vm6724_vm15, %v8797_v31, 0.0  ;;  %7467 = vmatpush.bf16.msrb.mxu0 %v8619_v18  ;;  %v7199_v21 = vpop.permute.xlu2 %7198 }
 0x588   : > { %8798 = vpow2.f32 %v6883_v52  ;;  %v6984_v39 = vrot.slane %v6983_v2, 4 }
 0x589   : > { %8800 = vrcp.f32 %v6975_v45 }
 0x58a   : > { %8802 = vrcp.f32 %v6982_v7  ;;  %v6985_v10 = vadd.f32 %v6984_v39, %v6983_v2  ;;  %v7169_v54 = vpop.permute.xlu0 %7168 }
 0x58b   : > { %v7216_v56 = vsel %vm7210_vm13, %v7167_v13, %v7169_v54 }
 0x58c   : > { %v6986_v22 = vrot.slane %v6985_v10, 2  ;;  %v7248_v40 = vmul.f32 %v7216_v56, %v7086_v34  ;;  %v7201_v61 = vpop.permute.xlu1 %7200 }
 0x58e   : > { %v8799_v26 = vpop.eup %8798  ;;  %v6987_v9 = vadd.f32 %v6986_v22, %v6985_v10  ;;  %v7294_v47 = vsel %vm14077_vm12, %v7248_v40, 0.0  ;;  %vm14092_vm12 = vcmask 1043459  }
 0x58f   : > { %v8801_v48 = vpop.eup %8800  ;;  %v6990_v43 = vsel %vm6724_vm15, %v8799_v26, 0.0  ;;  %v7295_v4 = vrot.slane %v7294_v47, 4  ;;  %v7173_v5 = vpop.permute.xlu2 %7172 }
 0x590   : > { %v8803_v11 = vpop.eup %8802  ;;  %v6991_v8 = vrot.slane %v6990_v43, 4  ;;  %v7025_v35 = vmul.f32 %v8801_v48, %v8793_v15  ;;  %v6988_v37 = vrot.slane %v6987_v9, 1 }
 0x591   : > { %v7026_v24 = vmul.f32 %v8803_v11, %v8795_v55  ;;  %v7296_v23 = vadd.f32 %v7295_v4, %v7294_v47  ;;  %v7220_v4 = vsel %vm7210_vm13, %v12924_v32, %v12926_v27  ;;  %v7223_v32 = vsel %vm7210_vm13, %v12960_v28, %v7197_v19 }
 0x592   : > { %v6992_v53 = vadd.f32 %v6991_v8, %v6990_v43  ;;  %v6989_v15 = vadd.f32 %v6988_v37, %v6987_v9  ;;  %v7171_v3 = vpop.permute.xlu0 %7170  ;;  %v8618_v37 = vld [vmem:[%s13424_s6] sm:$0xff] }
 0x593   : > { %v7035_v58 = vpack.c.bf16 %v7026_v24, %v7025_v35  ;;  %v7297_v1 = vrot.slane %v7296_v23, 2  ;;  %v7217_v52 = vsel %vm7210_vm13, %v7171_v3, %v7173_v5  ;;  %7468 = vmatpush.bf16.msrb.mxu0 %v8618_v37 }
 0x594   : > { %v6993_v49 = vrot.slane %v6992_v53, 2  ;;  %8804 = vrcp.f32 %v6989_v15  ;;  %v12973_v44 = vpop.permute.xlu1 %7202 }
 0x595   : > { %8503 = vmatmul.msk.bf16.gmra.mxu2 %vm6724_vm15, %v7035_v58  ;;  %v7298_v14 = vadd.f32 %v7297_v1, %v7296_v23 }
 0x596   : > { %v6994_v17 = vadd.f32 %v6993_v49, %v6992_v53 }
 0x597   : > { %v7299_v55 = vrot.slane %v7298_v14, 1 }
 0x598   : > { %v6995_v25 = vrot.slane %v6994_v17, 1 }
 0x599   : > { %v7300_v63 = vadd.f32 %v7299_v55, %v7298_v14 }
 0x59a   : > { %v6996_v12 = vadd.f32 %v6995_v25, %v6994_v17  ;;  %v8805_v29 = vpop.eup %8804 }
 0x59b   : > { %v7027_v59 = vmul.f32 %v8805_v29, %v8797_v31  ;;  %v7376_v51 = vpack.c.bf16 %v7300_v63, %v7300_v63  ;;  %v7224_v63 = vsel %vm7210_vm13, %v7199_v21, %v7201_v61  ;;  %v7205_v21 = vpop.permute.xlu0 %7204 }
 0x59c   : > { %8806 = vrcp.f32 %v6996_v12  ;;  %v7177_v7 = vpop.permute.xlu1 %7176 }
 0x59d   : > { %v7414_v57 = vunpack.c.l.b16 %v7376_v51 }
 0x59f   : > { %v7429_v33 = vsel %vm14078_vm11, %v7414_v57, %v12952_v36  ;;  %vm14093_vm11 = vcmask 1044484  }
 0x5a2   : > { %v8807_v16 = vpop.eup %8806 }
 0x5a3   : > { %v7028_v6 = vmul.f32 %v8807_v16, %v8799_v26  ;;  %v7175_v26 = vpop.permute.xlu2 %7174 }
 0x5a4   : > { %v7218_v36 = vsel %vm7210_vm13, %v7175_v26, %v7177_v7 }
 0x5a5   : > { %v7036_v62 = vpack.c.bf16 %v7028_v6, %v7027_v59  ;;  %v7221_v59 = vsel %vm7210_vm13, %v12930_v50, %v12933_v41  ;;  %v7219_v6 = vsel %vm7210_vm13, %v12917_v38, %v12920_v20 }
 0x5a7   : > { %8504 = vmatmul.msk.bf16.gmra.mxu2 %vm6724_vm15, %v7036_v62  ;;  %vm14079_vm15 = vmmov %vm14074_vm0  ;;  %v7222_v62 = vsel %vm7210_vm13, %v12938_v46, %v12955_v0 }
 0x5b7   : > { %v7089_v42 = vpop.f32.mrf.mxu2 }
 0x5b8   : > { %v7249_v60 = vmul.f32 %v7217_v52, %v7089_v42 }
 0x5ba   : > { %v7301_v31 = vsel %vm14079_vm15, %v7249_v60, 0.0  ;;  %vm14094_vm15 = vcmask 1045509  }
 0x5bb   : > { %v7302_v2 = vrot.slane %v7301_v31, 4 }
 0x5bd   : > { %v7303_v11 = vadd.f32 %v7302_v2, %v7301_v31  ;;  %v7225_v2 = vsel %vm7210_vm13, %v12973_v44, %v7205_v21 }
 0x5bf   : > { %v7091_v45 = vpop.f32.mrf.mxu2  ;;  %v7304_v8 = vrot.slane %v7303_v11, 2 }
 0x5c0   : > { %v7250_v43 = vmul.f32 %v7218_v36, %v7091_v45 }
 0x5c1   : > { %v7305_v58 = vadd.f32 %v7304_v8, %v7303_v11 }
 0x5c2   : > { %v7308_v39 = vsel %vm14080_vm8, %v7250_v43, 0.0  ;;  %vm14095_vm8 = vmmov %vm14081_vm2 }
 0x5c3   : > { %v7309_v35 = vrot.slane %v7308_v39, 4  ;;  %v7306_v53 = vrot.slane %v7305_v58, 1 }
 0x5c5   : > { %v7310_v10 = vadd.f32 %v7309_v35, %v7308_v39  ;;  %v7307_v9 = vadd.f32 %v7306_v53, %v7305_v58  ;;  %v7209_v53 = vpop.permute.xlu2 %7208 }
 0x5c7   : > { %v7311_v22 = vrot.slane %v7310_v10, 2  ;;  %v7377_v25 = vpack.c.bf16 %v7307_v9, %v7307_v9 }
 0x5c9   : > { %v7094_v48 = vpop.f32.mrf.mxu2  ;;  %v7312_v17 = vadd.f32 %v7311_v22, %v7310_v10  ;;  %v7415_v34 = vunpack.c.l.b16 %v7377_v25  ;;  %v7207_v22 = vpop.permute.xlu0 %7206 }
 0x5ca   : > { %v7251_v14 = vmul.f32 %v7219_v6, %v7094_v48 }
 0x5cb   : > { %v7313_v54 = vrot.slane %v7312_v17, 1  ;;  %v7430_v12 = vsel %vm14081_vm2, %v7415_v34, %v7429_v33  ;;  %vm14096_vm2 = vmmov %vm14082_vm6 }
 0x5cc   : > { %v7315_v38 = vsel %vm14085_vm9, %v7251_v14, 0.0  ;;  %vm14111_vm9 = vmmov %vm14092_vm12 }
 0x5cd   : > { %v7314_v13 = vadd.f32 %v7313_v54, %v7312_v17  ;;  %v7316_v18 = vrot.slane %v7315_v38, 4 }
 0x5cf   : > { %v7378_v15 = vpack.c.bf16 %v7314_v13, %v7314_v13  ;;  %v7317_v5 = vadd.f32 %v7316_v18, %v7315_v38 }
 0x5d1   : > { %v7096_v24 = vpop.f32.mrf.mxu2  ;;  %v7416_v40 = vunpack.c.l.b16 %v7378_v15  ;;  %v7318_v31 = vrot.slane %v7317_v5, 2 }
 0x5d2   : > { %v7252_v16 = vmul.f32 %v7220_v4, %v7096_v24 }
 0x5d3   : > { %v12984_v29 = vsel %vm14082_vm6, %v7416_v40, %v7430_v12  ;;  %v7319_v24 = vadd.f32 %v7318_v31, %v7317_v5  ;;  %vm14097_vm6 = vmmov %vm14074_vm0 }
 0x5d4   : > { %v7322_v50 = vsel %vm14083_vm3, %v7252_v16, 0.0 }
 0x5d5   : > { %v7323_v57 = vrot.slane %v7322_v50, 4  ;;  %v7320_v54 = vrot.slane %v7319_v24, 1 }
 0x5d7   : > { %v7324_v19 = vadd.f32 %v7323_v57, %v7322_v50  ;;  %v7321_v6 = vadd.f32 %v7320_v54, %v7319_v24  ;;  %v14098_v24 = vld [vmem:[#allocation5_spill] sm:$0xff] }
 0x5d9   : > { %v7099_v49 = vpop.f32.mrf.mxu2  ;;  %v7325_v52 = vrot.slane %v7324_v19, 2 }
 0x5da   : > { %v7253_v23 = vmul.f32 %v7221_v59, %v7099_v49 }
 0x5db   : > { %v7326_v11 = vadd.f32 %v7325_v52, %v7324_v19 }
 0x5dc   : > { %v7329_v51 = vsel %vm14084_vm10, %v7253_v23, 0.0  ;;  %vm14110_vm10 = vmmov %vm14091_vm5 }
 0x5dd   : > { %v7330_v0 = vrot.slane %v7329_v51, 4  ;;  %v7327_v9 = vrot.slane %v7326_v11, 1 }
 0x5df   : > { %v7331_v42 = vadd.f32 %v7330_v0, %v7329_v51  ;;  %v7328_v40 = vadd.f32 %v7327_v9, %v7326_v11 }
 0x5e1   : > { %v7101_v56 = vpop.f32.mrf.mxu2  ;;  %v7332_v7 = vrot.slane %v7331_v42, 2 }
 0x5e2   : > { %v7254_v55 = vmul.f32 %v7222_v62, %v7101_v56  ;;  %v7226_v56 = vsel %vm7210_vm13, %v7207_v22, %v7209_v53  ;;  %vm14090_vm13 = vcmask 1041409  }
 0x5e3   : > { %v7333_v8 = vadd.f32 %v7332_v7, %v7331_v42  ;;  %vm14107_vm3 = vmmov %vm14090_vm13 }
 0x5e4   : > { %v7336_v20 = vsel %vm14086_vm7, %v7254_v55, 0.0  ;;  %v7380_v55 = vpack.c.bf16 %v7328_v40, %v7328_v40  ;;  %v14105_v40 = vld [vmem:[#allocation12_spill] sm:$0xff]  ;;  %vm14115_vm7 = vmmov %vm14093_vm11 }
 0x5e5   : > { %v7337_v28 = vrot.slane %v7336_v20, 4  ;;  %v7334_v25 = vrot.slane %v7333_v8, 1 }
 0x5e6   : > { %v7418_v57 = vunpack.c.l.b16 %v7380_v55 }
 0x5e7   : > { %v7338_v3 = vadd.f32 %v7337_v28, %v7336_v20  ;;  %v7335_v16 = vadd.f32 %v7334_v25, %v7333_v8  ;;  %v14101_v25 = vld [vmem:[#allocation8_spill] sm:$0xff] }
 0x5e9   : > { %v7339_v26 = vrot.slane %v7338_v3, 2 }
 0x5eb   : > { %v7340_v58 = vadd.f32 %v7339_v26, %v7338_v3 }
 0x5ed   : > { %v7341_v34 = vrot.slane %v7340_v58, 1 }
 0x5ef   : > { %v7342_v23 = vadd.f32 %v7341_v34, %v7340_v58  ;;  %v14102_v34 = vld [vmem:[#allocation9_spill] sm:$0xff] }
 0x5f1   : > { %v7382_v51 = vpack.c.bf16 %v7342_v23, %v7342_v23 }
 0x618   : > { %v7104_v47 = vpop.f32.mrf.mxu2 }
 0x619   : > { %v7255_v27 = vmul.f32 %v7223_v32, %v7104_v47 }
 0x61b   : > { %v7343_v46 = vsel %vm14087_vm4, %v7255_v27, 0.0  ;;  %vm14117_vm4 = vmmov %vm14094_vm15 }
 0x61c   : > { %v7344_v33 = vrot.slane %v7343_v46, 4 }
 0x61e   : > { %v7345_v45 = vadd.f32 %v7344_v33, %v7343_v46  ;;  %v7420_v33 = vunpack.c.l.b16 %v7382_v51 }
 0x620   : > { %v7106_v1 = vpop.f32.mrf.mxu2  ;;  %v7346_v36 = vrot.slane %v7345_v45, 2 }
 0x621   : > { %v7256_v41 = vmul.f32 %v7224_v63, %v7106_v1  ;;  %v7381_v63 = vpack.c.bf16 %v7335_v16, %v7335_v16 }
 0x622   : > { %v7347_v49 = vadd.f32 %v7346_v36, %v7345_v45 }
 0x623   : > { %v7350_v30 = vsel %vm14088_vm1, %v7256_v41, 0.0  ;;  %v7379_v41 = vpack.c.bf16 %v7321_v6, %v7321_v6  ;;  %vm14119_vm1 = vmmov %vm14095_vm8 }
 0x624   : > { %v7351_v61 = vrot.slane %v7350_v30, 4  ;;  %v7348_v15 = vrot.slane %v7347_v49, 1 }
 0x625   : > { %v7417_v28 = vunpack.c.l.b16 %v7379_v41 }
 0x626   : > { %v7352_v60 = vadd.f32 %v7351_v61, %v7350_v30  ;;  %v7349_v14 = vadd.f32 %v7348_v15, %v7347_v49  ;;  %v7419_v30 = vunpack.c.l.b16 %v7381_v63  ;;  %v14099_v49 = vld [vmem:[#allocation6_spill] sm:$0xff]  ;;  %v14104_v15 = vld [vmem:[#allocation11_spill] sm:$0xff] }
 0x627   : > { %v7432_v21 = vsel %vm14090_vm13, %v7418_v57, %v7417_v28  ;;  %vm14122_vm13 = vmmov %vm14107_vm3 }
 0x628   : > { %v7353_v39 = vrot.slane %v7352_v60, 2  ;;  %v7383_v20 = vpack.c.bf16 %v7349_v14, %v7349_v14  ;;  %v7433_v3 = vsel %vm14091_vm5, %v7419_v30, %v7432_v21  ;;  %v14109_v21 = vld [vmem:[#allocation15_spill] sm:$0xff] }
 0x629   : > { %v7434_v52 = vsel %vm14092_vm12, %v7420_v33, %v7433_v3  ;;  %vm14123_vm12 = vmmov %vm14111_vm9 }
 0x62a   : > { %v7109_v48 = vpop.f32.mrf.mxu2  ;;  %v7354_v17 = vadd.f32 %v7353_v39, %v7352_v60  ;;  %v7421_v61 = vunpack.c.l.b16 %v7383_v20 }
 0x62b   : > { %v7257_v43 = vmul.f32 %v7225_v2, %v7109_v48 }
 0x62c   : > { %v7355_v47 = vrot.slane %v7354_v17, 1  ;;  %v7435_v7 = vsel %vm14093_vm11, %v7421_v61, %v7434_v52  ;;  %v14112_v52 = vld [vmem:[#allocation16_spill] sm:$0xff]  ;;  %vm14124_vm11 = vmmov %vm14115_vm7 }
 0x62d   : > { %v7357_v35 = vsel %vm14074_vm0, %v7257_v43, 0.0  ;;  %vm14120_vm0 = vmmov %vm14096_vm2 }
 0x62e   : > { %v7358_v10 = vrot.slane %v7357_v35, 4  ;;  %v7356_v32 = vadd.f32 %v7355_v47, %v7354_v17  ;;  %v14100_v17 = vld [vmem:[#allocation7_spill] sm:$0xff] }
 0x630   : > { %v7359_v37 = vadd.f32 %v7358_v10, %v7357_v35  ;;  %v7384_v46 = vpack.c.bf16 %v7356_v32, %v7356_v32 }
 0x632   : > { %v7360_v44 = vrot.slane %v7359_v37, 2  ;;  %v7111_v13 = vpop.f32.mrf.mxu2  ;;  %v7422_v42 = vunpack.c.l.b16 %v7384_v46 }
 0x633   : > { %v7258_v12 = vmul.f32 %v7226_v56, %v7111_v13  ;;  %v14103_v13 = vld [vmem:[#allocation10_spill] sm:$0xff] }
 0x634   : > { %v7361_v4 = vadd.f32 %v7360_v44, %v7359_v37  ;;  %v7436_v26 = vsel %vm14094_vm15, %v7422_v42, %v7435_v7  ;;  %v14113_v7 = vld [vmem:[#allocation17_spill] sm:$0xff]  ;;  %vm14125_vm15 = vmmov %vm14117_vm4 }
 0x635   : > { %v7364_v59 = vsel %vm14089_vm14, %v7258_v12, 0.0  ;;  %vm14121_vm14 = vmmov %vm14097_vm6 }
 0x636   : > { %v7362_v62 = vrot.slane %v7361_v4, 1  ;;  %v7365_v1 = vrot.slane %v7364_v59, 4 }
 0x638   : > { %v7366_v27 = vadd.f32 %v7365_v1, %v7364_v59  ;;  %v7363_v50 = vadd.f32 %v7362_v62, %v7361_v4 }
 0x63a   : > { %v7367_v38 = vrot.slane %v7366_v27, 2  ;;  %v7385_v18 = vpack.c.bf16 %v7363_v50, %v7363_v50 }
 0x63c   : > { %v7368_v0 = vadd.f32 %v7367_v38, %v7366_v27  ;;  %v7423_v45 = vunpack.c.l.b16 %v7385_v18 }
 0x63e   : > { %v7369_v19 = vrot.slane %v7368_v0, 1  ;;  %v7437_v48 = vsel %vm14095_vm8, %v7423_v45, %v7436_v26  ;;  %v14114_v26 = vld [vmem:[#allocation18_spill] sm:$0xff]  ;;  %vm14126_vm8 = vmmov %vm14119_vm1 }
 0x640   : > { %v7370_v5 = vadd.f32 %v7369_v19, %v7368_v0  ;;  %v14106_v0 = vld [vmem:[#allocation13_spill] sm:$0xff]  ;;  %v14108_v19 = vld [vmem:[#allocation14_spill] sm:$0xff] }
 0x642   : > { %v7386_v60 = vpack.c.bf16 %v7370_v5, %v7370_v5 }
 0x644   : > { %v7424_v31 = vunpack.c.l.b16 %v7386_v60 }
 0x646   : > { %v7438_v2 = vsel %vm14096_vm2, %v7424_v31, %v7437_v48  ;;  %vm14127_vm2 = vmmov %vm14120_vm0 }
 0x647   : > { %v7439_v36 = vpack.c.b16 %v7438_v2, %v12984_v29  ;;  %v8734_v29 = vld [vmem:[%s13420_s2 + $0x2] ss:$0 sm:$0xff] }
 0x649   : > { %8517 = vmatmul.msk.bf16.vlgmr.msrb.gmra.mxu0 %vm14097_vm6, %v7439_v36 }
 0x6c6   : > { %v7470_v43 = vpop.f32.mrf.mxu0 }
 0x6c7   : > { %v7477_v11 = vrot.slane %v7470_v43, 1  ;;  %v7478_v39 = vrot.slane %v7470_v43, 2  ;;  %v7479_v8 = vrot.slane %v7470_v43, 3  ;;  %v7480_v35 = vrot.slane %v7470_v43, 4 }
 0x6c8   : > { %v7507_v58 = vadd.f32 %v7470_v43, %v14098_v24  ;;  %v7481_v10 = vrot.slane %v7470_v43, 5  ;;  %v7482_v53 = vrot.slane %v7470_v43, 6  ;;  %v7483_v22 = vrot.slane %v7470_v43, 7 }
 0x6c9   : > { %v7508_v9 = vadd.f32 %v7477_v11, %v14099_v49  ;;  %v7509_v37 = vadd.f32 %v7478_v39, %v14100_v17  ;;  %v7510_v54 = vadd.f32 %v7479_v8, %v14101_v25  ;;  %v7511_v44 = vadd.f32 %v7480_v35, %v14102_v34  ;;  %v14116_v11 = vld [vmem:[#allocation19_spill] sm:$0xff]  ;;  %v14118_v35 = vld [vmem:[#allocation20_spill] sm:$0xff] }
 0x6ca   : > { %v7512_v56 = vadd.f32 %v7481_v10, %v14103_v13  ;;  %v7513_v12 = vadd.f32 %v7482_v53, %v14104_v15  ;;  %v7514_v47 = vadd.f32 %v7483_v22, %v14105_v40  ;;  %v13044_v1 = vadd.f32 %v8734_v29, %v7507_v58 }
 0x6cb   : > { %v13032_v4 = vadd.f32 %v8734_v29, %v7508_v9  ;;  %v13034_v16 = vadd.f32 %v8734_v29, %v7509_v37  ;;  %v13036_v59 = vadd.f32 %v8734_v29, %v7510_v54  ;;  %v13038_v6 = vadd.f32 %v8734_v29, %v7511_v44 }
 0x6cc   : > { %v13040_v23 = vadd.f32 %v8734_v29, %v7512_v56  ;;  %v13042_v62 = vadd.f32 %v8734_v29, %v7513_v12  ;;  %v13046_v14 = vadd.f32 %v8734_v29, %v7514_v47 }
 0x6cd   : > { %v7556_v55 = vrot.slane %v13032_v4, 7  ;;  %v7558_v32 = vrot.slane %v13034_v16, 6  ;;  %v7560_v63 = vrot.slane %v13036_v59, 5  ;;  %v7562_v50 = vrot.slane %v13038_v6, 4 }
 0x6ce   : > { %v7472_v27 = vpop.f32.mrf.mxu0  ;;  %v7564_v41 = vrot.slane %v13040_v23, 3  ;;  %v7566_v51 = vrot.slane %v13042_v62, 2  ;;  %v7568_v43 = vrot.slane %v13046_v14, 1 }
 0x6cf   : > { %v7484_v38 = vrot.slane %v7472_v27, 1  ;;  %v7485_v20 = vrot.slane %v7472_v27, 2  ;;  %v7486_v57 = vrot.slane %v7472_v27, 3  ;;  %v7487_v46 = vrot.slane %v7472_v27, 4 }
 0x6d0   : > { %v7515_v30 = vadd.f32 %v7472_v27, %v14106_v0  ;;  %v7557_v18 = vsel %vm14107_vm3, %v7556_v55, %v13044_v1  ;;  %v7488_v28 = vrot.slane %v7472_v27, 5  ;;  %v7489_v33 = vrot.slane %v7472_v27, 6  ;;  %v8528_v0 = vld [vmem:[%s13425_s7 + $0x10] sm:$0xf] }
 0x6d1   : > { %v7516_v61 = vadd.f32 %v7484_v38, %v14108_v19  ;;  %v7517_v42 = vadd.f32 %v7485_v20, %v14109_v21  ;;  %v7559_v5 = vsel %vm14110_vm10, %v7558_v32, %v7557_v18  ;;  %v7490_v3 = vrot.slane %v7472_v27, 7  ;;  %v8626_v38 = vld [vmem:[%s13425_s7 + $0x24] sm:$0xf0]  ;;  %v8625_v20 = vld [vmem:[%s13425_s7 + $0x24] sm:$0xf]  ;;  %vm14129_vm10 = vmmov %vm14091_vm5 }
 0x6d2   : > { %v7561_v45 = vsel %vm14111_vm9, %v7560_v63, %v7559_v5  ;;  %v7518_v60 = vadd.f32 %v7486_v57, %v14112_v52  ;;  %v7519_v31 = vadd.f32 %v7487_v46, %v14113_v7  ;;  %v7520_v48 = vadd.f32 %v7488_v28, %v14114_v26  ;;  %v8538_v46 = vld [vmem:[%s13425_s7 + $0x28] sm:$0xf0]  ;;  %v8623_v28 = vld [vmem:[%s13425_s7 + $0x14] sm:$0xf] }
 0x6d3   : > { %v13064_v2 = vadd.f32 %v8734_v29, %v7516_v61  ;;  %v7563_v36 = vsel %vm14115_vm7, %v7562_v50, %v7561_v45  ;;  %v7521_v39 = vadd.f32 %v7489_v33, %v14116_v11  ;;  %v7522_v24 = vadd.f32 %v7490_v3, %v14118_v35  ;;  %v8530_v33 = vld [vmem:[%s13425_s7 + $0x18] sm:$0xf0] }
 0x6d4   : > { %v7565_v8 = vsel %vm14117_vm4, %v7564_v41, %v7563_v36  ;;  %v13071_v58 = vadd.f32 %v8734_v29, %v7517_v42  ;;  %v13073_v10 = vadd.f32 %v8734_v29, %v7518_v60  ;;  %v13076_v22 = vadd.f32 %v8734_v29, %v7515_v30  ;;  %v8624_v30 = vld [vmem:[%s13425_s7 + $0x14] sm:$0xf0]  ;;  %v14128_v42 = vld [vmem:[#allocation22_spill] sm:$0xff] }
 0x6d5   : > { %v7567_v53 = vsel %vm14119_vm1, %v7566_v51, %v7565_v8  ;;  %v13078_v49 = vadd.f32 %v8734_v29, %v7519_v31  ;;  %v13081_v17 = vadd.f32 %v8734_v29, %v7520_v48  ;;  %v7570_v37 = vrot.slane %v13064_v2, 7  ;;  %v8536_v51 = vld [vmem:[%s13425_s7 + $0x20] sm:$0xf] }
 0x6d6   : > { %v7569_v9 = vsel %vm14120_vm0, %v7568_v43, %v7567_v53  ;;  %v7572_v25 = vrot.slane %v13071_v58, 6  ;;  %v13086_v34 = vadd.f32 %v8734_v29, %v7521_v39  ;;  %v13088_v44 = vadd.f32 %v8734_v29, %v7522_v24 }
 0x6d7   : > { %v7586_v54 = vsel %vm14121_vm14, %v7569_v9, 0.0  ;;  %v7571_v13 = vsel %vm14122_vm13, %v7570_v37, %v13076_v22  ;;  %v7574_v56 = vrot.slane %v13073_v10, 5  ;;  %v7576_v12 = vrot.slane %v13078_v49, 4  ;;  %vm14130_vm14 = vmmov %vm14097_vm6 }
 0x6d8   : > { %7587 = vadd.xlane.f32.xlu1 %v7586_v54  ;;  %v7573_v15 = vsel %vm14091_vm5, %v7572_v25, %v7571_v13  ;;  %v7578_v47 = vrot.slane %v13081_v17, 3  ;;  %v7580_v32 = vrot.slane %v13086_v34, 2  ;;  %v7582_v27 = vrot.slane %v13088_v44, 1  ;;  %vm14131_vm13 = vmmov %vm14107_vm3 }
 0x6d9   : > { %v7575_v40 = vsel %vm14123_vm12, %v7574_v56, %v7573_v15  ;;  %v8537_v57 = vor.u32 %v8626_v38, %v8536_v51  ;;  %v8541_v18 = vor.u32 %v8625_v20, %v8538_v46  ;;  %v8529_v19 = vor.u32 %v8624_v30, %v8528_v0  ;;  %vm14132_vm12 = vmmov %vm14111_vm9 }
 0x6da   : > { %v7577_v55 = vsel %vm14124_vm11, %v7576_v12, %v7575_v40  ;;  %v8533_v21 = vor.u32 %v8623_v28, %v8530_v33  ;;  %vm14133_vm11 = vmmov %vm14115_vm7 }
 0x6db   : > { %v7579_v29 = vsel %vm14125_vm15, %v7578_v47, %v7577_v55  ;;  %7943 = vmatpush.bf16.msrb.mxu1 %v8537_v57  ;;  %7957 = vmatpush.bf16.msrb.mxu3 %v8541_v18  ;;  %vm14134_vm15 = vmmov %vm14117_vm4 }
 0x6dc   : > { %v7581_v63 = vsel %vm14126_vm8, %v7580_v32, %v7579_v29  ;;  %vm14135_vm8 = vmmov %vm14119_vm1 }
 0x6dd   : > { %v7583_v50 = vsel %vm14127_vm2, %v7582_v27, %v7581_v63  ;;  %vm14136_vm2 = vmmov %vm14120_vm0 }
 0x6de   : > { %v7589_v41 = vsel %vm14097_vm6, %v7583_v50, 0.0 }
 0x6df   : > { %7590 = vadd.xlane.f32.xlu0 %v7589_v41  ;;  %7944 = vmatpush.bf16.msrb.mxu1 %v8529_v19 }
 0x6e0   : > { %7958 = vmatpush.bf16.msrb.mxu3 %v8533_v21 }
 0x74b   : > { %v7588_v61 = vpop.xlane.xlu1 %7587 }
 0x74c   : > { %v7592_v5 = vmul.f32 %v7588_v61, %v14128_v42 }
 0x74e   : > { %v7596_v3 = vrot.slane %v7592_v5, 1  ;;  %v7597_v45 = vrot.slane %v7592_v5, 2  ;;  %v7598_v52 = vrot.slane %v7592_v5, 3  ;;  %v7599_v60 = vrot.slane %v7592_v5, 4 }
 0x74f   : > { %v7600_v7 = vrot.slane %v7592_v5, 5  ;;  %v7601_v31 = vrot.slane %v7592_v5, 6  ;;  %v7602_v26 = vrot.slane %v7592_v5, 7  ;;  %v13130_v48 = vsub.f32 %v13044_v1, %v7592_v5 }
 0x750   : > { %v13133_v36 = vsub.f32 %v13032_v4, %v7596_v3  ;;  %v13136_v43 = vsub.f32 %v13034_v16, %v7597_v45  ;;  %v13139_v11 = vsub.f32 %v13036_v59, %v7598_v52  ;;  %v13142_v39 = vsub.f32 %v13038_v6, %v7599_v60 }
 0x751   : > { %v13145_v8 = vsub.f32 %v13040_v23, %v7600_v7  ;;  %v13148_v35 = vsub.f32 %v13042_v62, %v7601_v31  ;;  %v13151_v24 = vsub.f32 %v13046_v14, %v7602_v26  ;;  %v7642_v13 = vmul.f32 %v13130_v48, %v13130_v48 }
 0x752   : > { %v7643_v53 = vmul.f32 %v13133_v36, %v13133_v36  ;;  %v7644_v9 = vmul.f32 %v13136_v43, %v13136_v43  ;;  %v7645_v37 = vmul.f32 %v13139_v11, %v13139_v11  ;;  %v7646_v25 = vmul.f32 %v13142_v39, %v13142_v39  ;;  %v7591_v54 = vpop.xlane.xlu0 %7590 }
 0x753   : > { %v7647_v56 = vmul.f32 %v13145_v8, %v13145_v8  ;;  %v7648_v15 = vmul.f32 %v13148_v35, %v13148_v35  ;;  %v7593_v12 = vmul.f32 %v7591_v54, %v14128_v42  ;;  %v7649_v40 = vmul.f32 %v13151_v24, %v13151_v24 }
 0x754   : > { %v7674_v47 = vrot.slane %v7643_v53, 7  ;;  %v7676_v55 = vrot.slane %v7644_v9, 6  ;;  %v7678_v32 = vrot.slane %v7645_v37, 5  ;;  %v7680_v29 = vrot.slane %v7646_v25, 4 }
 0x755   : > { %v7682_v27 = vrot.slane %v7647_v56, 3  ;;  %v7684_v63 = vrot.slane %v7648_v15, 2  ;;  %v7603_v41 = vrot.slane %v7593_v12, 1  ;;  %v7604_v51 = vrot.slane %v7593_v12, 2 }
 0x756   : > { %v7675_v50 = vsel %vm14107_vm3, %v7674_v47, %v7642_v13  ;;  %v7605_v38 = vrot.slane %v7593_v12, 3  ;;  %v7606_v57 = vrot.slane %v7593_v12, 4  ;;  %v7607_v46 = vrot.slane %v7593_v12, 5 }
 0x757   : > { %v7677_v20 = vsel %vm14129_vm10, %v7676_v55, %v7675_v50  ;;  %v7608_v0 = vrot.slane %v7593_v12, 6  ;;  %v7609_v18 = vrot.slane %v7593_v12, 7  ;;  %v13174_v28 = vsub.f32 %v13076_v22, %v7593_v12 }
 0x758   : > { %v7679_v30 = vsel %vm14111_vm9, %v7678_v32, %v7677_v20  ;;  %v13177_v33 = vsub.f32 %v13064_v2, %v7603_v41  ;;  %v13181_v61 = vsub.f32 %v13071_v58, %v7604_v51  ;;  %v13184_v21 = vsub.f32 %v13073_v10, %v7605_v38 }
 0x759   : > { %v7681_v19 = vsel %vm14115_vm7, %v7680_v29, %v7679_v30  ;;  %v13187_v5 = vsub.f32 %v13078_v49, %v7606_v57  ;;  %v7686_v45 = vrot.slane %v7649_v40, 1  ;;  %v13191_v52 = vsub.f32 %v13081_v17, %v7607_v46 }
 0x75a   : > { %v7683_v3 = vsel %vm14117_vm4, %v7682_v27, %v7681_v19  ;;  %v13194_v60 = vsub.f32 %v13086_v34, %v7608_v0  ;;  %v13198_v31 = vsub.f32 %v13088_v44, %v7609_v18  ;;  %v7651_v26 = vmul.f32 %v13177_v33, %v13177_v33 }
 0x75b   : > { %v7685_v7 = vsel %vm14119_vm1, %v7684_v63, %v7683_v3  ;;  %v7652_v53 = vmul.f32 %v13181_v61, %v13181_v61  ;;  %v7653_v37 = vmul.f32 %v13184_v21, %v13184_v21  ;;  %v7654_v25 = vmul.f32 %v13187_v5, %v13187_v5  ;;  %v8520_v3 = vld [vmem:[%s13425_s7] sm:$0xf] }
 0x75c   : > { %v7687_v9 = vsel %vm14120_vm0, %v7686_v45, %v7685_v7  ;;  %v7650_v13 = vmul.f32 %v13174_v28, %v13174_v28  ;;  %v7655_v56 = vmul.f32 %v13191_v52, %v13191_v52  ;;  %v7688_v15 = vrot.slane %v7651_v26, 7  ;;  %v8622_v45 = vld [vmem:[%s13425_s7 + $0x4] sm:$0xf0]  ;;  %v8621_v7 = vld [vmem:[%s13425_s7 + $0x4] sm:$0xf]  ;;  %vm14137_vm0 = vmmov %vm14131_vm13 }
 0x75d   : > { %v7704_v54 = vsel %vm14130_vm14, %v7687_v9, 0.0  ;;  %v7656_v12 = vmul.f32 %v13194_v60, %v13194_v60  ;;  %v7690_v40 = vrot.slane %v7652_v53, 6  ;;  %v7657_v47 = vmul.f32 %v13198_v31, %v13198_v31  ;;  %v8522_v53 = vld [vmem:[%s13425_s7 + $0x8] sm:$0xf0]  ;;  %vm14138_vm14 = vmmov %vm14091_vm5 }
 0x75e   : > { %7705 = vadd.xlane.f32.xlu2 %v7704_v54  ;;  %v7689_v55 = vsel %vm14131_vm13, %v7688_v15, %v7650_v13  ;;  %v7692_v32 = vrot.slane %v7653_v37, 5  ;;  %v7694_v27 = vrot.slane %v7654_v25, 4  ;;  %v7696_v50 = vrot.slane %v7655_v56, 3  ;;  %vm14139_vm13 = vmmov %vm14132_vm12 }
 0x75f   : > { %v7691_v29 = vsel %vm14091_vm5, %v7690_v40, %v7689_v55  ;;  %v7698_v51 = vrot.slane %v7656_v12, 2  ;;  %v7700_v20 = vrot.slane %v7657_v47, 1  ;;  %v8521_v26 = vor.u32 %v8622_v45, %v8520_v3  ;;  %vm14140_vm5 = vmmov %vm14137_vm0 }
 0x760   : > { %v7693_v63 = vsel %vm14132_vm12, %v7692_v32, %v7691_v29  ;;  %v8525_v9 = vor.u32 %v8621_v7, %v8522_v53  ;;  %v13243_v29 = vld [vmem:[%s13420_s2 + $0x3] ss:$0 sm:$0xff]  ;;  %vm14141_vm12 = vmmov %vm14133_vm11 }
 0x761   : > { %v7695_v41 = vsel %vm14133_vm11, %v7694_v27, %v7693_v63  ;;  %7945 = vmatpush.bf16.msrb.mxu1 %v8521_v26  ;;  %vm14142_vm11 = vmmov %vm14138_vm14 }
 0x762   : > { %v7697_v38 = vsel %vm14134_vm15, %v7696_v50, %v7695_v41  ;;  %7959 = vmatpush.bf16.msrb.mxu3 %v8525_v9 }
 0x763   : > { %v7699_v57 = vsel %vm14135_vm8, %v7698_v51, %v7697_v38  ;;  %vm14143_vm8 = vmmov %vm14139_vm13 }
 0x764   : > { %v7701_v46 = vsel %vm14136_vm2, %v7700_v20, %v7699_v57  ;;  %vm14144_vm2 = vcmask 1046534  }
 0x765   : > { %v7707_v0 = vsel %vm14097_vm6, %v7701_v46, 0.0  ;;  %vm14145_vm6 = vmmov %vm14141_vm12 }
 0x766   : > { %7708 = vadd.xlane.f32.xlu1 %v7707_v0 }
 0x7d1   : > { %v7706_v30 = vpop.xlane.xlu2 %7705 }
 0x7d2   : > { %v7710_v18 = vmul.f32 %v7706_v30, %v14128_v42 }
 0x7d4   : > { %v7712_v19 = vadd.f32 1e-05, %v7710_v18 }
 0x7d6   : > { %8808 = vrsqrt.f32 %v7712_v19  ;;  %vm7720_vm10 = vweird.f32 %v7712_v19 }
 0x7d9   : > { %v7709_v37 = vpop.xlane.xlu1 %7708 }
 0x7da   : > { %v7711_v25 = vmul.f32 %v7709_v37, %v14128_v42 }
 0x7dc   : > { %v8809_v54 = vpop.eup %8808  ;;  %v7713_v56 = vadd.f32 1e-05, %v7711_v25 }
 0x7dd   : > { %v7715_v13 = vmul.f32 %v8809_v54, %v7712_v19  ;;  %vm7721_vm3 = vweird.f32 %v8809_v54 }
 0x7de   : > { %8810 = vrsqrt.f32 %v7713_v56  ;;  %vm7722_vm9 = vmor %vm7720_vm10, %vm7721_vm3  ;;  %vm7730_vm4 = vweird.f32 %v7713_v56 }
 0x7df   : > { %v7716_v15 = vmul.f32 %v8809_v54, %v7715_v13  ;;  %vm14146_vm3 = vmmov %vm14134_vm15 }
 0x7e0   : > { %vm14147_vm10 = vmmov %vm14144_vm2 }
 0x7e1   : > { %v7717_v12 = vmul.f32 0.5, %v7716_v15 }
 0x7e3   : > { %v7718_v40 = vsub.f32 1.5, %v7717_v12 }
 0x7e4   : > { %v8811_v47 = vpop.eup %8810 }
 0x7e5   : > { %v7719_v55 = vmul.f32 %v8809_v54, %v7718_v40  ;;  %v7725_v32 = vmul.f32 %v8811_v47, %v7713_v56  ;;  %vm7731_vm7 = vweird.f32 %v8811_v47 }
 0x7e6   : > { %vm7732_vm1 = vmor %vm7730_vm4, %vm7731_vm7  ;;  %vm14150_vm4 = vcmask 392192  }
 0x7e7   : > { %v7723_v27 = vsel %vm7722_vm9, %v8809_v54, %v7719_v55  ;;  %v7726_v20 = vmul.f32 %v8811_v47, %v7725_v32  ;;  %v8633_v54 = vld [vmem:[%s13427_s9 + $0x30] sm:$0xff]  ;;  %vm14148_vm9 = vcmask 1047559  }
 0x7e8   : > { %v7736_v42 = vrot.slane %v7723_v27, 1  ;;  %v7737_v63 = vrot.slane %v7723_v27, 2  ;;  %v7738_v50 = vrot.slane %v7723_v27, 3  ;;  %v7739_v41 = vrot.slane %v7723_v27, 4  ;;  %vm14149_vm7 = vmmov %vm14148_vm9 }
 0x7e9   : > { %v7740_v51 = vrot.slane %v7723_v27, 5  ;;  %v7766_v38 = vmul.f32 %v7723_v27, %v13130_v48  ;;  %v7741_v57 = vrot.slane %v7723_v27, 6  ;;  %v7742_v18 = vrot.slane %v7723_v27, 7 }
 0x7ea   : > { %v7767_v46 = vmul.f32 %v7736_v42, %v13133_v36  ;;  %v7768_v0 = vmul.f32 %v7737_v63, %v13136_v43  ;;  %v7769_v30 = vmul.f32 %v7738_v50, %v13139_v11  ;;  %v7727_v3 = vmul.f32 0.5, %v7726_v20  ;;  %v8736_v43 = vld [vmem:[%s13420_s2 + $0x4] ss:$0 sm:$0xff] }
 0x7eb   : > { %v7783_v19 = vmul.f32 %v13243_v29, %v7766_v38  ;;  %v7770_v45 = vmul.f32 %v7739_v41, %v13142_v39  ;;  %v7771_v7 = vmul.f32 %v7740_v51, %v13145_v8  ;;  %v7772_v48 = vmul.f32 %v7741_v57, %v13148_v35  ;;  %v8634_v8 = vld [vmem:[%s13427_s9 + $0x38] sm:$0xff] }
 0x7ec   : > { %v7784_v26 = vmul.f32 %v13243_v29, %v7767_v46  ;;  %v7773_v53 = vmul.f32 %v7742_v18, %v13151_v24  ;;  %v7785_v36 = vmul.f32 %v13243_v29, %v7768_v0  ;;  %v7728_v11 = vsub.f32 1.5, %v7727_v3  ;;  %8073 = vmatpush.bf16.msra.mxu2 %v8634_v8  ;;  %v8632_v46 = vld [vmem:[%s13427_s9 + $0x28] sm:$0xff] }
 0x7ed   : > { %v7786_v9 = vmul.f32 %v13243_v29, %v7769_v30  ;;  %v7787_v37 = vmul.f32 %v13243_v29, %v7770_v45  ;;  %v7788_v39 = vmul.f32 %v13243_v29, %v7771_v7  ;;  %v7789_v35 = vmul.f32 %v13243_v29, %v7772_v48 }
 0x7ee   : > { %v7729_v24 = vmul.f32 %v8811_v47, %v7728_v11  ;;  %v7790_v25 = vmul.f32 %v13243_v29, %v7773_v53  ;;  %v13271_v13 = vadd.f32 %v8736_v43, %v7783_v19  ;;  %v7801_v15 = vadd.f32 %v8736_v43, %v7784_v26 }
 0x7ef   : > { %v7802_v12 = vadd.f32 %v8736_v43, %v7785_v36  ;;  %v7803_v40 = vadd.f32 %v8736_v43, %v7786_v9  ;;  %v7804_v32 = vadd.f32 %v8736_v43, %v7787_v37  ;;  %v7805_v27 = vadd.f32 %v8736_v43, %v7788_v39 }
 0x7f0   : > { %v7733_v55 = vsel %vm7732_vm1, %v8811_v47, %v7729_v24  ;;  %v13273_v42 = vadd.f32 %v8736_v43, %v7789_v35  ;;  %8074 = vmatpush.bf16.msra.mxu2 %v8633_v54  ;;  %v7807_v53 = vadd.f32 %v8736_v43, %v7790_v25  ;;  %v7817_v39 = vpack.c.bf16 %v7801_v15, %v7801_v15  ;;  %vm14151_vm1 = vmmov %vm14150_vm4 }
 0x7f1   : > { %v7743_v56 = vrot.slane %v7733_v55, 1  ;;  %v7744_v63 = vrot.slane %v7733_v55, 2  ;;  %v7745_v50 = vrot.slane %v7733_v55, 3  ;;  %v7746_v41 = vrot.slane %v7733_v55, 4 }
 0x7f2   : > { %v7747_v51 = vrot.slane %v7733_v55, 5  ;;  %v7774_v38 = vmul.f32 %v7733_v55, %v13174_v28  ;;  %v7748_v20 = vrot.slane %v7733_v55, 6  ;;  %v7749_v57 = vrot.slane %v7733_v55, 7 }
 0x7f3   : > { %v7775_v47 = vmul.f32 %v7743_v56, %v13177_v33  ;;  %v7776_v0 = vmul.f32 %v7744_v63, %v13181_v61  ;;  %v7777_v30 = vmul.f32 %v7745_v50, %v13184_v21  ;;  %v7778_v18 = vmul.f32 %v7746_v41, %v13187_v5  ;;  %v8630_v50 = vld [vmem:[%s13427_s9 + $0x18] sm:$0xff] }
 0x7f4   : > { %v7791_v19 = vmul.f32 %v13243_v29, %v7774_v38  ;;  %v7779_v3 = vmul.f32 %v7747_v51, %v13191_v52  ;;  %v7780_v28 = vmul.f32 %v7748_v20, %v13194_v60  ;;  %v7781_v45 = vmul.f32 %v7749_v57, %v13198_v31  ;;  %8075 = vmatpush.bf16.msra.mxu2 %v8632_v46  ;;  %v8631_v52 = vld [vmem:[%s13427_s9 + $0x20] sm:$0xff] }
 0x7f5   : > { %v7792_v7 = vmul.f32 %v13243_v29, %v7775_v47  ;;  %v7793_v26 = vmul.f32 %v13243_v29, %v7776_v0  ;;  %v7794_v33 = vmul.f32 %v13243_v29, %v7777_v30  ;;  %v7795_v61 = vmul.f32 %v13243_v29, %v7778_v18 }
 0x7f6   : > { %v7796_v21 = vmul.f32 %v13243_v29, %v7779_v3  ;;  %v7797_v5 = vmul.f32 %v13243_v29, %v7780_v28  ;;  %v7798_v48 = vmul.f32 %v13243_v29, %v7781_v45  ;;  %v7808_v60 = vadd.f32 %v8736_v43, %v7791_v19 }
 0x7f7   : > { %v7809_v31 = vadd.f32 %v8736_v43, %v7792_v7  ;;  %v7810_v36 = vadd.f32 %v8736_v43, %v7793_v26  ;;  %v7811_v11 = vadd.f32 %v8736_v43, %v7794_v33  ;;  %v7812_v9 = vadd.f32 %v8736_v43, %v7795_v61 }
 0x7f8   : > { %v7813_v37 = vadd.f32 %v8736_v43, %v7796_v21  ;;  %v7818_v8 = vpack.c.bf16 %v7802_v12, %v7802_v12  ;;  %v7814_v35 = vadd.f32 %v8736_v43, %v7797_v5  ;;  %v7815_v24 = vadd.f32 %v8736_v43, %v7798_v48  ;;  %8076 = vmatpush.bf16.msra.mxu2 %v8631_v52 }
 0x7f9   : > { %v7816_v54 = vpack.c.bf16 %v13271_v13, %v13271_v13  ;;  %v7819_v29 = vpack.c.bf16 %v7803_v40, %v7803_v40  ;;  %v7820_v25 = vpack.c.bf16 %v7804_v32, %v7804_v32  ;;  %v7821_v55 = vpack.c.bf16 %v7805_v27, %v7805_v27 }
 0x7fa   : > { %v7825_v56 = vpack.c.bf16 %v7809_v31, %v7809_v31  ;;  %v7826_v63 = vpack.c.bf16 %v7810_v36, %v7810_v36  ;;  %v7822_v41 = vpack.c.bf16 %v13273_v42, %v13273_v42  ;;  %v7823_v15 = vpack.c.bf16 %v7807_v53, %v7807_v53  ;;  %v8629_v42 = vld [vmem:[%s13427_s9 + $0x10] sm:$0xff]  ;;  %v8628_v36 = vld [vmem:[%s13427_s9 + $0x8] sm:$0xff] }
 0x7fb   : > { %v7824_v12 = vpack.c.bf16 %v7808_v60, %v7808_v60  ;;  %v7827_v51 = vpack.c.bf16 %v7811_v11, %v7811_v11  ;;  %v7828_v43 = vpack.c.bf16 %v7812_v9, %v7812_v9  ;;  %v7829_v38 = vpack.c.bf16 %v7813_v37, %v7813_v37 }
 0x7fc   : > { %v7861_v20 = vunpack.c.l.b16 %v7817_v39  ;;  %v7862_v13 = vunpack.c.l.b16 %v7818_v8  ;;  %v7830_v40 = vpack.c.bf16 %v7814_v35, %v7814_v35  ;;  %v7831_v32 = vpack.c.bf16 %v7815_v24, %v7815_v24  ;;  %8077 = vmatpush.bf16.msra.mxu2 %v8630_v50 }
 0x7fd   : > { %v7860_v27 = vunpack.c.l.b16 %v7816_v54  ;;  %v7863_v57 = vunpack.c.l.b16 %v7819_v29  ;;  %v7864_v46 = vunpack.c.l.b16 %v7820_v25  ;;  %v7865_v47 = vunpack.c.l.b16 %v7821_v55 }
 0x7fe   : > { %v7869_v0 = vunpack.c.l.b16 %v7825_v56  ;;  %v7870_v30 = vunpack.c.l.b16 %v7826_v63  ;;  %v7866_v18 = vunpack.c.l.b16 %v7822_v41  ;;  %v7867_v19 = vunpack.c.l.b16 %v7823_v15  ;;  %v8627_v41 = vld [vmem:[%s13427_s9] sm:$0xff] }
 0x7ff   : > { %v7871_v3 = vunpack.c.l.b16 %v7827_v51  ;;  %v7876_v28 = vrot.slane %v7861_v20, 7  ;;  %v7868_v45 = vunpack.c.l.b16 %v7824_v12  ;;  %v7872_v7 = vunpack.c.l.b16 %v7828_v43 }
 0x800   : > { %v7873_v26 = vunpack.c.l.b16 %v7829_v38  ;;  %v7878_v33 = vrot.slane %v7862_v13, 6  ;;  %v7874_v61 = vunpack.c.l.b16 %v7830_v40  ;;  %v7880_v5 = vrot.slane %v7863_v57, 5  ;;  %8078 = vmatpush.bf16.msra.mxu2 %v8629_v42  ;;  %v8638_v40 = vld [vmem:[%s13427_s9 + $0x58] sm:$0xff]  ;;  %v8635_v57 = vld [vmem:[%s13427_s9 + $0x40] sm:$0xff] }
 0x801   : > { %v7877_v21 = vsel %vm14137_vm0, %v7876_v28, %v7860_v27  ;;  %v7890_v48 = vrot.slane %v7869_v0, 7  ;;  %v7875_v53 = vunpack.c.l.b16 %v7831_v32  ;;  %v7882_v60 = vrot.slane %v7864_v46, 4  ;;  %8091 = vmatpush.bf16.msra.mxu0 %v8638_v40  ;;  %v8637_v32 = vld [vmem:[%s13427_s9 + $0x50] sm:$0xff]  ;;  %v8636_v27 = vld [vmem:[%s13427_s9 + $0x48] sm:$0xff]  ;;  %v7838_v46 = vld [vmem:[%s13426_s8] sm:$0x3] }
 0x802   : > { %v7879_v52 = vsel %vm14138_vm14, %v7878_v33, %v7877_v21  ;;  %v7892_v31 = vrot.slane %v7870_v30, 6  ;;  %v7884_v9 = vrot.slane %v7865_v47, 3  ;;  %v7894_v39 = vrot.slane %v7871_v3, 5  ;;  %vm14152_vm14 = vmmov %vm14140_vm5 }
 0x803   : > { %v7881_v11 = vsel %vm14139_vm13, %v7880_v5, %v7879_v52  ;;  %v7891_v37 = vsel %vm14140_vm5, %v7890_v48, %v7868_v45  ;;  %v7886_v35 = vrot.slane %v7866_v18, 2  ;;  %v7896_v54 = vrot.slane %v7872_v7, 4  ;;  %vm14153_vm13 = vmmov %vm14142_vm11 }
 0x804   : > { %v7883_v8 = vsel %vm14141_vm12, %v7882_v60, %v7881_v11  ;;  %v7893_v24 = vsel %vm14142_vm11, %v7892_v31, %v7891_v37  ;;  %v7898_v55 = vrot.slane %v7873_v26, 3  ;;  %v7900_v50 = vrot.slane %v7874_v61, 2  ;;  %8079 = vmatpush.bf16.msra.mxu2 %v8628_v36  ;;  %vm14154_vm5 = vmmov %vm14143_vm8 }
 0x805   : > { %v7885_v29 = vsel %vm14134_vm15, %v7884_v9, %v7883_v8  ;;  %v7895_v25 = vsel %vm14143_vm8, %v7894_v39, %v7893_v24  ;;  %v7888_v15 = vrot.slane %v7867_v19, 1  ;;  %v7902_v51 = vrot.slane %v7875_v53, 1  ;;  %8092 = vmatpush.bf16.msra.mxu0 %v8637_v32  ;;  %v8737_v53 = vld [vmem:[%s13420_s2 + $0x5] ss:$0 sm:$0xff]  ;;  %vm14155_vm12 = vmmov %vm14145_vm6 }
 0x806   : > { %v7887_v56 = vsel %vm14144_vm2, %v7886_v35, %v7885_v29  ;;  %v7897_v63 = vsel %vm14145_vm6, %v7896_v54, %v7895_v25  ;;  %v7840_v0 = vperm.slane %v7838_v46, 0  ;;  %v7841_v19 = vperm.slane %v7838_v46, 1  ;;  %vm14156_vm11 = vmmov %vm14146_vm3 }
 0x807   : > { %v7899_v12 = vsel %vm14146_vm3, %v7898_v55, %v7897_v63  ;;  %v7889_v38 = vsel %vm14148_vm9, %v7888_v15, %v7887_v56  ;;  %vm8069_vm0 = vcmask 523264   ;;  %vm14157_vm15 = vmmov %vm14144_vm2 }
 0x808   : > { %v7901_v43 = vsel %vm14147_vm10, %v7900_v50, %v7899_v12  ;;  %8080 = vmatpush.bf16.msra.mxu2 %v8627_v41  ;;  %vm14158_vm8 = vmmov %vm14152_vm14 }
 0x809   : > { %v7903_v20 = vsel %vm14149_vm7, %v7902_v51, %v7901_v43  ;;  %8093 = vmatpush.bf16.msra.mxu0 %v8636_v27  ;;  %vm14159_vm2 = vmmov %vm14149_vm7 }
 0x80a   : > { %v7904_v13 = vpack.c.b16 %v7903_v20, %v7889_v38  ;;  %vm14160_vm6 = vmmov %vm14153_vm13 }
 0x80b   : > { %vm14161_vm3 = vmmov %vm14154_vm5 }
 0x80c   : > { %8542 = vmatmul.msk.bf16.vlgmr.msrb.gmra.mxu1 %vm14150_vm4, %v7904_v13  ;;  %8543 = vmatmul.msk.bf16.vlgmr.msrb.gmra.mxu3 %vm14151_vm1, %v7904_v13  ;;  %vm14162_vm10 = vmmov %vm14151_vm1 }
 0x80d   : > { %8094 = vmatpush.bf16.msra.mxu0 %v8635_v57  ;;  %vm14163_vm9 = vmmov %vm14155_vm12 }
 0x80e   : > { %vm14164_vm7 = vmmov %vm14156_vm11 }
 0x80f   : > { %vm14165_vm4 = vmmov %vm14157_vm15 }
 0x810   : > { %vm14166_vm1 = vmmov %vm14159_vm2 }
 0x889   : > { %v7947_v47 = vpop.f32.mrf.mxu1 }
 0x88a   : > { %v7948_v42 = vadd.f32 %v7947_v47, %v7840_v0 }
 0x88c   : > { %v7966_v28 = vmax.f32 %v7948_v42, 0.0 }
 0x88f   : > { %v7961_v30 = vpop.f32.mrf.mxu3 }
 0x890   : > { %v7962_v7 = vadd.f32 %v7961_v30, %v7841_v19 }
 0x891   : > { %v7949_v18 = vpop.f32.mrf.mxu1 }
 0x892   : > { %v7950_v3 = vadd.f32 %v7949_v18, %v7840_v0  ;;  %v7967_v21 = vmax.f32 %v7962_v7, 0.0 }
 0x894   : > { %v7968_v45 = vmax.f32 %v7950_v3, 0.0 }
 0x896   : > { %v7970_v26 = vpack.c.bf16 %v7968_v45, %v7966_v28 }
 0x897   : > { %v7963_v33 = vpop.f32.mrf.mxu3 }
 0x898   : > { %v7964_v61 = vadd.f32 %v7963_v33, %v7841_v19  ;;  %8081 = vmatmul.bf16.vlgmr.msra.gmra.mxu2 %v7970_v26 }
 0x89a   : > { %v7969_v5 = vmax.f32 %v7964_v61, 0.0 }
 0x89c   : > { %v7971_v48 = vpack.c.bf16 %v7969_v5, %v7967_v21 }
 0x89e   : > { %8592 = vmatmul.msk.bf16.vlgmr.msra.gmra.mxu0 %vm8069_vm0, %v7971_v48  ;;  %vm14167_vm0 = vmmov %vm14162_vm10 }
 0x91b   : > { %v8082_v52 = vpop.f32.mrf.mxu2  ;;  %v8096_v60 = vpop.f32.mrf.mxu0 }
 0x91c   : > { %v8083_v31 = vadd.f32 %v8737_v53, %v8082_v52 }
 0x91e   : > { %v8097_v36 = vadd.f32 %v8096_v60, %v8083_v31 }
 0x920   : > { %v8103_v11 = vrot.slane %v8097_v36, 1  ;;  %v8104_v9 = vrot.slane %v8097_v36, 2  ;;  %v8105_v37 = vrot.slane %v8097_v36, 3  ;;  %v8106_v39 = vrot.slane %v8097_v36, 4 }
 0x921   : > { %v8107_v8 = vrot.slane %v8097_v36, 5  ;;  %v8108_v29 = vrot.slane %v8097_v36, 6  ;;  %v8109_v25 = vrot.slane %v8097_v36, 7  ;;  %v8133_v63 = vadd.f32 %v8097_v36, %v13044_v1 }
 0x922   : > { %v8134_v35 = vadd.f32 %v8103_v11, %v13032_v4  ;;  %v8135_v24 = vadd.f32 %v8104_v9, %v13034_v16  ;;  %v8136_v55 = vadd.f32 %v8105_v37, %v13036_v59  ;;  %v8137_v12 = vadd.f32 %v8106_v39, %v13038_v6 }
 0x923   : > { %v8084_v54 = vpop.f32.mrf.mxu2  ;;  %v8098_v15 = vpop.f32.mrf.mxu0  ;;  %v8138_v51 = vadd.f32 %v8107_v8, %v13040_v23  ;;  %v8139_v16 = vadd.f32 %v8108_v29, %v13042_v62  ;;  %v8140_v38 = vadd.f32 %v8109_v25, %v13046_v14 }
 0x924   : > { %v8085_v56 = vadd.f32 %v8737_v53, %v8084_v54  ;;  %v8165_v50 = vrot.slane %v8134_v35, 7  ;;  %v8167_v41 = vrot.slane %v8135_v24, 6  ;;  %v8169_v20 = vrot.slane %v8136_v55, 5 }
 0x925   : > { %v8171_v23 = vrot.slane %v8137_v12, 4  ;;  %v8173_v57 = vrot.slane %v8138_v51, 3  ;;  %v8175_v18 = vrot.slane %v8139_v16, 2 }
 0x926   : > { %v8099_v43 = vadd.f32 %v8098_v15, %v8085_v56  ;;  %v8166_v4 = vsel %vm14152_vm14, %v8165_v50, %v8133_v63 }
 0x927   : > { %v8168_v59 = vsel %vm14153_vm13, %v8167_v41, %v8166_v4 }
 0x928   : > { %v8110_v1 = vrot.slane %v8099_v43, 1  ;;  %v8111_v13 = vrot.slane %v8099_v43, 2  ;;  %v8112_v40 = vrot.slane %v8099_v43, 3  ;;  %v8113_v32 = vrot.slane %v8099_v43, 4 }
 0x929   : > { %v8114_v27 = vrot.slane %v8099_v43, 5  ;;  %v8115_v6 = vrot.slane %v8099_v43, 6  ;;  %v8116_v46 = vrot.slane %v8099_v43, 7  ;;  %v8141_v0 = vadd.f32 %v8099_v43, %v13076_v22 }
 0x92a   : > { %v8142_v47 = vadd.f32 %v8110_v1, %v13064_v2  ;;  %v8143_v62 = vadd.f32 %v8111_v13, %v13071_v58  ;;  %v8144_v14 = vadd.f32 %v8112_v40, %v13073_v10  ;;  %v8145_v30 = vadd.f32 %v8113_v32, %v13078_v49 }
 0x92b   : > { %v8170_v42 = vsel %vm14154_vm5, %v8169_v20, %v8168_v59  ;;  %v8146_v19 = vadd.f32 %v8114_v27, %v13081_v17  ;;  %v8147_v2 = vadd.f32 %v8115_v6, %v13086_v34  ;;  %v8177_v10 = vrot.slane %v8140_v38, 1 }
 0x92c   : > { %v8172_v3 = vsel %vm14155_vm12, %v8171_v23, %v8170_v42  ;;  %v8179_v28 = vrot.slane %v8142_v47, 7  ;;  %v8181_v45 = vrot.slane %v8143_v62, 6  ;;  %v8148_v22 = vadd.f32 %v8116_v46, %v13088_v44 }
 0x92d   : > { %v8174_v58 = vsel %vm14156_vm11, %v8173_v57, %v8172_v3  ;;  %v8183_v17 = vrot.slane %v8144_v14, 5  ;;  %v8185_v61 = vrot.slane %v8145_v30, 4  ;;  %v8187_v21 = vrot.slane %v8146_v19, 3 }
 0x92e   : > { %v8176_v49 = vsel %vm14157_vm15, %v8175_v18, %v8174_v58  ;;  %v8180_v7 = vsel %vm14158_vm8, %v8179_v28, %v8141_v0  ;;  %v8189_v5 = vrot.slane %v8147_v2, 2  ;;  %v8191_v53 = vrot.slane %v8148_v22, 1 }
 0x92f   : > { %v8178_v26 = vsel %vm14159_vm2, %v8177_v10, %v8176_v49  ;;  %v8182_v33 = vsel %vm14160_vm6, %v8181_v45, %v8180_v7 }
 0x930   : > { %v8184_v34 = vsel %vm14161_vm3, %v8183_v17, %v8182_v33  ;;  %8195 = vst.msk [vmem:[%s369_s17] sm:$0xff] %vm14162_vm10, %v8178_v26 }
 0x931   : > { %v8186_v44 = vsel %vm14163_vm9, %v8185_v61, %v8184_v34 }
 0x932   : > { %v8188_v48 = vsel %vm14164_vm7, %v8187_v21, %v8186_v44 }
 0x933   : > { %v8190_v52 = vsel %vm14165_vm4, %v8189_v5, %v8188_v48 }
 0x934   : > { %v8192_v60 = vsel %vm14166_vm1, %v8191_v53, %v8190_v52 }
 0x935   : > { %8196 = vst.msk [vmem:[%s369_s17 + $0x8] sm:$0xff] %vm14167_vm0, %v8192_v60 }
 0x936   : > { %8857 = shalt.err (!%p8854_p3)
}
 0x937   : > { %s8907_s29 = smov 128   ;;  %s8908_s17 = smov 8  }
 0x938   : > { %8640 = dma.vmem_to_hbm [thread:$0]  (%p8999_p5), %s8211_s25, 256, %s8213_s20, %s8198_s21, %s8907_s29, %s8907_s29, %s8908_s17  }
 0x939 PF: > { %p8646_p4 = scmp.ge.s32.totalorder %s8892_s16, 2  ;;  %s8227_s18 = sand.u32 1, %s8880_s13  }
 0x93a   : > { %s8228_s11 = scalar_lea.sflag [#allocation3], %s8227_s18 }
 0x93b   : > { %p8643_p7 = pnand %p8646_p4, %p9003_p6 }
 0x93d   : > { %p8644_p8 = pneg %p8643_p7 }
 0x93f   : > { %8875 = dma.done.wait (%p8644_p8), %s8228_s11, 256  }
 0x940   : > { %8877 = vsyncadd (%p8644_p8), %s8228_s11, 4294967040  ;;  %p20_p9 = scmp.ge.s32.totalorder %s8987_s19, 4   ;;  %s14168_s13 = smov %s8884_s14 }
 0x941   : > { %s14169_s14 = smov %s8888_s15  ;;  %s14170_s15 = smov %s8997_s22 }
 0x942   : > { %s14171_s16 = smov %s8987_s19  ;;  %22 = sbr.rel (!%p20_p9) target bundleno = 3 (0x3), region = 98 }
 0x947   :  { %8234 = vsyncpa [#allocation3], 1 }
 0x948   :  { %8236 = vsyncpa [#allocation3 + $0x1], 1 }

</bundles_post_ra>
